<compile_context>
chip_gen: v7x
topology: tpu7x:2x2x1
jax: 0.10.0
libtpu: 0.0.40
codegen_flags: <defaults>
</compile_context>

<pallas_src>
import functools
import math

import jax
import jax.numpy as jnp
from jax import lax
from jax.experimental import pallas as pl
from jax.experimental.pallas import tpu as pltpu

# ----------------------------------------------------------------------------
# KANLinear constants (match the PyTorch module's hyperparameters)
# ----------------------------------------------------------------------------
GRID_SIZE = 5
SPLINE_ORDER = 3
GRID_RANGE = (-1.0, 1.0)
NUM_COEFF = GRID_SIZE + SPLINE_ORDER      # 8 spline basis functions per input
NUM_FEATS = NUM_COEFF + 1                 # + SiLU base path -> 9 stacked blocks

_H_KNOT = (GRID_RANGE[1] - GRID_RANGE[0]) / GRID_SIZE
# Extended uniform knot vector, identical to KANLinear's `grid` buffer.
GRID_PTS = tuple(
    GRID_RANGE[0] + _H_KNOT * (i - SPLINE_ORDER)
    for i in range(GRID_SIZE + 2 * SPLINE_ORDER + 1)
)  # 12 knots


# ----------------------------------------------------------------------------
# KANLinear feature construction + accumulated MXU dots (kernel-side helper)
# ----------------------------------------------------------------------------
def _kan_linear_accumulate(x, w_ref):
    """y = SiLU(x) @ W_base + sum_t B_t(x) @ W_spline_t, all on the MXU.

    Each of the 9 (rows, Cp) feature blocks is cast to bf16 and dotted with its
    (Cp, Cp) weight slab as soon as it is produced; accumulation stays in f32
    via preferred_element_type.  No (rows, 9*Cp) slab is ever materialized,
    keeping vreg pressure and vector-store traffic low.
    """
    Cp = x.shape[-1]
    g = GRID_PTS
    n = GRID_SIZE + 2 * SPLINE_ORDER              # 11 degree-0 intervals

    # Base (SiLU) path.
    acc = jnp.dot((x * jax.nn.sigmoid(x)).astype(jnp.bfloat16),
                  w_ref[0:Cp, :], preferred_element_type=jnp.float32)

    # Degree-0 boxes as differences of step functions (half-open intervals,
    # identical to the reference (x >= g[t]) & (x < g[t+1]) formulation).
    steps = [(x >= g[t]).astype(jnp.float32) for t in range(n + 1)]
    bases = [steps[t] - steps[t + 1] for t in range(n)]

    # Degrees 1 .. SPLINE_ORDER-1: Cox-de-Boor with constant denominators
    # folded into reciprocal multiplies (mathematically identical).
    for k in range(1, SPLINE_ORDER):
        bases = [
            ((x - g[t]) * (1.0 / (g[t + k] - g[t]))) * bases[t]
            - ((x - g[t + k + 1]) * (1.0 / (g[t + k + 1] - g[t + 1]))) * bases[t + 1]
            for t in range(n - k)
        ]

    # Final recursion level: consume each degree-3 basis immediately.
    k = SPLINE_ORDER
    for t in range(NUM_COEFF):
        b_t = (((x - g[t]) * (1.0 / (g[t + k] - g[t]))) * bases[t]
               - ((x - g[t + k + 1]) * (1.0 / (g[t + k + 1] - g[t + 1]))) * bases[t + 1])
        acc = acc + jnp.dot(b_t.astype(jnp.bfloat16),
                            w_ref[(t + 1) * Cp:(t + 2) * Cp, :],
                            preferred_element_type=jnp.float32)
    return acc


def _b_splines_ref(x):
    """Original efficient-KAN formulation (reference / correctness check)."""
    g = GRID_PTS
    n = GRID_SIZE + 2 * SPLINE_ORDER
    bases = [
        jnp.where((x >= g[t]) & (x < g[t + 1]), 1.0, 0.0).astype(jnp.float32)
        for t in range(n)
    ]
    for k in range(1, SPLINE_ORDER + 1):
        new_bases = []
        for t in range(n - k):
            left = (x - g[t]) / (g[t + k] - g[t]) * bases[t]
            right = (g[t + k + 1] - x) / (g[t + k + 1] - g[t + 1]) * bases[t + 1]
            new_bases.append(left + right)
        bases = new_bases
    return bases


# ----------------------------------------------------------------------------
# Fused per-layer kernel: KANLinear -> depthwise 3x3 conv (+folded BN) -> ReLU
# One grid step processes one batch element (all N = H*W tokens).
# ----------------------------------------------------------------------------
def kan_block_kernel(x_ref, w_ref, dw_ref, b_ref, o_ref, pad_ref, *, H, W):
    # x_ref  : (1, N, Cp)        f32 input tokens for one batch element
    # w_ref  : (9*Cp, Cp)        bf16 stacked KANLinear weights [base; spline_0..7]
    # dw_ref : (9, Cp)           f32 BN-folded depthwise taps, index = dy*3+dx
    # b_ref  : (1, Cp)           f32 BN-folded bias
    # o_ref  : (1, N, Cp)        f32 output tokens
    # pad_ref: (H+2, W+2, Cp)    f32 VMEM scratch (1-pixel halo image)
    N, Cp = x_ref.shape[1], x_ref.shape[2]

    # ---- KANLinear (tokens as rows, channels on lanes) ----
    x = x_ref[0].astype(jnp.float32)                      # (N, Cp)
    y = _kan_linear_accumulate(x, w_ref)                  # (N, Cp) f32

    # ---- depthwise 3x3 conv + ReLU on the H x W image, halo built in VMEM ----
    # Zero only the 1-pixel halo ring; the interior is fully overwritten below.
    # Done every step (not just step 0) so it stays correct when the parallel
    # grid axis is split across TensorCores (each core has its own scratch).
    pad_ref[0:1, :, :] = jnp.zeros((1, W + 2, Cp), jnp.float32)
    pad_ref[H + 1:H + 2, :, :] = jnp.zeros((1, W + 2, Cp), jnp.float32)
    pad_ref[1:H + 1, 0:1, :] = jnp.zeros((H, 1, Cp), jnp.float32)
    pad_ref[1:H + 1, W + 1:W + 2, :] = jnp.zeros((H, 1, Cp), jnp.float32)
    pad_ref[1:H + 1, 1:W + 1, :] = y.reshape(H, W, Cp)

    xp = pad_ref[...]                                     # (H+2, W+2, Cp)
    w = dw_ref[...].astype(jnp.float32)                   # (9, Cp), loaded once
    acc = jnp.broadcast_to(b_ref[...].astype(jnp.float32), (H, W, Cp))
    # Hoist the W-axis (sublane-crossing) shift out of the inner loop:
    # 3 shifted slices instead of 9; the H slide is a cheap leading-dim offset.
    for dx in range(3):
        col = xp[:, dx:dx + W, :]                         # (H+2, W, Cp)
        for dy in range(3):
            tap = w[dy * 3 + dx:dy * 3 + dx + 1, :]       # (1, Cp)
            acc = acc + col[dy:dy + H, :, :] * tap
    o_ref[0] = jnp.maximum(acc, 0.0).reshape(N, Cp).astype(o_ref.dtype)


def kan_block(x_bnc, w_stack, dw_w, dw_b, *, H, W):
    """One fused (KANLinear -> DW-conv+BN+ReLU) layer. x_bnc: (B, N, Cp) f32."""
    B, N, Cp = x_bnc.shape
    K9, Cout = w_stack.shape
    kernel = functools.partial(kan_block_kernel, H=H, W=W)
    return pl.pallas_call(
        kernel,
        out_shape=jax.ShapeDtypeStruct((B, N, Cout), jnp.float32),
        grid=(B,),
        in_specs=[
            pl.BlockSpec((1, N, Cp), lambda b: (b, 0, 0)),
            # Constant-index weight/tap/bias blocks: fetched once by the
            # pipeline; double-buffer allocation is ~0.3 MiB at Cp=128.
            pl.BlockSpec((K9, Cout), lambda b: (0, 0)),
            pl.BlockSpec((9, Cp), lambda b: (0, 0)),
            pl.BlockSpec((1, Cp), lambda b: (0, 0)),
        ],
        out_specs=pl.BlockSpec((1, N, Cout), lambda b: (b, 0, 0)),
        scratch_shapes=[pltpu.VMEM((H + 2, W + 2, Cp), jnp.float32)],
        compiler_params=pltpu.CompilerParams(
            dimension_semantics=("parallel",),
            vmem_limit_bytes=32 * 1024 * 1024,
        ),
    )(x_bnc, w_stack, dw_w, dw_b)


# ----------------------------------------------------------------------------
# Full KANLayer forward: 3 fused layers
# ----------------------------------------------------------------------------
@functools.partial(jax.jit, static_argnames=("H", "W"))
def kan_layer_forward(x, params, H, W):
    B, N, C = x.shape
    assert N == H * W
    Cp = params[0]["w_stack"].shape[1]
    # One-time channel pad to a lane-dense width; padded channels stay exactly
    # zero through every layer (their weight rows/cols are zero).
    h = x if Cp == C else jnp.pad(x, ((0, 0), (0, 0), (0, Cp - C)))
    for p in params:
        h = kan_block(h, p["w_stack"], p["dw_w"], p["dw_b"], H=H, W=W)
    return h if Cp == C else h[:, :, :C]


# ----------------------------------------------------------------------------
# Pure-JAX reference (independent structure; matched bf16 matmul precision)
# ----------------------------------------------------------------------------
def _ref_kan_linear(x, base_w_t, spline_w_t):
    base = (x * jax.nn.sigmoid(x)).astype(jnp.bfloat16)
    y = jnp.dot(base, base_w_t, preferred_element_type=jnp.float32)
    bases = _b_splines_ref(x)
    for t in range(NUM_COEFF):
        y = y + jnp.dot(bases[t].astype(jnp.bfloat16), spline_w_t[t],
                        preferred_element_type=jnp.float32)
    return y


def _ref_dw_bn_relu(x_bhwc, w9c, bias_c):
    C = x_bhwc.shape[-1]
    w = w9c.reshape(3, 3, 1, C)     # HWIO, depthwise (I=1, O=C)
    y = lax.conv_general_dilated(
        x_bhwc, w, window_strides=(1, 1), padding="SAME",
        dimension_numbers=("NHWC", "HWIO", "NHWC"), feature_group_count=C)
    return jnp.maximum(y + bias_c.reshape(1, 1, 1, C), 0.0)


def _ref_forward(x, rparams, H, W):
    B, N, C = x.shape
    for p in rparams:
        h = _ref_kan_linear(x.reshape(B * N, C), p["base_w_t"], p["spline_w_t"])
        h = _ref_dw_bn_relu(h.reshape(B, H, W, C), p["dw_w"], p["dw_b"])
        x = h.reshape(B, N, C)
    return x


# ----------------------------------------------------------------------------
# Deterministic parameter construction (synthetic; matches module shapes)
# ----------------------------------------------------------------------------
def make_params(key, dim):
    dim_pad = ((dim + 127) // 128) * 128
    bn_eps = 1e-5
    bn_scale = 1.0 / math.sqrt(1.0 + bn_eps)  # gamma=1, running_var=1
    kparams, rparams = [], []
    for layer in range(3):
        keys = jax.random.split(jax.random.fold_in(key, layer), 4)
        # KANLinear parameters (in = out = dim, as the forward requires)
        base_w = 0.1 * jax.random.normal(keys[0], (dim, dim), jnp.float32)          # (out, in)
        spline_w = 0.1 * jax.random.normal(keys[1], (dim, dim, NUM_COEFF), jnp.float32)
        spline_scaler = 1.0 + 0.1 * jax.random.normal(keys[2], (dim, dim), jnp.float32)
        scaled = spline_w * spline_scaler[..., None]                                 # (out, in, K)

        # Stacked weight: rows = [base block ; spline_t blocks], each block has
        # dim_pad rows (input channels), columns = dim_pad outputs; stored bf16.
        w_stack = jnp.zeros((NUM_FEATS * dim_pad, dim_pad), jnp.float32)
        w_stack = w_stack.at[:dim, :dim].set(base_w.T)
        for t in range(NUM_COEFF):
            r0 = (t + 1) * dim_pad
            w_stack = w_stack.at[r0:r0 + dim, :dim].set(scaled[:, :, t].T)
        w_stack = w_stack.astype(jnp.bfloat16)

        # Depthwise conv weight (dim, 3, 3), bias zeros; fold BatchNorm (eval).
        dw = math.sqrt(2.0 / 9.0) * jax.random.normal(keys[3], (dim, 3, 3), jnp.float32)
        dw_bias = jnp.zeros((dim,), jnp.float32)
        dw_folded = dw * bn_scale                                                    # mean=0, beta=0
        dw_w = jnp.zeros((9, dim_pad), jnp.float32)
        dw_w = dw_w.at[:, :dim].set(jnp.transpose(dw_folded, (1, 2, 0)).reshape(9, dim))
        dw_b = jnp.zeros((1, dim_pad), jnp.float32)
        dw_b = dw_b.at[:, :dim].set((dw_bias * bn_scale)[None, :])

        kparams.append({"w_stack": w_stack, "dw_w": dw_w, "dw_b": dw_b})
        # Reference uses the same (bf16) weights at logical (unpadded) shape.
        rparams.append({
            "base_w_t": w_stack[:dim, :dim],
            "spline_w_t": jnp.stack(
                [w_stack[(t + 1) * dim_pad:(t + 1) * dim_pad + dim, :dim]
                 for t in range(NUM_COEFF)], axis=0),
            "dw_w": dw_w[:, :dim],
            "dw_b": dw_b[:, :dim],
        })
    return kparams, rparams


if __name__ == "__main__":
    B, H, W, C = 2, 8, 8, 32
    N = H * W
    key = jax.random.PRNGKey(0)
    kx, kp = jax.random.split(key)
    x = jax.random.normal(kx, (B, N, C), jnp.float32)
    kparams, rparams = make_params(kp, C)

    out = jax.block_until_ready(kan_layer_forward(x, kparams, H, W))

    ref = _ref_forward(x, rparams, H, W)
    assert out.shape == (B, N, C)
    max_err = float(jnp.max(jnp.abs(out - ref)))
    assert jnp.allclose(out, ref, rtol=1e-2, atol=1e-2), max_err

    print("KERNEL_OK")
</pallas_src>

<mosaic_0001>
module attributes {stable_mosaic.version = 11 : i64} {
  func.func @kan_block_kernel(%arg0: i32, %arg1: memref<1x64x128xf32, #tpu.memory_space<vmem>>, %arg2: memref<1152x128xbf16, #tpu.memory_space<vmem>>, %arg3: memref<9x128xf32, #tpu.memory_space<vmem>>, %arg4: memref<1x128xf32, #tpu.memory_space<vmem>>, %arg5: memref<1x64x128xf32, #tpu.memory_space<vmem>>, %arg6: memref<10x10x128xf32, #tpu.memory_space<vmem>>) attributes {dimension_semantics = [#tpu.dimension_semantics<parallel>], iteration_bounds = array<i64: 2>, scalar_prefetch = 0 : i64, scratch_operands = 1 : i64, tpu.core_type = #tpu.core_type<tc>, window_params = [{transform_indices = @transform_0, window_bounds = array<i64: 1, 64, 128>}, {pipeline_mode = #tpu.pipeline_mode<synchronous>, transform_indices = @transform_1, window_bounds = array<i64: 1152, 128>}, {pipeline_mode = #tpu.pipeline_mode<synchronous>, transform_indices = @transform_2, window_bounds = array<i64: 9, 128>}, {pipeline_mode = #tpu.pipeline_mode<synchronous>, transform_indices = @transform_3, window_bounds = array<i64: 1, 128>}, {transform_indices = @transform_4, window_bounds = array<i64: 1, 64, 128>}]} {
    %c0 = arith.constant 0 : index
    %c0_0 = arith.constant 0 : index
    %c0_1 = arith.constant 0 : index
    %0 = vector.load %arg1[%c0, %c0_0, %c0_1] : memref<1x64x128xf32, #tpu.memory_space<vmem>>, vector<1x64x128xf32>
    %1 = vector.shape_cast %0 : vector<1x64x128xf32> to vector<64x128xf32>
    %2 = arith.negf %1 : vector<64x128xf32>
    %3 = math.exp %2 : vector<64x128xf32>
    %cst = arith.constant 1.000000e+00 : f32
    %4 = vector.broadcast %cst : f32 to vector<64x128xf32>
    %5 = arith.addf %4, %3 : vector<64x128xf32>
    %6 = arith.divf %4, %5 : vector<64x128xf32>
    %7 = arith.mulf %1, %6 : vector<64x128xf32>
    %8 = arith.truncf %7 : vector<64x128xf32> to vector<64x128xbf16>
    %c0_2 = arith.constant 0 : index
    %c0_3 = arith.constant 0 : index
    %9 = vector.load %arg2[%c0_2, %c0_3] : memref<1152x128xbf16, #tpu.memory_space<vmem>>, vector<128x128xbf16>
    %cst_4 = arith.constant dense<0.000000e+00> : vector<64x128xf32>
    %10 = tpu.matmul %8, %9, %cst_4 {dimension_numbers = #tpu.dot_dimension_numbers<[1], [0], [0], [1], [0, 0, 1, 1], [], []>} : vector<64x128xbf16>, vector<128x128xbf16>, vector<64x128xf32> -> vector<64x128xf32>
    %cst_5 = arith.constant -2.200000e+00 : f32
    %11 = vector.broadcast %cst_5 : f32 to vector<64x128xf32>
    %12 = arith.cmpf oge, %1, %11 : vector<64x128xf32>
    %13 = arith.extui %12 : vector<64x128xi1> to vector<64x128xi32>
    %14 = arith.sitofp %13 : vector<64x128xi32> to vector<64x128xf32>
    %cst_6 = arith.constant -1.800000e+00 : f32
    %15 = vector.broadcast %cst_6 : f32 to vector<64x128xf32>
    %16 = arith.cmpf oge, %1, %15 : vector<64x128xf32>
    %17 = arith.extui %16 : vector<64x128xi1> to vector<64x128xi32>
    %18 = arith.sitofp %17 : vector<64x128xi32> to vector<64x128xf32>
    %cst_7 = arith.constant -1.400000e+00 : f32
    %19 = vector.broadcast %cst_7 : f32 to vector<64x128xf32>
    %20 = arith.cmpf oge, %1, %19 : vector<64x128xf32>
    %21 = arith.extui %20 : vector<64x128xi1> to vector<64x128xi32>
    %22 = arith.sitofp %21 : vector<64x128xi32> to vector<64x128xf32>
    %cst_8 = arith.constant -1.000000e+00 : f32
    %23 = vector.broadcast %cst_8 : f32 to vector<64x128xf32>
    %24 = arith.cmpf oge, %1, %23 : vector<64x128xf32>
    %25 = arith.extui %24 : vector<64x128xi1> to vector<64x128xi32>
    %26 = arith.sitofp %25 : vector<64x128xi32> to vector<64x128xf32>
    %cst_9 = arith.constant -6.000000e-01 : f32
    %27 = vector.broadcast %cst_9 : f32 to vector<64x128xf32>
    %28 = arith.cmpf oge, %1, %27 : vector<64x128xf32>
    %29 = arith.extui %28 : vector<64x128xi1> to vector<64x128xi32>
    %30 = arith.sitofp %29 : vector<64x128xi32> to vector<64x128xf32>
    %cst_10 = arith.constant -2.000000e-01 : f32
    %31 = vector.broadcast %cst_10 : f32 to vector<64x128xf32>
    %32 = arith.cmpf oge, %1, %31 : vector<64x128xf32>
    %33 = arith.extui %32 : vector<64x128xi1> to vector<64x128xi32>
    %34 = arith.sitofp %33 : vector<64x128xi32> to vector<64x128xf32>
    %cst_11 = arith.constant 2.000000e-01 : f32
    %35 = vector.broadcast %cst_11 : f32 to vector<64x128xf32>
    %36 = arith.cmpf oge, %1, %35 : vector<64x128xf32>
    %37 = arith.extui %36 : vector<64x128xi1> to vector<64x128xi32>
    %38 = arith.sitofp %37 : vector<64x128xi32> to vector<64x128xf32>
    %cst_12 = arith.constant 6.000000e-01 : f32
    %39 = vector.broadcast %cst_12 : f32 to vector<64x128xf32>
    %40 = arith.cmpf oge, %1, %39 : vector<64x128xf32>
    %41 = arith.extui %40 : vector<64x128xi1> to vector<64x128xi32>
    %42 = arith.sitofp %41 : vector<64x128xi32> to vector<64x128xf32>
    %cst_13 = arith.constant 1.000000e+00 : f32
    %43 = vector.broadcast %cst_13 : f32 to vector<64x128xf32>
    %44 = arith.cmpf oge, %1, %43 : vector<64x128xf32>
    %45 = arith.extui %44 : vector<64x128xi1> to vector<64x128xi32>
    %46 = arith.sitofp %45 : vector<64x128xi32> to vector<64x128xf32>
    %cst_14 = arith.constant 1.400000e+00 : f32
    %47 = vector.broadcast %cst_14 : f32 to vector<64x128xf32>
    %48 = arith.cmpf oge, %1, %47 : vector<64x128xf32>
    %49 = arith.extui %48 : vector<64x128xi1> to vector<64x128xi32>
    %50 = arith.sitofp %49 : vector<64x128xi32> to vector<64x128xf32>
    %cst_15 = arith.constant 1.800000e+00 : f32
    %51 = vector.broadcast %cst_15 : f32 to vector<64x128xf32>
    %52 = arith.cmpf oge, %1, %51 : vector<64x128xf32>
    %53 = arith.extui %52 : vector<64x128xi1> to vector<64x128xi32>
    %54 = arith.sitofp %53 : vector<64x128xi32> to vector<64x128xf32>
    %cst_16 = arith.constant 2.200000e+00 : f32
    %55 = vector.broadcast %cst_16 : f32 to vector<64x128xf32>
    %56 = arith.cmpf oge, %1, %55 : vector<64x128xf32>
    %57 = arith.extui %56 : vector<64x128xi1> to vector<64x128xi32>
    %58 = arith.sitofp %57 : vector<64x128xi32> to vector<64x128xf32>
    %59 = arith.subf %14, %18 : vector<64x128xf32>
    %60 = arith.subf %18, %22 : vector<64x128xf32>
    %61 = arith.subf %22, %26 : vector<64x128xf32>
    %62 = arith.subf %26, %30 : vector<64x128xf32>
    %63 = arith.subf %30, %34 : vector<64x128xf32>
    %64 = arith.subf %34, %38 : vector<64x128xf32>
    %65 = arith.subf %38, %42 : vector<64x128xf32>
    %66 = arith.subf %42, %46 : vector<64x128xf32>
    %67 = arith.subf %46, %50 : vector<64x128xf32>
    %68 = arith.subf %50, %54 : vector<64x128xf32>
    %69 = arith.subf %54, %58 : vector<64x128xf32>
    %cst_17 = arith.constant -2.200000e+00 : f32
    %70 = vector.broadcast %cst_17 : f32 to vector<64x128xf32>
    %71 = arith.subf %1, %70 : vector<64x128xf32>
    %cst_18 = arith.constant 2.500000e+00 : f32
    %72 = vector.broadcast %cst_18 : f32 to vector<64x128xf32>
    %73 = arith.mulf %71, %72 : vector<64x128xf32>
    %74 = arith.mulf %73, %59 : vector<64x128xf32>
    %cst_19 = arith.constant -1.400000e+00 : f32
    %75 = vector.broadcast %cst_19 : f32 to vector<64x128xf32>
    %76 = arith.subf %1, %75 : vector<64x128xf32>
    %cst_20 = arith.constant 2.500000e+00 : f32
    %77 = vector.broadcast %cst_20 : f32 to vector<64x128xf32>
    %78 = arith.mulf %76, %77 : vector<64x128xf32>
    %79 = arith.mulf %78, %60 : vector<64x128xf32>
    %80 = arith.subf %74, %79 : vector<64x128xf32>
    %cst_21 = arith.constant -1.800000e+00 : f32
    %81 = vector.broadcast %cst_21 : f32 to vector<64x128xf32>
    %82 = arith.subf %1, %81 : vector<64x128xf32>
    %cst_22 = arith.constant 2.500000e+00 : f32
    %83 = vector.broadcast %cst_22 : f32 to vector<64x128xf32>
    %84 = arith.mulf %82, %83 : vector<64x128xf32>
    %85 = arith.mulf %84, %60 : vector<64x128xf32>
    %cst_23 = arith.constant -1.000000e+00 : f32
    %86 = vector.broadcast %cst_23 : f32 to vector<64x128xf32>
    %87 = arith.subf %1, %86 : vector<64x128xf32>
    %cst_24 = arith.constant 2.500000e+00 : f32
    %88 = vector.broadcast %cst_24 : f32 to vector<64x128xf32>
    %89 = arith.mulf %87, %88 : vector<64x128xf32>
    %90 = arith.mulf %89, %61 : vector<64x128xf32>
    %91 = arith.subf %85, %90 : vector<64x128xf32>
    %cst_25 = arith.constant -1.400000e+00 : f32
    %92 = vector.broadcast %cst_25 : f32 to vector<64x128xf32>
    %93 = arith.subf %1, %92 : vector<64x128xf32>
    %cst_26 = arith.constant 2.500000e+00 : f32
    %94 = vector.broadcast %cst_26 : f32 to vector<64x128xf32>
    %95 = arith.mulf %93, %94 : vector<64x128xf32>
    %96 = arith.mulf %95, %61 : vector<64x128xf32>
    %cst_27 = arith.constant -6.000000e-01 : f32
    %97 = vector.broadcast %cst_27 : f32 to vector<64x128xf32>
    %98 = arith.subf %1, %97 : vector<64x128xf32>
    %cst_28 = arith.constant 2.500000e+00 : f32
    %99 = vector.broadcast %cst_28 : f32 to vector<64x128xf32>
    %100 = arith.mulf %98, %99 : vector<64x128xf32>
    %101 = arith.mulf %100, %62 : vector<64x128xf32>
    %102 = arith.subf %96, %101 : vector<64x128xf32>
    %cst_29 = arith.constant -1.000000e+00 : f32
    %103 = vector.broadcast %cst_29 : f32 to vector<64x128xf32>
    %104 = arith.subf %1, %103 : vector<64x128xf32>
    %cst_30 = arith.constant 2.500000e+00 : f32
    %105 = vector.broadcast %cst_30 : f32 to vector<64x128xf32>
    %106 = arith.mulf %104, %105 : vector<64x128xf32>
    %107 = arith.mulf %106, %62 : vector<64x128xf32>
    %cst_31 = arith.constant -2.000000e-01 : f32
    %108 = vector.broadcast %cst_31 : f32 to vector<64x128xf32>
    %109 = arith.subf %1, %108 : vector<64x128xf32>
    %cst_32 = arith.constant 2.500000e+00 : f32
    %110 = vector.broadcast %cst_32 : f32 to vector<64x128xf32>
    %111 = arith.mulf %109, %110 : vector<64x128xf32>
    %112 = arith.mulf %111, %63 : vector<64x128xf32>
    %113 = arith.subf %107, %112 : vector<64x128xf32>
    %cst_33 = arith.constant -6.000000e-01 : f32
    %114 = vector.broadcast %cst_33 : f32 to vector<64x128xf32>
    %115 = arith.subf %1, %114 : vector<64x128xf32>
    %cst_34 = arith.constant 2.500000e+00 : f32
    %116 = vector.broadcast %cst_34 : f32 to vector<64x128xf32>
    %117 = arith.mulf %115, %116 : vector<64x128xf32>
    %118 = arith.mulf %117, %63 : vector<64x128xf32>
    %cst_35 = arith.constant 2.000000e-01 : f32
    %119 = vector.broadcast %cst_35 : f32 to vector<64x128xf32>
    %120 = arith.subf %1, %119 : vector<64x128xf32>
    %cst_36 = arith.constant 2.500000e+00 : f32
    %121 = vector.broadcast %cst_36 : f32 to vector<64x128xf32>
    %122 = arith.mulf %120, %121 : vector<64x128xf32>
    %123 = arith.mulf %122, %64 : vector<64x128xf32>
    %124 = arith.subf %118, %123 : vector<64x128xf32>
    %cst_37 = arith.constant -2.000000e-01 : f32
    %125 = vector.broadcast %cst_37 : f32 to vector<64x128xf32>
    %126 = arith.subf %1, %125 : vector<64x128xf32>
    %cst_38 = arith.constant 2.500000e+00 : f32
    %127 = vector.broadcast %cst_38 : f32 to vector<64x128xf32>
    %128 = arith.mulf %126, %127 : vector<64x128xf32>
    %129 = arith.mulf %128, %64 : vector<64x128xf32>
    %cst_39 = arith.constant 6.000000e-01 : f32
    %130 = vector.broadcast %cst_39 : f32 to vector<64x128xf32>
    %131 = arith.subf %1, %130 : vector<64x128xf32>
    %cst_40 = arith.constant 2.500000e+00 : f32
    %132 = vector.broadcast %cst_40 : f32 to vector<64x128xf32>
    %133 = arith.mulf %131, %132 : vector<64x128xf32>
    %134 = arith.mulf %133, %65 : vector<64x128xf32>
    %135 = arith.subf %129, %134 : vector<64x128xf32>
    %cst_41 = arith.constant 2.000000e-01 : f32
    %136 = vector.broadcast %cst_41 : f32 to vector<64x128xf32>
    %137 = arith.subf %1, %136 : vector<64x128xf32>
    %cst_42 = arith.constant 2.500000e+00 : f32
    %138 = vector.broadcast %cst_42 : f32 to vector<64x128xf32>
    %139 = arith.mulf %137, %138 : vector<64x128xf32>
    %140 = arith.mulf %139, %65 : vector<64x128xf32>
    %cst_43 = arith.constant 1.000000e+00 : f32
    %141 = vector.broadcast %cst_43 : f32 to vector<64x128xf32>
    %142 = arith.subf %1, %141 : vector<64x128xf32>
    %cst_44 = arith.constant 2.500000e+00 : f32
    %143 = vector.broadcast %cst_44 : f32 to vector<64x128xf32>
    %144 = arith.mulf %142, %143 : vector<64x128xf32>
    %145 = arith.mulf %144, %66 : vector<64x128xf32>
    %146 = arith.subf %140, %145 : vector<64x128xf32>
    %cst_45 = arith.constant 6.000000e-01 : f32
    %147 = vector.broadcast %cst_45 : f32 to vector<64x128xf32>
    %148 = arith.subf %1, %147 : vector<64x128xf32>
    %cst_46 = arith.constant 2.500000e+00 : f32
    %149 = vector.broadcast %cst_46 : f32 to vector<64x128xf32>
    %150 = arith.mulf %148, %149 : vector<64x128xf32>
    %151 = arith.mulf %150, %66 : vector<64x128xf32>
    %cst_47 = arith.constant 1.400000e+00 : f32
    %152 = vector.broadcast %cst_47 : f32 to vector<64x128xf32>
    %153 = arith.subf %1, %152 : vector<64x128xf32>
    %cst_48 = arith.constant 2.500000e+00 : f32
    %154 = vector.broadcast %cst_48 : f32 to vector<64x128xf32>
    %155 = arith.mulf %153, %154 : vector<64x128xf32>
    %156 = arith.mulf %155, %67 : vector<64x128xf32>
    %157 = arith.subf %151, %156 : vector<64x128xf32>
    %cst_49 = arith.constant 1.000000e+00 : f32
    %158 = vector.broadcast %cst_49 : f32 to vector<64x128xf32>
    %159 = arith.subf %1, %158 : vector<64x128xf32>
    %cst_50 = arith.constant 2.500000e+00 : f32
    %160 = vector.broadcast %cst_50 : f32 to vector<64x128xf32>
    %161 = arith.mulf %159, %160 : vector<64x128xf32>
    %162 = arith.mulf %161, %67 : vector<64x128xf32>
    %cst_51 = arith.constant 1.800000e+00 : f32
    %163 = vector.broadcast %cst_51 : f32 to vector<64x128xf32>
    %164 = arith.subf %1, %163 : vector<64x128xf32>
    %cst_52 = arith.constant 2.500000e+00 : f32
    %165 = vector.broadcast %cst_52 : f32 to vector<64x128xf32>
    %166 = arith.mulf %164, %165 : vector<64x128xf32>
    %167 = arith.mulf %166, %68 : vector<64x128xf32>
    %168 = arith.subf %162, %167 : vector<64x128xf32>
    %cst_53 = arith.constant 1.400000e+00 : f32
    %169 = vector.broadcast %cst_53 : f32 to vector<64x128xf32>
    %170 = arith.subf %1, %169 : vector<64x128xf32>
    %cst_54 = arith.constant 2.500000e+00 : f32
    %171 = vector.broadcast %cst_54 : f32 to vector<64x128xf32>
    %172 = arith.mulf %170, %171 : vector<64x128xf32>
    %173 = arith.mulf %172, %68 : vector<64x128xf32>
    %cst_55 = arith.constant 2.200000e+00 : f32
    %174 = vector.broadcast %cst_55 : f32 to vector<64x128xf32>
    %175 = arith.subf %1, %174 : vector<64x128xf32>
    %cst_56 = arith.constant 2.500000e+00 : f32
    %176 = vector.broadcast %cst_56 : f32 to vector<64x128xf32>
    %177 = arith.mulf %175, %176 : vector<64x128xf32>
    %178 = arith.mulf %177, %69 : vector<64x128xf32>
    %179 = arith.subf %173, %178 : vector<64x128xf32>
    %cst_57 = arith.constant -2.200000e+00 : f32
    %180 = vector.broadcast %cst_57 : f32 to vector<64x128xf32>
    %181 = arith.subf %1, %180 : vector<64x128xf32>
    %cst_58 = arith.constant 1.250000e+00 : f32
    %182 = vector.broadcast %cst_58 : f32 to vector<64x128xf32>
    %183 = arith.mulf %181, %182 : vector<64x128xf32>
    %184 = arith.mulf %183, %80 : vector<64x128xf32>
    %cst_59 = arith.constant -1.000000e+00 : f32
    %185 = vector.broadcast %cst_59 : f32 to vector<64x128xf32>
    %186 = arith.subf %1, %185 : vector<64x128xf32>
    %cst_60 = arith.constant 1.250000e+00 : f32
    %187 = vector.broadcast %cst_60 : f32 to vector<64x128xf32>
    %188 = arith.mulf %186, %187 : vector<64x128xf32>
    %189 = arith.mulf %188, %91 : vector<64x128xf32>
    %190 = arith.subf %184, %189 : vector<64x128xf32>
    %cst_61 = arith.constant -1.800000e+00 : f32
    %191 = vector.broadcast %cst_61 : f32 to vector<64x128xf32>
    %192 = arith.subf %1, %191 : vector<64x128xf32>
    %cst_62 = arith.constant 1.250000e+00 : f32
    %193 = vector.broadcast %cst_62 : f32 to vector<64x128xf32>
    %194 = arith.mulf %192, %193 : vector<64x128xf32>
    %195 = arith.mulf %194, %91 : vector<64x128xf32>
    %cst_63 = arith.constant -6.000000e-01 : f32
    %196 = vector.broadcast %cst_63 : f32 to vector<64x128xf32>
    %197 = arith.subf %1, %196 : vector<64x128xf32>
    %cst_64 = arith.constant 1.250000e+00 : f32
    %198 = vector.broadcast %cst_64 : f32 to vector<64x128xf32>
    %199 = arith.mulf %197, %198 : vector<64x128xf32>
    %200 = arith.mulf %199, %102 : vector<64x128xf32>
    %201 = arith.subf %195, %200 : vector<64x128xf32>
    %cst_65 = arith.constant -1.400000e+00 : f32
    %202 = vector.broadcast %cst_65 : f32 to vector<64x128xf32>
    %203 = arith.subf %1, %202 : vector<64x128xf32>
    %cst_66 = arith.constant 1.250000e+00 : f32
    %204 = vector.broadcast %cst_66 : f32 to vector<64x128xf32>
    %205 = arith.mulf %203, %204 : vector<64x128xf32>
    %206 = arith.mulf %205, %102 : vector<64x128xf32>
    %cst_67 = arith.constant -2.000000e-01 : f32
    %207 = vector.broadcast %cst_67 : f32 to vector<64x128xf32>
    %208 = arith.subf %1, %207 : vector<64x128xf32>
    %cst_68 = arith.constant 1.250000e+00 : f32
    %209 = vector.broadcast %cst_68 : f32 to vector<64x128xf32>
    %210 = arith.mulf %208, %209 : vector<64x128xf32>
    %211 = arith.mulf %210, %113 : vector<64x128xf32>
    %212 = arith.subf %206, %211 : vector<64x128xf32>
    %cst_69 = arith.constant -1.000000e+00 : f32
    %213 = vector.broadcast %cst_69 : f32 to vector<64x128xf32>
    %214 = arith.subf %1, %213 : vector<64x128xf32>
    %cst_70 = arith.constant 1.250000e+00 : f32
    %215 = vector.broadcast %cst_70 : f32 to vector<64x128xf32>
    %216 = arith.mulf %214, %215 : vector<64x128xf32>
    %217 = arith.mulf %216, %113 : vector<64x128xf32>
    %cst_71 = arith.constant 2.000000e-01 : f32
    %218 = vector.broadcast %cst_71 : f32 to vector<64x128xf32>
    %219 = arith.subf %1, %218 : vector<64x128xf32>
    %cst_72 = arith.constant 1.250000e+00 : f32
    %220 = vector.broadcast %cst_72 : f32 to vector<64x128xf32>
    %221 = arith.mulf %219, %220 : vector<64x128xf32>
    %222 = arith.mulf %221, %124 : vector<64x128xf32>
    %223 = arith.subf %217, %222 : vector<64x128xf32>
    %cst_73 = arith.constant -6.000000e-01 : f32
    %224 = vector.broadcast %cst_73 : f32 to vector<64x128xf32>
    %225 = arith.subf %1, %224 : vector<64x128xf32>
    %cst_74 = arith.constant 1.250000e+00 : f32
    %226 = vector.broadcast %cst_74 : f32 to vector<64x128xf32>
    %227 = arith.mulf %225, %226 : vector<64x128xf32>
    %228 = arith.mulf %227, %124 : vector<64x128xf32>
    %cst_75 = arith.constant 6.000000e-01 : f32
    %229 = vector.broadcast %cst_75 : f32 to vector<64x128xf32>
    %230 = arith.subf %1, %229 : vector<64x128xf32>
    %cst_76 = arith.constant 1.250000e+00 : f32
    %231 = vector.broadcast %cst_76 : f32 to vector<64x128xf32>
    %232 = arith.mulf %230, %231 : vector<64x128xf32>
    %233 = arith.mulf %232, %135 : vector<64x128xf32>
    %234 = arith.subf %228, %233 : vector<64x128xf32>
    %cst_77 = arith.constant -2.000000e-01 : f32
    %235 = vector.broadcast %cst_77 : f32 to vector<64x128xf32>
    %236 = arith.subf %1, %235 : vector<64x128xf32>
    %cst_78 = arith.constant 1.250000e+00 : f32
    %237 = vector.broadcast %cst_78 : f32 to vector<64x128xf32>
    %238 = arith.mulf %236, %237 : vector<64x128xf32>
    %239 = arith.mulf %238, %135 : vector<64x128xf32>
    %cst_79 = arith.constant 1.000000e+00 : f32
    %240 = vector.broadcast %cst_79 : f32 to vector<64x128xf32>
    %241 = arith.subf %1, %240 : vector<64x128xf32>
    %cst_80 = arith.constant 1.250000e+00 : f32
    %242 = vector.broadcast %cst_80 : f32 to vector<64x128xf32>
    %243 = arith.mulf %241, %242 : vector<64x128xf32>
    %244 = arith.mulf %243, %146 : vector<64x128xf32>
    %245 = arith.subf %239, %244 : vector<64x128xf32>
    %cst_81 = arith.constant 2.000000e-01 : f32
    %246 = vector.broadcast %cst_81 : f32 to vector<64x128xf32>
    %247 = arith.subf %1, %246 : vector<64x128xf32>
    %cst_82 = arith.constant 1.250000e+00 : f32
    %248 = vector.broadcast %cst_82 : f32 to vector<64x128xf32>
    %249 = arith.mulf %247, %248 : vector<64x128xf32>
    %250 = arith.mulf %249, %146 : vector<64x128xf32>
    %cst_83 = arith.constant 1.400000e+00 : f32
    %251 = vector.broadcast %cst_83 : f32 to vector<64x128xf32>
    %252 = arith.subf %1, %251 : vector<64x128xf32>
    %cst_84 = arith.constant 1.250000e+00 : f32
    %253 = vector.broadcast %cst_84 : f32 to vector<64x128xf32>
    %254 = arith.mulf %252, %253 : vector<64x128xf32>
    %255 = arith.mulf %254, %157 : vector<64x128xf32>
    %256 = arith.subf %250, %255 : vector<64x128xf32>
    %cst_85 = arith.constant 6.000000e-01 : f32
    %257 = vector.broadcast %cst_85 : f32 to vector<64x128xf32>
    %258 = arith.subf %1, %257 : vector<64x128xf32>
    %cst_86 = arith.constant 1.250000e+00 : f32
    %259 = vector.broadcast %cst_86 : f32 to vector<64x128xf32>
    %260 = arith.mulf %258, %259 : vector<64x128xf32>
    %261 = arith.mulf %260, %157 : vector<64x128xf32>
    %cst_87 = arith.constant 1.800000e+00 : f32
    %262 = vector.broadcast %cst_87 : f32 to vector<64x128xf32>
    %263 = arith.subf %1, %262 : vector<64x128xf32>
    %cst_88 = arith.constant 1.250000e+00 : f32
    %264 = vector.broadcast %cst_88 : f32 to vector<64x128xf32>
    %265 = arith.mulf %263, %264 : vector<64x128xf32>
    %266 = arith.mulf %265, %168 : vector<64x128xf32>
    %267 = arith.subf %261, %266 : vector<64x128xf32>
    %cst_89 = arith.constant 1.000000e+00 : f32
    %268 = vector.broadcast %cst_89 : f32 to vector<64x128xf32>
    %269 = arith.subf %1, %268 : vector<64x128xf32>
    %cst_90 = arith.constant 1.250000e+00 : f32
    %270 = vector.broadcast %cst_90 : f32 to vector<64x128xf32>
    %271 = arith.mulf %269, %270 : vector<64x128xf32>
    %272 = arith.mulf %271, %168 : vector<64x128xf32>
    %cst_91 = arith.constant 2.200000e+00 : f32
    %273 = vector.broadcast %cst_91 : f32 to vector<64x128xf32>
    %274 = arith.subf %1, %273 : vector<64x128xf32>
    %cst_92 = arith.constant 1.250000e+00 : f32
    %275 = vector.broadcast %cst_92 : f32 to vector<64x128xf32>
    %276 = arith.mulf %274, %275 : vector<64x128xf32>
    %277 = arith.mulf %276, %179 : vector<64x128xf32>
    %278 = arith.subf %272, %277 : vector<64x128xf32>
    %cst_93 = arith.constant -2.200000e+00 : f32
    %279 = vector.broadcast %cst_93 : f32 to vector<64x128xf32>
    %280 = arith.subf %1, %279 : vector<64x128xf32>
    %cst_94 = arith.constant 0.833333313 : f32
    %281 = vector.broadcast %cst_94 : f32 to vector<64x128xf32>
    %282 = arith.mulf %280, %281 : vector<64x128xf32>
    %283 = arith.mulf %282, %190 : vector<64x128xf32>
    %cst_95 = arith.constant -6.000000e-01 : f32
    %284 = vector.broadcast %cst_95 : f32 to vector<64x128xf32>
    %285 = arith.subf %1, %284 : vector<64x128xf32>
    %cst_96 = arith.constant 0.833333313 : f32
    %286 = vector.broadcast %cst_96 : f32 to vector<64x128xf32>
    %287 = arith.mulf %285, %286 : vector<64x128xf32>
    %288 = arith.mulf %287, %201 : vector<64x128xf32>
    %289 = arith.subf %283, %288 : vector<64x128xf32>
    %290 = arith.truncf %289 : vector<64x128xf32> to vector<64x128xbf16>
    %c128 = arith.constant 128 : index
    %c0_97 = arith.constant 0 : index
    %291 = vector.load %arg2[%c128, %c0_97] : memref<1152x128xbf16, #tpu.memory_space<vmem>>, vector<128x128xbf16>
    %cst_98 = arith.constant dense<0.000000e+00> : vector<64x128xf32>
    %292 = tpu.matmul %290, %291, %cst_98 {dimension_numbers = #tpu.dot_dimension_numbers<[1], [0], [0], [1], [0, 0, 1, 1], [], []>} : vector<64x128xbf16>, vector<128x128xbf16>, vector<64x128xf32> -> vector<64x128xf32>
    %293 = arith.addf %10, %292 : vector<64x128xf32>
    %cst_99 = arith.constant -1.800000e+00 : f32
    %294 = vector.broadcast %cst_99 : f32 to vector<64x128xf32>
    %295 = arith.subf %1, %294 : vector<64x128xf32>
    %cst_100 = arith.constant 0.833333313 : f32
    %296 = vector.broadcast %cst_100 : f32 to vector<64x128xf32>
    %297 = arith.mulf %295, %296 : vector<64x128xf32>
    %298 = arith.mulf %297, %201 : vector<64x128xf32>
    %cst_101 = arith.constant -2.000000e-01 : f32
    %299 = vector.broadcast %cst_101 : f32 to vector<64x128xf32>
    %300 = arith.subf %1, %299 : vector<64x128xf32>
    %cst_102 = arith.constant 0.833333313 : f32
    %301 = vector.broadcast %cst_102 : f32 to vector<64x128xf32>
    %302 = arith.mulf %300, %301 : vector<64x128xf32>
    %303 = arith.mulf %302, %212 : vector<64x128xf32>
    %304 = arith.subf %298, %303 : vector<64x128xf32>
    %305 = arith.truncf %304 : vector<64x128xf32> to vector<64x128xbf16>
    %c256 = arith.constant 256 : index
    %c0_103 = arith.constant 0 : index
    %306 = vector.load %arg2[%c256, %c0_103] : memref<1152x128xbf16, #tpu.memory_space<vmem>>, vector<128x128xbf16>
    %cst_104 = arith.constant dense<0.000000e+00> : vector<64x128xf32>
    %307 = tpu.matmul %305, %306, %cst_104 {dimension_numbers = #tpu.dot_dimension_numbers<[1], [0], [0], [1], [0, 0, 1, 1], [], []>} : vector<64x128xbf16>, vector<128x128xbf16>, vector<64x128xf32> -> vector<64x128xf32>
    %308 = arith.addf %293, %307 : vector<64x128xf32>
    %cst_105 = arith.constant -1.400000e+00 : f32
    %309 = vector.broadcast %cst_105 : f32 to vector<64x128xf32>
    %310 = arith.subf %1, %309 : vector<64x128xf32>
    %cst_106 = arith.constant 0.833333313 : f32
    %311 = vector.broadcast %cst_106 : f32 to vector<64x128xf32>
    %312 = arith.mulf %310, %311 : vector<64x128xf32>
    %313 = arith.mulf %312, %212 : vector<64x128xf32>
    %cst_107 = arith.constant 2.000000e-01 : f32
    %314 = vector.broadcast %cst_107 : f32 to vector<64x128xf32>
    %315 = arith.subf %1, %314 : vector<64x128xf32>
    %cst_108 = arith.constant 0.833333313 : f32
    %316 = vector.broadcast %cst_108 : f32 to vector<64x128xf32>
    %317 = arith.mulf %315, %316 : vector<64x128xf32>
    %318 = arith.mulf %317, %223 : vector<64x128xf32>
    %319 = arith.subf %313, %318 : vector<64x128xf32>
    %320 = arith.truncf %319 : vector<64x128xf32> to vector<64x128xbf16>
    %c384 = arith.constant 384 : index
    %c0_109 = arith.constant 0 : index
    %321 = vector.load %arg2[%c384, %c0_109] : memref<1152x128xbf16, #tpu.memory_space<vmem>>, vector<128x128xbf16>
    %cst_110 = arith.constant dense<0.000000e+00> : vector<64x128xf32>
    %322 = tpu.matmul %320, %321, %cst_110 {dimension_numbers = #tpu.dot_dimension_numbers<[1], [0], [0], [1], [0, 0, 1, 1], [], []>} : vector<64x128xbf16>, vector<128x128xbf16>, vector<64x128xf32> -> vector<64x128xf32>
    %323 = arith.addf %308, %322 : vector<64x128xf32>
    %cst_111 = arith.constant -1.000000e+00 : f32
    %324 = vector.broadcast %cst_111 : f32 to vector<64x128xf32>
    %325 = arith.subf %1, %324 : vector<64x128xf32>
    %cst_112 = arith.constant 0.833333313 : f32
    %326 = vector.broadcast %cst_112 : f32 to vector<64x128xf32>
    %327 = arith.mulf %325, %326 : vector<64x128xf32>
    %328 = arith.mulf %327, %223 : vector<64x128xf32>
    %cst_113 = arith.constant 6.000000e-01 : f32
    %329 = vector.broadcast %cst_113 : f32 to vector<64x128xf32>
    %330 = arith.subf %1, %329 : vector<64x128xf32>
    %cst_114 = arith.constant 0.833333313 : f32
    %331 = vector.broadcast %cst_114 : f32 to vector<64x128xf32>
    %332 = arith.mulf %330, %331 : vector<64x128xf32>
    %333 = arith.mulf %332, %234 : vector<64x128xf32>
    %334 = arith.subf %328, %333 : vector<64x128xf32>
    %335 = arith.truncf %334 : vector<64x128xf32> to vector<64x128xbf16>
    %c512 = arith.constant 512 : index
    %c0_115 = arith.constant 0 : index
    %336 = vector.load %arg2[%c512, %c0_115] : memref<1152x128xbf16, #tpu.memory_space<vmem>>, vector<128x128xbf16>
    %cst_116 = arith.constant dense<0.000000e+00> : vector<64x128xf32>
    %337 = tpu.matmul %335, %336, %cst_116 {dimension_numbers = #tpu.dot_dimension_numbers<[1], [0], [0], [1], [0, 0, 1, 1], [], []>} : vector<64x128xbf16>, vector<128x128xbf16>, vector<64x128xf32> -> vector<64x128xf32>
    %338 = arith.addf %323, %337 : vector<64x128xf32>
    %cst_117 = arith.constant -6.000000e-01 : f32
    %339 = vector.broadcast %cst_117 : f32 to vector<64x128xf32>
    %340 = arith.subf %1, %339 : vector<64x128xf32>
    %cst_118 = arith.constant 0.833333313 : f32
    %341 = vector.broadcast %cst_118 : f32 to vector<64x128xf32>
    %342 = arith.mulf %340, %341 : vector<64x128xf32>
    %343 = arith.mulf %342, %234 : vector<64x128xf32>
    %cst_119 = arith.constant 1.000000e+00 : f32
    %344 = vector.broadcast %cst_119 : f32 to vector<64x128xf32>
    %345 = arith.subf %1, %344 : vector<64x128xf32>
    %cst_120 = arith.constant 0.833333313 : f32
    %346 = vector.broadcast %cst_120 : f32 to vector<64x128xf32>
    %347 = arith.mulf %345, %346 : vector<64x128xf32>
    %348 = arith.mulf %347, %245 : vector<64x128xf32>
    %349 = arith.subf %343, %348 : vector<64x128xf32>
    %350 = arith.truncf %349 : vector<64x128xf32> to vector<64x128xbf16>
    %c640 = arith.constant 640 : index
    %c0_121 = arith.constant 0 : index
    %351 = vector.load %arg2[%c640, %c0_121] : memref<1152x128xbf16, #tpu.memory_space<vmem>>, vector<128x128xbf16>
    %cst_122 = arith.constant dense<0.000000e+00> : vector<64x128xf32>
    %352 = tpu.matmul %350, %351, %cst_122 {dimension_numbers = #tpu.dot_dimension_numbers<[1], [0], [0], [1], [0, 0, 1, 1], [], []>} : vector<64x128xbf16>, vector<128x128xbf16>, vector<64x128xf32> -> vector<64x128xf32>
    %353 = arith.addf %338, %352 : vector<64x128xf32>
    %cst_123 = arith.constant -2.000000e-01 : f32
    %354 = vector.broadcast %cst_123 : f32 to vector<64x128xf32>
    %355 = arith.subf %1, %354 : vector<64x128xf32>
    %cst_124 = arith.constant 0.833333313 : f32
    %356 = vector.broadcast %cst_124 : f32 to vector<64x128xf32>
    %357 = arith.mulf %355, %356 : vector<64x128xf32>
    %358 = arith.mulf %357, %245 : vector<64x128xf32>
    %cst_125 = arith.constant 1.400000e+00 : f32
    %359 = vector.broadcast %cst_125 : f32 to vector<64x128xf32>
    %360 = arith.subf %1, %359 : vector<64x128xf32>
    %cst_126 = arith.constant 0.833333313 : f32
    %361 = vector.broadcast %cst_126 : f32 to vector<64x128xf32>
    %362 = arith.mulf %360, %361 : vector<64x128xf32>
    %363 = arith.mulf %362, %256 : vector<64x128xf32>
    %364 = arith.subf %358, %363 : vector<64x128xf32>
    %365 = arith.truncf %364 : vector<64x128xf32> to vector<64x128xbf16>
    %c768 = arith.constant 768 : index
    %c0_127 = arith.constant 0 : index
    %366 = vector.load %arg2[%c768, %c0_127] : memref<1152x128xbf16, #tpu.memory_space<vmem>>, vector<128x128xbf16>
    %cst_128 = arith.constant dense<0.000000e+00> : vector<64x128xf32>
    %367 = tpu.matmul %365, %366, %cst_128 {dimension_numbers = #tpu.dot_dimension_numbers<[1], [0], [0], [1], [0, 0, 1, 1], [], []>} : vector<64x128xbf16>, vector<128x128xbf16>, vector<64x128xf32> -> vector<64x128xf32>
    %368 = arith.addf %353, %367 : vector<64x128xf32>
    %cst_129 = arith.constant 2.000000e-01 : f32
    %369 = vector.broadcast %cst_129 : f32 to vector<64x128xf32>
    %370 = arith.subf %1, %369 : vector<64x128xf32>
    %cst_130 = arith.constant 0.833333313 : f32
    %371 = vector.broadcast %cst_130 : f32 to vector<64x128xf32>
    %372 = arith.mulf %370, %371 : vector<64x128xf32>
    %373 = arith.mulf %372, %256 : vector<64x128xf32>
    %cst_131 = arith.constant 1.800000e+00 : f32
    %374 = vector.broadcast %cst_131 : f32 to vector<64x128xf32>
    %375 = arith.subf %1, %374 : vector<64x128xf32>
    %cst_132 = arith.constant 0.833333313 : f32
    %376 = vector.broadcast %cst_132 : f32 to vector<64x128xf32>
    %377 = arith.mulf %375, %376 : vector<64x128xf32>
    %378 = arith.mulf %377, %267 : vector<64x128xf32>
    %379 = arith.subf %373, %378 : vector<64x128xf32>
    %380 = arith.truncf %379 : vector<64x128xf32> to vector<64x128xbf16>
    %c896 = arith.constant 896 : index
    %c0_133 = arith.constant 0 : index
    %381 = vector.load %arg2[%c896, %c0_133] : memref<1152x128xbf16, #tpu.memory_space<vmem>>, vector<128x128xbf16>
    %cst_134 = arith.constant dense<0.000000e+00> : vector<64x128xf32>
    %382 = tpu.matmul %380, %381, %cst_134 {dimension_numbers = #tpu.dot_dimension_numbers<[1], [0], [0], [1], [0, 0, 1, 1], [], []>} : vector<64x128xbf16>, vector<128x128xbf16>, vector<64x128xf32> -> vector<64x128xf32>
    %383 = arith.addf %368, %382 : vector<64x128xf32>
    %cst_135 = arith.constant 6.000000e-01 : f32
    %384 = vector.broadcast %cst_135 : f32 to vector<64x128xf32>
    %385 = arith.subf %1, %384 : vector<64x128xf32>
    %cst_136 = arith.constant 0.833333313 : f32
    %386 = vector.broadcast %cst_136 : f32 to vector<64x128xf32>
    %387 = arith.mulf %385, %386 : vector<64x128xf32>
    %388 = arith.mulf %387, %267 : vector<64x128xf32>
    %cst_137 = arith.constant 2.200000e+00 : f32
    %389 = vector.broadcast %cst_137 : f32 to vector<64x128xf32>
    %390 = arith.subf %1, %389 : vector<64x128xf32>
    %cst_138 = arith.constant 0.833333313 : f32
    %391 = vector.broadcast %cst_138 : f32 to vector<64x128xf32>
    %392 = arith.mulf %390, %391 : vector<64x128xf32>
    %393 = arith.mulf %392, %278 : vector<64x128xf32>
    %394 = arith.subf %388, %393 : vector<64x128xf32>
    %395 = arith.truncf %394 : vector<64x128xf32> to vector<64x128xbf16>
    %c1024 = arith.constant 1024 : index
    %c0_139 = arith.constant 0 : index
    %396 = vector.load %arg2[%c1024, %c0_139] : memref<1152x128xbf16, #tpu.memory_space<vmem>>, vector<128x128xbf16>
    %cst_140 = arith.constant dense<0.000000e+00> : vector<64x128xf32>
    %397 = tpu.matmul %395, %396, %cst_140 {dimension_numbers = #tpu.dot_dimension_numbers<[1], [0], [0], [1], [0, 0, 1, 1], [], []>} : vector<64x128xbf16>, vector<128x128xbf16>, vector<64x128xf32> -> vector<64x128xf32>
    %398 = arith.addf %383, %397 : vector<64x128xf32>
    %cst_141 = arith.constant 0.000000e+00 : f32
    %399 = vector.broadcast %cst_141 : f32 to vector<1x10x128xf32>
    %c0_142 = arith.constant 0 : index
    %c0_143 = arith.constant 0 : index
    %c0_144 = arith.constant 0 : index
    %400 = vector.load %arg6[%c0_142, %c0_143, %c0_144] : memref<10x10x128xf32, #tpu.memory_space<vmem>>, vector<1x10x128xf32>
    tpu.vector_store %arg6[%c0_142, %c0_143, %c0_144], %399 {strides = array<i32>} : memref<10x10x128xf32, #tpu.memory_space<vmem>>, vector<1x10x128xf32>,
    %cst_145 = arith.constant 0.000000e+00 : f32
    %401 = vector.broadcast %cst_145 : f32 to vector<1x10x128xf32>
    %c9 = arith.constant 9 : index
    %c0_146 = arith.constant 0 : index
    %c0_147 = arith.constant 0 : index
    %402 = vector.load %arg6[%c9, %c0_146, %c0_147] : memref<10x10x128xf32, #tpu.memory_space<vmem>>, vector<1x10x128xf32>
    tpu.vector_store %arg6[%c9, %c0_146, %c0_147], %401 {strides = array<i32>} : memref<10x10x128xf32, #tpu.memory_space<vmem>>, vector<1x10x128xf32>,
    %cst_148 = arith.constant 0.000000e+00 : f32
    %403 = vector.broadcast %cst_148 : f32 to vector<8x1x128xf32>
    %c1 = arith.constant 1 : index
    %c0_149 = arith.constant 0 : index
    %c0_150 = arith.constant 0 : index
    %404 = vector.load %arg6[%c1, %c0_149, %c0_150] : memref<10x10x128xf32, #tpu.memory_space<vmem>>, vector<8x1x128xf32>
    tpu.vector_store %arg6[%c1, %c0_149, %c0_150], %403 {strides = array<i32>} : memref<10x10x128xf32, #tpu.memory_space<vmem>>, vector<8x1x128xf32>,
    %cst_151 = arith.constant 0.000000e+00 : f32
    %405 = vector.broadcast %cst_151 : f32 to vector<8x1x128xf32>
    %c1_152 = arith.constant 1 : index
    %c9_153 = arith.constant 9 : index
    %c0_154 = arith.constant 0 : index
    %406 = vector.load %arg6[%c1_152, %c9_153, %c0_154] : memref<10x10x128xf32, #tpu.memory_space<vmem>>, vector<8x1x128xf32>
    tpu.vector_store %arg6[%c1_152, %c9_153, %c0_154], %405 {strides = array<i32>} : memref<10x10x128xf32, #tpu.memory_space<vmem>>, vector<8x1x128xf32>,
    %407 = vector.shape_cast %398 : vector<64x128xf32> to vector<8x8x128xf32>
    %c1_155 = arith.constant 1 : index
    %c1_156 = arith.constant 1 : index
    %c0_157 = arith.constant 0 : index
    %408 = vector.load %arg6[%c1_155, %c1_156, %c0_157] : memref<10x10x128xf32, #tpu.memory_space<vmem>>, vector<8x8x128xf32>
    tpu.vector_store %arg6[%c1_155, %c1_156, %c0_157], %407 {strides = array<i32>} : memref<10x10x128xf32, #tpu.memory_space<vmem>>, vector<8x8x128xf32>,
    %c0_158 = arith.constant 0 : index
    %c0_159 = arith.constant 0 : index
    %c0_160 = arith.constant 0 : index
    %409 = vector.load %arg6[%c0_158, %c0_159, %c0_160] : memref<10x10x128xf32, #tpu.memory_space<vmem>>, vector<10x10x128xf32>
    %c0_161 = arith.constant 0 : index
    %c0_162 = arith.constant 0 : index
    %410 = vector.load %arg3[%c0_161, %c0_162] : memref<9x128xf32, #tpu.memory_space<vmem>>, vector<9x128xf32>
    %c0_163 = arith.constant 0 : index
    %c0_164 = arith.constant 0 : index
    %411 = vector.load %arg4[%c0_163, %c0_164] : memref<1x128xf32, #tpu.memory_space<vmem>>, vector<1x128xf32>
    %412 = vector.shape_cast %411 : vector<1x128xf32> to vector<1x1x128xf32>
    %413 = vector.broadcast %412 : vector<1x1x128xf32> to vector<8x8x128xf32>
    %414 = vector.extract_strided_slice %409 {offsets = [0, 0, 0], sizes = [10, 8, 128], strides = [1, 1, 1]} : vector<10x10x128xf32> to vector<10x8x128xf32>
    %415 = vector.extract_strided_slice %410 {offsets = [0, 0], sizes = [1, 128], strides = [1, 1]} : vector<9x128xf32> to vector<1x128xf32>
    %416 = vector.extract_strided_slice %414 {offsets = [0, 0, 0], sizes = [8, 8, 128], strides = [1, 1, 1]} : vector<10x8x128xf32> to vector<8x8x128xf32>
    %417 = vector.shape_cast %415 : vector<1x128xf32> to vector<1x1x128xf32>
    %418 = vector.broadcast %417 : vector<1x1x128xf32> to vector<8x8x128xf32>
    %419 = arith.mulf %416, %418 : vector<8x8x128xf32>
    %420 = arith.addf %413, %419 : vector<8x8x128xf32>
    %421 = vector.extract_strided_slice %410 {offsets = [3, 0], sizes = [1, 128], strides = [1, 1]} : vector<9x128xf32> to vector<1x128xf32>
    %422 = vector.extract_strided_slice %414 {offsets = [1, 0, 0], sizes = [8, 8, 128], strides = [1, 1, 1]} : vector<10x8x128xf32> to vector<8x8x128xf32>
    %423 = vector.shape_cast %421 : vector<1x128xf32> to vector<1x1x128xf32>
    %424 = vector.broadcast %423 : vector<1x1x128xf32> to vector<8x8x128xf32>
    %425 = arith.mulf %422, %424 : vector<8x8x128xf32>
    %426 = arith.addf %420, %425 : vector<8x8x128xf32>
    %427 = vector.extract_strided_slice %410 {offsets = [6, 0], sizes = [1, 128], strides = [1, 1]} : vector<9x128xf32> to vector<1x128xf32>
    %428 = vector.extract_strided_slice %414 {offsets = [2, 0, 0], sizes = [8, 8, 128], strides = [1, 1, 1]} : vector<10x8x128xf32> to vector<8x8x128xf32>
    %429 = vector.shape_cast %427 : vector<1x128xf32> to vector<1x1x128xf32>
    %430 = vector.broadcast %429 : vector<1x1x128xf32> to vector<8x8x128xf32>
    %431 = arith.mulf %428, %430 : vector<8x8x128xf32>
    %432 = arith.addf %426, %431 : vector<8x8x128xf32>
    %433 = vector.extract_strided_slice %409 {offsets = [0, 1, 0], sizes = [10, 8, 128], strides = [1, 1, 1]} : vector<10x10x128xf32> to vector<10x8x128xf32>
    %434 = vector.extract_strided_slice %410 {offsets = [1, 0], sizes = [1, 128], strides = [1, 1]} : vector<9x128xf32> to vector<1x128xf32>
    %435 = vector.extract_strided_slice %433 {offsets = [0, 0, 0], sizes = [8, 8, 128], strides = [1, 1, 1]} : vector<10x8x128xf32> to vector<8x8x128xf32>
    %436 = vector.shape_cast %434 : vector<1x128xf32> to vector<1x1x128xf32>
    %437 = vector.broadcast %436 : vector<1x1x128xf32> to vector<8x8x128xf32>
    %438 = arith.mulf %435, %437 : vector<8x8x128xf32>
    %439 = arith.addf %432, %438 : vector<8x8x128xf32>
    %440 = vector.extract_strided_slice %410 {offsets = [4, 0], sizes = [1, 128], strides = [1, 1]} : vector<9x128xf32> to vector<1x128xf32>
    %441 = vector.extract_strided_slice %433 {offsets = [1, 0, 0], sizes = [8, 8, 128], strides = [1, 1, 1]} : vector<10x8x128xf32> to vector<8x8x128xf32>
    %442 = vector.shape_cast %440 : vector<1x128xf32> to vector<1x1x128xf32>
    %443 = vector.broadcast %442 : vector<1x1x128xf32> to vector<8x8x128xf32>
    %444 = arith.mulf %441, %443 : vector<8x8x128xf32>
    %445 = arith.addf %439, %444 : vector<8x8x128xf32>
    %446 = vector.extract_strided_slice %410 {offsets = [7, 0], sizes = [1, 128], strides = [1, 1]} : vector<9x128xf32> to vector<1x128xf32>
    %447 = vector.extract_strided_slice %433 {offsets = [2, 0, 0], sizes = [8, 8, 128], strides = [1, 1, 1]} : vector<10x8x128xf32> to vector<8x8x128xf32>
    %448 = vector.shape_cast %446 : vector<1x128xf32> to vector<1x1x128xf32>
    %449 = vector.broadcast %448 : vector<1x1x128xf32> to vector<8x8x128xf32>
    %450 = arith.mulf %447, %449 : vector<8x8x128xf32>
    %451 = arith.addf %445, %450 : vector<8x8x128xf32>
    %452 = vector.extract_strided_slice %409 {offsets = [0, 2, 0], sizes = [10, 8, 128], strides = [1, 1, 1]} : vector<10x10x128xf32> to vector<10x8x128xf32>
    %453 = vector.extract_strided_slice %410 {offsets = [2, 0], sizes = [1, 128], strides = [1, 1]} : vector<9x128xf32> to vector<1x128xf32>
    %454 = vector.extract_strided_slice %452 {offsets = [0, 0, 0], sizes = [8, 8, 128], strides = [1, 1, 1]} : vector<10x8x128xf32> to vector<8x8x128xf32>
    %455 = vector.shape_cast %453 : vector<1x128xf32> to vector<1x1x128xf32>
    %456 = vector.broadcast %455 : vector<1x1x128xf32> to vector<8x8x128xf32>
    %457 = arith.mulf %454, %456 : vector<8x8x128xf32>
    %458 = arith.addf %451, %457 : vector<8x8x128xf32>
    %459 = vector.extract_strided_slice %410 {offsets = [5, 0], sizes = [1, 128], strides = [1, 1]} : vector<9x128xf32> to vector<1x128xf32>
    %460 = vector.extract_strided_slice %452 {offsets = [1, 0, 0], sizes = [8, 8, 128], strides = [1, 1, 1]} : vector<10x8x128xf32> to vector<8x8x128xf32>
    %461 = vector.shape_cast %459 : vector<1x128xf32> to vector<1x1x128xf32>
    %462 = vector.broadcast %461 : vector<1x1x128xf32> to vector<8x8x128xf32>
    %463 = arith.mulf %460, %462 : vector<8x8x128xf32>
    %464 = arith.addf %458, %463 : vector<8x8x128xf32>
    %465 = vector.extract_strided_slice %410 {offsets = [8, 0], sizes = [1, 128], strides = [1, 1]} : vector<9x128xf32> to vector<1x128xf32>
    %466 = vector.extract_strided_slice %452 {offsets = [2, 0, 0], sizes = [8, 8, 128], strides = [1, 1, 1]} : vector<10x8x128xf32> to vector<8x8x128xf32>
    %467 = vector.shape_cast %465 : vector<1x128xf32> to vector<1x1x128xf32>
    %468 = vector.broadcast %467 : vector<1x1x128xf32> to vector<8x8x128xf32>
    %469 = arith.mulf %466, %468 : vector<8x8x128xf32>
    %470 = arith.addf %464, %469 : vector<8x8x128xf32>
    %cst_165 = arith.constant 0.000000e+00 : f32
    %471 = vector.broadcast %cst_165 : f32 to vector<8x8x128xf32>
    %472 = arith.maximumf %470, %471 : vector<8x8x128xf32>
    %473 = vector.shape_cast %472 : vector<8x8x128xf32> to vector<64x128xf32>
    %c0_166 = arith.constant 0 : index
    %c0_167 = arith.constant 0 : index
    %c0_168 = arith.constant 0 : index
    %474 = vector.load %arg5[%c0_166, %c0_167, %c0_168] : memref<1x64x128xf32, #tpu.memory_space<vmem>>, vector<1x64x128xf32>
    %475 = vector.shape_cast %474 : vector<1x64x128xf32> to vector<64x128xf32>
    %476 = vector.shape_cast %473 : vector<64x128xf32> to vector<1x64x128xf32>
    tpu.vector_store %arg5[%c0_166, %c0_167, %c0_168], %476 {strides = array<i32>} : memref<1x64x128xf32, #tpu.memory_space<vmem>>, vector<1x64x128xf32>,
    return
  }
  func.func @transform_0(%arg0: i32) -> (i32, i32, i32) {
    %c0_i32 = arith.constant 0 : i32
    %c0_i32_0 = arith.constant 0 : i32
    %c0_i32_1 = arith.constant 0 : i32
    return %arg0, %c0_i32, %c0_i32_0 : i32, i32, i32
  }
  func.func @transform_1(%arg0: i32) -> (i32, i32) {
    %c0_i32 = arith.constant 0 : i32
    %c0_i32_0 = arith.constant 0 : i32
    %c0_i32_1 = arith.constant 0 : i32
    return %c0_i32, %c0_i32_0 : i32, i32
  }
  func.func @transform_2(%arg0: i32) -> (i32, i32) {
    %c0_i32 = arith.constant 0 : i32
    %c0_i32_0 = arith.constant 0 : i32
    %c0_i32_1 = arith.constant 0 : i32
    return %c0_i32, %c0_i32_0 : i32, i32
  }
  func.func @transform_3(%arg0: i32) -> (i32, i32) {
    %c0_i32 = arith.constant 0 : i32
    %c0_i32_0 = arith.constant 0 : i32
    %c0_i32_1 = arith.constant 0 : i32
    return %c0_i32, %c0_i32_0 : i32, i32
  }
  func.func @transform_4(%arg0: i32) -> (i32, i32, i32) {
    %c0_i32 = arith.constant 0 : i32
    %c0_i32_0 = arith.constant 0 : i32
    %c0_i32_1 = arith.constant 0 : i32
    return %arg0, %c0_i32, %c0_i32_0 : i32, i32, i32
  }
}

module attributes {stable_mosaic.version = 11 : i64} {
  func.func @kan_block_kernel(%arg0: i32, %arg1: memref<1x64x128xf32, #tpu.memory_space<vmem>>, %arg2: memref<1152x128xbf16, #tpu.memory_space<vmem>>, %arg3: memref<9x128xf32, #tpu.memory_space<vmem>>, %arg4: memref<1x128xf32, #tpu.memory_space<vmem>>, %arg5: memref<1x64x128xf32, #tpu.memory_space<vmem>>, %arg6: memref<10x10x128xf32, #tpu.memory_space<vmem>>) attributes {dimension_semantics = [#tpu.dimension_semantics<parallel>], iteration_bounds = array<i64: 2>, scalar_prefetch = 0 : i64, scratch_operands = 1 : i64, tpu.core_type = #tpu.core_type<tc>, window_params = [{transform_indices = @transform_0, window_bounds = array<i64: 1, 64, 128>}, {pipeline_mode = #tpu.pipeline_mode<synchronous>, transform_indices = @transform_1, window_bounds = array<i64: 1152, 128>}, {pipeline_mode = #tpu.pipeline_mode<synchronous>, transform_indices = @transform_2, window_bounds = array<i64: 9, 128>}, {pipeline_mode = #tpu.pipeline_mode<synchronous>, transform_indices = @transform_3, window_bounds = array<i64: 1, 128>}, {transform_indices = @transform_4, window_bounds = array<i64: 1, 64, 128>}]} {
    %c0 = arith.constant 0 : index
    %c0_0 = arith.constant 0 : index
    %c0_1 = arith.constant 0 : index
    %0 = vector.load %arg1[%c0, %c0_0, %c0_1] : memref<1x64x128xf32, #tpu.memory_space<vmem>>, vector<1x64x128xf32>
    %1 = vector.shape_cast %0 : vector<1x64x128xf32> to vector<64x128xf32>
    %2 = arith.negf %1 : vector<64x128xf32>
    %3 = math.exp %2 : vector<64x128xf32>
    %cst = arith.constant 1.000000e+00 : f32
    %4 = vector.broadcast %cst : f32 to vector<64x128xf32>
    %5 = arith.addf %4, %3 : vector<64x128xf32>
    %6 = arith.divf %4, %5 : vector<64x128xf32>
    %7 = arith.mulf %1, %6 : vector<64x128xf32>
    %8 = arith.truncf %7 : vector<64x128xf32> to vector<64x128xbf16>
    %c0_2 = arith.constant 0 : index
    %c0_3 = arith.constant 0 : index
    %9 = vector.load %arg2[%c0_2, %c0_3] : memref<1152x128xbf16, #tpu.memory_space<vmem>>, vector<128x128xbf16>
    %cst_4 = arith.constant dense<0.000000e+00> : vector<64x128xf32>
    %10 = tpu.matmul %8, %9, %cst_4 {dimension_numbers = #tpu.dot_dimension_numbers<[1], [0], [0], [1], [0, 0, 1, 1], [], []>} : vector<64x128xbf16>, vector<128x128xbf16>, vector<64x128xf32> -> vector<64x128xf32>
    %cst_5 = arith.constant -2.200000e+00 : f32
    %11 = vector.broadcast %cst_5 : f32 to vector<64x128xf32>
    %12 = arith.cmpf oge, %1, %11 : vector<64x128xf32>
    %13 = arith.extui %12 : vector<64x128xi1> to vector<64x128xi32>
    %14 = arith.sitofp %13 : vector<64x128xi32> to vector<64x128xf32>
    %cst_6 = arith.constant -1.800000e+00 : f32
    %15 = vector.broadcast %cst_6 : f32 to vector<64x128xf32>
    %16 = arith.cmpf oge, %1, %15 : vector<64x128xf32>
    %17 = arith.extui %16 : vector<64x128xi1> to vector<64x128xi32>
    %18 = arith.sitofp %17 : vector<64x128xi32> to vector<64x128xf32>
    %cst_7 = arith.constant -1.400000e+00 : f32
    %19 = vector.broadcast %cst_7 : f32 to vector<64x128xf32>
    %20 = arith.cmpf oge, %1, %19 : vector<64x128xf32>
    %21 = arith.extui %20 : vector<64x128xi1> to vector<64x128xi32>
    %22 = arith.sitofp %21 : vector<64x128xi32> to vector<64x128xf32>
    %cst_8 = arith.constant -1.000000e+00 : f32
    %23 = vector.broadcast %cst_8 : f32 to vector<64x128xf32>
    %24 = arith.cmpf oge, %1, %23 : vector<64x128xf32>
    %25 = arith.extui %24 : vector<64x128xi1> to vector<64x128xi32>
    %26 = arith.sitofp %25 : vector<64x128xi32> to vector<64x128xf32>
    %cst_9 = arith.constant -6.000000e-01 : f32
    %27 = vector.broadcast %cst_9 : f32 to vector<64x128xf32>
    %28 = arith.cmpf oge, %1, %27 : vector<64x128xf32>
    %29 = arith.extui %28 : vector<64x128xi1> to vector<64x128xi32>
    %30 = arith.sitofp %29 : vector<64x128xi32> to vector<64x128xf32>
    %cst_10 = arith.constant -2.000000e-01 : f32
    %31 = vector.broadcast %cst_10 : f32 to vector<64x128xf32>
    %32 = arith.cmpf oge, %1, %31 : vector<64x128xf32>
    %33 = arith.extui %32 : vector<64x128xi1> to vector<64x128xi32>
    %34 = arith.sitofp %33 : vector<64x128xi32> to vector<64x128xf32>
    %cst_11 = arith.constant 2.000000e-01 : f32
    %35 = vector.broadcast %cst_11 : f32 to vector<64x128xf32>
    %36 = arith.cmpf oge, %1, %35 : vector<64x128xf32>
    %37 = arith.extui %36 : vector<64x128xi1> to vector<64x128xi32>
    %38 = arith.sitofp %37 : vector<64x128xi32> to vector<64x128xf32>
    %cst_12 = arith.constant 6.000000e-01 : f32
    %39 = vector.broadcast %cst_12 : f32 to vector<64x128xf32>
    %40 = arith.cmpf oge, %1, %39 : vector<64x128xf32>
    %41 = arith.extui %40 : vector<64x128xi1> to vector<64x128xi32>
    %42 = arith.sitofp %41 : vector<64x128xi32> to vector<64x128xf32>
    %cst_13 = arith.constant 1.000000e+00 : f32
    %43 = vector.broadcast %cst_13 : f32 to vector<64x128xf32>
    %44 = arith.cmpf oge, %1, %43 : vector<64x128xf32>
    %45 = arith.extui %44 : vector<64x128xi1> to vector<64x128xi32>
    %46 = arith.sitofp %45 : vector<64x128xi32> to vector<64x128xf32>
    %cst_14 = arith.constant 1.400000e+00 : f32
    %47 = vector.broadcast %cst_14 : f32 to vector<64x128xf32>
    %48 = arith.cmpf oge, %1, %47 : vector<64x128xf32>
    %49 = arith.extui %48 : vector<64x128xi1> to vector<64x128xi32>
    %50 = arith.sitofp %49 : vector<64x128xi32> to vector<64x128xf32>
    %cst_15 = arith.constant 1.800000e+00 : f32
    %51 = vector.broadcast %cst_15 : f32 to vector<64x128xf32>
    %52 = arith.cmpf oge, %1, %51 : vector<64x128xf32>
    %53 = arith.extui %52 : vector<64x128xi1> to vector<64x128xi32>
    %54 = arith.sitofp %53 : vector<64x128xi32> to vector<64x128xf32>
    %cst_16 = arith.constant 2.200000e+00 : f32
    %55 = vector.broadcast %cst_16 : f32 to vector<64x128xf32>
    %56 = arith.cmpf oge, %1, %55 : vector<64x128xf32>
    %57 = arith.extui %56 : vector<64x128xi1> to vector<64x128xi32>
    %58 = arith.sitofp %57 : vector<64x128xi32> to vector<64x128xf32>
    %59 = arith.subf %14, %18 : vector<64x128xf32>
    %60 = arith.subf %18, %22 : vector<64x128xf32>
    %61 = arith.subf %22, %26 : vector<64x128xf32>
    %62 = arith.subf %26, %30 : vector<64x128xf32>
    %63 = arith.subf %30, %34 : vector<64x128xf32>
    %64 = arith.subf %34, %38 : vector<64x128xf32>
    %65 = arith.subf %38, %42 : vector<64x128xf32>
    %66 = arith.subf %42, %46 : vector<64x128xf32>
    %67 = arith.subf %46, %50 : vector<64x128xf32>
    %68 = arith.subf %50, %54 : vector<64x128xf32>
    %69 = arith.subf %54, %58 : vector<64x128xf32>
    %cst_17 = arith.constant -2.200000e+00 : f32
    %70 = vector.broadcast %cst_17 : f32 to vector<64x128xf32>
    %71 = arith.subf %1, %70 : vector<64x128xf32>
    %cst_18 = arith.constant 2.500000e+00 : f32
    %72 = vector.broadcast %cst_18 : f32 to vector<64x128xf32>
    %73 = arith.mulf %71, %72 : vector<64x128xf32>
    %74 = arith.mulf %73, %59 : vector<64x128xf32>
    %cst_19 = arith.constant -1.400000e+00 : f32
    %75 = vector.broadcast %cst_19 : f32 to vector<64x128xf32>
    %76 = arith.subf %1, %75 : vector<64x128xf32>
    %cst_20 = arith.constant 2.500000e+00 : f32
    %77 = vector.broadcast %cst_20 : f32 to vector<64x128xf32>
    %78 = arith.mulf %76, %77 : vector<64x128xf32>
    %79 = arith.mulf %78, %60 : vector<64x128xf32>
    %80 = arith.subf %74, %79 : vector<64x128xf32>
    %cst_21 = arith.constant -1.800000e+00 : f32
    %81 = vector.broadcast %cst_21 : f32 to vector<64x128xf32>
    %82 = arith.subf %1, %81 : vector<64x128xf32>
    %cst_22 = arith.constant 2.500000e+00 : f32
    %83 = vector.broadcast %cst_22 : f32 to vector<64x128xf32>
    %84 = arith.mulf %82, %83 : vector<64x128xf32>
    %85 = arith.mulf %84, %60 : vector<64x128xf32>
    %cst_23 = arith.constant -1.000000e+00 : f32
    %86 = vector.broadcast %cst_23 : f32 to vector<64x128xf32>
    %87 = arith.subf %1, %86 : vector<64x128xf32>
    %cst_24 = arith.constant 2.500000e+00 : f32
    %88 = vector.broadcast %cst_24 : f32 to vector<64x128xf32>
    %89 = arith.mulf %87, %88 : vector<64x128xf32>
    %90 = arith.mulf %89, %61 : vector<64x128xf32>
    %91 = arith.subf %85, %90 : vector<64x128xf32>
    %cst_25 = arith.constant -1.400000e+00 : f32
    %92 = vector.broadcast %cst_25 : f32 to vector<64x128xf32>
    %93 = arith.subf %1, %92 : vector<64x128xf32>
    %cst_26 = arith.constant 2.500000e+00 : f32
    %94 = vector.broadcast %cst_26 : f32 to vector<64x128xf32>
    %95 = arith.mulf %93, %94 : vector<64x128xf32>
    %96 = arith.mulf %95, %61 : vector<64x128xf32>
    %cst_27 = arith.constant -6.000000e-01 : f32
    %97 = vector.broadcast %cst_27 : f32 to vector<64x128xf32>
    %98 = arith.subf %1, %97 : vector<64x128xf32>
    %cst_28 = arith.constant 2.500000e+00 : f32
    %99 = vector.broadcast %cst_28 : f32 to vector<64x128xf32>
    %100 = arith.mulf %98, %99 : vector<64x128xf32>
    %101 = arith.mulf %100, %62 : vector<64x128xf32>
    %102 = arith.subf %96, %101 : vector<64x128xf32>
    %cst_29 = arith.constant -1.000000e+00 : f32
    %103 = vector.broadcast %cst_29 : f32 to vector<64x128xf32>
    %104 = arith.subf %1, %103 : vector<64x128xf32>
    %cst_30 = arith.constant 2.500000e+00 : f32
    %105 = vector.broadcast %cst_30 : f32 to vector<64x128xf32>
    %106 = arith.mulf %104, %105 : vector<64x128xf32>
    %107 = arith.mulf %106, %62 : vector<64x128xf32>
    %cst_31 = arith.constant -2.000000e-01 : f32
    %108 = vector.broadcast %cst_31 : f32 to vector<64x128xf32>
    %109 = arith.subf %1, %108 : vector<64x128xf32>
    %cst_32 = arith.constant 2.500000e+00 : f32
    %110 = vector.broadcast %cst_32 : f32 to vector<64x128xf32>
    %111 = arith.mulf %109, %110 : vector<64x128xf32>
    %112 = arith.mulf %111, %63 : vector<64x128xf32>
    %113 = arith.subf %107, %112 : vector<64x128xf32>
    %cst_33 = arith.constant -6.000000e-01 : f32
    %114 = vector.broadcast %cst_33 : f32 to vector<64x128xf32>
    %115 = arith.subf %1, %114 : vector<64x128xf32>
    %cst_34 = arith.constant 2.500000e+00 : f32
    %116 = vector.broadcast %cst_34 : f32 to vector<64x128xf32>
    %117 = arith.mulf %115, %116 : vector<64x128xf32>
    %118 = arith.mulf %117, %63 : vector<64x128xf32>
    %cst_35 = arith.constant 2.000000e-01 : f32
    %119 = vector.broadcast %cst_35 : f32 to vector<64x128xf32>
    %120 = arith.subf %1, %119 : vector<64x128xf32>
    %cst_36 = arith.constant 2.500000e+00 : f32
    %121 = vector.broadcast %cst_36 : f32 to vector<64x128xf32>
    %122 = arith.mulf %120, %121 : vector<64x128xf32>
    %123 = arith.mulf %122, %64 : vector<64x128xf32>
    %124 = arith.subf %118, %123 : vector<64x128xf32>
    %cst_37 = arith.constant -2.000000e-01 : f32
    %125 = vector.broadcast %cst_37 : f32 to vector<64x128xf32>
    %126 = arith.subf %1, %125 : vector<64x128xf32>
    %cst_38 = arith.constant 2.500000e+00 : f32
    %127 = vector.broadcast %cst_38 : f32 to vector<64x128xf32>
    %128 = arith.mulf %126, %127 : vector<64x128xf32>
    %129 = arith.mulf %128, %64 : vector<64x128xf32>
    %cst_39 = arith.constant 6.000000e-01 : f32
    %130 = vector.broadcast %cst_39 : f32 to vector<64x128xf32>
    %131 = arith.subf %1, %130 : vector<64x128xf32>
    %cst_40 = arith.constant 2.500000e+00 : f32
    %132 = vector.broadcast %cst_40 : f32 to vector<64x128xf32>
    %133 = arith.mulf %131, %132 : vector<64x128xf32>
    %134 = arith.mulf %133, %65 : vector<64x128xf32>
    %135 = arith.subf %129, %134 : vector<64x128xf32>
    %cst_41 = arith.constant 2.000000e-01 : f32
    %136 = vector.broadcast %cst_41 : f32 to vector<64x128xf32>
    %137 = arith.subf %1, %136 : vector<64x128xf32>
    %cst_42 = arith.constant 2.500000e+00 : f32
    %138 = vector.broadcast %cst_42 : f32 to vector<64x128xf32>
    %139 = arith.mulf %137, %138 : vector<64x128xf32>
    %140 = arith.mulf %139, %65 : vector<64x128xf32>
    %cst_43 = arith.constant 1.000000e+00 : f32
    %141 = vector.broadcast %cst_43 : f32 to vector<64x128xf32>
    %142 = arith.subf %1, %141 : vector<64x128xf32>
    %cst_44 = arith.constant 2.500000e+00 : f32
    %143 = vector.broadcast %cst_44 : f32 to vector<64x128xf32>
    %144 = arith.mulf %142, %143 : vector<64x128xf32>
    %145 = arith.mulf %144, %66 : vector<64x128xf32>
    %146 = arith.subf %140, %145 : vector<64x128xf32>
    %cst_45 = arith.constant 6.000000e-01 : f32
    %147 = vector.broadcast %cst_45 : f32 to vector<64x128xf32>
    %148 = arith.subf %1, %147 : vector<64x128xf32>
    %cst_46 = arith.constant 2.500000e+00 : f32
    %149 = vector.broadcast %cst_46 : f32 to vector<64x128xf32>
    %150 = arith.mulf %148, %149 : vector<64x128xf32>
    %151 = arith.mulf %150, %66 : vector<64x128xf32>
    %cst_47 = arith.constant 1.400000e+00 : f32
    %152 = vector.broadcast %cst_47 : f32 to vector<64x128xf32>
    %153 = arith.subf %1, %152 : vector<64x128xf32>
    %cst_48 = arith.constant 2.500000e+00 : f32
    %154 = vector.broadcast %cst_48 : f32 to vector<64x128xf32>
    %155 = arith.mulf %153, %154 : vector<64x128xf32>
    %156 = arith.mulf %155, %67 : vector<64x128xf32>
    %157 = arith.subf %151, %156 : vector<64x128xf32>
    %cst_49 = arith.constant 1.000000e+00 : f32
    %158 = vector.broadcast %cst_49 : f32 to vector<64x128xf32>
    %159 = arith.subf %1, %158 : vector<64x128xf32>
    %cst_50 = arith.constant 2.500000e+00 : f32
    %160 = vector.broadcast %cst_50 : f32 to vector<64x128xf32>
    %161 = arith.mulf %159, %160 : vector<64x128xf32>
    %162 = arith.mulf %161, %67 : vector<64x128xf32>
    %cst_51 = arith.constant 1.800000e+00 : f32
    %163 = vector.broadcast %cst_51 : f32 to vector<64x128xf32>
    %164 = arith.subf %1, %163 : vector<64x128xf32>
    %cst_52 = arith.constant 2.500000e+00 : f32
    %165 = vector.broadcast %cst_52 : f32 to vector<64x128xf32>
    %166 = arith.mulf %164, %165 : vector<64x128xf32>
    %167 = arith.mulf %166, %68 : vector<64x128xf32>
    %168 = arith.subf %162, %167 : vector<64x128xf32>
    %cst_53 = arith.constant 1.400000e+00 : f32
    %169 = vector.broadcast %cst_53 : f32 to vector<64x128xf32>
    %170 = arith.subf %1, %169 : vector<64x128xf32>
    %cst_54 = arith.constant 2.500000e+00 : f32
    %171 = vector.broadcast %cst_54 : f32 to vector<64x128xf32>
    %172 = arith.mulf %170, %171 : vector<64x128xf32>
    %173 = arith.mulf %172, %68 : vector<64x128xf32>
    %cst_55 = arith.constant 2.200000e+00 : f32
    %174 = vector.broadcast %cst_55 : f32 to vector<64x128xf32>
    %175 = arith.subf %1, %174 : vector<64x128xf32>
    %cst_56 = arith.constant 2.500000e+00 : f32
    %176 = vector.broadcast %cst_56 : f32 to vector<64x128xf32>
    %177 = arith.mulf %175, %176 : vector<64x128xf32>
    %178 = arith.mulf %177, %69 : vector<64x128xf32>
    %179 = arith.subf %173, %178 : vector<64x128xf32>
    %cst_57 = arith.constant -2.200000e+00 : f32
    %180 = vector.broadcast %cst_57 : f32 to vector<64x128xf32>
    %181 = arith.subf %1, %180 : vector<64x128xf32>
    %cst_58 = arith.constant 1.250000e+00 : f32
    %182 = vector.broadcast %cst_58 : f32 to vector<64x128xf32>
    %183 = arith.mulf %181, %182 : vector<64x128xf32>
    %184 = arith.mulf %183, %80 : vector<64x128xf32>
    %cst_59 = arith.constant -1.000000e+00 : f32
    %185 = vector.broadcast %cst_59 : f32 to vector<64x128xf32>
    %186 = arith.subf %1, %185 : vector<64x128xf32>
    %cst_60 = arith.constant 1.250000e+00 : f32
    %187 = vector.broadcast %cst_60 : f32 to vector<64x128xf32>
    %188 = arith.mulf %186, %187 : vector<64x128xf32>
    %189 = arith.mulf %188, %91 : vector<64x128xf32>
    %190 = arith.subf %184, %189 : vector<64x128xf32>
    %cst_61 = arith.constant -1.800000e+00 : f32
    %191 = vector.broadcast %cst_61 : f32 to vector<64x128xf32>
    %192 = arith.subf %1, %191 : vector<64x128xf32>
    %cst_62 = arith.constant 1.250000e+00 : f32
    %193 = vector.broadcast %cst_62 : f32 to vector<64x128xf32>
    %194 = arith.mulf %192, %193 : vector<64x128xf32>
    %195 = arith.mulf %194, %91 : vector<64x128xf32>
    %cst_63 = arith.constant -6.000000e-01 : f32
    %196 = vector.broadcast %cst_63 : f32 to vector<64x128xf32>
    %197 = arith.subf %1, %196 : vector<64x128xf32>
    %cst_64 = arith.constant 1.250000e+00 : f32
    %198 = vector.broadcast %cst_64 : f32 to vector<64x128xf32>
    %199 = arith.mulf %197, %198 : vector<64x128xf32>
    %200 = arith.mulf %199, %102 : vector<64x128xf32>
    %201 = arith.subf %195, %200 : vector<64x128xf32>
    %cst_65 = arith.constant -1.400000e+00 : f32
    %202 = vector.broadcast %cst_65 : f32 to vector<64x128xf32>
    %203 = arith.subf %1, %202 : vector<64x128xf32>
    %cst_66 = arith.constant 1.250000e+00 : f32
    %204 = vector.broadcast %cst_66 : f32 to vector<64x128xf32>
    %205 = arith.mulf %203, %204 : vector<64x128xf32>
    %206 = arith.mulf %205, %102 : vector<64x128xf32>
    %cst_67 = arith.constant -2.000000e-01 : f32
    %207 = vector.broadcast %cst_67 : f32 to vector<64x128xf32>
    %208 = arith.subf %1, %207 : vector<64x128xf32>
    %cst_68 = arith.constant 1.250000e+00 : f32
    %209 = vector.broadcast %cst_68 : f32 to vector<64x128xf32>
    %210 = arith.mulf %208, %209 : vector<64x128xf32>
    %211 = arith.mulf %210, %113 : vector<64x128xf32>
    %212 = arith.subf %206, %211 : vector<64x128xf32>
    %cst_69 = arith.constant -1.000000e+00 : f32
    %213 = vector.broadcast %cst_69 : f32 to vector<64x128xf32>
    %214 = arith.subf %1, %213 : vector<64x128xf32>
    %cst_70 = arith.constant 1.250000e+00 : f32
    %215 = vector.broadcast %cst_70 : f32 to vector<64x128xf32>
    %216 = arith.mulf %214, %215 : vector<64x128xf32>
    %217 = arith.mulf %216, %113 : vector<64x128xf32>
    %cst_71 = arith.constant 2.000000e-01 : f32
    %218 = vector.broadcast %cst_71 : f32 to vector<64x128xf32>
    %219 = arith.subf %1, %218 : vector<64x128xf32>
    %cst_72 = arith.constant 1.250000e+00 : f32
    %220 = vector.broadcast %cst_72 : f32 to vector<64x128xf32>
    %221 = arith.mulf %219, %220 : vector<64x128xf32>
    %222 = arith.mulf %221, %124 : vector<64x128xf32>
    %223 = arith.subf %217, %222 : vector<64x128xf32>
    %cst_73 = arith.constant -6.000000e-01 : f32
    %224 = vector.broadcast %cst_73 : f32 to vector<64x128xf32>
    %225 = arith.subf %1, %224 : vector<64x128xf32>
    %cst_74 = arith.constant 1.250000e+00 : f32
    %226 = vector.broadcast %cst_74 : f32 to vector<64x128xf32>
    %227 = arith.mulf %225, %226 : vector<64x128xf32>
    %228 = arith.mulf %227, %124 : vector<64x128xf32>
    %cst_75 = arith.constant 6.000000e-01 : f32
    %229 = vector.broadcast %cst_75 : f32 to vector<64x128xf32>
    %230 = arith.subf %1, %229 : vector<64x128xf32>
    %cst_76 = arith.constant 1.250000e+00 : f32
    %231 = vector.broadcast %cst_76 : f32 to vector<64x128xf32>
    %232 = arith.mulf %230, %231 : vector<64x128xf32>
    %233 = arith.mulf %232, %135 : vector<64x128xf32>
    %234 = arith.subf %228, %233 : vector<64x128xf32>
    %cst_77 = arith.constant -2.000000e-01 : f32
    %235 = vector.broadcast %cst_77 : f32 to vector<64x128xf32>
    %236 = arith.subf %1, %235 : vector<64x128xf32>
    %cst_78 = arith.constant 1.250000e+00 : f32
    %237 = vector.broadcast %cst_78 : f32 to vector<64x128xf32>
    %238 = arith.mulf %236, %237 : vector<64x128xf32>
    %239 = arith.mulf %238, %135 : vector<64x128xf32>
    %cst_79 = arith.constant 1.000000e+00 : f32
    %240 = vector.broadcast %cst_79 : f32 to vector<64x128xf32>
    %241 = arith.subf %1, %240 : vector<64x128xf32>
    %cst_80 = arith.constant 1.250000e+00 : f32
    %242 = vector.broadcast %cst_80 : f32 to vector<64x128xf32>
    %243 = arith.mulf %241, %242 : vector<64x128xf32>
    %244 = arith.mulf %243, %146 : vector<64x128xf32>
    %245 = arith.subf %239, %244 : vector<64x128xf32>
    %cst_81 = arith.constant 2.000000e-01 : f32
    %246 = vector.broadcast %cst_81 : f32 to vector<64x128xf32>
    %247 = arith.subf %1, %246 : vector<64x128xf32>
    %cst_82 = arith.constant 1.250000e+00 : f32
    %248 = vector.broadcast %cst_82 : f32 to vector<64x128xf32>
    %249 = arith.mulf %247, %248 : vector<64x128xf32>
    %250 = arith.mulf %249, %146 : vector<64x128xf32>
    %cst_83 = arith.constant 1.400000e+00 : f32
    %251 = vector.broadcast %cst_83 : f32 to vector<64x128xf32>
    %252 = arith.subf %1, %251 : vector<64x128xf32>
    %cst_84 = arith.constant 1.250000e+00 : f32
    %253 = vector.broadcast %cst_84 : f32 to vector<64x128xf32>
    %254 = arith.mulf %252, %253 : vector<64x128xf32>
    %255 = arith.mulf %254, %157 : vector<64x128xf32>
    %256 = arith.subf %250, %255 : vector<64x128xf32>
    %cst_85 = arith.constant 6.000000e-01 : f32
    %257 = vector.broadcast %cst_85 : f32 to vector<64x128xf32>
    %258 = arith.subf %1, %257 : vector<64x128xf32>
    %cst_86 = arith.constant 1.250000e+00 : f32
    %259 = vector.broadcast %cst_86 : f32 to vector<64x128xf32>
    %260 = arith.mulf %258, %259 : vector<64x128xf32>
    %261 = arith.mulf %260, %157 : vector<64x128xf32>
    %cst_87 = arith.constant 1.800000e+00 : f32
    %262 = vector.broadcast %cst_87 : f32 to vector<64x128xf32>
    %263 = arith.subf %1, %262 : vector<64x128xf32>
    %cst_88 = arith.constant 1.250000e+00 : f32
    %264 = vector.broadcast %cst_88 : f32 to vector<64x128xf32>
    %265 = arith.mulf %263, %264 : vector<64x128xf32>
    %266 = arith.mulf %265, %168 : vector<64x128xf32>
    %267 = arith.subf %261, %266 : vector<64x128xf32>
    %cst_89 = arith.constant 1.000000e+00 : f32
    %268 = vector.broadcast %cst_89 : f32 to vector<64x128xf32>
    %269 = arith.subf %1, %268 : vector<64x128xf32>
    %cst_90 = arith.constant 1.250000e+00 : f32
    %270 = vector.broadcast %cst_90 : f32 to vector<64x128xf32>
    %271 = arith.mulf %269, %270 : vector<64x128xf32>
    %272 = arith.mulf %271, %168 : vector<64x128xf32>
    %cst_91 = arith.constant 2.200000e+00 : f32
    %273 = vector.broadcast %cst_91 : f32 to vector<64x128xf32>
    %274 = arith.subf %1, %273 : vector<64x128xf32>
    %cst_92 = arith.constant 1.250000e+00 : f32
    %275 = vector.broadcast %cst_92 : f32 to vector<64x128xf32>
    %276 = arith.mulf %274, %275 : vector<64x128xf32>
    %277 = arith.mulf %276, %179 : vector<64x128xf32>
    %278 = arith.subf %272, %277 : vector<64x128xf32>
    %cst_93 = arith.constant -2.200000e+00 : f32
    %279 = vector.broadcast %cst_93 : f32 to vector<64x128xf32>
    %280 = arith.subf %1, %279 : vector<64x128xf32>
    %cst_94 = arith.constant 0.833333313 : f32
    %281 = vector.broadcast %cst_94 : f32 to vector<64x128xf32>
    %282 = arith.mulf %280, %281 : vector<64x128xf32>
    %283 = arith.mulf %282, %190 : vector<64x128xf32>
    %cst_95 = arith.constant -6.000000e-01 : f32
    %284 = vector.broadcast %cst_95 : f32 to vector<64x128xf32>
    %285 = arith.subf %1, %284 : vector<64x128xf32>
    %cst_96 = arith.constant 0.833333313 : f32
    %286 = vector.broadcast %cst_96 : f32 to vector<64x128xf32>
    %287 = arith.mulf %285, %286 : vector<64x128xf32>
    %288 = arith.mulf %287, %201 : vector<64x128xf32>
    %289 = arith.subf %283, %288 : vector<64x128xf32>
    %290 = arith.truncf %289 : vector<64x128xf32> to vector<64x128xbf16>
    %c128 = arith.constant 128 : index
    %c0_97 = arith.constant 0 : index
    %291 = vector.load %arg2[%c128, %c0_97] : memref<1152x128xbf16, #tpu.memory_space<vmem>>, vector<128x128xbf16>
    %cst_98 = arith.constant dense<0.000000e+00> : vector<64x128xf32>
    %292 = tpu.matmul %290, %291, %cst_98 {dimension_numbers = #tpu.dot_dimension_numbers<[1], [0], [0], [1], [0, 0, 1, 1], [], []>} : vector<64x128xbf16>, vector<128x128xbf16>, vector<64x128xf32> -> vector<64x128xf32>
    %293 = arith.addf %10, %292 : vector<64x128xf32>
    %cst_99 = arith.constant -1.800000e+00 : f32
    %294 = vector.broadcast %cst_99 : f32 to vector<64x128xf32>
    %295 = arith.subf %1, %294 : vector<64x128xf32>
    %cst_100 = arith.constant 0.833333313 : f32
    %296 = vector.broadcast %cst_100 : f32 to vector<64x128xf32>
    %297 = arith.mulf %295, %296 : vector<64x128xf32>
    %298 = arith.mulf %297, %201 : vector<64x128xf32>
    %cst_101 = arith.constant -2.000000e-01 : f32
    %299 = vector.broadcast %cst_101 : f32 to vector<64x128xf32>
    %300 = arith.subf %1, %299 : vector<64x128xf32>
    %cst_102 = arith.constant 0.833333313 : f32
    %301 = vector.broadcast %cst_102 : f32 to vector<64x128xf32>
    %302 = arith.mulf %300, %301 : vector<64x128xf32>
    %303 = arith.mulf %302, %212 : vector<64x128xf32>
    %304 = arith.subf %298, %303 : vector<64x128xf32>
    %305 = arith.truncf %304 : vector<64x128xf32> to vector<64x128xbf16>
    %c256 = arith.constant 256 : index
    %c0_103 = arith.constant 0 : index
    %306 = vector.load %arg2[%c256, %c0_103] : memref<1152x128xbf16, #tpu.memory_space<vmem>>, vector<128x128xbf16>
    %cst_104 = arith.constant dense<0.000000e+00> : vector<64x128xf32>
    %307 = tpu.matmul %305, %306, %cst_104 {dimension_numbers = #tpu.dot_dimension_numbers<[1], [0], [0], [1], [0, 0, 1, 1], [], []>} : vector<64x128xbf16>, vector<128x128xbf16>, vector<64x128xf32> -> vector<64x128xf32>
    %308 = arith.addf %293, %307 : vector<64x128xf32>
    %cst_105 = arith.constant -1.400000e+00 : f32
    %309 = vector.broadcast %cst_105 : f32 to vector<64x128xf32>
    %310 = arith.subf %1, %309 : vector<64x128xf32>
    %cst_106 = arith.constant 0.833333313 : f32
    %311 = vector.broadcast %cst_106 : f32 to vector<64x128xf32>
    %312 = arith.mulf %310, %311 : vector<64x128xf32>
    %313 = arith.mulf %312, %212 : vector<64x128xf32>
    %cst_107 = arith.constant 2.000000e-01 : f32
    %314 = vector.broadcast %cst_107 : f32 to vector<64x128xf32>
    %315 = arith.subf %1, %314 : vector<64x128xf32>
    %cst_108 = arith.constant 0.833333313 : f32
    %316 = vector.broadcast %cst_108 : f32 to vector<64x128xf32>
    %317 = arith.mulf %315, %316 : vector<64x128xf32>
    %318 = arith.mulf %317, %223 : vector<64x128xf32>
    %319 = arith.subf %313, %318 : vector<64x128xf32>
    %320 = arith.truncf %319 : vector<64x128xf32> to vector<64x128xbf16>
    %c384 = arith.constant 384 : index
    %c0_109 = arith.constant 0 : index
    %321 = vector.load %arg2[%c384, %c0_109] : memref<1152x128xbf16, #tpu.memory_space<vmem>>, vector<128x128xbf16>
    %cst_110 = arith.constant dense<0.000000e+00> : vector<64x128xf32>
    %322 = tpu.matmul %320, %321, %cst_110 {dimension_numbers = #tpu.dot_dimension_numbers<[1], [0], [0], [1], [0, 0, 1, 1], [], []>} : vector<64x128xbf16>, vector<128x128xbf16>, vector<64x128xf32> -> vector<64x128xf32>
    %323 = arith.addf %308, %322 : vector<64x128xf32>
    %cst_111 = arith.constant -1.000000e+00 : f32
    %324 = vector.broadcast %cst_111 : f32 to vector<64x128xf32>
    %325 = arith.subf %1, %324 : vector<64x128xf32>
    %cst_112 = arith.constant 0.833333313 : f32
    %326 = vector.broadcast %cst_112 : f32 to vector<64x128xf32>
    %327 = arith.mulf %325, %326 : vector<64x128xf32>
    %328 = arith.mulf %327, %223 : vector<64x128xf32>
    %cst_113 = arith.constant 6.000000e-01 : f32
    %329 = vector.broadcast %cst_113 : f32 to vector<64x128xf32>
    %330 = arith.subf %1, %329 : vector<64x128xf32>
    %cst_114 = arith.constant 0.833333313 : f32
    %331 = vector.broadcast %cst_114 : f32 to vector<64x128xf32>
    %332 = arith.mulf %330, %331 : vector<64x128xf32>
    %333 = arith.mulf %332, %234 : vector<64x128xf32>
    %334 = arith.subf %328, %333 : vector<64x128xf32>
    %335 = arith.truncf %334 : vector<64x128xf32> to vector<64x128xbf16>
    %c512 = arith.constant 512 : index
    %c0_115 = arith.constant 0 : index
    %336 = vector.load %arg2[%c512, %c0_115] : memref<1152x128xbf16, #tpu.memory_space<vmem>>, vector<128x128xbf16>
    %cst_116 = arith.constant dense<0.000000e+00> : vector<64x128xf32>
    %337 = tpu.matmul %335, %336, %cst_116 {dimension_numbers = #tpu.dot_dimension_numbers<[1], [0], [0], [1], [0, 0, 1, 1], [], []>} : vector<64x128xbf16>, vector<128x128xbf16>, vector<64x128xf32> -> vector<64x128xf32>
    %338 = arith.addf %323, %337 : vector<64x128xf32>
    %cst_117 = arith.constant -6.000000e-01 : f32
    %339 = vector.broadcast %cst_117 : f32 to vector<64x128xf32>
    %340 = arith.subf %1, %339 : vector<64x128xf32>
    %cst_118 = arith.constant 0.833333313 : f32
    %341 = vector.broadcast %cst_118 : f32 to vector<64x128xf32>
    %342 = arith.mulf %340, %341 : vector<64x128xf32>
    %343 = arith.mulf %342, %234 : vector<64x128xf32>
    %cst_119 = arith.constant 1.000000e+00 : f32
    %344 = vector.broadcast %cst_119 : f32 to vector<64x128xf32>
    %345 = arith.subf %1, %344 : vector<64x128xf32>
    %cst_120 = arith.constant 0.833333313 : f32
    %346 = vector.broadcast %cst_120 : f32 to vector<64x128xf32>
    %347 = arith.mulf %345, %346 : vector<64x128xf32>
    %348 = arith.mulf %347, %245 : vector<64x128xf32>
    %349 = arith.subf %343, %348 : vector<64x128xf32>
    %350 = arith.truncf %349 : vector<64x128xf32> to vector<64x128xbf16>
    %c640 = arith.constant 640 : index
    %c0_121 = arith.constant 0 : index
    %351 = vector.load %arg2[%c640, %c0_121] : memref<1152x128xbf16, #tpu.memory_space<vmem>>, vector<128x128xbf16>
    %cst_122 = arith.constant dense<0.000000e+00> : vector<64x128xf32>
    %352 = tpu.matmul %350, %351, %cst_122 {dimension_numbers = #tpu.dot_dimension_numbers<[1], [0], [0], [1], [0, 0, 1, 1], [], []>} : vector<64x128xbf16>, vector<128x128xbf16>, vector<64x128xf32> -> vector<64x128xf32>
    %353 = arith.addf %338, %352 : vector<64x128xf32>
    %cst_123 = arith.constant -2.000000e-01 : f32
    %354 = vector.broadcast %cst_123 : f32 to vector<64x128xf32>
    %355 = arith.subf %1, %354 : vector<64x128xf32>
    %cst_124 = arith.constant 0.833333313 : f32
    %356 = vector.broadcast %cst_124 : f32 to vector<64x128xf32>
    %357 = arith.mulf %355, %356 : vector<64x128xf32>
    %358 = arith.mulf %357, %245 : vector<64x128xf32>
    %cst_125 = arith.constant 1.400000e+00 : f32
    %359 = vector.broadcast %cst_125 : f32 to vector<64x128xf32>
    %360 = arith.subf %1, %359 : vector<64x128xf32>
    %cst_126 = arith.constant 0.833333313 : f32
    %361 = vector.broadcast %cst_126 : f32 to vector<64x128xf32>
    %362 = arith.mulf %360, %361 : vector<64x128xf32>
    %363 = arith.mulf %362, %256 : vector<64x128xf32>
    %364 = arith.subf %358, %363 : vector<64x128xf32>
    %365 = arith.truncf %364 : vector<64x128xf32> to vector<64x128xbf16>
    %c768 = arith.constant 768 : index
    %c0_127 = arith.constant 0 : index
    %366 = vector.load %arg2[%c768, %c0_127] : memref<1152x128xbf16, #tpu.memory_space<vmem>>, vector<128x128xbf16>
    %cst_128 = arith.constant dense<0.000000e+00> : vector<64x128xf32>
    %367 = tpu.matmul %365, %366, %cst_128 {dimension_numbers = #tpu.dot_dimension_numbers<[1], [0], [0], [1], [0, 0, 1, 1], [], []>} : vector<64x128xbf16>, vector<128x128xbf16>, vector<64x128xf32> -> vector<64x128xf32>
    %368 = arith.addf %353, %367 : vector<64x128xf32>
    %cst_129 = arith.constant 2.000000e-01 : f32
    %369 = vector.broadcast %cst_129 : f32 to vector<64x128xf32>
    %370 = arith.subf %1, %369 : vector<64x128xf32>
    %cst_130 = arith.constant 0.833333313 : f32
    %371 = vector.broadcast %cst_130 : f32 to vector<64x128xf32>
    %372 = arith.mulf %370, %371 : vector<64x128xf32>
    %373 = arith.mulf %372, %256 : vector<64x128xf32>
    %cst_131 = arith.constant 1.800000e+00 : f32
    %374 = vector.broadcast %cst_131 : f32 to vector<64x128xf32>
    %375 = arith.subf %1, %374 : vector<64x128xf32>
    %cst_132 = arith.constant 0.833333313 : f32
    %376 = vector.broadcast %cst_132 : f32 to vector<64x128xf32>
    %377 = arith.mulf %375, %376 : vector<64x128xf32>
    %378 = arith.mulf %377, %267 : vector<64x128xf32>
    %379 = arith.subf %373, %378 : vector<64x128xf32>
    %380 = arith.truncf %379 : vector<64x128xf32> to vector<64x128xbf16>
    %c896 = arith.constant 896 : index
    %c0_133 = arith.constant 0 : index
    %381 = vector.load %arg2[%c896, %c0_133] : memref<1152x128xbf16, #tpu.memory_space<vmem>>, vector<128x128xbf16>
    %cst_134 = arith.constant dense<0.000000e+00> : vector<64x128xf32>
    %382 = tpu.matmul %380, %381, %cst_134 {dimension_numbers = #tpu.dot_dimension_numbers<[1], [0], [0], [1], [0, 0, 1, 1], [], []>} : vector<64x128xbf16>, vector<128x128xbf16>, vector<64x128xf32> -> vector<64x128xf32>
    %383 = arith.addf %368, %382 : vector<64x128xf32>
    %cst_135 = arith.constant 6.000000e-01 : f32
    %384 = vector.broadcast %cst_135 : f32 to vector<64x128xf32>
    %385 = arith.subf %1, %384 : vector<64x128xf32>
    %cst_136 = arith.constant 0.833333313 : f32
    %386 = vector.broadcast %cst_136 : f32 to vector<64x128xf32>
    %387 = arith.mulf %385, %386 : vector<64x128xf32>
    %388 = arith.mulf %387, %267 : vector<64x128xf32>
    %cst_137 = arith.constant 2.200000e+00 : f32
    %389 = vector.broadcast %cst_137 : f32 to vector<64x128xf32>
    %390 = arith.subf %1, %389 : vector<64x128xf32>
    %cst_138 = arith.constant 0.833333313 : f32
    %391 = vector.broadcast %cst_138 : f32 to vector<64x128xf32>
    %392 = arith.mulf %390, %391 : vector<64x128xf32>
    %393 = arith.mulf %392, %278 : vector<64x128xf32>
    %394 = arith.subf %388, %393 : vector<64x128xf32>
    %395 = arith.truncf %394 : vector<64x128xf32> to vector<64x128xbf16>
    %c1024 = arith.constant 1024 : index
    %c0_139 = arith.constant 0 : index
    %396 = vector.load %arg2[%c1024, %c0_139] : memref<1152x128xbf16, #tpu.memory_space<vmem>>, vector<128x128xbf16>
    %cst_140 = arith.constant dense<0.000000e+00> : vector<64x128xf32>
    %397 = tpu.matmul %395, %396, %cst_140 {dimension_numbers = #tpu.dot_dimension_numbers<[1], [0], [0], [1], [0, 0, 1, 1], [], []>} : vector<64x128xbf16>, vector<128x128xbf16>, vector<64x128xf32> -> vector<64x128xf32>
    %398 = arith.addf %383, %397 : vector<64x128xf32>
    %cst_141 = arith.constant 0.000000e+00 : f32
    %399 = vector.broadcast %cst_141 : f32 to vector<1x10x128xf32>
    %c0_142 = arith.constant 0 : index
    %c0_143 = arith.constant 0 : index
    %c0_144 = arith.constant 0 : index
    %400 = vector.load %arg6[%c0_142, %c0_143, %c0_144] : memref<10x10x128xf32, #tpu.memory_space<vmem>>, vector<1x10x128xf32>
    tpu.vector_store %arg6[%c0_142, %c0_143, %c0_144], %399 {strides = array<i32>} : memref<10x10x128xf32, #tpu.memory_space<vmem>>, vector<1x10x128xf32>,
    %cst_145 = arith.constant 0.000000e+00 : f32
    %401 = vector.broadcast %cst_145 : f32 to vector<1x10x128xf32>
    %c9 = arith.constant 9 : index
    %c0_146 = arith.constant 0 : index
    %c0_147 = arith.constant 0 : index
    %402 = vector.load %arg6[%c9, %c0_146, %c0_147] : memref<10x10x128xf32, #tpu.memory_space<vmem>>, vector<1x10x128xf32>
    tpu.vector_store %arg6[%c9, %c0_146, %c0_147], %401 {strides = array<i32>} : memref<10x10x128xf32, #tpu.memory_space<vmem>>, vector<1x10x128xf32>,
    %cst_148 = arith.constant 0.000000e+00 : f32
    %403 = vector.broadcast %cst_148 : f32 to vector<8x1x128xf32>
    %c1 = arith.constant 1 : index
    %c0_149 = arith.constant 0 : index
    %c0_150 = arith.constant 0 : index
    %404 = vector.load %arg6[%c1, %c0_149, %c0_150] : memref<10x10x128xf32, #tpu.memory_space<vmem>>, vector<8x1x128xf32>
    tpu.vector_store %arg6[%c1, %c0_149, %c0_150], %403 {strides = array<i32>} : memref<10x10x128xf32, #tpu.memory_space<vmem>>, vector<8x1x128xf32>,
    %cst_151 = arith.constant 0.000000e+00 : f32
    %405 = vector.broadcast %cst_151 : f32 to vector<8x1x128xf32>
    %c1_152 = arith.constant 1 : index
    %c9_153 = arith.constant 9 : index
    %c0_154 = arith.constant 0 : index
    %406 = vector.load %arg6[%c1_152, %c9_153, %c0_154] : memref<10x10x128xf32, #tpu.memory_space<vmem>>, vector<8x1x128xf32>
    tpu.vector_store %arg6[%c1_152, %c9_153, %c0_154], %405 {strides = array<i32>} : memref<10x10x128xf32, #tpu.memory_space<vmem>>, vector<8x1x128xf32>,
    %407 = vector.shape_cast %398 : vector<64x128xf32> to vector<8x8x128xf32>
    %c1_155 = arith.constant 1 : index
    %c1_156 = arith.constant 1 : index
    %c0_157 = arith.constant 0 : index
    %408 = vector.load %arg6[%c1_155, %c1_156, %c0_157] : memref<10x10x128xf32, #tpu.memory_space<vmem>>, vector<8x8x128xf32>
    tpu.vector_store %arg6[%c1_155, %c1_156, %c0_157], %407 {strides = array<i32>} : memref<10x10x128xf32, #tpu.memory_space<vmem>>, vector<8x8x128xf32>,
    %c0_158 = arith.constant 0 : index
    %c0_159 = arith.constant 0 : index
    %c0_160 = arith.constant 0 : index
    %409 = vector.load %arg6[%c0_158, %c0_159, %c0_160] : memref<10x10x128xf32, #tpu.memory_space<vmem>>, vector<10x10x128xf32>
    %c0_161 = arith.constant 0 : index
    %c0_162 = arith.constant 0 : index
    %410 = vector.load %arg3[%c0_161, %c0_162] : memref<9x128xf32, #tpu.memory_space<vmem>>, vector<9x128xf32>
    %c0_163 = arith.constant 0 : index
    %c0_164 = arith.constant 0 : index
    %411 = vector.load %arg4[%c0_163, %c0_164] : memref<1x128xf32, #tpu.memory_space<vmem>>, vector<1x128xf32>
    %412 = vector.shape_cast %411 : vector<1x128xf32> to vector<1x1x128xf32>
    %413 = vector.broadcast %412 : vector<1x1x128xf32> to vector<8x8x128xf32>
    %414 = vector.extract_strided_slice %409 {offsets = [0, 0, 0], sizes = [10, 8, 128], strides = [1, 1, 1]} : vector<10x10x128xf32> to vector<10x8x128xf32>
    %415 = vector.extract_strided_slice %410 {offsets = [0, 0], sizes = [1, 128], strides = [1, 1]} : vector<9x128xf32> to vector<1x128xf32>
    %416 = vector.extract_strided_slice %414 {offsets = [0, 0, 0], sizes = [8, 8, 128], strides = [1, 1, 1]} : vector<10x8x128xf32> to vector<8x8x128xf32>
    %417 = vector.shape_cast %415 : vector<1x128xf32> to vector<1x1x128xf32>
    %418 = vector.broadcast %417 : vector<1x1x128xf32> to vector<8x8x128xf32>
    %419 = arith.mulf %416, %418 : vector<8x8x128xf32>
    %420 = arith.addf %413, %419 : vector<8x8x128xf32>
    %421 = vector.extract_strided_slice %410 {offsets = [3, 0], sizes = [1, 128], strides = [1, 1]} : vector<9x128xf32> to vector<1x128xf32>
    %422 = vector.extract_strided_slice %414 {offsets = [1, 0, 0], sizes = [8, 8, 128], strides = [1, 1, 1]} : vector<10x8x128xf32> to vector<8x8x128xf32>
    %423 = vector.shape_cast %421 : vector<1x128xf32> to vector<1x1x128xf32>
    %424 = vector.broadcast %423 : vector<1x1x128xf32> to vector<8x8x128xf32>
    %425 = arith.mulf %422, %424 : vector<8x8x128xf32>
    %426 = arith.addf %420, %425 : vector<8x8x128xf32>
    %427 = vector.extract_strided_slice %410 {offsets = [6, 0], sizes = [1, 128], strides = [1, 1]} : vector<9x128xf32> to vector<1x128xf32>
    %428 = vector.extract_strided_slice %414 {offsets = [2, 0, 0], sizes = [8, 8, 128], strides = [1, 1, 1]} : vector<10x8x128xf32> to vector<8x8x128xf32>
    %429 = vector.shape_cast %427 : vector<1x128xf32> to vector<1x1x128xf32>
    %430 = vector.broadcast %429 : vector<1x1x128xf32> to vector<8x8x128xf32>
    %431 = arith.mulf %428, %430 : vector<8x8x128xf32>
    %432 = arith.addf %426, %431 : vector<8x8x128xf32>
    %433 = vector.extract_strided_slice %409 {offsets = [0, 1, 0], sizes = [10, 8, 128], strides = [1, 1, 1]} : vector<10x10x128xf32> to vector<10x8x128xf32>
    %434 = vector.extract_strided_slice %410 {offsets = [1, 0], sizes = [1, 128], strides = [1, 1]} : vector<9x128xf32> to vector<1x128xf32>
    %435 = vector.extract_strided_slice %433 {offsets = [0, 0, 0], sizes = [8, 8, 128], strides = [1, 1, 1]} : vector<10x8x128xf32> to vector<8x8x128xf32>
    %436 = vector.shape_cast %434 : vector<1x128xf32> to vector<1x1x128xf32>
    %437 = vector.broadcast %436 : vector<1x1x128xf32> to vector<8x8x128xf32>
    %438 = arith.mulf %435, %437 : vector<8x8x128xf32>
    %439 = arith.addf %432, %438 : vector<8x8x128xf32>
    %440 = vector.extract_strided_slice %410 {offsets = [4, 0], sizes = [1, 128], strides = [1, 1]} : vector<9x128xf32> to vector<1x128xf32>
    %441 = vector.extract_strided_slice %433 {offsets = [1, 0, 0], sizes = [8, 8, 128], strides = [1, 1, 1]} : vector<10x8x128xf32> to vector<8x8x128xf32>
    %442 = vector.shape_cast %440 : vector<1x128xf32> to vector<1x1x128xf32>
    %443 = vector.broadcast %442 : vector<1x1x128xf32> to vector<8x8x128xf32>
    %444 = arith.mulf %441, %443 : vector<8x8x128xf32>
    %445 = arith.addf %439, %444 : vector<8x8x128xf32>
    %446 = vector.extract_strided_slice %410 {offsets = [7, 0], sizes = [1, 128], strides = [1, 1]} : vector<9x128xf32> to vector<1x128xf32>
    %447 = vector.extract_strided_slice %433 {offsets = [2, 0, 0], sizes = [8, 8, 128], strides = [1, 1, 1]} : vector<10x8x128xf32> to vector<8x8x128xf32>
    %448 = vector.shape_cast %446 : vector<1x128xf32> to vector<1x1x128xf32>
    %449 = vector.broadcast %448 : vector<1x1x128xf32> to vector<8x8x128xf32>
    %450 = arith.mulf %447, %449 : vector<8x8x128xf32>
    %451 = arith.addf %445, %450 : vector<8x8x128xf32>
    %452 = vector.extract_strided_slice %409 {offsets = [0, 2, 0], sizes = [10, 8, 128], strides = [1, 1, 1]} : vector<10x10x128xf32> to vector<10x8x128xf32>
    %453 = vector.extract_strided_slice %410 {offsets = [2, 0], sizes = [1, 128], strides = [1, 1]} : vector<9x128xf32> to vector<1x128xf32>
    %454 = vector.extract_strided_slice %452 {offsets = [0, 0, 0], sizes = [8, 8, 128], strides = [1, 1, 1]} : vector<10x8x128xf32> to vector<8x8x128xf32>
    %455 = vector.shape_cast %453 : vector<1x128xf32> to vector<1x1x128xf32>
    %456 = vector.broadcast %455 : vector<1x1x128xf32> to vector<8x8x128xf32>
    %457 = arith.mulf %454, %456 : vector<8x8x128xf32>
    %458 = arith.addf %451, %457 : vector<8x8x128xf32>
    %459 = vector.extract_strided_slice %410 {offsets = [5, 0], sizes = [1, 128], strides = [1, 1]} : vector<9x128xf32> to vector<1x128xf32>
    %460 = vector.extract_strided_slice %452 {offsets = [1, 0, 0], sizes = [8, 8, 128], strides = [1, 1, 1]} : vector<10x8x128xf32> to vector<8x8x128xf32>
    %461 = vector.shape_cast %459 : vector<1x128xf32> to vector<1x1x128xf32>
    %462 = vector.broadcast %461 : vector<1x1x128xf32> to vector<8x8x128xf32>
    %463 = arith.mulf %460, %462 : vector<8x8x128xf32>
    %464 = arith.addf %458, %463 : vector<8x8x128xf32>
    %465 = vector.extract_strided_slice %410 {offsets = [8, 0], sizes = [1, 128], strides = [1, 1]} : vector<9x128xf32> to vector<1x128xf32>
    %466 = vector.extract_strided_slice %452 {offsets = [2, 0, 0], sizes = [8, 8, 128], strides = [1, 1, 1]} : vector<10x8x128xf32> to vector<8x8x128xf32>
    %467 = vector.shape_cast %465 : vector<1x128xf32> to vector<1x1x128xf32>
    %468 = vector.broadcast %467 : vector<1x1x128xf32> to vector<8x8x128xf32>
    %469 = arith.mulf %466, %468 : vector<8x8x128xf32>
    %470 = arith.addf %464, %469 : vector<8x8x128xf32>
    %cst_165 = arith.constant 0.000000e+00 : f32
    %471 = vector.broadcast %cst_165 : f32 to vector<8x8x128xf32>
    %472 = arith.maximumf %470, %471 : vector<8x8x128xf32>
    %473 = vector.shape_cast %472 : vector<8x8x128xf32> to vector<64x128xf32>
    %c0_166 = arith.constant 0 : index
    %c0_167 = arith.constant 0 : index
    %c0_168 = arith.constant 0 : index
    %474 = vector.load %arg5[%c0_166, %c0_167, %c0_168] : memref<1x64x128xf32, #tpu.memory_space<vmem>>, vector<1x64x128xf32>
    %475 = vector.shape_cast %474 : vector<1x64x128xf32> to vector<64x128xf32>
    %476 = vector.shape_cast %473 : vector<64x128xf32> to vector<1x64x128xf32>
    tpu.vector_store %arg5[%c0_166, %c0_167, %c0_168], %476 {strides = array<i32>} : memref<1x64x128xf32, #tpu.memory_space<vmem>>, vector<1x64x128xf32>,
    return
  }
  func.func @transform_0(%arg0: i32) -> (i32, i32, i32) {
    %c0_i32 = arith.constant 0 : i32
    %c0_i32_0 = arith.constant 0 : i32
    %c0_i32_1 = arith.constant 0 : i32
    return %arg0, %c0_i32, %c0_i32_0 : i32, i32, i32
  }
  func.func @transform_1(%arg0: i32) -> (i32, i32) {
    %c0_i32 = arith.constant 0 : i32
    %c0_i32_0 = arith.constant 0 : i32
    %c0_i32_1 = arith.constant 0 : i32
    return %c0_i32, %c0_i32_0 : i32, i32
  }
  func.func @transform_2(%arg0: i32) -> (i32, i32) {
    %c0_i32 = arith.constant 0 : i32
    %c0_i32_0 = arith.constant 0 : i32
    %c0_i32_1 = arith.constant 0 : i32
    return %c0_i32, %c0_i32_0 : i32, i32
  }
  func.func @transform_3(%arg0: i32) -> (i32, i32) {
    %c0_i32 = arith.constant 0 : i32
    %c0_i32_0 = arith.constant 0 : i32
    %c0_i32_1 = arith.constant 0 : i32
    return %c0_i32, %c0_i32_0 : i32, i32
  }
  func.func @transform_4(%arg0: i32) -> (i32, i32, i32) {
    %c0_i32 = arith.constant 0 : i32
    %c0_i32_0 = arith.constant 0 : i32
    %c0_i32_1 = arith.constant 0 : i32
    return %arg0, %c0_i32, %c0_i32_0 : i32, i32, i32
  }
}

</mosaic_0001>

<bundles_post_ra>
// kernel: kan_layer_forward.3
= control target key start
LH: loop header
LB: loop body
LE: loop exit
PB: predicated region body
PF: predicated region fallthrough
CT: control target
= control target key end

     0   :  { %9 = vsyncpa [#allocation4], 0  ;;  %s4506_s15 = smov 0   ;;  %s6830_s0 = inlined_call_operand.vmem [shape: f32[2,64,128], index: 0, kind: input, shape index: {}]   ;;  %s6831_s1 = inlined_call_operand.hbm [shape: bf16[1152,128], index: 1, kind: input, shape index: {}]   ;;  %s6832_s2 = inlined_call_operand.vmem [shape: f32[9,128], index: 2, kind: input, shape index: {}]   ;;  %s6833_s3 = inlined_call_operand.vmem [shape: f32[1,128], index: 3, kind: input, shape index: {}]   ;;  %s6834_s4 = inlined_call_operand.vmem [shape: f32[2,64,128], index: 4, kind: output, shape index: {}]  }
   0x1 LB: > { %s4512_s16 = sadd.s32 4294967295, %s4475_s15   ;;  %p3601_p0 = scmp.ge.s32.totalorder %s4475_s15, 1  ;;  %s4475_s15 = sphi %s4506_s15, %s15_s15  }
   0x2   : > { %p135_p1 = scmp.lt.s32.totalorder %s4475_s15, 3  ;;  %s4477_s17 = smov [#allocation3]  }
   0x3   : > { %s147_s18 = sshll.u32 %s4477_s17, 4  ;;  %p6835_p3 = scmp.eq.s32.totalorder %s4512_s16, 0  ;;  %s148_s18 = int_to_ptr.vmem [resolvable:$true] %s147_s18 }
   0x4   : > { %p4516_p2 = pnand %p3601_p0, %p135_p1  ;;  %s4437_s23 = scalar_lea.hbm %s6831_s1, 9216 }
   0x5   : > { %p4438_p6 = scmp.ne.s32.totalorder %s6831_s1, %s4437_s23  ;;  %p4444_p10 = scmp.lt.u32.totalorder %s4437_s23, %s6831_s1 }
   0x6   : > { %s7008_s19 = scalar_select %p4516_p2, 1, 0 }
   0x7   : > { %p4296_p4 = pneg %p4516_p2 }
   0x9   : > { %p4525_p5 = pnand %p6835_p3, %p4296_p4 }
   0xb   : > { %p4439_p7 = pneg %p4525_p5 }
   0xd   : > { %p4440_p8 = pnand %p4439_p7, %p4438_p6 }
   0xf   : > { %p4441_p9 = pneg %p4440_p8 }
  0x11   : > { %p4446_p11 = pnand %p4444_p10, %p4441_p9 }
  0x13   : > { %4449 = shalt.err (!%p4446_p11)
}
  0x14   : > { %s4450_s28 = scalar_lea.vmem %s148_s18, 9216  ;;  %p4458_p1 = scmp.lt.s32.totalorder %s148_s18, %s148_s18 }
  0x15   : > { %p4451_p12 = scmp.ne.s32.totalorder %s148_s18, %s4450_s28  ;;  %p4459_p4 = scmp.lt.s32.totalorder %s4450_s28, %s4450_s28 }
  0x17   : > { %p4453_p13 = pnand %p4451_p12, %p4439_p7  ;;  %p4460_p3 = por %p4459_p4, %p4458_p1 }
  0x19   : > { %p4454_p0 = pneg %p4453_p13 }
  0x1b   : > { %p4461_p2 = pnand %p4460_p3, %p4454_p0 }
  0x1d   : > { %4464 = shalt.err (!%p4461_p2)
}
  0x1e   : > { %s4478_s29 = smov 64   ;;  %s4479_s30 = smov 4  }
  0x1f   : > { %4299 = dma.hbm_to_vmem [thread:$0]  (!%p4525_p5), %s6831_s1, 9216, %s148_s18, [#allocation4], %s4478_s29, %s4478_s29, %s4479_s30  }
  0x20   : > { %p7010_p6 = scmp.ne.s32.totalorder %s7008_s19, 0 }
  0x22   : > { %177 = sbr.rel (%p7010_p6) target bundleno = 716 (0x2cc), region = 36 }
  0x29   : > { %p7011_p8 = scmp.eq.s32.totalorder %s4512_s16, 0 }
  0x2b   : > { %4470 = dma.done.wait (%p7011_p8), [#allocation4], 9216   ;;  %p7012_p7 = pmov %p7011_p8 }
  0x2c   : > { %v6838_v0 = vmov 0.0   ;;  %v4314_v1 = vld [vmem:[#allocation3 + $0x40] sm:$0xff]   ;;  %v4316_v3 = vld [vmem:[#allocation3 + $0x48] sm:$0xff]   ;;  %p203_p2 = scmp.lt.s32.totalorder %s4512_s16, 1  ;;  %v4318_v5 = vld [vmem:[#allocation3 + $0x50] sm:$0xff]  }
  0x2d   : > { %4472 = vsyncadd (%p7012_p7), [#allocation4], 4294958080  ;;  %2939 = vst [vmem:[#allocation2] sm:$0xff] %v6838_v0  ;;  %v4315_v2 = vld [vmem:[#allocation3 + $0x100] sm:$0xff]   ;;  %3996 = vmatprep.subr.bf16.mxu1 %v4314_v1  ;;  %v4317_v4 = vld [vmem:[#allocation3 + $0x108] sm:$0xff]  }
  0x2e   : > { %2940 = vst [vmem:[#allocation2 + $0x8] sm:$0x3] %v6838_v0  ;;  %2943 = vst [vmem:[#allocation2 + $0x98] sm:$0x3] %v6838_v0  ;;  %4092 = vmatprep.subr.bf16.mxu0 %v4315_v2  ;;  %3997 = vmatpush3.bf16.msra.mxu1 %v4314_v1  ;;  %v4319_v6 = vld [vmem:[#allocation3 + $0x110] sm:$0xff]   ;;  %s7377_s16 = smov (!%p203_p2, %s4512_s16), 1 }
  0x2f   : > { %2945 = vst [vmem:[#allocation2 + $0x10] sm:$0x1] %v6838_v0  ;;  %2946 = vst [vmem:[#allocation2 + $0x20] sm:$0x1] %v6838_v0  ;;  %4093 = vmatpush3.bf16.msra.mxu0 %v4315_v2  ;;  %3998 = vmatprep.subr.bf16.mxu1 %v4316_v3  ;;  %v4320_v7 = vld [vmem:[#allocation3 + $0x58] sm:$0xff]   ;;  %s3886_s7 = sshll.u32 %s7377_s16, 6 }
  0x30   : > { %2947 = vst [vmem:[#allocation2 + $0x30] sm:$0x1] %v6838_v0  ;;  %2948 = vst [vmem:[#allocation2 + $0x40] sm:$0x1] %v6838_v0  ;;  %4094 = vmatprep.subr.bf16.mxu0 %v4317_v4  ;;  %v4321_v8 = vld [vmem:[#allocation3 + $0x118] sm:$0xff]   ;;  %v4322_v9 = vld [vmem:[#allocation3 + $0x60] sm:$0xff]   ;;  %s4580_s10 = scalar_lea.vmem %s6830_s0, %s3886_s7  ;;  %s6677_s21 = scalar_lea.vmem %s6834_s4, %s3886_s7 }
  0x31   : > { %2949 = vst [vmem:[#allocation2 + $0x50] sm:$0x1] %v6838_v0  ;;  %2950 = vst [vmem:[#allocation2 + $0x60] sm:$0x1] %v6838_v0  ;;  %v4323_v10 = vld [vmem:[#allocation3 + $0x120] sm:$0xff]   ;;  %v4324_v11 = vld [vmem:[#allocation3 + $0x68] sm:$0xff]  }
  0x32   : > { %2951 = vst [vmem:[#allocation2 + $0x70] sm:$0x1] %v6838_v0  ;;  %2952 = vst [vmem:[#allocation2 + $0x80] sm:$0x1] %v6838_v0  ;;  %3999 = vmatpush3.bf16.msra.mxu1 %v4316_v3  ;;  %v4325_v12 = vld [vmem:[#allocation3 + $0x128] sm:$0xff]   ;;  %v4583_v13 = vld [vmem:[%s4580_s10] sm:$0xff] }
  0x33   : > { %2953 = vst [vmem:[#allocation2 + $0x19] sm:$0x1] %v6838_v0  ;;  %2954 = vst [vmem:[#allocation2 + $0x29] sm:$0x1] %v6838_v0  ;;  %4095 = vmatpush3.bf16.msra.mxu0 %v4317_v4  ;;  %4000 = vmatprep.subr.bf16.mxu1 %v4318_v5  ;;  %v4586_v14 = vld [vmem:[%s4580_s10 + $0x8] sm:$0xff]  ;;  %v4326_v15 = vld [vmem:[#allocation3 + $0x70] sm:$0xff]  }
  0x34   : > { %2955 = vst [vmem:[#allocation2 + $0x39] sm:$0x1] %v6838_v0  ;;  %2956 = vst [vmem:[#allocation2 + $0x49] sm:$0x1] %v6838_v0  ;;  %4096 = vmatprep.subr.bf16.mxu0 %v4319_v6  ;;  %vm298_vm0 = vcmp.ge.f32.partialorder %v4583_v13, -2.2 }
  0x35   : > { %2957 = vst [vmem:[#allocation2 + $0x59] sm:$0x1] %v6838_v0  ;;  %2958 = vst [vmem:[#allocation2 + $0x69] sm:$0x1] %v6838_v0  ;;  %vm299_vm1 = vcmp.ge.f32.partialorder %v4586_v14, -2.2 }
  0x36   : > { %2959 = vst [vmem:[#allocation2 + $0x79] sm:$0x1] %v6838_v0  ;;  %2960 = vst [vmem:[#allocation2 + $0x89] sm:$0x1] %v6838_v0  ;;  %4001 = vmatpush3.bf16.msra.mxu1 %v4318_v5  ;;  %vm322_vm2 = vcmp.ge.f32.partialorder %v4583_v13, -1.8 }
  0x37   : > { %4097 = vmatpush3.bf16.msra.mxu0 %v4319_v6  ;;  %4002 = vmatprep.subr.bf16.mxu1 %v4320_v7  ;;  %v3618_v16 = vsel %vm298_vm0, 1.0, %v6838_v0  ;;  %v3619_v17 = vsel %vm299_vm1, 1.0, %v6838_v0  ;;  %vm323_vm3 = vcmp.ge.f32.partialorder %v4586_v14, -1.8  ;;  %v3626_v18 = vsel %vm322_vm2, 1.0, %v6838_v0  ;;  %v4327_v23 = vld [vmem:[#allocation3 + $0x130] sm:$0xff]  }
  0x38   : > { %4098 = vmatprep.subr.bf16.mxu0 %v4321_v8  ;;  %v3627_v19 = vsel %vm323_vm3, 1.0, %v6838_v0  ;;  %vm346_vm4 = vcmp.ge.f32.partialorder %v4583_v13, -1.4  ;;  %vm347_vm5 = vcmp.ge.f32.partialorder %v4586_v14, -1.4  ;;  %vm370_vm6 = vcmp.ge.f32.partialorder %v4583_v13, -1.0 }
  0x39   : > { %v3634_v20 = vsel %vm346_vm4, 1.0, %v6838_v0  ;;  %v3635_v21 = vsel %vm347_vm5, 1.0, %v6838_v0  ;;  %vm371_vm7 = vcmp.ge.f32.partialorder %v4586_v14, -1.0  ;;  %v3642_v22 = vsel %vm370_vm6, 1.0, %v6838_v0  ;;  %v4328_v29 = vld [vmem:[#allocation3 + $0x78] sm:$0xff]   ;;  %v4651_v55 = vld [vmem:[#allocation3] sm:$0xff]  }
  0x3a   : > { %4003 = vmatpush3.bf16.msra.mxu1 %v4320_v7  ;;  %v3643_v24 = vsel %vm371_vm7, 1.0, %v6838_v0  ;;  %vm394_vm8 = vcmp.ge.f32.partialorder %v4583_v13, -0.6  ;;  %vm395_vm9 = vcmp.ge.f32.partialorder %v4586_v14, -0.6  ;;  %v586_v27 = vsub.f32 %v3618_v16, %v3626_v18  ;;  %v4329_v30 = vld [vmem:[#allocation3 + $0x138] sm:$0xff]  }
  0x3b   : > { %4099 = vmatpush3.bf16.msra.mxu0 %v4321_v8  ;;  %4004 = vmatprep.subr.bf16.mxu1 %v4322_v9  ;;  %v4607_v25 = vsel %vm394_vm8, 1.0, %v6838_v0  ;;  %v4610_v26 = vsel %vm395_vm9, 1.0, %v6838_v0  ;;  %v587_v28 = vsub.f32 %v3619_v17, %v3627_v19  ;;  %v594_v31 = vsub.f32 %v3626_v18, %v3634_v20  ;;  %v4331_v60 = vld [vmem:[#allocation3 + $0x140] sm:$0xff]  }
  0x3c   : > { %4100 = vmatprep.subr.bf16.mxu0 %v4323_v10  ;;  %v595_v32 = vsub.f32 %v3627_v19, %v3635_v21  ;;  %v602_v33 = vsub.f32 %v3634_v20, %v3642_v22  ;;  %v603_v34 = vsub.f32 %v3635_v21, %v3643_v24  ;;  %v4613_v35 = vsub.f32 %v3642_v22, %v4607_v25 }
  0x3d   : > { %v4616_v36 = vadd.f32 2.2, %v4583_v13  ;;  %v4619_v37 = vadd.f32 2.2, %v4586_v14  ;;  %v4622_v38 = vadd.f32 1.4, %v4583_v13  ;;  %v4625_v39 = vsub.f32 %v3643_v24, %v4610_v26 }
  0x3e   : > { %4005 = vmatpush3.bf16.msra.mxu1 %v4322_v9  ;;  %v4628_v40 = vadd.f32 1.4, %v4586_v14  ;;  %v4631_v41 = vadd.f32 1.8, %v4583_v13  ;;  %v4634_v42 = vadd.f32 1.8, %v4586_v14 }
  0x3f   : > { %4101 = vmatpush3.bf16.msra.mxu0 %v4323_v10  ;;  %4006 = vmatprep.subr.bf16.mxu1 %v4324_v11  ;;  %7013 = vst [vmem:[#allocation6_spill] sm:$0xff] %v4622_v38  ;;  %v682_v43 = vmul.f32 2.5, %v4616_v36  ;;  %v683_v44 = vmul.f32 2.5, %v4619_v37  ;;  %v706_v45 = vmul.f32 2.5, %v4622_v38  ;;  %v4640_v46 = vadd.f32 1.0, %v4583_v13 }
  0x40   : > { %4102 = vmatprep.subr.bf16.mxu0 %v4325_v12  ;;  %7014 = vst [vmem:[#allocation7_spill] sm:$0xff] %v4628_v40  ;;  %7015 = vst [vmem:[#allocation8_spill] sm:$0xff] %v4631_v41  ;;  %v707_v47 = vmul.f32 2.5, %v4628_v40  ;;  %v738_v48 = vmul.f32 2.5, %v4631_v41  ;;  %v739_v49 = vmul.f32 2.5, %v4634_v42  ;;  %v4646_v50 = vadd.f32 1.0, %v4586_v14 }
  0x41   : > { %7016 = vst [vmem:[#allocation9_spill] sm:$0xff] %v4634_v42  ;;  %v690_v51 = vmul.f32 %v682_v43, %v586_v27  ;;  %v691_v52 = vmul.f32 %v683_v44, %v587_v28  ;;  %v714_v53 = vmul.f32 %v706_v45, %v594_v31  ;;  %v4649_v54 = vmul.f32 2.5, %v4640_v46 }
  0x42   : > { %4007 = vmatpush3.bf16.msra.mxu1 %v4324_v11  ;;  %v715_v56 = vmul.f32 %v707_v47, %v595_v32  ;;  %v746_v57 = vmul.f32 %v738_v48, %v594_v31  ;;  %v747_v58 = vmul.f32 %v739_v49, %v595_v32  ;;  %v4654_v59 = vmul.f32 2.5, %v4646_v50 }
  0x43   : > { %4103 = vmatpush3.bf16.msra.mxu0 %v4325_v12  ;;  %4008 = vmatprep.subr.bf16.mxu1 %v4326_v15  ;;  %v722_v61 = vsub.f32 %v690_v51, %v714_v53  ;;  %v770_v62 = vmul.f32 %v4649_v54, %v602_v33  ;;  %v786_v63 = vmul.f32 %v706_v45, %v602_v33  ;;  %v3746_v4 = vadd.f32 0.6, %v4583_v13 }
  0x44   : > { %4104 = vmatprep.subr.bf16.mxu0 %v4327_v23  ;;  %v787_v1 = vmul.f32 %v707_v47, %v603_v34  ;;  %v723_v2 = vsub.f32 %v691_v52, %v715_v56  ;;  %v771_v3 = vmul.f32 %v4654_v59, %v603_v34  ;;  %v3747_v5 = vadd.f32 0.6, %v4586_v14 }
  0x45   : > { %v778_v6 = vsub.f32 %v746_v57, %v770_v62  ;;  %v1106_v7 = vmul.f32 1.25, %v4616_v36  ;;  %v1107_v8 = vmul.f32 1.25, %v4619_v37  ;;  %v4663_v9 = vmul.f32 1.25, %v4640_v46 }
  0x46   : > { %4009 = vmatpush3.bf16.msra.mxu1 %v4326_v15  ;;  %v779_v10 = vsub.f32 %v747_v58, %v771_v3  ;;  %v802_v11 = vmul.f32 2.5, %v3746_v4  ;;  %v803_v12 = vmul.f32 2.5, %v3747_v5  ;;  %v4667_v15 = vmul.f32 1.25, %v4646_v50 }
  0x47   : > { %4105 = vmatpush3.bf16.msra.mxu0 %v4327_v23  ;;  %4010 = vmatprep.subr.bf16.mxu1 %v4328_v29  ;;  %v1114_v16 = vmul.f32 %v1106_v7, %v722_v61  ;;  %v1115_v17 = vmul.f32 %v1107_v8, %v723_v2  ;;  %v1130_v18 = vmul.f32 %v4663_v9, %v778_v6  ;;  %v1146_v19 = vmul.f32 1.25, %v4631_v41 }
  0x48   : > { %4106 = vmatprep.subr.bf16.mxu0 %v4329_v30  ;;  %v810_v20 = vmul.f32 %v802_v11, %v4613_v35  ;;  %v811_v21 = vmul.f32 %v803_v12, %v4625_v39  ;;  %v1131_v22 = vmul.f32 %v4667_v15, %v779_v10  ;;  %v1147_v23 = vmul.f32 1.25, %v4634_v42 }
  0x49   : > { %v1138_v24 = vsub.f32 %v1114_v16, %v1130_v18  ;;  %v1154_v27 = vmul.f32 %v1146_v19, %v778_v6  ;;  %v4675_v28 = vmul.f32 1.25, %v3746_v4  ;;  %v1418_v34 = vmul.f32 0.8333333, %v4616_v36 }
  0x4a   : > { %4011 = vmatpush3.bf16.msra.mxu1 %v4328_v29  ;;  %v4677_v29 = vmul.f32 1.25, %v3747_v5  ;;  %v4681_v31 = vsub.f32 %v787_v1, %v811_v21  ;;  %v1139_v32 = vsub.f32 %v1115_v17, %v1131_v22  ;;  %v1155_v33 = vmul.f32 %v1147_v23, %v779_v10 }
  0x4b   : > { %4107 = vmatpush3.bf16.msra.mxu0 %v4329_v30  ;;  %4020 = vmatprep.subr.bf16.mxu1 %v4651_v55  ;;  %v4679_v30 = vsub.f32 %v786_v63, %v810_v20  ;;  %v1419_v43 = vmul.f32 0.8333333, %v4619_v37  ;;  %v4685_v44 = vmul.f32 0.8333333, %v3746_v4  ;;  %v4691_v48 = vmul.f32 0.8333333, %v3747_v5 }
  0x4c   : > { %4116 = vmatprep.subr.bf16.mxu0 %v4331_v60  ;;  %7018 = vst [vmem:[#allocation11_spill] sm:$0xff] %v4681_v31  ;;  %v1171_v47 = vmul.f32 %v4677_v29, %v4681_v31  ;;  %vm418_vm10 = vcmp.ge.f32.partialorder %v4583_v13, -0.2  ;;  %v1426_v49 = vmul.f32 %v1418_v34, %v1138_v24  ;;  %vm419_vm11 = vcmp.ge.f32.partialorder %v4586_v14, -0.2 }
  0x4d   : > { %7017 = vst [vmem:[#allocation10_spill] sm:$0xff] %v4679_v30  ;;  %7019 = vst [vmem:[#allocation12_spill] sm:$0xff] %v4685_v44  ;;  %v1170_v45 = vmul.f32 %v4675_v28, %v4679_v30  ;;  %v1427_v51 = vmul.f32 %v1419_v43, %v1139_v32  ;;  %v3658_v37 = vsel %vm418_vm10, 1.0, %v6838_v0  ;;  %vm442_vm12 = vcmp.ge.f32.partialorder %v4583_v13, 0.2 }
  0x4e   : > { %7020 = vst [vmem:[#allocation13_spill] sm:$0xff] %v4691_v48  ;;  %v4697_v36 = vsub.f32 %v1155_v33, %v1171_v47  ;;  %v3659_v53 = vsel %vm419_vm11, 1.0, %v6838_v0  ;;  %vm443_vm13 = vcmp.ge.f32.partialorder %v4586_v14, 0.2  ;;  %vm466_vm14 = vcmp.ge.f32.partialorder %v4583_v13, 0.6 }
  0x4f   : > { %v4695_v52 = vsub.f32 %v1154_v27, %v1170_v45  ;;  %vm490_vm15 = vcmp.ge.f32.partialorder %v4583_v13, 1.0  ;;  %v3666_v58 = vsel %vm442_vm12, 1.0, %v6838_v0  ;;  %vm467_vm0 = vcmp.ge.f32.partialorder %v4586_v14, 0.6 }
  0x50   : > { %7022 = vst [vmem:[#allocation15_spill] sm:$0xff] %v4697_v36  ;;  %v1443_v57 = vmul.f32 %v4691_v48, %v4697_v36  ;;  %v3667_v60 = vsel %vm443_vm13, 1.0, %v6838_v0  ;;  %v4713_v61 = vsel %vm466_vm14, 1.0, %v6838_v0  ;;  %v4716_v62 = vsel %vm467_vm0, 1.0, %v6838_v0 }
  0x51   : > { %7021 = vst [vmem:[#allocation14_spill] sm:$0xff] %v4695_v52  ;;  %v1442_v56 = vmul.f32 %v4685_v44, %v4695_v52  ;;  %v4719_v2 = vsel %vm490_vm15, 1.0, %v6838_v0  ;;  %v618_v3 = vsub.f32 %v4607_v25, %v3658_v37  ;;  %v619_v4 = vsub.f32 %v4610_v26, %v3659_v53 }
  0x52   : > { %v1451_v1 = vsub.f32 %v1427_v51, %v1443_v57  ;;  %7023 = vst [vmem:[#allocation16_spill] sm:$0xff] %v4719_v2  ;;  %v626_v5 = vsub.f32 %v3658_v37, %v3666_v58  ;;  %v826_v6 = vmul.f32 %v4649_v54, %v4613_v35  ;;  %v627_v8 = vsub.f32 %v3659_v53, %v3667_v60  ;;  %v4777_v53 = vld [vmem:[%s4580_s10 + $0x10] sm:$0xff] }
  0x53   : > { %v1450_v63 = vsub.f32 %v1426_v49, %v1442_v56  ;;  %v4726_v10 = vsub.f32 %v3666_v58, %v4713_v61  ;;  %v4729_v16 = vsub.f32 %v3667_v60, %v4716_v62  ;;  %v827_v17 = vmul.f32 %v4654_v59, %v4625_v39 }
  0x54   : > { %v4734_v18 = vadd.f32 0.2, %v4583_v13  ;;  %v4737_v25 = vadd.f32 0.2, %v4586_v14  ;;  %v866_v26 = vmul.f32 %v802_v11, %v618_v3  ;;  %v867_v35 = vmul.f32 %v803_v12, %v619_v4 }
  0x55   : > { %v1458_v7 = vpack.c.bf16 %v1451_v1, %v1450_v63  ;;  %v4740_v54 = vadd.f32 -0.2, %v4583_v13  ;;  %v4743_v19 = vadd.f32 -0.2, %v4586_v14  ;;  %v3770_v20 = vadd.f32 -0.6, %v4583_v13 }
  0x56   : > { %7024 = vst [vmem:[#allocation17_spill] sm:$0xff] %v4734_v18  ;;  %7025 = vst [vmem:[#allocation18_spill] sm:$0xff] %v4737_v25  ;;  %v842_v21 = vmul.f32 2.5, %v4734_v18  ;;  %v843_v39 = vmul.f32 2.5, %v4737_v25  ;;  %v3771_v59 = vadd.f32 -0.6, %v4586_v14 }
  0x57   : > { %4012 = vmatprep.mubr.bf16.mxu1 %v1458_v7  ;;  %7026 = vst [vmem:[#allocation19_spill] sm:$0xff] %v4740_v54  ;;  %7027 = vst [vmem:[#allocation20_spill] sm:$0xff] %v4743_v19  ;;  %v2066_v22 = vmul.f32 0.8333333, %v4640_v46  ;;  %v4751_v11 = vmul.f32 2.5, %v4740_v54  ;;  %v4754_v12 = vmul.f32 2.5, %v4743_v19 }
  0x58   : > { %v4756_v23 = vmul.f32 2.5, %v3770_v20  ;;  %v4759_v24 = vmul.f32 1.25, %v4740_v54  ;;  %v850_v13 = vmul.f32 %v842_v21, %v618_v3  ;;  %v851_v27 = vmul.f32 %v843_v39, %v619_v4 }
  0x59   : > { %v906_v32 = vmul.f32 %v842_v21, %v626_v5  ;;  %v907_v33 = vmul.f32 %v843_v39, %v627_v8  ;;  %v890_v34 = vmul.f32 %v4751_v11, %v626_v5  ;;  %v891_v46 = vmul.f32 %v4754_v12, %v627_v8  ;;  %v4792_v5 = vld [vmem:[%s4580_s10 + $0x18] sm:$0xff] }
  0x5a   : > { %7028 = vst [vmem:[#allocation21_spill] sm:$0xff] %v4756_v23  ;;  %7029 = vst [vmem:[#allocation22_spill] sm:$0xff] %v4759_v24  ;;  %v4763_v43 = vmul.f32 2.5, %v3771_v59  ;;  %v930_v45 = vmul.f32 %v4756_v23, %v4726_v10  ;;  %v4767_v47 = vsub.f32 %v826_v6, %v850_v13  ;;  %v4769_v49 = vsub.f32 %v827_v17, %v851_v27 }
  0x5b   : > { %v4772_v51 = vmul.f32 1.25, %v4743_v19  ;;  %v4774_v37 = vmul.f32 1.25, %v3770_v20  ;;  %vm491_vm1 = vcmp.ge.f32.partialorder %v4586_v14, 1.0  ;;  %v898_v56 = vsub.f32 %v866_v26, %v890_v34 }
  0x5c   : > { %7030 = vst [vmem:[#allocation23_spill] sm:$0xff] %v4763_v43  ;;  %7031 = vst [vmem:[#allocation24_spill] sm:$0xff] %v4767_v47  ;;  %v899_v57 = vsub.f32 %v867_v35, %v891_v46  ;;  %v931_v58 = vmul.f32 %v4763_v43, %v4729_v16  ;;  %v4782_v60 = vsub.f32 %v906_v32, %v930_v45  ;;  %v4788_v3 = vmul.f32 1.25, %v3771_v59 }
  0x5d   : > { %7032 = vst [vmem:[#allocation25_spill] sm:$0xff] %v4769_v49  ;;  %7033 = vst [vmem:[#allocation26_spill] sm:$0xff] %v4772_v51  ;;  %v1226_v63 = vmul.f32 %v4663_v9, %v4767_v47  ;;  %v1227_v1 = vmul.f32 %v4667_v15, %v4769_v49  ;;  %v2067_v4 = vmul.f32 0.8333333, %v4646_v50  ;;  %v1242_v7 = vmul.f32 %v4759_v24, %v898_v56 }
  0x5e   : > { %7034 = vst [vmem:[#allocation27_spill] sm:$0xff] %v4774_v37  ;;  %7035 = vst [vmem:[#allocation28_spill] sm:$0xff] %v4782_v60  ;;  %v4794_v6 = vsub.f32 %v907_v33, %v931_v58  ;;  %v1243_v8 = vmul.f32 %v4772_v51, %v899_v57  ;;  %v1258_v17 = vmul.f32 %v4675_v28, %v898_v56  ;;  %v4802_v15 = vmul.f32 0.8333333, %v3770_v20 }
  0x5f   : > { %7036 = vst [vmem:[#allocation29_spill] sm:$0xff] %v4788_v3  ;;  %v1259_v26 = vmul.f32 %v4677_v29, %v899_v57  ;;  %v1274_v9 = vmul.f32 %v4774_v37, %v4782_v60  ;;  %v4804_v35 = vmul.f32 0.8333333, %v3771_v59  ;;  %v4806_v50 = vsub.f32 %v1226_v63, %v1242_v7 }
  0x60   : > { %7037 = vst [vmem:[#allocation30_spill] sm:$0xff] %v4794_v6  ;;  %7038 = vst [vmem:[#allocation31_spill] sm:$0xff] %v4802_v15  ;;  %v4808_v21 = vsub.f32 %v1227_v1, %v1243_v8  ;;  %v1275_v39 = vmul.f32 %v4788_v3, %v4794_v6  ;;  %vm300_vm2 = vcmp.ge.f32.partialorder %v4777_v53, -2.2  ;;  %vm301_vm3 = vcmp.ge.f32.partialorder %v4792_v5, -2.2 }
  0x61   : > { %7039 = vst [vmem:[#allocation32_spill] sm:$0xff] %v4804_v35  ;;  %7040 = vst [vmem:[#allocation33_spill] sm:$0xff] %v4806_v50  ;;  %v4813_v13 = vsub.f32 %v1258_v17, %v1274_v9  ;;  %v3620_v28 = vsel %vm300_vm2, 1.0, %v6838_v0  ;;  %vm324_vm4 = vcmp.ge.f32.partialorder %v4777_v53, -1.8  ;;  %v2074_v20 = vmul.f32 %v2066_v22, %v4806_v50 }
  0x62   : > { %7041 = vst [vmem:[#allocation34_spill] sm:$0xff] %v4808_v21  ;;  %v4818_v29 = vsub.f32 %v1259_v26, %v1275_v39  ;;  %v2075_v59 = vmul.f32 %v2067_v4, %v4808_v21  ;;  %v3621_v27 = vsel %vm301_vm3, 1.0, %v6838_v0  ;;  %vm325_vm5 = vcmp.ge.f32.partialorder %v4792_v5, -1.8 }
  0x63   : > { %v2090_v32 = vmul.f32 %v4802_v15, %v4813_v13  ;;  %v3628_v33 = vsel %vm324_vm4, 1.0, %v6838_v0  ;;  %vm348_vm6 = vcmp.ge.f32.partialorder %v4777_v53, -1.4  ;;  %v3629_v46 = vsel %vm325_vm5, 1.0, %v6838_v0 }
  0x64   : > { %7042 = vst [vmem:[#allocation35_spill] sm:$0xff] %v4818_v29  ;;  %v2091_v34 = vmul.f32 %v4804_v35, %v4818_v29  ;;  %vm349_vm7 = vcmp.ge.f32.partialorder %v4792_v5, -1.4  ;;  %v3636_v22 = vsel %vm348_vm6, 1.0, %v6838_v0  ;;  %vm372_vm8 = vcmp.ge.f32.partialorder %v4777_v53, -1.0 }
  0x65   : > { %v2098_v45 = vsub.f32 %v2074_v20, %v2090_v32  ;;  %v3637_v56 = vsel %vm349_vm7, 1.0, %v6838_v0  ;;  %vm373_vm9 = vcmp.ge.f32.partialorder %v4792_v5, -1.0  ;;  %v3644_v58 = vsel %vm372_vm8, 1.0, %v6838_v0 }
  0x66   : > { %v2099_v57 = vsub.f32 %v2075_v59, %v2091_v34  ;;  %v3645_v63 = vsel %vm373_vm9, 1.0, %v6838_v0  ;;  %vm396_vm10 = vcmp.ge.f32.partialorder %v4777_v53, -0.6  ;;  %v4842_v1 = vsel %vm491_vm1, 1.0, %v6838_v0 }
  0x67   : > { %7043 = vst [vmem:[#allocation36_spill] sm:$0xff] %v4842_v1  ;;  %v4846_v4 = vsub.f32 %v4713_v61, %v4719_v2  ;;  %vm397_vm11 = vcmp.ge.f32.partialorder %v4792_v5, -0.6  ;;  %v4850_v7 = vsel %vm396_vm10, 1.0, %v6838_v0  ;;  %v588_v26 = vsub.f32 %v3620_v28, %v3628_v33 }
  0x68   : > { %v2106_v8 = vpack.c.bf16 %v2099_v57, %v2098_v45  ;;  %v4853_v17 = vsel %vm397_vm11, 1.0, %v6838_v0  ;;  %v589_v9 = vsub.f32 %v3621_v27, %v3629_v46  ;;  %v596_v39 = vsub.f32 %v3628_v33, %v3636_v22 }
  0x69   : > { %7044 = vst [vmem:[#allocation37_spill] sm:$0xff] %v4846_v4  ;;  %v597_v20 = vsub.f32 %v3629_v46, %v3637_v56  ;;  %v604_v14 = vsub.f32 %v3636_v22, %v3644_v58  ;;  %v605_v59 = vsub.f32 %v3637_v56, %v3645_v63  ;;  %v4856_v32 = vsub.f32 %v3644_v58, %v4850_v7 }
  0x6a   : > { %4108 = vmatprep.mubr.bf16.mxu0 %v2106_v8  ;;  %v3716_v61 = vadd.f32 2.2, %v4777_v53  ;;  %v3717_v34 = vadd.f32 2.2, %v4792_v5  ;;  %v4861_v35 = vadd.f32 1.4, %v4777_v53  ;;  %v4864_v45 = vsub.f32 %v3645_v63, %v4853_v17 }
  0x6b   : > { %v4867_v28 = vadd.f32 1.4, %v4792_v5  ;;  %v4870_v27 = vadd.f32 1.8, %v4777_v53  ;;  %v4873_v33 = vadd.f32 1.8, %v4792_v5 }
  0x6c   : > { %7045 = vst [vmem:[#allocation38_spill] sm:$0xff] %v4861_v35  ;;  %v684_v46 = vmul.f32 2.5, %v3716_v61  ;;  %v685_v22 = vmul.f32 2.5, %v3717_v34  ;;  %v708_v56 = vmul.f32 2.5, %v4861_v35  ;;  %v4877_v57 = vadd.f32 1.0, %v4777_v53 }
  0x6d   : > { %7046 = vst [vmem:[#allocation39_spill] sm:$0xff] %v4867_v28  ;;  %v709_v58 = vmul.f32 2.5, %v4867_v28  ;;  %v740_v63 = vmul.f32 2.5, %v4870_v27  ;;  %v741_v8 = vmul.f32 2.5, %v4873_v33  ;;  %v4883_v0 = vadd.f32 1.0, %v4792_v5 }
  0x6e   : > { %v692_v15 = vmul.f32 %v684_v46, %v588_v26  ;;  %v693_v3 = vmul.f32 %v685_v22, %v589_v9  ;;  %v716_v37 = vmul.f32 %v708_v56, %v596_v39  ;;  %v4886_v21 = vmul.f32 2.5, %v4877_v57 }
  0x6f   : > { %v717_v50 = vmul.f32 %v709_v58, %v597_v20  ;;  %v748_v19 = vmul.f32 %v740_v63, %v596_v39  ;;  %v749_v54 = vmul.f32 %v741_v8, %v597_v20  ;;  %v4889_v51 = vmul.f32 2.5, %v4883_v0 }
  0x70   : > { %v724_v24 = vsub.f32 %v692_v15, %v716_v37  ;;  %v772_v43 = vmul.f32 %v4886_v21, %v604_v14  ;;  %v788_v23 = vmul.f32 %v708_v56, %v604_v14  ;;  %v789_v2 = vmul.f32 %v709_v58, %v605_v59 }
  0x71   : > { %v725_v36 = vsub.f32 %v693_v3, %v717_v50  ;;  %v773_v52 = vmul.f32 %v4889_v51, %v605_v59  ;;  %v3748_v26 = vadd.f32 0.6, %v4777_v53  ;;  %v3749_v9 = vadd.f32 0.6, %v4792_v5 }
  0x72   : > { %v780_v46 = vsub.f32 %v748_v19, %v772_v43  ;;  %v1108_v22 = vmul.f32 1.25, %v3716_v61  ;;  %v1109_v42 = vmul.f32 1.25, %v3717_v34  ;;  %v4896_v39 = vmul.f32 1.25, %v4877_v57 }
  0x73   : > { %v781_v20 = vsub.f32 %v749_v54, %v773_v52  ;;  %v4898_v63 = vmul.f32 2.5, %v3748_v26  ;;  %v4900_v37 = vmul.f32 2.5, %v3749_v9  ;;  %v4903_v15 = vmul.f32 1.25, %v4883_v0 }
  0x74   : > { %v1116_v3 = vmul.f32 %v1108_v22, %v724_v24  ;;  %v1117_v50 = vmul.f32 %v1109_v42, %v725_v36  ;;  %v1132_v14 = vmul.f32 %v4896_v39, %v780_v46  ;;  %v1148_v59 = vmul.f32 1.25, %v4870_v27 }
  0x75   : > { %v812_v19 = vmul.f32 %v4898_v63, %v4856_v32  ;;  %v813_v43 = vmul.f32 %v4900_v37, %v4864_v45  ;;  %v1133_v52 = vmul.f32 %v4903_v15, %v781_v20  ;;  %v1149_v54 = vmul.f32 1.25, %v4873_v33 }
  0x76   : > { %v1140_v56 = vsub.f32 %v1116_v3, %v1132_v14  ;;  %v1156_v58 = vmul.f32 %v1148_v59, %v780_v46  ;;  %v4913_v8 = vmul.f32 1.25, %v3748_v26  ;;  %v4915_v24 = vmul.f32 1.25, %v3749_v9 }
  0x77   : > { %v820_v42 = vsub.f32 %v788_v23, %v812_v19  ;;  %v821_v36 = vsub.f32 %v789_v2, %v813_v43  ;;  %v1141_v22 = vsub.f32 %v1117_v50, %v1133_v52  ;;  %v1157_v41 = vmul.f32 %v1149_v54, %v781_v20 }
  0x78   : > { %v1188_v49 = vmul.f32 1.25, %v4861_v35  ;;  %v1189_v31 = vmul.f32 1.25, %v4867_v28  ;;  %v1420_v30 = vmul.f32 0.8333333, %v3716_v61  ;;  %v1421_v47 = vmul.f32 0.8333333, %v3717_v34 }
  0x79   : > { %v1172_v40 = vmul.f32 %v4913_v8, %v820_v42  ;;  %v1173_v38 = vmul.f32 %v4915_v24, %v821_v36  ;;  %v4921_v3 = vmul.f32 0.8333333, %v3748_v26  ;;  %v4923_v46 = vmul.f32 0.8333333, %v3749_v9  ;;  %v4336_v35 = vld [vmem:[#allocation3 + $0x18] sm:$0xff]  }
  0x7a   : > { %v4927_v23 = vsub.f32 %v4716_v62, %v4842_v1  ;;  %v4929_v2 = vmul.f32 %v1188_v49, %v820_v42  ;;  %v1428_v20 = vmul.f32 %v1420_v30, %v1140_v56  ;;  %v1429_v50 = vmul.f32 %v1421_v47, %v1141_v22 }
  0x7b   : > { %v1180_v14 = vsub.f32 %v1156_v58, %v1172_v40  ;;  %v1181_v59 = vsub.f32 %v1157_v41, %v1173_v38  ;;  %v1706_v61 = vmul.f32 0.8333333, %v4870_v27  ;;  %v1707_v34 = vmul.f32 0.8333333, %v4873_v33  ;;  %v4332_v58 = vld [vmem:[#allocation3 + $0x8] sm:$0xff]  }
  0x7c   : > { %7047 = vst [vmem:[#allocation40_spill] sm:$0xff] %v4927_v23  ;;  %7048 = vst [vmem:[#allocation41_spill] sm:$0xff] %v4929_v2  ;;  %v4933_v19 = vmul.f32 %v1189_v31, %v821_v36  ;;  %vm420_vm12 = vcmp.ge.f32.partialorder %v4777_v53, -0.2  ;;  %vm421_vm13 = vcmp.ge.f32.partialorder %v4792_v5, -0.2  ;;  %v828_v42 = vmul.f32 %v4886_v21, %v4856_v32 }
  0x7d   : > { %vm444_vm14 = vcmp.ge.f32.partialorder %v4777_v53, 0.2  ;;  %v1444_v62 = vmul.f32 %v4921_v3, %v1180_v14  ;;  %v1445_v49 = vmul.f32 %v4923_v46, %v1181_v59  ;;  %v4940_v30 = vmul.f32 %v1706_v61, %v1180_v14  ;;  %v4962_v36 = vld [vmem:[#allocation2] sm:$0xff]  ;;  %v4334_v14 = vld [vmem:[#allocation3 + $0x10] sm:$0xff]  }
  0x7e   : > { %7049 = vst [vmem:[#allocation42_spill] sm:$0xff] %v4933_v19  ;;  %v4942_v40 = vmul.f32 %v1707_v34, %v1181_v59  ;;  %v7052_v38 = vmov 0.0   ;;  %vm445_vm15 = vcmp.ge.f32.partialorder %v4792_v5, 0.2  ;;  %vm468_vm0 = vcmp.ge.f32.partialorder %v4777_v53, 0.6 }
  0x7f   : > { %7050 = vst [vmem:[#allocation43_spill] sm:$0xff] %v4940_v30  ;;  %v3660_v41 = vsel %vm420_vm12, 1.0, %v7052_v38  ;;  %v3661_v47 = vsel %vm421_vm13, 1.0, %v7052_v38  ;;  %v3668_v31 = vsel %vm444_vm14, 1.0, %v7052_v38  ;;  %v1452_v27 = vsub.f32 %v1428_v20, %v1444_v62  ;;  %v4338_v2 = vld [vmem:[#allocation3 + $0x20] sm:$0xff]  }
  0x80   : > { %7051 = vst [vmem:[#allocation44_spill] sm:$0xff] %v4942_v40  ;;  %v1453_v33 = vsub.f32 %v1429_v50, %v1445_v49  ;;  %v3669_v26 = vsel %vm445_vm15, 1.0, %v7052_v38  ;;  %vm469_vm1 = vcmp.ge.f32.partialorder %v4792_v5, 0.6  ;;  %v3676_v9 = vsel %vm468_vm0, 1.0, %v7052_v38 }
  0x81   : > { %vm492_vm2 = vcmp.ge.f32.partialorder %v4777_v53, 1.0  ;;  %vm493_vm3 = vcmp.ge.f32.partialorder %v4792_v5, 1.0  ;;  %v3677_v52 = vsel %vm469_vm1, 1.0, %v7052_v38  ;;  %vm516_vm4 = vcmp.ge.f32.partialorder %v4777_v53, 1.4 }
  0x82   : > { %v1459_v43 = vpack.c.bf16 %v1453_v33, %v1452_v27  ;;  %v3684_v54 = vsel %vm492_vm2, 1.0, %v7052_v38  ;;  %v3685_v56 = vsel %vm493_vm3, 1.0, %v7052_v38  ;;  %vm517_vm5 = vcmp.ge.f32.partialorder %v4792_v5, 1.4 }
  0x83   : > { %vm540_vm6 = vcmp.ge.f32.partialorder %v4777_v53, 1.8  ;;  %v3692_v22 = vsel %vm516_vm4, 1.0, %v4962_v36  ;;  %v3693_v20 = vsel %vm517_vm5, 1.0, %v4962_v36  ;;  %vm541_vm7 = vcmp.ge.f32.partialorder %v4792_v5, 1.8 }
  0x84   : > { %4013 = vmatmul.mubr.bf16.vlgmr.msra.gmra.mrb[0].mxu1 %v1459_v43  ;;  %v620_v50 = vsub.f32 %v4850_v7, %v3660_v41  ;;  %v4970_v59 = vsel %vm540_vm6, 1.0, %v4962_v36  ;;  %v4973_v61 = vsel %vm541_vm7, 1.0, %v4962_v36  ;;  %vm564_vm8 = vcmp.ge.f32.partialorder %v4777_v53, 2.2 }
  0x85   : > { %4021 = vmatpush3.bf16.msra.mxu1 %v4651_v55  ;;  %7053 = vst [vmem:[#allocation45_spill] sm:$0xff] %v4970_v59  ;;  %7054 = vst [vmem:[#allocation46_spill] sm:$0xff] %v4973_v61  ;;  %vm565_vm9 = vcmp.ge.f32.partialorder %v4792_v5, 2.2  ;;  %v4978_v21 = vsel %vm564_vm8, 1.0, %v4962_v36  ;;  %v621_v7 = vsub.f32 %v4853_v17, %v3661_v47  ;;  %v628_v34 = vsub.f32 %v3660_v41, %v3668_v31 }
  0x86   : > { %7055 = vst [vmem:[#allocation47_spill] sm:$0xff] %v4978_v21  ;;  %v4981_v32 = vsel %vm565_vm9, 1.0, %v4962_v36  ;;  %4022 = vmatprep.subr.bf16.mxu1 %v4332_v58  ;;  %v629_v55 = vsub.f32 %v3661_v47, %v3669_v26  ;;  %v636_v62 = vsub.f32 %v3668_v31, %v3676_v9  ;;  %v637_v49 = vsub.f32 %v3669_v26, %v3677_v52 }
  0x87   : > { %7056 = vst [vmem:[#allocation48_spill] sm:$0xff] %v4981_v32  ;;  %v644_v38 = vsub.f32 %v3676_v9, %v3684_v54  ;;  %v645_v27 = vsub.f32 %v3677_v52, %v3685_v56  ;;  %v4984_v33 = vsub.f32 %v3684_v54, %v3692_v22  ;;  %v4986_v43 = vsub.f32 %v3685_v56, %v3693_v20 }
  0x88   : > { %v4989_v28 = vsub.f32 %v3692_v22, %v4970_v59  ;;  %v4992_v40 = vsub.f32 %v3693_v20, %v4973_v61  ;;  %v829_v41 = vmul.f32 %v4889_v51, %v4864_v45  ;;  %v4999_v47 = vadd.f32 0.2, %v4777_v53 }
  0x89   : > { %4023 = vmatpush3.bf16.msra.mxu1 %v4332_v58  ;;  %v5002_v31 = vadd.f32 0.2, %v4792_v5  ;;  %v868_v26 = vmul.f32 %v4898_v63, %v620_v50  ;;  %v869_v9 = vmul.f32 %v4900_v37, %v621_v7  ;;  %v5007_v52 = vadd.f32 -0.2, %v4777_v53 }
  0x8a   : > { %7057 = vst [vmem:[#allocation49_spill] sm:$0xff] %v4989_v28  ;;  %7058 = vst [vmem:[#allocation50_spill] sm:$0xff] %v4992_v40  ;;  %4024 = vmatprep.subr.bf16.mxu1 %v4334_v14  ;;  %v844_v54 = vmul.f32 2.5, %v4999_v47  ;;  %v5011_v56 = vadd.f32 -0.2, %v4792_v5  ;;  %v5017_v45 = vadd.f32 -1.0, %v4777_v53 }
  0x8b   : > { %7059 = vst [vmem:[#allocation51_spill] sm:$0xff] %v4999_v47  ;;  %7060 = vst [vmem:[#allocation52_spill] sm:$0xff] %v5002_v31  ;;  %v5014_v51 = vadd.f32 -0.6, %v4777_v53  ;;  %v845_v58 = vmul.f32 2.5, %v5002_v31  ;;  %v884_v63 = vmul.f32 2.5, %v5007_v52 }
  0x8c   : > { %v5022_v37 = vadd.f32 -0.6, %v4792_v5  ;;  %v5025_v22 = vadd.f32 -1.0, %v4792_v5  ;;  %v852_v20 = vmul.f32 %v844_v54, %v620_v50  ;;  %v885_v17 = vmul.f32 2.5, %v5011_v56 }
  0x8d   : > { %v908_v21 = vmul.f32 %v844_v54, %v628_v34  ;;  %v924_v59 = vmul.f32 2.5, %v5014_v51  ;;  %4025 = vmatpush3.bf16.msra.mxu1 %v4334_v14  ;;  %v853_v61 = vmul.f32 %v845_v58, %v621_v7  ;;  %v892_v32 = vmul.f32 %v884_v63, %v628_v34 }
  0x8e   : > { %v909_v30 = vmul.f32 %v845_v58, %v629_v55  ;;  %v925_v19 = vmul.f32 2.5, %v5022_v37  ;;  %4026 = vmatprep.subr.bf16.mxu1 %v4336_v35  ;;  %v860_v1 = vsub.f32 %v828_v42, %v852_v20  ;;  %v893_v48 = vmul.f32 %v885_v17, %v629_v55  ;;  %v4340_v42 = vld [vmem:[#allocation3 + $0x28] sm:$0xff]  }
  0x8f   : > { %v932_v29 = vmul.f32 %v924_v59, %v636_v62  ;;  %v948_v6 = vmul.f32 %v884_v63, %v636_v62  ;;  %v861_v23 = vsub.f32 %v829_v41, %v853_v61  ;;  %v900_v60 = vsub.f32 %v868_v26, %v892_v32 }
  0x90   : > { %v933_v50 = vmul.f32 %v925_v19, %v637_v49  ;;  %v949_v4 = vmul.f32 %v885_v17, %v637_v49  ;;  %v901_v25 = vsub.f32 %v869_v9, %v893_v48  ;;  %v964_v18 = vmul.f32 2.5, %v5017_v45 }
  0x91   : > { %v940_v54 = vsub.f32 %v908_v21, %v932_v29  ;;  %v965_v14 = vmul.f32 2.5, %v5025_v22  ;;  %4027 = vmatpush3.bf16.msra.mxu1 %v4336_v35  ;;  %v988_v34 = vmul.f32 %v924_v59, %v644_v38  ;;  %v989_v58 = vmul.f32 %v925_v19, %v645_v27 }
  0x92   : > { %v941_v7 = vsub.f32 %v909_v30, %v933_v50  ;;  %v5033_v44 = vadd.f32 -1.4, %v4777_v53  ;;  %4028 = vmatprep.subr.bf16.mxu1 %v4338_v2  ;;  %v972_v55 = vmul.f32 %v964_v18, %v644_v38  ;;  %v5036_v32 = vadd.f32 -1.4, %v4792_v5 }
  0x93   : > { %v973_v61 = vmul.f32 %v965_v14, %v645_v27  ;;  %v1028_v48 = vmul.f32 %v964_v18, %v4984_v33  ;;  %v1029_v35 = vmul.f32 %v965_v14, %v4986_v43  ;;  %v5044_v30 = vadd.f32 -1.8, %v4777_v53 }
  0x94   : > { %7061 = vst [vmem:[#allocation53_spill] sm:$0xff] %v5033_v44  ;;  %7062 = vst [vmem:[#allocation54_spill] sm:$0xff] %v5036_v32  ;;  %v5040_v29 = vmul.f32 2.5, %v5033_v44  ;;  %v5047_v19 = vadd.f32 -1.8, %v4792_v5  ;;  %v5049_v59 = vsub.f32 %v948_v6, %v972_v55  ;;  %v5054_v62 = vmul.f32 2.5, %v5036_v32 }
  0x95   : > { %7064 = vst [vmem:[#allocation56_spill] sm:$0xff] %v5044_v30  ;;  %v5051_v21 = vsub.f32 %v949_v4, %v973_v61  ;;  %v1204_v18 = vmul.f32 1.25, %v4999_v47  ;;  %4029 = vmatpush3.bf16.msra.mxu1 %v4338_v2  ;;  %v1044_v38 = vmul.f32 2.5, %v5044_v30  ;;  %v1205_v5 = vmul.f32 1.25, %v5002_v31  ;;  %v4342_v6 = vld [vmem:[#allocation3 + $0x30] sm:$0xff]  }
  0x96   : > { %7063 = vst [vmem:[#allocation55_spill] sm:$0xff] %v5040_v29  ;;  %7065 = vst [vmem:[#allocation57_spill] sm:$0xff] %v5047_v19  ;;  %v1012_v49 = vmul.f32 %v5040_v29, %v4984_v33  ;;  %v1045_v53 = vmul.f32 2.5, %v5047_v19  ;;  %4030 = vmatprep.subr.bf16.mxu1 %v4340_v42  ;;  %v1013_v4 = vmul.f32 %v5054_v62, %v4986_v43  ;;  %v1236_v20 = vmul.f32 1.25, %v5007_v52 }
  0x97   : > { %7066 = vst [vmem:[#allocation58_spill] sm:$0xff] %v5054_v62  ;;  %v5064_v27 = vmul.f32 %v1204_v18, %v860_v1  ;;  %v1228_v17 = vmul.f32 %v4896_v39, %v860_v1  ;;  %v1229_v2 = vmul.f32 %v4903_v15, %v861_v23  ;;  %v1052_v33 = vmul.f32 %v1044_v38, %v4989_v28 }
  0x98   : > { %v5068_v41 = vsub.f32 %v988_v34, %v1012_v49  ;;  %v1053_v26 = vmul.f32 %v1045_v53, %v4992_v40  ;;  %v5072_v9 = vmul.f32 %v1205_v5, %v861_v23  ;;  %v5074_v63 = vsub.f32 %v989_v58, %v1013_v4  ;;  %v4344_v23 = vld [vmem:[#allocation3 + $0x38] sm:$0xff]  }
  0x99   : > { %7067 = vst [vmem:[#allocation59_spill] sm:$0xff] %v5064_v27  ;;  %v1237_v43 = vmul.f32 1.25, %v5011_v56  ;;  %v1260_v50 = vmul.f32 %v4913_v8, %v900_v60  ;;  %4031 = vmatpush3.bf16.msra.mxu1 %v4340_v42  ;;  %v5079_v1 = vsub.f32 %v1028_v48, %v1052_v33  ;;  %v1261_v15 = vmul.f32 %v4915_v24, %v901_v25 }
  0x9a   : > { %7068 = vst [vmem:[#allocation60_spill] sm:$0xff] %v5068_v41  ;;  %7069 = vst [vmem:[#allocation61_spill] sm:$0xff] %v5072_v9  ;;  %v5081_v39 = vsub.f32 %v1029_v35, %v1053_v26  ;;  %v1268_v14 = vmul.f32 1.25, %v5014_v51  ;;  %4032 = vmatprep.subr.bf16.mxu1 %v4342_v6  ;;  %v1244_v34 = vmul.f32 %v1236_v20, %v900_v60  ;;  %v1269_v55 = vmul.f32 1.25, %v5022_v37 }
  0x9b   : > { %7070 = vst [vmem:[#allocation62_spill] sm:$0xff] %v5074_v63  ;;  %7071 = vst [vmem:[#allocation63_spill] sm:$0xff] %v5079_v1  ;;  %v1245_v58 = vmul.f32 %v1237_v43, %v901_v25  ;;  %v5086_v61 = vmul.f32 %v1204_v18, %v940_v54  ;;  %v5088_v38 = vmul.f32 %v1205_v5, %v941_v7  ;;  %v1365_v18 = vmul.f32 1.25, %v5047_v19  ;;  %v4346_v5 = vld [vmem:[#allocation3 + $0x80] sm:$0xff]  }
  0x9c   : > { %7072 = vst [vmem:[#allocation64_spill] sm:$0xff] %v5081_v39  ;;  %v1276_v49 = vmul.f32 %v1268_v14, %v940_v54  ;;  %v5091_v8 = vmul.f32 %v1236_v20, %v5049_v59  ;;  %v5094_v42 = vmul.f32 %v1237_v43, %v5051_v21  ;;  %v1252_v24 = vsub.f32 %v1228_v17, %v1244_v34  ;;  %v5112_v43 = vld [vmem:[%s4580_s10 + $0x20] sm:$0xff] }
  0x9d   : > { %v1253_v48 = vsub.f32 %v1229_v2, %v1245_v58  ;;  %v1277_v35 = vmul.f32 %v1269_v55, %v941_v7  ;;  %v1356_v53 = vmul.f32 %v1268_v14, %v5068_v41  ;;  %4033 = vmatpush3.bf16.msra.mxu1 %v4342_v6  ;;  %v1357_v60 = vmul.f32 %v1269_v55, %v5074_v63 }
  0x9e   : > { %7073 = vst [vmem:[#allocation65_spill] sm:$0xff] %v5091_v8  ;;  %7074 = vst [vmem:[#allocation66_spill] sm:$0xff] %v5094_v42  ;;  %v1284_v25 = vsub.f32 %v1260_v50, %v1276_v49  ;;  %v1364_v54 = vmul.f32 1.25, %v5044_v30  ;;  %4034 = vmatprep.subr.bf16.mxu1 %v4344_v23  ;;  %v5101_v33 = vmul.f32 0.8333333, %v5007_v52  ;;  %v1373_v2 = vmul.f32 %v1365_v18, %v5081_v39  ;;  %v4339_v30 = vld [vmem:[#allocation3 + $0x160] sm:$0xff]  }
  0x9f   : > { %v1285_v4 = vsub.f32 %v1261_v15, %v1277_v35  ;;  %v5104_v7 = vmul.f32 0.8333333, %v5011_v56  ;;  %v2068_v17 = vmul.f32 0.8333333, %v4877_v57  ;;  %v2069_v26 = vmul.f32 0.8333333, %v4883_v0 }
  0xa0   : > { %7075 = vst [vmem:[#allocation67_spill] sm:$0xff] %v5101_v33  ;;  %v1372_v6 = vmul.f32 %v1364_v54, %v5079_v1  ;;  %v2084_v20 = vmul.f32 0.8333333, %v5014_v51  ;;  %v5115_v50 = vmul.f32 %v5101_v33, %v1252_v24  ;;  %v2085_v15 = vmul.f32 0.8333333, %v5022_v37  ;;  %v5122_v57 = vld [vmem:[%s4580_s10 + $0x28] sm:$0xff] }
  0xa1   : > { %7076 = vst [vmem:[#allocation68_spill] sm:$0xff] %v5104_v7  ;;  %v5118_v52 = vmul.f32 %v5104_v7, %v1253_v48  ;;  %v2076_v56 = vmul.f32 %v2068_v17, %v1252_v24  ;;  %4035 = vmatpush3.bf16.msra.mxu1 %v4344_v23  ;;  %v5126_v34 = vsub.f32 %v1357_v60, %v1373_v2  ;;  %vm302_vm10 = vcmp.ge.f32.partialorder %v5112_v43, -2.2  ;;  %v4419_v2 = vld [vmem:[#allocation3 + $0x140] sm:$0xff]  }
  0xa2   : > { %7077 = vst [vmem:[#allocation69_spill] sm:$0xff] %v5115_v50  ;;  %v5124_v14 = vsub.f32 %v1356_v53, %v1372_v6  ;;  %v2077_v0 = vmul.f32 %v2069_v26, %v1253_v48  ;;  %v2092_v51 = vmul.f32 %v2084_v20, %v1284_v25  ;;  %4044 = vmatprep.subr.bf16.mxu1 %v4346_v5  ;;  %vm303_vm11 = vcmp.ge.f32.partialorder %v5122_v57, -2.2 }
  0xa3   : > { %7078 = vst [vmem:[#allocation70_spill] sm:$0xff] %v5118_v52  ;;  %7080 = vst [vmem:[#allocation72_spill] sm:$0xff] %v5126_v34  ;;  %v2093_v58 = vmul.f32 %v2085_v15, %v1285_v4  ;;  %v5129_v55 = vmul.f32 %v4921_v3, %v1284_v25  ;;  %v5132_v49 = vmul.f32 %v4923_v46, %v1285_v4  ;;  %v3622_v35 = vsel %vm302_vm10, 1.0, %v4962_v36  ;;  %v4333_v25 = vld [vmem:[#allocation3 + $0x148] sm:$0xff]  }
  0xa4   : > { %7079 = vst [vmem:[#allocation71_spill] sm:$0xff] %v5124_v14  ;;  %v2100_v37 = vsub.f32 %v2076_v56, %v2092_v51  ;;  %v5136_v24 = vmul.f32 %v2084_v20, %v5124_v14  ;;  %v5139_v23 = vmul.f32 %v2085_v15, %v5126_v34  ;;  %v3623_v3 = vsel %vm303_vm11, 1.0, %v4962_v36 }
  0xa5   : > { %v2101_v48 = vsub.f32 %v2077_v0, %v2093_v58  ;;  %vm326_vm12 = vcmp.ge.f32.partialorder %v5112_v43, -1.8  ;;  %vm327_vm13 = vcmp.ge.f32.partialorder %v5122_v57, -1.8  ;;  %vm350_vm14 = vcmp.ge.f32.partialorder %v5112_v43, -1.4 }
  0xa6   : > { %7081 = vst [vmem:[#allocation73_spill] sm:$0xff] %v5136_v24  ;;  %7082 = vst [vmem:[#allocation74_spill] sm:$0xff] %v5139_v23  ;;  %v3630_v46 = vsel %vm326_vm12, 1.0, %v4962_v36  ;;  %vm374_vm15 = vcmp.ge.f32.partialorder %v5112_v43, -1.0  ;;  %v3631_v60 = vsel %vm327_vm13, 1.0, %v4962_v36  ;;  %v3638_v54 = vsel %vm350_vm14, 1.0, %v4962_v36 }
  0xa7   : > { %v2107_v53 = vpack.c.bf16 %v2101_v48, %v2100_v37  ;;  %vm351_vm0 = vcmp.ge.f32.partialorder %v5122_v57, -1.4  ;;  %vm375_vm1 = vcmp.ge.f32.partialorder %v5122_v57, -1.0  ;;  %v3646_v5 = vsel %vm374_vm15, 1.0, %v4962_v36  ;;  %v4335_v0 = vld [vmem:[#allocation3 + $0x150] sm:$0xff]   ;;  %v4337_v23 = vld [vmem:[#allocation3 + $0x158] sm:$0xff]  }
  0xa8   : > { %v3639_v18 = vsel %vm351_vm0, 1.0, %v4962_v36  ;;  %vm398_vm2 = vcmp.ge.f32.partialorder %v5112_v43, -0.6  ;;  %v3647_v4 = vsel %vm375_vm1, 1.0, %v4962_v36  ;;  %vm399_vm3 = vcmp.ge.f32.partialorder %v5122_v57, -0.6 }
  0xa9   : > { %4109 = vmatmul.mubr.bf16.vlgmr.msra.gmra.mrb[0].mxu0 %v2107_v53  ;;  %v5159_v17 = vsel %vm398_vm2, 1.0, %v4962_v36  ;;  %v590_v6 = vsub.f32 %v3622_v35, %v3630_v46  ;;  %v5162_v26 = vsel %vm399_vm3, 1.0, %v4962_v36  ;;  %v591_v20 = vsub.f32 %v3623_v3, %v3631_v60 }
  0xaa   : > { %4117 = vmatpush3.bf16.msra.mxu0 %v4419_v2  ;;  %v598_v56 = vsub.f32 %v3630_v46, %v3638_v54  ;;  %v599_v15 = vsub.f32 %v3631_v60, %v3639_v18  ;;  %v606_v51 = vsub.f32 %v3638_v54, %v3646_v5  ;;  %v607_v58 = vsub.f32 %v3639_v18, %v3647_v4 }
  0xab   : > { %4118 = vmatprep.subr.bf16.mxu0 %v4333_v25  ;;  %v5165_v37 = vsub.f32 %v3646_v5, %v5159_v17  ;;  %v5168_v48 = vsub.f32 %v3647_v4, %v5162_v26  ;;  %v5171_v35 = vadd.f32 2.2, %v5112_v43  ;;  %v5174_v53 = vadd.f32 2.2, %v5122_v57 }
  0xac   : > { %v5177_v3 = vadd.f32 1.4, %v5112_v43  ;;  %v5181_v46 = vmul.f32 %v4751_v11, %v4726_v10  ;;  %v5184_v60 = vadd.f32 1.4, %v5122_v57  ;;  %v5187_v54 = vadd.f32 1.8, %v5112_v43 }
  0xad   : > { %v5190_v18 = vadd.f32 1.8, %v5122_v57  ;;  %v5194_v5 = vmul.f32 %v4754_v12, %v4729_v16  ;;  %v686_v4 = vmul.f32 2.5, %v5171_v35  ;;  %v687_v2 = vmul.f32 2.5, %v5174_v53 }
  0xae   : > { %7083 = vst [vmem:[#allocation75_spill] sm:$0xff] %v5177_v3  ;;  %7084 = vst [vmem:[#allocation76_spill] sm:$0xff] %v5184_v60  ;;  %4119 = vmatpush3.bf16.msra.mxu0 %v4333_v25  ;;  %v710_v10 = vmul.f32 2.5, %v5177_v3  ;;  %v5200_v11 = vadd.f32 1.0, %v5112_v43  ;;  %v711_v24 = vmul.f32 2.5, %v5184_v60  ;;  %v742_v39 = vmul.f32 2.5, %v5187_v54 }
  0xaf   : > { %7085 = vst [vmem:[#allocation77_spill] sm:$0xff] %v5187_v54  ;;  %7086 = vst [vmem:[#allocation78_spill] sm:$0xff] %v5190_v18  ;;  %4120 = vmatprep.subr.bf16.mxu0 %v4335_v0  ;;  %v743_v1 = vmul.f32 2.5, %v5190_v18  ;;  %v5206_v16 = vadd.f32 1.0, %v5122_v57  ;;  %v694_v12 = vmul.f32 %v686_v4, %v590_v6  ;;  %v695_v25 = vmul.f32 %v687_v2, %v591_v20 }
  0xb0   : > { %v718_v62 = vmul.f32 %v710_v10, %v598_v56  ;;  %v766_v40 = vmul.f32 2.5, %v5200_v11  ;;  %v719_v29 = vmul.f32 %v711_v24, %v599_v15  ;;  %v750_v28 = vmul.f32 %v742_v39, %v598_v56 }
  0xb1   : > { %v751_v34 = vmul.f32 %v743_v1, %v599_v15  ;;  %v5210_v52 = vmul.f32 2.5, %v5206_v16  ;;  %v790_v19 = vmul.f32 %v710_v10, %v606_v51  ;;  %v791_v7 = vmul.f32 %v711_v24, %v607_v58 }
  0xb2   : > { %4121 = vmatpush3.bf16.msra.mxu0 %v4335_v0  ;;  %v726_v50 = vsub.f32 %v694_v12, %v718_v62  ;;  %v774_v14 = vmul.f32 %v766_v40, %v606_v51  ;;  %v727_v33 = vsub.f32 %v695_v25, %v719_v29  ;;  %v3750_v20 = vadd.f32 0.6, %v5112_v43 }
  0xb3   : > { %4122 = vmatprep.subr.bf16.mxu0 %v4337_v23  ;;  %v775_v6 = vmul.f32 %v5210_v52, %v607_v58  ;;  %v3751_v4 = vadd.f32 0.6, %v5122_v57  ;;  %v1110_v1 = vmul.f32 1.25, %v5171_v35  ;;  %v1111_v39 = vmul.f32 1.25, %v5174_v53  ;;  %v4341_v58 = vld [vmem:[#allocation3 + $0x168] sm:$0xff]  }
  0xb4   : > { %v782_v2 = vsub.f32 %v750_v28, %v774_v14  ;;  %v5218_v56 = vmul.f32 1.25, %v5200_v11  ;;  %v5220_v15 = vmul.f32 2.5, %v3750_v20  ;;  %v5225_v29 = vmul.f32 1.25, %v5206_v16 }
  0xb5   : > { %v783_v62 = vsub.f32 %v751_v34, %v775_v6  ;;  %v5222_v24 = vmul.f32 2.5, %v3751_v4  ;;  %v1118_v0 = vmul.f32 %v1110_v1, %v726_v50  ;;  %v1119_v51 = vmul.f32 %v1111_v39, %v727_v33 }
  0xb6   : > { %4123 = vmatpush3.bf16.msra.mxu0 %v4337_v23  ;;  %v1134_v28 = vmul.f32 %v5218_v56, %v782_v2  ;;  %v1150_v14 = vmul.f32 1.25, %v5187_v54  ;;  %v814_v10 = vmul.f32 %v5220_v15, %v5165_v37  ;;  %v1151_v25 = vmul.f32 1.25, %v5190_v18 }
  0xb7   : > { %4124 = vmatprep.subr.bf16.mxu0 %v4339_v30  ;;  %v815_v34 = vmul.f32 %v5222_v24, %v5168_v48  ;;  %v1135_v12 = vmul.f32 %v5225_v29, %v783_v62  ;;  %v5235_v50 = vmul.f32 1.25, %v3750_v20  ;;  %v5237_v33 = vmul.f32 1.25, %v3751_v4 }
  0xb8   : > { %v1142_v6 = vsub.f32 %v1118_v0, %v1134_v28  ;;  %v1158_v23 = vmul.f32 %v1150_v14, %v782_v2  ;;  %v5239_v1 = vsub.f32 %v790_v19, %v814_v10  ;;  %v1159_v60 = vmul.f32 %v1151_v25, %v783_v62 }
  0xb9   : > { %v5241_v39 = vsub.f32 %v791_v7, %v815_v34  ;;  %v1143_v54 = vsub.f32 %v1119_v51, %v1135_v12  ;;  %v1422_v3 = vmul.f32 0.8333333, %v5171_v35  ;;  %v1423_v42 = vmul.f32 0.8333333, %v5174_v53  ;;  %v4345_v51 = vld [vmem:[#allocation3 + $0x178] sm:$0xff]  }
  0xba   : > { %7087 = vst [vmem:[#allocation79_spill] sm:$0xff] %v5239_v1  ;;  %4125 = vmatpush3.bf16.msra.mxu0 %v4339_v30  ;;  %v5245_v8 = vmul.f32 0.8333333, %v3750_v20  ;;  %v5248_v0 = vmul.f32 %v766_v40, %v5165_v37  ;;  %v1174_v2 = vmul.f32 %v5235_v50, %v5239_v1  ;;  %v5254_v7 = vmul.f32 0.8333333, %v3751_v4  ;;  %v4343_v30 = vld [vmem:[#allocation3 + $0x170] sm:$0xff]  }
  0xbb   : > { %7088 = vst [vmem:[#allocation80_spill] sm:$0xff] %v5241_v39  ;;  %4126 = vmatprep.subr.bf16.mxu0 %v4341_v58  ;;  %v1175_v19 = vmul.f32 %v5237_v33, %v5241_v39  ;;  %vm422_vm4 = vcmp.ge.f32.partialorder %v5112_v43, -0.2  ;;  %v1430_v35 = vmul.f32 %v1422_v3, %v1142_v6  ;;  %v1431_v62 = vmul.f32 %v1423_v42, %v1143_v54 }
  0xbc   : > { %7089 = vst [vmem:[#allocation81_spill] sm:$0xff] %v5245_v8  ;;  %7090 = vst [vmem:[#allocation82_spill] sm:$0xff] %v5254_v7  ;;  %vm423_vm5 = vcmp.ge.f32.partialorder %v5122_v57, -0.2  ;;  %v3662_v53 = vsel %vm422_vm4, 1.0, %v4962_v36  ;;  %v5259_v40 = vsub.f32 %v1158_v23, %v1174_v2  ;;  %v831_v23 = vmul.f32 %v5210_v52, %v5168_v48 }
  0xbd   : > { %v5261_v37 = vsub.f32 %v1159_v60, %v1175_v19  ;;  %v3663_v20 = vsel %vm423_vm5, 1.0, %v4962_v36  ;;  %vm446_vm6 = vcmp.ge.f32.partialorder %v5112_v43, 0.2  ;;  %vm447_vm7 = vcmp.ge.f32.partialorder %v5122_v57, 0.2 }
  0xbe   : > { %7091 = vst [vmem:[#allocation83_spill] sm:$0xff] %v5259_v40  ;;  %4127 = vmatpush3.bf16.msra.mxu0 %v4341_v58  ;;  %v3670_v4 = vsel %vm446_vm6, 1.0, %v4962_v36  ;;  %vm470_vm8 = vcmp.ge.f32.partialorder %v5112_v43, 0.6  ;;  %v622_v42 = vsub.f32 %v5159_v17, %v3662_v53  ;;  %v1446_v3 = vmul.f32 %v5245_v8, %v5259_v40 }
  0xbf   : > { %7092 = vst [vmem:[#allocation84_spill] sm:$0xff] %v5261_v37  ;;  %v1447_v60 = vmul.f32 %v5254_v7, %v5261_v37  ;;  %v3671_v54 = vsel %vm447_vm7, 1.0, %v4962_v36  ;;  %vm471_vm9 = vcmp.ge.f32.partialorder %v5122_v57, 0.6  ;;  %4128 = vmatprep.subr.bf16.mxu0 %v4343_v30  ;;  %v5276_v28 = vsel %vm470_vm8, 1.0, %v4962_v36 }
  0xc0   : > { %v5279_v14 = vsel %vm471_vm9, 1.0, %v4962_v36  ;;  %v623_v17 = vsub.f32 %v5162_v26, %v3663_v20  ;;  %v630_v58 = vsub.f32 %v3662_v53, %v3670_v4  ;;  %v1454_v10 = vsub.f32 %v1430_v35, %v1446_v3 }
  0xc1   : > { %v1455_v34 = vsub.f32 %v1431_v62, %v1447_v60  ;;  %v631_v12 = vsub.f32 %v3663_v20, %v3671_v54  ;;  %v5283_v25 = vsub.f32 %v3670_v4, %v5276_v28  ;;  %v5286_v6 = vsub.f32 %v3671_v54, %v5279_v14  ;;  %v5301_v20 = vld [vmem:[#allocation3 + $0x180] sm:$0xff]  }
  0xc2   : > { %v5291_v2 = vadd.f32 0.2, %v5112_v43  ;;  %v5294_v19 = vadd.f32 0.2, %v5122_v57  ;;  %4129 = vmatpush3.bf16.msra.mxu0 %v4343_v30  ;;  %v870_v35 = vmul.f32 %v5220_v15, %v622_v42  ;;  %v871_v62 = vmul.f32 %v5222_v24, %v623_v17  ;;  %7095 = vst [vmem:[#allocation87_spill] sm:$0xff] %v5301_v20 }
  0xc3   : > { %v1460_v26 = vpack.c.bf16 %v1455_v34, %v1454_v10  ;;  %v5299_v53 = vadd.f32 -0.2, %v5112_v43  ;;  %4130 = vmatprep.subr.bf16.mxu0 %v4345_v51  ;;  %v5306_v4 = vadd.f32 -0.2, %v5122_v57  ;;  %v3774_v30 = vadd.f32 -0.6, %v5112_v43 }
  0xc4   : > { %7093 = vst [vmem:[#allocation85_spill] sm:$0xff] %v5294_v19  ;;  %v846_v52 = vmul.f32 2.5, %v5291_v2  ;;  %v847_v48 = vmul.f32 2.5, %v5294_v19  ;;  %v3775_v24 = vadd.f32 -0.6, %v5122_v57 }
  0xc5   : > { %7094 = vst [vmem:[#allocation86_spill] sm:$0xff] %v5299_v53  ;;  %7096 = vst [vmem:[#allocation88_spill] sm:$0xff] %v5306_v4  ;;  %4016 = vmatprep.mubr.bf16.mxu1 %v1460_v26  ;;  %v5310_v15 = vmul.f32 2.5, %v5299_v53  ;;  %v5314_v3 = vmul.f32 1.25, %v5299_v53  ;;  %v2070_v60 = vmul.f32 0.8333333, %v5200_v11 }
  0xc6   : > { %v854_v54 = vmul.f32 %v846_v52, %v622_v42  ;;  %v855_v10 = vmul.f32 %v847_v48, %v623_v17  ;;  %v5318_v34 = vmul.f32 2.5, %v5306_v4  ;;  %v910_v37 = vmul.f32 %v846_v52, %v630_v58  ;;  %4131 = vmatpush3.bf16.msra.mxu0 %v4345_v51 }
  0xc7   : > { %7097 = vst [vmem:[#allocation89_spill] sm:$0xff] %v5314_v3  ;;  %v894_v40 = vmul.f32 %v5310_v15, %v630_v58  ;;  %v911_v26 = vmul.f32 %v847_v48, %v631_v12  ;;  %v5321_v18 = vmul.f32 2.5, %v3774_v30  ;;  %v5323_v39 = vmul.f32 2.5, %v3775_v24  ;;  %4140 = vmatprep.subr.bf16.mxu0 %v5301_v20 }
  0xc8   : > { %v5327_v53 = vsub.f32 %v5248_v0, %v854_v54  ;;  %v5329_v11 = vsub.f32 %v831_v23, %v855_v10  ;;  %v895_v42 = vmul.f32 %v5318_v34, %v631_v12  ;;  %v5333_v51 = vmul.f32 1.25, %v5306_v4 }
  0xc9   : > { %7098 = vst [vmem:[#allocation90_spill] sm:$0xff] %v5321_v18  ;;  %7099 = vst [vmem:[#allocation91_spill] sm:$0xff] %v5323_v39  ;;  %v902_v17 = vsub.f32 %v870_v35, %v894_v40  ;;  %v934_v58 = vmul.f32 %v5321_v18, %v5283_v25  ;;  %v935_v52 = vmul.f32 %v5323_v39, %v5286_v6  ;;  %v5339_v48 = vmul.f32 1.25, %v3774_v30  ;;  %v5354_v39 = vld [vmem:[%s4580_s10 + $0x30] sm:$0xff]  ;;  %v5357_v18 = vld [vmem:[%s4580_s10 + $0x38] sm:$0xff] }
  0xca   : > { %7100 = vst [vmem:[#allocation92_spill] sm:$0xff] %v5327_v53  ;;  %7101 = vst [vmem:[#allocation93_spill] sm:$0xff] %v5329_v11  ;;  %v903_v0 = vsub.f32 %v871_v62, %v895_v42  ;;  %v1230_v23 = vmul.f32 %v5218_v56, %v5327_v53  ;;  %v1231_v54 = vmul.f32 %v5225_v29, %v5329_v11  ;;  %v5345_v12 = vmul.f32 1.25, %v3775_v24 }
  0xcb   : > { %7102 = vst [vmem:[#allocation94_spill] sm:$0xff] %v5333_v51  ;;  %7103 = vst [vmem:[#allocation95_spill] sm:$0xff] %v5339_v48  ;;  %v5347_v10 = vsub.f32 %v910_v37, %v934_v58  ;;  %v5349_v40 = vsub.f32 %v911_v26, %v935_v52  ;;  %v1246_v35 = vmul.f32 %v5314_v3, %v902_v17  ;;  %v2071_v29 = vmul.f32 0.8333333, %v5206_v16 }
  0xcc   : > { %7104 = vst [vmem:[#allocation96_spill] sm:$0xff] %v5345_v12  ;;  %v1262_v4 = vmul.f32 %v5235_v50, %v902_v17  ;;  %v1247_v62 = vmul.f32 %v5333_v51, %v903_v0  ;;  %v1263_v56 = vmul.f32 %v5237_v33, %v903_v0  ;;  %v5362_v42 = vmul.f32 0.8333333, %v3774_v30 }
  0xcd   : > { %7105 = vst [vmem:[#allocation97_spill] sm:$0xff] %v5347_v10  ;;  %7106 = vst [vmem:[#allocation98_spill] sm:$0xff] %v5349_v40  ;;  %v5364_v37 = vsub.f32 %v1230_v23, %v1246_v35  ;;  %v1278_v26 = vmul.f32 %v5339_v48, %v5347_v10  ;;  %v1279_v50 = vmul.f32 %v5345_v12, %v5349_v40  ;;  %v5370_v17 = vmul.f32 0.8333333, %v3775_v24 }
  0xce   : > { %7107 = vst [vmem:[#allocation99_spill] sm:$0xff] %v5362_v42  ;;  %v5372_v58 = vsub.f32 %v1231_v54, %v1247_v62  ;;  %vm304_vm10 = vcmp.ge.f32.partialorder %v5354_v39, -2.2  ;;  %vm305_vm11 = vcmp.ge.f32.partialorder %v5357_v18, -2.2  ;;  %vm376_vm0 = vcmp.ge.f32.partialorder %v5354_v39, -1.0 }
  0xcf   : > { %7108 = vst [vmem:[#allocation100_spill] sm:$0xff] %v5364_v37  ;;  %7109 = vst [vmem:[#allocation101_spill] sm:$0xff] %v5370_v17  ;;  %vm328_vm12 = vcmp.ge.f32.partialorder %v5354_v39, -1.8  ;;  %v5377_v16 = vsub.f32 %v1262_v4, %v1278_v26  ;;  %v5379_v33 = vsub.f32 %v1263_v56, %v1279_v50  ;;  %v2078_v30 = vmul.f32 %v2070_v60, %v5364_v37 }
  0xd0   : > { %7110 = vst [vmem:[#allocation102_spill] sm:$0xff] %v5372_v58  ;;  %v3624_v52 = vsel %vm304_vm10, 1.0, %v4962_v36  ;;  %v2079_v0 = vmul.f32 %v2071_v29, %v5372_v58  ;;  %v3625_v24 = vsel %vm305_vm11, 1.0, %v4962_v36  ;;  %vm329_vm13 = vcmp.ge.f32.partialorder %v5357_v18, -1.8 }
  0xd1   : > { %7111 = vst [vmem:[#allocation103_spill] sm:$0xff] %v5377_v16  ;;  %7112 = vst [vmem:[#allocation104_spill] sm:$0xff] %v5379_v33  ;;  %v3632_v23 = vsel %vm328_vm12, 1.0, %v4962_v36  ;;  %v2094_v54 = vmul.f32 %v5362_v42, %v5377_v16  ;;  %v2095_v4 = vmul.f32 %v5370_v17, %v5379_v33  ;;  %v3633_v35 = vsel %vm329_vm13, 1.0, %v4962_v36 }
  0xd2   : > { %vm352_vm14 = vcmp.ge.f32.partialorder %v5354_v39, -1.4  ;;  %vm353_vm15 = vcmp.ge.f32.partialorder %v5357_v18, -1.4  ;;  %vm377_vm1 = vcmp.ge.f32.partialorder %v5357_v18, -1.0  ;;  %v3648_v26 = vsel %vm376_vm0, 1.0, %v4962_v36 }
  0xd3   : > { %v3640_v60 = vsel %vm352_vm14, 1.0, %v4962_v36  ;;  %v2102_v62 = vsub.f32 %v2078_v30, %v2094_v54  ;;  %v2103_v56 = vsub.f32 %v2079_v0, %v2095_v4  ;;  %v3641_v29 = vsel %vm353_vm15, 1.0, %v4962_v36 }
  0xd4   : > { %v3649_v50 = vsel %vm377_vm1, 1.0, %v4962_v36  ;;  %vm400_vm2 = vcmp.ge.f32.partialorder %v5354_v39, -0.6  ;;  %vm401_vm3 = vcmp.ge.f32.partialorder %v5357_v18, -0.6  ;;  %v592_v17 = vsub.f32 %v3624_v52, %v3632_v23 }
  0xd5   : > { %v2108_v42 = vpack.c.bf16 %v2103_v56, %v2102_v62  ;;  %v5403_v12 = vsel %vm400_vm2, 1.0, %v4962_v36  ;;  %v5406_v48 = vsel %vm401_vm3, 1.0, %v4962_v36  ;;  %v593_v30 = vsub.f32 %v3625_v24, %v3633_v35 }
  0xd6   : > { %v600_v0 = vsub.f32 %v3632_v23, %v3640_v60  ;;  %v601_v54 = vsub.f32 %v3633_v35, %v3641_v29  ;;  %v608_v4 = vsub.f32 %v3640_v60, %v3648_v26  ;;  %v609_v58 = vsub.f32 %v3641_v29, %v3649_v50 }
  0xd7   : > { %4112 = vmatprep.mubr.bf16.mxu0 %v2108_v42  ;;  %v5409_v37 = vsub.f32 %v3648_v26, %v5403_v12  ;;  %v5412_v51 = vsub.f32 %v3649_v50, %v5406_v48  ;;  %v3720_v52 = vadd.f32 2.2, %v5354_v39  ;;  %v3721_v62 = vadd.f32 2.2, %v5357_v18  ;;  %v7116_v42 = vld [vmem:[#allocation12_spill] sm:$0xff] }
  0xd8   : > { %v5417_v56 = vadd.f32 1.4, %v5354_v39  ;;  %v5420_v24 = vadd.f32 1.4, %v5357_v18  ;;  %v5423_v23 = vadd.f32 1.8, %v5354_v39  ;;  %v5427_v35 = vmul.f32 %v7116_v42, %v4813_v13 }
  0xd9   : > { %v688_v60 = vmul.f32 2.5, %v3720_v52  ;;  %v689_v29 = vmul.f32 2.5, %v3721_v62  ;;  %v5430_v26 = vadd.f32 1.8, %v5357_v18  ;;  %v5433_v50 = vadd.f32 1.0, %v5354_v39 }
  0xda   : > { %7113 = vst [vmem:[#allocation105_spill] sm:$0xff] %v5417_v56  ;;  %7114 = vst [vmem:[#allocation106_spill] sm:$0xff] %v5420_v24  ;;  %v712_v3 = vmul.f32 2.5, %v5417_v56  ;;  %v713_v11 = vmul.f32 2.5, %v5420_v24  ;;  %v744_v1 = vmul.f32 2.5, %v5423_v23  ;;  %v5439_v53 = vadd.f32 1.0, %v5357_v18 }
  0xdb   : > { %7115 = vst [vmem:[#allocation107_spill] sm:$0xff] %v5423_v23  ;;  %7117 = vst [vmem:[#allocation12_spill] sm:$0xff] %v5430_v26  ;;  %v696_v63 = vmul.f32 %v688_v60, %v592_v17  ;;  %v697_v13 = vmul.f32 %v689_v29, %v593_v30  ;;  %v745_v42 = vmul.f32 2.5, %v5430_v26  ;;  %v5443_v41 = vmul.f32 2.5, %v5433_v50 }
  0xdc   : > { %v720_v32 = vmul.f32 %v712_v3, %v600_v0  ;;  %v721_v44 = vmul.f32 %v713_v11, %v601_v54  ;;  %v752_v31 = vmul.f32 %v744_v1, %v600_v0  ;;  %v5446_v47 = vmul.f32 2.5, %v5439_v53 }
  0xdd   : > { %v753_v56 = vmul.f32 %v745_v42, %v601_v54  ;;  %v776_v24 = vmul.f32 %v5443_v41, %v608_v4  ;;  %v792_v9 = vmul.f32 %v712_v3, %v608_v4  ;;  %v793_v27 = vmul.f32 %v713_v11, %v609_v58 }
  0xde   : > { %v728_v20 = vsub.f32 %v696_v63, %v720_v32  ;;  %v729_v40 = vsub.f32 %v697_v13, %v721_v44  ;;  %v777_v17 = vmul.f32 %v5446_v47, %v609_v58  ;;  %v3752_v30 = vadd.f32 0.6, %v5354_v39 }
  0xdf   : > { %v784_v60 = vsub.f32 %v752_v31, %v776_v24  ;;  %v3753_v29 = vadd.f32 0.6, %v5357_v18  ;;  %v1112_v10 = vmul.f32 1.25, %v3720_v52  ;;  %v1113_v7 = vmul.f32 1.25, %v3721_v62 }
  0xe0   : > { %v785_v1 = vsub.f32 %v753_v56, %v777_v17  ;;  %v808_v0 = vmul.f32 2.5, %v3752_v30  ;;  %v5453_v33 = vmul.f32 1.25, %v5433_v50  ;;  %v5456_v54 = vmul.f32 1.25, %v5439_v53 }
  0xe1   : > { %v809_v3 = vmul.f32 2.5, %v3753_v29  ;;  %v1120_v32 = vmul.f32 %v1112_v10, %v728_v20  ;;  %v1121_v44 = vmul.f32 %v1113_v7, %v729_v40  ;;  %v1152_v63 = vmul.f32 1.25, %v5423_v23 }
  0xe2   : > { %v816_v11 = vmul.f32 %v808_v0, %v5409_v37  ;;  %v1136_v31 = vmul.f32 %v5453_v33, %v784_v60  ;;  %v1137_v58 = vmul.f32 %v5456_v54, %v785_v1  ;;  %v1153_v4 = vmul.f32 1.25, %v5430_v26 }
  0xe3   : > { %v817_v56 = vmul.f32 %v809_v3, %v5412_v51  ;;  %v1160_v24 = vmul.f32 %v1152_v63, %v784_v60  ;;  %v5464_v13 = vmul.f32 1.25, %v3752_v30  ;;  %v5466_v42 = vmul.f32 1.25, %v3753_v29 }
  0xe4   : > { %v5468_v17 = vsub.f32 %v792_v9, %v816_v11  ;;  %v1144_v7 = vsub.f32 %v1120_v32, %v1136_v31  ;;  %v1145_v20 = vsub.f32 %v1121_v44, %v1137_v58  ;;  %v1161_v10 = vmul.f32 %v1153_v4, %v785_v1 }
  0xe5   : > { %v5470_v40 = vsub.f32 %v793_v27, %v817_v56  ;;  %v1424_v23 = vmul.f32 0.8333333, %v3720_v52  ;;  %v1425_v8 = vmul.f32 0.8333333, %v3721_v62  ;;  %v5472_v16 = vmul.f32 0.8333333, %v3752_v30 }
  0xe6   : > { %7118 = vst [vmem:[#allocation108_spill] sm:$0xff] %v5468_v17  ;;  %v1176_v26 = vmul.f32 %v5464_v13, %v5468_v17  ;;  %v5476_v19 = vmul.f32 0.8333333, %v3753_v29  ;;  %vm424_vm4 = vcmp.ge.f32.partialorder %v5354_v39, -0.2  ;;  %vm494_vm10 = vcmp.ge.f32.partialorder %v5112_v43, 1.0 }
  0xe7   : > { %7119 = vst [vmem:[#allocation109_spill] sm:$0xff] %v5470_v40  ;;  %vm425_vm5 = vcmp.ge.f32.partialorder %v5357_v18, -0.2  ;;  %v1177_v9 = vmul.f32 %v5466_v42, %v5470_v40  ;;  %v1432_v60 = vmul.f32 %v1424_v23, %v1144_v7  ;;  %v1433_v1 = vmul.f32 %v1425_v8, %v1145_v20 }
  0xe8   : > { %v3664_v27 = vsel %vm424_vm4, 1.0, %v4962_v36  ;;  %v5483_v52 = vsub.f32 %v1160_v24, %v1176_v26  ;;  %v3665_v62 = vsel %vm425_vm5, 1.0, %v4962_v36  ;;  %vm448_vm6 = vcmp.ge.f32.partialorder %v5354_v39, 0.2 }
  0xe9   : > { %vm449_vm7 = vcmp.ge.f32.partialorder %v5357_v18, 0.2  ;;  %v5488_v30 = vsub.f32 %v1161_v10, %v1177_v9  ;;  %v3672_v29 = vsel %vm448_vm6, 1.0, %v4962_v36  ;;  %vm472_vm8 = vcmp.ge.f32.partialorder %v5354_v39, 0.6 }
  0xea   : > { %7120 = vst [vmem:[#allocation110_spill] sm:$0xff] %v5483_v52  ;;  %v3673_v32 = vsel %vm449_vm7, 1.0, %v4962_v36  ;;  %v1448_v8 = vmul.f32 %v5472_v16, %v5483_v52  ;;  %vm473_vm9 = vcmp.ge.f32.partialorder %v5357_v18, 0.6  ;;  %v5497_v23 = vsel %vm472_vm8, 1.0, %v4962_v36 }
  0xeb   : > { %7121 = vst [vmem:[#allocation111_spill] sm:$0xff] %v5488_v30  ;;  %v624_v26 = vsub.f32 %v5403_v12, %v3664_v27  ;;  %v1449_v44 = vmul.f32 %v5476_v19, %v5488_v30  ;;  %v5503_v63 = vsel %vm473_vm9, 1.0, %v4962_v36  ;;  %v625_v11 = vsub.f32 %v5406_v48, %v3665_v62 }
  0xec   : > { %v632_v31 = vsub.f32 %v3664_v27, %v3672_v29  ;;  %v1456_v58 = vsub.f32 %v1432_v60, %v1448_v8  ;;  %v633_v4 = vsub.f32 %v3665_v62, %v3673_v32  ;;  %v5507_v56 = vsub.f32 %v3672_v29, %v5497_v23 }
  0xed   : > { %v5510_v24 = vsub.f32 %v3673_v32, %v5503_v63  ;;  %v1457_v7 = vsub.f32 %v1433_v1, %v1449_v44  ;;  %v832_v12 = vmul.f32 %v5443_v41, %v5409_v37  ;;  %v833_v20 = vmul.f32 %v5446_v47, %v5412_v51 }
  0xee   : > { %v5517_v36 = vadd.f32 0.2, %v5354_v39  ;;  %v5520_v48 = vadd.f32 0.2, %v5357_v18  ;;  %v872_v10 = vmul.f32 %v808_v0, %v624_v26  ;;  %v873_v9 = vmul.f32 %v809_v3, %v625_v11 }
  0xef   : > { %v5523_v60 = vadd.f32 -0.2, %v5354_v39  ;;  %v1461_v27 = vpack.c.bf16 %v1457_v7, %v1456_v58  ;;  %v5527_v62 = vadd.f32 -0.2, %v5357_v18  ;;  %v3776_v41 = vadd.f32 -0.6, %v5354_v39 }
  0xf0   : > { %v848_v1 = vmul.f32 2.5, %v5517_v36  ;;  %v849_v47 = vmul.f32 2.5, %v5520_v48  ;;  %v3777_v37 = vadd.f32 -0.6, %v5357_v18  ;;  %vm495_vm11 = vcmp.ge.f32.partialorder %v5122_v57, 1.0 }
  0xf1   : > { %7122 = vst [vmem:[#allocation112_spill] sm:$0xff] %v5523_v60  ;;  %7123 = vst [vmem:[#allocation113_spill] sm:$0xff] %v5527_v62  ;;  %v5532_v51 = vmul.f32 2.5, %v5523_v60  ;;  %v5536_v0 = vmul.f32 1.25, %v5523_v60  ;;  %4017 = vmatmul.mubr.bf16.gmra.mrb[4].mxu1 %v1461_v27  ;;  %v5539_v29 = vmul.f32 2.5, %v5527_v62  ;;  %v5541_v8 = vmul.f32 2.5, %v3776_v41 }
  0xf2   : > { %v856_v3 = vmul.f32 %v848_v1, %v624_v26  ;;  %v912_v32 = vmul.f32 %v848_v1, %v632_v31  ;;  %v857_v44 = vmul.f32 %v849_v47, %v625_v11  ;;  %v913_v7 = vmul.f32 %v849_v47, %v633_v4 }
  0xf3   : > { %7124 = vst [vmem:[#allocation114_spill] sm:$0xff] %v5536_v0  ;;  %7125 = vst [vmem:[#allocation115_spill] sm:$0xff] %v5541_v8  ;;  %v896_v58 = vmul.f32 %v5532_v51, %v632_v31  ;;  %v5544_v30 = vmul.f32 2.5, %v3777_v37  ;;  %v897_v40 = vmul.f32 %v5539_v29, %v633_v4  ;;  %v936_v27 = vmul.f32 %v5541_v8, %v5507_v56  ;;  %v7149_v8 = vld [vmem:[#allocation13_spill] sm:$0xff] }
  0xf4   : > { %v5546_v52 = vsub.f32 %v832_v12, %v856_v3  ;;  %v5552_v26 = vmul.f32 1.25, %v5527_v62  ;;  %v5554_v60 = vsub.f32 %v833_v20, %v857_v44  ;;  %v5558_v31 = vmul.f32 1.25, %v3776_v41 }
  0xf5   : > { %7126 = vst [vmem:[#allocation116_spill] sm:$0xff] %v5544_v30  ;;  %v904_v1 = vsub.f32 %v872_v10, %v896_v58  ;;  %v937_v11 = vmul.f32 %v5544_v30, %v5510_v24  ;;  %v905_v47 = vsub.f32 %v873_v9, %v897_v40  ;;  %v5560_v17 = vsub.f32 %v912_v32, %v936_v27  ;;  %v7148_v30 = vld [vmem:[#allocation35_spill] sm:$0xff] }
  0xf6   : > { %7127 = vst [vmem:[#allocation117_spill] sm:$0xff] %v5546_v52  ;;  %7128 = vst [vmem:[#allocation118_spill] sm:$0xff] %v5552_v26  ;;  %v1232_v4 = vmul.f32 %v5453_v33, %v5546_v52  ;;  %v5564_v12 = vmul.f32 1.25, %v3777_v37  ;;  %v1233_v20 = vmul.f32 %v5456_v54, %v5554_v60  ;;  %v2072_v32 = vmul.f32 0.8333333, %v5433_v50 }
  0xf7   : > { %7129 = vst [vmem:[#allocation119_spill] sm:$0xff] %v5554_v60  ;;  %7130 = vst [vmem:[#allocation120_spill] sm:$0xff] %v5558_v31  ;;  %v5566_v3 = vsub.f32 %v913_v7, %v937_v11  ;;  %v1248_v10 = vmul.f32 %v5536_v0, %v904_v1  ;;  %v1264_v44 = vmul.f32 %v5464_v13, %v904_v1  ;;  %v2073_v54 = vmul.f32 0.8333333, %v5439_v53 }
  0xf8   : > { %7131 = vst [vmem:[#allocation121_spill] sm:$0xff] %v5564_v12  ;;  %v1249_v40 = vmul.f32 %v5552_v26, %v905_v47  ;;  %v1265_v9 = vmul.f32 %v5466_v42, %v905_v47  ;;  %v1280_v33 = vmul.f32 %v5558_v31, %v5560_v17  ;;  %v5582_v27 = vmul.f32 0.8333333, %v3776_v41  ;;  %v5591_v42 = vld [vmem:[%s4580_s10] sm:$0xff]  ;;  %v7146_v26 = vld [vmem:[#allocation40_spill] sm:$0xff] }
  0xf9   : > { %v5577_v58 = vsub.f32 %v1232_v4, %v1248_v10  ;;  %v1281_v7 = vmul.f32 %v5564_v12, %v5566_v3  ;;  %v5588_v11 = vmul.f32 0.8333333, %v3777_v37  ;;  %7136 = vst [vmem:[#allocation126_spill] sm:$0xff] %v5591_v42  ;;  %v3610_v47 = vmul.f32 -1.442695, %v5591_v42  ;;  %v5598_v10 = vld [vmem:[%s4580_s10 + $0x8] sm:$0xff] }
  0xfa   : > { %7133 = vst [vmem:[#allocation123_spill] sm:$0xff] %v5582_v27  ;;  %v5584_v13 = vsub.f32 %v1233_v20, %v1249_v40  ;;  %v5586_v1 = vsub.f32 %v1264_v44, %v1280_v33  ;;  %7137 = vst [vmem:[#allocation127_spill] sm:$0xff] %v5598_v10  ;;  %v3611_v53 = vmul.f32 -1.442695, %v5598_v10  ;;  %v3778_v41 = vadd.f32 -1.0, %v5591_v42  ;;  %v7139_v33 = vld [vmem:[#allocation17_spill] sm:$0xff] }
  0xfb   : > { %7132 = vst [vmem:[#allocation122_spill] sm:$0xff] %v5577_v58  ;;  %7135 = vst [vmem:[#allocation125_spill] sm:$0xff] %v5588_v11  ;;  %v5594_v50 = vsub.f32 %v1265_v9, %v1281_v7  ;;  %v2080_v4 = vmul.f32 %v2072_v32, %v5577_v58  ;;  %4386 = vpow2.f32 %v3610_v47  ;;  %v3779_v44 = vadd.f32 -1.0, %v5598_v10 }
  0xfc   : > { %7134 = vst [vmem:[#allocation124_spill] sm:$0xff] %v5584_v13  ;;  %v2081_v20 = vmul.f32 %v2073_v54, %v5584_v13  ;;  %v2096_v37 = vmul.f32 %v5582_v27, %v5586_v1  ;;  %4388 = vpow2.f32 %v3611_v53  ;;  %v5608_v9 = vmul.f32 2.5, %v3778_v41  ;;  %v7141_v54 = vld [vmem:[#allocation18_spill] sm:$0xff]  ;;  %v7143_v13 = vld [vmem:[#allocation37_spill] sm:$0xff]  ;;  %v7144_v53 = vld [vmem:[#allocation28_spill] sm:$0xff] }
  0xfd   : > { %v2097_v40 = vmul.f32 %v5588_v11, %v5594_v50  ;;  %v5611_v32 = vmul.f32 1.25, %v7139_v33  ;;  %v5613_v12 = vmul.f32 2.5, %v3779_v44  ;;  %v5616_v31 = vmul.f32 1.25, %v7141_v54 }
  0xfe   : > { %7138 = vst [vmem:[#allocation128_spill] sm:$0xff] %v5608_v9  ;;  %v2104_v7 = vsub.f32 %v2080_v4, %v2096_v37  ;;  %v5618_v47 = vmul.f32 1.25, %v3778_v41  ;;  %v970_v11 = vmul.f32 %v5608_v9, %v7143_v13  ;;  %v5624_v62 = vmul.f32 1.25, %v3779_v44  ;;  %v7147_v37 = vld [vmem:[#allocation30_spill] sm:$0xff]  ;;  %v5636_v9 = vld [vmem:[%s4580_s10 + $0x10] sm:$0xff] }
  0xff   : > { %7140 = vst [vmem:[#allocation17_spill] sm:$0xff] %v5613_v12  ;;  %v2105_v27 = vsub.f32 %v2081_v20, %v2097_v40  ;;  %v1290_v58 = vmul.f32 %v5611_v32, %v7144_v53  ;;  %v971_v4 = vmul.f32 %v5613_v12, %v7146_v26  ;;  %v1291_v0 = vmul.f32 %v5616_v31, %v7147_v37  ;;  %v5643_v12 = vld [vmem:[%s4580_s10 + $0x18] sm:$0xff] }
 0x100   : > { %7142 = vst [vmem:[#allocation129_spill] sm:$0xff] %v5618_v47  ;;  %7145 = vst [vmem:[#allocation28_spill] sm:$0xff] %v5624_v62  ;;  %v2248_v60 = vmul.f32 %v7149_v8, %v7148_v30  ;;  %v2255_v52 = vmul.f32 0.8333333, %v3778_v41  ;;  %v5633_v20 = vsub.f32 %v5181_v46, %v970_v11  ;;  %v2256_v40 = vmul.f32 0.8333333, %v3779_v44 }
 0x101   : > { %v2109_v54 = vpack.c.bf16 %v2105_v27, %v2104_v7  ;;  %v3612_v53 = vmul.f32 -1.442695, %v5636_v9  ;;  %v5640_v13 = vsub.f32 %v5194_v5, %v971_v4  ;;  %v3613_v37 = vmul.f32 -1.442695, %v5643_v12 }
 0x102   : > { %v5647_v26 = vmul.f32 1.25, %v5017_v45  ;;  %v5650_v30 = vmul.f32 1.25, %v5025_v22  ;;  %v1306_v46 = vmul.f32 %v5618_v47, %v5633_v20  ;;  %v2257_v8 = vmul.f32 0.8333333, %v5017_v45 }
 0x103   : > { %4113 = vmatmul.mubr.bf16.gmra.mrb[4].mxu0 %v2109_v54  ;;  %4390 = vpow2.f32 %v3612_v53  ;;  %v2258_v5 = vmul.f32 0.8333333, %v5025_v22  ;;  %v1307_v27 = vmul.f32 %v5624_v62, %v5640_v13  ;;  %v3614_v7 = vmul.f32 -1.442695, %v5112_v43 }
 0x104   : > { %7150 = vst [vmem:[#allocation30_spill] sm:$0xff] %v5647_v26  ;;  %7151 = vst [vmem:[#allocation35_spill] sm:$0xff] %v5650_v30  ;;  %4392 = vpow2.f32 %v3613_v37  ;;  %v1308_v11 = vmul.f32 %v5647_v26, %v5049_v59  ;;  %v1309_v41 = vmul.f32 %v5650_v30, %v5051_v21  ;;  %v5662_v44 = vsub.f32 %v1290_v58, %v1306_v46  ;;  %v5677_v37 = vld [vmem:[#allocation2] sm:$0xff] }
 0x105   : > { %v3615_v54 = vmul.f32 -1.442695, %v5122_v57  ;;  %v4387_v45 = vpop.eup %4386  ;;  %v5667_v22 = vsub.f32 %v1291_v0, %v1307_v27  ;;  %4394 = vpow2.f32 %v3614_v7  ;;  %v5680_v46 = vsel %vm494_vm10, 1.0, %v5677_v37 }
 0x106   : > { %v5670_v4 = vsub.f32 %v5086_v61, %v1308_v11  ;;  %v5673_v53 = vsub.f32 %v5088_v38, %v1309_v41  ;;  %v4389_v59 = vpop.eup %4388  ;;  %v246_v21 = vadd.f32 1.0, %v4387_v45  ;;  %v2263_v58 = vmul.f32 %v2255_v52, %v5662_v44 }
 0x107   : > { %v247_v0 = vadd.f32 1.0, %v4389_v59  ;;  %v2264_v27 = vmul.f32 %v2256_v40, %v5667_v22  ;;  %v5687_v41 = vsel %vm495_vm11, 1.0, %v5677_v37  ;;  %v5691_v52 = vsub.f32 %v5276_v28, %v5680_v46 }
 0x108   : > { %v2265_v61 = vmul.f32 %v2257_v8, %v5670_v4  ;;  %v2266_v38 = vmul.f32 %v2258_v5, %v5673_v53  ;;  %4396 = vrcp.f32 %v246_v21  ;;  %v2271_v11 = vsub.f32 %v5427_v35, %v2263_v58  ;;  %v4349_v58 = vld [vmem:[#allocation3 + $0x188] sm:$0xff]  }
 0x109   : > { %4398 = vrcp.f32 %v247_v0  ;;  %v2272_v7 = vsub.f32 %v2248_v60, %v2264_v27  ;;  %v5697_v8 = vsub.f32 %v5279_v14, %v5687_v41  ;;  %v950_v35 = vmul.f32 %v5310_v15, %v5283_v25  ;;  %v7153_v0 = vld [vmem:[#allocation103_spill] sm:$0xff]  ;;  %v7154_v27 = vld [vmem:[#allocation81_spill] sm:$0xff]  ;;  %v7155_v15 = vld [vmem:[#allocation104_spill] sm:$0xff] }
 0x10a   : > { %v2273_v45 = vsub.f32 %v5129_v55, %v2265_v61  ;;  %v2274_v40 = vsub.f32 %v5132_v49, %v2266_v38  ;;  %4400 = vpow2.f32 %v3615_v54  ;;  %v951_v5 = vmul.f32 %v5318_v34, %v5286_v6  ;;  %v7152_v54 = vld [vmem:[#allocation85_spill] sm:$0xff]  ;;  %v7156_v6 = vld [vmem:[#allocation82_spill] sm:$0xff] }
 0x10b   : > { %v2279_v59 = vpack.c.bf16 %v2272_v7, %v2271_v11  ;;  %v3782_v21 = vadd.f32 -1.0, %v5112_v43  ;;  %v3783_v60 = vadd.f32 -1.0, %v5122_v57  ;;  %v5706_v49 = vmul.f32 1.25, %v5291_v2 }
 0x10c   : > { %v2280_v28 = vpack.c.bf16 %v2274_v40, %v2273_v45  ;;  %v5709_v14 = vmul.f32 1.25, %v7152_v54  ;;  %v5713_v25 = vmul.f32 %v7154_v27, %v7153_v0  ;;  %v5717_v34 = vmul.f32 %v7156_v6, %v7155_v15  ;;  %v7160_v45 = vld [vmem:[#allocation97_spill] sm:$0xff]  ;;  %v7161_v0 = vld [vmem:[#allocation98_spill] sm:$0xff]  ;;  %v7163_v15 = vld [vmem:[#allocation87_spill] sm:$0xff] }
 0x10d   : > { %v4391_v55 = vpop.eup %4390  ;;  %4132 = vmatprep.mubr.bf16.mxu0 %v2279_v59  ;;  %v5719_v57 = vmul.f32 2.5, %v3782_v21  ;;  %v5721_v38 = vmul.f32 2.5, %v3783_v60  ;;  %v5723_v11 = vmul.f32 1.25, %v3782_v21  ;;  %v1294_v40 = vmul.f32 %v5706_v49, %v7160_v45  ;;  %v4351_v59 = vld [vmem:[#allocation3 + $0x190] sm:$0xff]  }
 0x10e   : > { %v4393_v61 = vpop.eup %4392  ;;  %v248_v43 = vadd.f32 1.0, %v4391_v55  ;;  %4133 = vmatmul.mubr.bf16.vlgmr.msra.gmra.mrb[0].mxu0 %v2280_v28  ;;  %v1295_v27 = vmul.f32 %v5709_v14, %v7161_v0  ;;  %v5729_v30 = vmul.f32 1.25, %v3783_v60  ;;  %v2260_v45 = vmul.f32 0.8333333, %v3783_v60 }
 0x10f   : > { %7157 = vst [vmem:[#allocation13_spill] sm:$0xff] %v5719_v57  ;;  %7158 = vst [vmem:[#allocation85_spill] sm:$0xff] %v5721_v38  ;;  %v249_v7 = vadd.f32 1.0, %v4393_v61  ;;  %4141 = vmatpush3.bf16.msra.mxu0 %v7163_v15  ;;  %v974_v55 = vmul.f32 %v5719_v57, %v5691_v52  ;;  %v975_v6 = vmul.f32 %v5721_v38, %v5697_v8  ;;  %v2259_v61 = vmul.f32 0.8333333, %v3782_v21  ;;  %v4395_v28 = vpop.eup %4394 }
 0x110   : > { %7159 = vst [vmem:[#allocation103_spill] sm:$0xff] %v5723_v11  ;;  %7162 = vst [vmem:[#allocation81_spill] sm:$0xff] %v5729_v30  ;;  %4402 = vrcp.f32 %v248_v43  ;;  %4142 = vmatprep.subr.bf16.mxu0 %v4349_v58  ;;  %v3616_v26 = vmul.f32 -1.442695, %v5354_v39  ;;  %v3617_v0 = vmul.f32 -1.442695, %v5357_v18  ;;  %v952_v60 = vmul.f32 %v5532_v51, %v5507_v56 }
 0x111   : > { %4404 = vrcp.f32 %v249_v7  ;;  %v250_v62 = vadd.f32 1.0, %v4395_v28  ;;  %v5738_v43 = vsub.f32 %v950_v35, %v974_v55  ;;  %v5740_v15 = vsub.f32 %v951_v5, %v975_v6  ;;  %v4353_v6 = vld [vmem:[#allocation3 + $0x198] sm:$0xff]  }
 0x112   : > { %vm496_vm12 = vcmp.ge.f32.partialorder %v5354_v39, 1.0  ;;  %v4397_v47 = vpop.eup %4396  ;;  %4406 = vpow2.f32 %v3616_v26  ;;  %vm497_vm13 = vcmp.ge.f32.partialorder %v5357_v18, 1.0  ;;  %vm514_vm14 = vcmp.ge.f32.partialorder %v5591_v42, 1.4 }
 0x113   : > { %v5745_v21 = vsel %vm496_vm12, 1.0, %v5677_v37  ;;  %v4399_v7 = vpop.eup %4398  ;;  %v270_v38 = vmul.f32 %v5591_v42, %v4397_v47  ;;  %4143 = vmatpush3.bf16.msra.mxu0 %v4349_v58  ;;  %4408 = vrcp.f32 %v250_v62  ;;  %v1310_v35 = vmul.f32 %v5723_v11, %v5738_v43 }
 0x114   : > { %7164 = vst [vmem:[#allocation104_spill] sm:$0xff] %v5745_v21  ;;  %v1311_v5 = vmul.f32 %v5729_v30, %v5740_v15  ;;  %v4401_v26 = vpop.eup %4400  ;;  %v271_v55 = vmul.f32 %v5598_v10, %v4399_v7  ;;  %4144 = vmatprep.subr.bf16.mxu0 %v4351_v59  ;;  %4410 = vpow2.f32 %v3617_v0  ;;  %v5756_v28 = vsel %vm497_vm13, 1.0, %v5677_v37 }
 0x115   : > { %7165 = vst [vmem:[#allocation82_spill] sm:$0xff] %v5756_v28  ;;  %v5760_v56 = vsub.f32 %v5497_v23, %v5745_v21  ;;  %v251_v62 = vadd.f32 1.0, %v4401_v26  ;;  %v5762_v51 = vsub.f32 %v1294_v40, %v1310_v35  ;;  %v5768_v58 = vsub.f32 %v5503_v63, %v5756_v28  ;;  %v4355_v63 = vld [vmem:[#allocation3 + $0x1a0] sm:$0xff]  }
 0x116   : > { %v5764_v47 = vsub.f32 %v1295_v27, %v1311_v5  ;;  %v278_v7 = vpack.c.bf16 %v271_v55, %v270_v38  ;;  %v953_v0 = vmul.f32 %v5539_v29, %v5510_v24  ;;  %v3784_v30 = vadd.f32 -1.0, %v5354_v39 }
 0x117   : > { %7166 = vst [vmem:[#allocation97_spill] sm:$0xff] %v5768_v58  ;;  %v3785_v11 = vadd.f32 -1.0, %v5357_v18  ;;  %4145 = vmatpush3.bf16.msra.mxu0 %v4351_v59  ;;  %4412 = vrcp.f32 %v251_v62  ;;  %v2267_v23 = vmul.f32 %v2259_v61, %v5762_v51  ;;  %v5777_v27 = vmul.f32 1.25, %v5517_v36 }
 0x118   : > { %v2268_v40 = vmul.f32 %v2260_v45, %v5764_v47  ;;  %4036 = vmatprep.mubr.bf16.mxu1 %v278_v7  ;;  %4146 = vmatprep.subr.bf16.mxu0 %v4353_v6  ;;  %v5779_v38 = vmul.f32 2.5, %v3784_v30  ;;  %v5784_v24 = vmul.f32 1.25, %v5520_v48  ;;  %v5786_v29 = vmul.f32 1.25, %v3784_v30 }
 0x119   : > { %v5781_v35 = vmul.f32 2.5, %v3785_v11  ;;  %v2275_v61 = vsub.f32 %v5713_v25, %v2267_v23  ;;  %v1296_v5 = vmul.f32 %v5777_v27, %v5560_v17  ;;  %v5792_v26 = vmul.f32 1.25, %v3785_v11 }
 0x11a   : > { %7167 = vst [vmem:[#allocation98_spill] sm:$0xff] %v5779_v38  ;;  %7169 = vst [vmem:[#allocation130_spill] sm:$0xff] %v5786_v29  ;;  %v4403_v59 = vpop.eup %4402  ;;  %v2276_v45 = vsub.f32 %v5717_v34, %v2268_v40  ;;  %v976_v7 = vmul.f32 %v5779_v38, %v5760_v56  ;;  %v1297_v28 = vmul.f32 %v5784_v24, %v5566_v3  ;;  %v4357_v40 = vld [vmem:[#allocation3 + $0x1a8] sm:$0xff]   ;;  %v2261_v3 = vmul.f32 0.8333333, %v3784_v30 }
 0x11b   : > { %7168 = vst [vmem:[#allocation87_spill] sm:$0xff] %v5781_v35  ;;  %7170 = vst [vmem:[#allocation131_spill] sm:$0xff] %v5792_v26  ;;  %v4405_v55 = vpop.eup %4404  ;;  %v272_v62 = vmul.f32 %v5636_v9, %v4403_v59  ;;  %v977_v57 = vmul.f32 %v5781_v35, %v5768_v58  ;;  %4147 = vmatpush3.bf16.msra.mxu0 %v4353_v6  ;;  %v5804_v17 = vmul.f32 %v5472_v16, %v5586_v1  ;;  %v7171_v1 = vld [vmem:[#allocation6_spill] sm:$0xff]  ;;  %v7172_v38 = vld [vmem:[#allocation7_spill] sm:$0xff] }
 0x11c   : > { %v273_v25 = vmul.f32 %v5643_v12, %v4405_v55  ;;  %v2281_v34 = vpack.c.bf16 %v2276_v45, %v2275_v61  ;;  %v5808_v9 = vmul.f32 %v5476_v19, %v5594_v50  ;;  %v4407_v23 = vpop.eup %4406  ;;  %4148 = vmatprep.subr.bf16.mxu0 %v4355_v63  ;;  %v5810_v59 = vsub.f32 %v952_v60, %v976_v7  ;;  %v4348_v45 = vld [vmem:[#allocation3 + $0x88] sm:$0xff]   ;;  %v5817_v58 = vld [vmem:[%s4580_s10 + $0x20] sm:$0xff] }
 0x11d   : > { %v5812_v35 = vsub.f32 %v953_v0, %v977_v57  ;;  %v2262_v12 = vmul.f32 0.8333333, %v3785_v11  ;;  %v4409_v6 = vpop.eup %4408  ;;  %v252_v16 = vadd.f32 1.0, %v4407_v23  ;;  %v1186_v55 = vmul.f32 1.25, %v7171_v1  ;;  %v7173_v11 = vld [vmem:[#allocation24_spill] sm:$0xff]  ;;  %v4426_v23 = vld [vmem:[#allocation3 + $0x80] sm:$0xff]  }
 0x11e   : > { %v279_v61 = vpack.c.bf16 %v273_v25, %v272_v62  ;;  %4136 = vmatprep.mubr.bf16.mxu0 %v2281_v34  ;;  %v1187_v19 = vmul.f32 1.25, %v7172_v38  ;;  %v4411_v50 = vpop.eup %4410  ;;  %v274_v21 = vmul.f32 %v5817_v58, %v4409_v6  ;;  %v1312_v57 = vmul.f32 %v5786_v29, %v5810_v59  ;;  %v7174_v62 = vld [vmem:[#allocation10_spill] sm:$0xff]  ;;  %v7175_v25 = vld [vmem:[#allocation11_spill] sm:$0xff]  ;;  %v4359_v6 = vld [vmem:[#allocation3 + $0x1b0] sm:$0xff]  }
 0x11f   : > { %v1313_v30 = vmul.f32 %v5792_v26, %v5812_v35  ;;  %v1210_v60 = vmul.f32 %v5611_v32, %v7173_v11  ;;  %4149 = vmatpush3.bf16.msra.mxu0 %v4355_v63  ;;  %v253_v0 = vadd.f32 1.0, %v4411_v50  ;;  %4414 = vrcp.f32 %v252_v16  ;;  %v7176_v26 = vld [vmem:[#allocation25_spill] sm:$0xff]  ;;  %v4350_v16 = vld [vmem:[#allocation3 + $0x90] sm:$0xff]   ;;  %v7209_v1 = vld [vmem:[#allocation43_spill] sm:$0xff] }
 0x120   : > { %4037 = vmatmul.mubr.bf16.vlgmr.msra.gmra.mrb[0].mxu1 %v279_v61  ;;  %v1194_v7 = vmul.f32 %v1186_v55, %v7174_v62  ;;  %v1195_v34 = vmul.f32 %v1187_v19, %v7175_v25  ;;  %4150 = vmatprep.subr.bf16.mxu0 %v4357_v40  ;;  %v5828_v29 = vsub.f32 %v1296_v5, %v1312_v57  ;;  %v7177_v61 = vld [vmem:[#allocation8_spill] sm:$0xff]  ;;  %v7179_v19 = vld [vmem:[#allocation9_spill] sm:$0xff]  ;;  %v1720_v62 = vmul.f32 0.8333333, %v7139_v33  ;;  %v5840_v25 = vld [vmem:[%s4580_s10 + $0x28] sm:$0xff] }
 0x121   : > { %4045 = vmatpush3.bf16.msra.mxu1 %v4426_v23  ;;  %v5830_v38 = vsub.f32 %v1297_v28, %v1313_v30  ;;  %v1211_v32 = vmul.f32 %v5616_v31, %v7176_v26  ;;  %v1704_v63 = vmul.f32 0.8333333, %v7177_v61  ;;  %v4413_v50 = vpop.eup %4412  ;;  %4416 = vrcp.f32 %v253_v0  ;;  %v7181_v57 = vld [vmem:[#allocation14_spill] sm:$0xff]  ;;  %v7182_v0 = vld [vmem:[#allocation15_spill] sm:$0xff] }
 0x122   : > { %4046 = vmatprep.subr.bf16.mxu1 %v4348_v45  ;;  %v5835_v55 = vsub.f32 %v1194_v7, %v1210_v60  ;;  %v1705_v11 = vmul.f32 0.8333333, %v7179_v19  ;;  %v275_v28 = vmul.f32 %v5840_v25, %v4413_v50  ;;  %v2269_v5 = vmul.f32 %v2261_v3, %v5828_v29  ;;  %v7183_v7 = vld [vmem:[#allocation18_spill] sm:$0xff]  ;;  %v7188_v19 = vld [vmem:[#allocation37_spill] sm:$0xff] }
 0x123   : > { %v2270_v31 = vmul.f32 %v2262_v12, %v5830_v38  ;;  %v5845_v26 = vsub.f32 %v1195_v34, %v1211_v32  ;;  %4151 = vmatpush3.bf16.msra.mxu0 %v4357_v40  ;;  %v1712_v30 = vmul.f32 %v1704_v63, %v7181_v57  ;;  %v1721_v23 = vmul.f32 0.8333333, %v7183_v7  ;;  %v4352_v12 = vld [vmem:[#allocation3 + $0x98] sm:$0xff]  }
 0x124   : > { %7178 = vst [vmem:[#allocation24_spill] sm:$0xff] %v5835_v55  ;;  %v1713_v60 = vmul.f32 %v1705_v11, %v7182_v0  ;;  %v1728_v61 = vmul.f32 %v1720_v62, %v5835_v55  ;;  %v280_v33 = vpack.c.bf16 %v275_v28, %v274_v21  ;;  %4152 = vmatprep.subr.bf16.mxu0 %v4359_v6  ;;  %v4361_v40 = vld [vmem:[#allocation3 + $0x1b8] sm:$0xff]   ;;  %vm515_vm15 = vcmp.ge.f32.partialorder %v5598_v10, 1.4  ;;  %v7193_v0 = vld [vmem:[#allocation23_spill] sm:$0xff] }
 0x125   : > { %7180 = vst [vmem:[#allocation10_spill] sm:$0xff] %v5845_v26  ;;  %4047 = vmatpush3.bf16.msra.mxu1 %v4348_v45  ;;  %v2277_v50 = vsub.f32 %v5804_v17, %v2269_v5  ;;  %v2278_v3 = vsub.f32 %v5808_v9, %v2270_v31  ;;  %v1729_v34 = vmul.f32 %v1721_v23, %v5845_v26  ;;  %v5857_v63 = vsel %vm514_vm14, 1.0, %v5677_v37  ;;  %v7186_v17 = vld [vmem:[#allocation16_spill] sm:$0xff]  ;;  %v7189_v11 = vld [vmem:[#allocation21_spill] sm:$0xff]  ;;  %v7201_v26 = vld [vmem:[#allocation42_spill] sm:$0xff] }
 0x126   : > { %4048 = vmatprep.subr.bf16.mxu1 %v4350_v16  ;;  %v1736_v32 = vsub.f32 %v1712_v30, %v1728_v61  ;;  %7184 = vst [vmem:[#allocation11_spill] sm:$0xff] %v5857_v63  ;;  %4040 = vmatprep.mubr.bf16.mxu1 %v280_v33  ;;  %v5860_v45 = vsel %vm515_vm15, 1.0, %v5677_v37  ;;  %v5864_v9 = vsub.f32 %v7186_v17, %v5857_v63  ;;  %v7190_v31 = vld [vmem:[#allocation36_spill] sm:$0xff]  ;;  %v3786_v61 = vadd.f32 -1.4, %v5591_v42  ;;  %v7195_v17 = vld [vmem:[#allocation26_spill] sm:$0xff] }
 0x127   : > { %v2282_v21 = vpack.c.bf16 %v2278_v3, %v2277_v50  ;;  %7185 = vst [vmem:[#allocation25_spill] sm:$0xff] %v5860_v45  ;;  %v986_v28 = vmul.f32 %v7189_v11, %v7188_v19  ;;  %4153 = vmatpush3.bf16.msra.mxu0 %v4359_v6  ;;  %v1737_v5 = vsub.f32 %v1713_v60, %v1729_v34  ;;  %v7192_v30 = vld [vmem:[#allocation40_spill] sm:$0xff]  ;;  %v3787_v33 = vadd.f32 -1.4, %v5598_v10  ;;  %v7194_v50 = vld [vmem:[#allocation22_spill] sm:$0xff]  ;;  %v7200_v63 = vld [vmem:[#allocation61_spill] sm:$0xff] }
 0x128   : > { %7187 = vst [vmem:[#allocation8_spill] sm:$0xff] %v5864_v9  ;;  %v5870_v57 = vsub.f32 %v7190_v31, %v5860_v45  ;;  %v987_v7 = vmul.f32 %v7193_v0, %v7192_v30  ;;  %v1322_v3 = vmul.f32 %v7194_v50, %v5633_v20  ;;  %v1323_v6 = vmul.f32 %v7195_v17, %v5640_v13  ;;  %v5883_v34 = vld [vmem:[#allocation3 + $0x1c0] sm:$0xff]   ;;  %v7198_v45 = vld [vmem:[#allocation59_spill] sm:$0xff] }
 0x129   : > { %4049 = vmatpush3.bf16.msra.mxu1 %v4350_v16  ;;  %4137 = vmatmul.mubr.bf16.gmra.mrb[4].mxu0 %v2282_v21  ;;  %v5881_v60 = vmul.f32 %v1720_v62, %v5662_v44  ;;  %v4415_v19 = vpop.eup %4414  ;;  %v4354_v11 = vld [vmem:[#allocation3 + $0xa0] sm:$0xff]   ;;  %v1744_v31 = vpack.c.bf16 %v1737_v5, %v1736_v32  ;;  %v5885_v16 = vmul.f32 2.5, %v3786_v61  ;;  %v1330_v21 = vmul.f32 1.25, %v3786_v61  ;;  %v7199_v32 = vld [vmem:[#allocation41_spill] sm:$0xff] }
 0x12a   : > { %7191 = vst [vmem:[#allocation9_spill] sm:$0xff] %v5870_v57  ;;  %4050 = vmatprep.subr.bf16.mxu1 %v4352_v12  ;;  %4154 = vmatprep.subr.bf16.mxu0 %v4361_v40  ;;  %v5888_v30 = vmul.f32 %v1721_v23, %v5667_v22  ;;  %v276_v20 = vmul.f32 %v4415_v19, %v5354_v39  ;;  %v5891_v0 = vmul.f32 2.5, %v3787_v33  ;;  %v1331_v13 = vmul.f32 1.25, %v3787_v33  ;;  %v7204_v19 = vld [vmem:[#allocation52_spill] sm:$0xff]  ;;  %v7208_v10 = vld [vmem:[#allocation62_spill] sm:$0xff] }
 0x12b   : > { %7196 = vst [vmem:[#allocation14_spill] sm:$0xff] %v5885_v16  ;;  %v2428_v44 = vmul.f32 0.8333333, %v3786_v61  ;;  %v4417_v62 = vpop.eup %4416  ;;  %4155 = vmatpush3.bf16.msra.mxu0 %v4361_v40  ;;  %v1010_v50 = vmul.f32 %v5885_v16, %v5864_v9  ;;  %v2429_v17 = vmul.f32 0.8333333, %v3787_v33  ;;  %v5897_v5 = vsub.f32 %v7199_v32, %v7198_v45  ;;  %v7203_v40 = vld [vmem:[#allocation51_spill] sm:$0xff] }
 0x12c   : > { %7197 = vst [vmem:[#allocation15_spill] sm:$0xff] %v5891_v0  ;;  %v5901_v22 = vsub.f32 %v7201_v26, %v7200_v63  ;;  %v277_v39 = vmul.f32 %v4417_v62, %v5357_v18  ;;  %v1011_v23 = vmul.f32 %v5891_v0, %v5870_v57  ;;  %4164 = vmatprep.subr.bf16.mxu0 %v5883_v34  ;;  %v1722_v61 = vmul.f32 0.8333333, %v7203_v40  ;;  %v4356_v16 = vld [vmem:[#allocation3 + $0xa8] sm:$0xff]   ;;  %v7205_v32 = vld [vmem:[#allocation53_spill] sm:$0xff]  ;;  %v7206_v26 = vld [vmem:[#allocation54_spill] sm:$0xff] }
 0x12d   : > { %4051 = vmatpush3.bf16.msra.mxu1 %v4352_v12  ;;  %v1723_v33 = vmul.f32 0.8333333, %v7204_v19  ;;  %v5909_v45 = vsub.f32 %v986_v28, %v1010_v50  ;;  %v1332_v9 = vmul.f32 1.25, %v7205_v32  ;;  %v1333_v63 = vmul.f32 1.25, %v7206_v26  ;;  %v7207_v19 = vld [vmem:[#allocation60_spill] sm:$0xff] }
 0x12e   : > { %7202 = vst [vmem:[#allocation18_spill] sm:$0xff] %v5901_v22  ;;  %4052 = vmatprep.subr.bf16.mxu1 %v4354_v11  ;;  %v2430_v12 = vmul.f32 0.8333333, %v7205_v32  ;;  %v281_v18 = vpack.c.bf16 %v277_v39, %v276_v20  ;;  %v5914_v62 = vsub.f32 %v987_v7, %v1011_v23  ;;  %v1730_v0 = vmul.f32 %v1722_v61, %v5897_v5  ;;  %v7210_v20 = vld [vmem:[#allocation44_spill] sm:$0xff] }
 0x12f   : > { %v1731_v57 = vmul.f32 %v1723_v33, %v5901_v22  ;;  %v1338_v40 = vmul.f32 %v1330_v21, %v5909_v45  ;;  %v1340_v55 = vmul.f32 %v1332_v9, %v7207_v19  ;;  %v1341_v28 = vmul.f32 %v1333_v63, %v7208_v10  ;;  %v4358_v23 = vld [vmem:[#allocation3 + $0xb0] sm:$0xff]   ;;  %v7211_v21 = vld [vmem:[#allocation65_spill] sm:$0xff]  ;;  %v7212_v10 = vld [vmem:[#allocation66_spill] sm:$0xff] }
 0x130   : > { %v2422_v50 = vmul.f32 %v1722_v61, %v5670_v4  ;;  %v1339_v42 = vmul.f32 %v1331_v13, %v5914_v62  ;;  %v1738_v32 = vsub.f32 %v7209_v1, %v1730_v0  ;;  %v2423_v39 = vmul.f32 %v1723_v33, %v5673_v53  ;;  %4041 = vmatmul.mubr.bf16.gmra.mrb[4].mxu1 %v281_v18  ;;  %v7214_v0 = vld [vmem:[#allocation76_spill] sm:$0xff]  ;;  %v7218_v19 = vld [vmem:[#allocation93_spill] sm:$0xff] }
 0x131   : > { %4053 = vmatpush3.bf16.msra.mxu1 %v4354_v11  ;;  %v1739_v7 = vsub.f32 %v7210_v20, %v1731_v57  ;;  %v5926_v22 = vsub.f32 %v1322_v3, %v1338_v40  ;;  %v5929_v9 = vsub.f32 %v7211_v21, %v1340_v55  ;;  %v5932_v63 = vsub.f32 %v7212_v10, %v1341_v28  ;;  %v7213_v57 = vld [vmem:[#allocation75_spill] sm:$0xff]  ;;  %v7215_v33 = vld [vmem:[#allocation92_spill] sm:$0xff]  ;;  %v7220_v10 = vld [vmem:[#allocation78_spill] sm:$0xff] }
 0x132   : > { %4054 = vmatprep.subr.bf16.mxu1 %v4356_v16  ;;  %v2431_v4 = vmul.f32 0.8333333, %v7206_v26  ;;  %4060 = vmatprep.mubr.bf16.mxu1 %v1744_v31  ;;  %v5935_v11 = vsub.f32 %v1323_v6, %v1339_v42  ;;  %v1190_v53 = vmul.f32 1.25, %v7213_v57  ;;  %v1191_v13 = vmul.f32 1.25, %v7214_v0  ;;  %v7216_v42 = vld [vmem:[#allocation79_spill] sm:$0xff]  ;;  %v7217_v26 = vld [vmem:[#allocation80_spill] sm:$0xff] }
 0x133   : > { %v5937_v1 = vpack.c.bf16 %v1739_v7, %v1738_v32  ;;  %v2436_v3 = vmul.f32 %v2428_v44, %v5926_v22  ;;  %v2438_v61 = vmul.f32 %v2430_v12, %v5929_v9  ;;  %v1214_v18 = vmul.f32 %v5706_v49, %v7215_v33  ;;  %v4360_v32 = vld [vmem:[#allocation3 + $0xb8] sm:$0xff]  }
 0x134   : > { %v2439_v55 = vmul.f32 %v2431_v4, %v5932_v63  ;;  %v2437_v31 = vmul.f32 %v2429_v17, %v5935_v11  ;;  %v1198_v6 = vmul.f32 %v1190_v53, %v7216_v42  ;;  %v1199_v40 = vmul.f32 %v1191_v13, %v7217_v26  ;;  %v7219_v7 = vld [vmem:[#allocation77_spill] sm:$0xff]  ;;  %v7221_v13 = vld [vmem:[#allocation83_spill] sm:$0xff] }
 0x135   : > { %4055 = vmatpush3.bf16.msra.mxu1 %v4356_v16  ;;  %v1215_v28 = vmul.f32 %v5709_v14, %v7218_v19  ;;  %v2444_v44 = vsub.f32 %v5881_v60, %v2436_v3  ;;  %v2446_v12 = vsub.f32 %v2422_v50, %v2438_v61  ;;  %v1708_v21 = vmul.f32 0.8333333, %v7219_v7  ;;  %v7222_v50 = vld [vmem:[#allocation84_spill] sm:$0xff]  ;;  %v4365_v3 = vld [vmem:[#allocation3 + $0x1c8] sm:$0xff]  }
 0x136   : > { %4056 = vmatprep.subr.bf16.mxu1 %v4358_v23  ;;  %v2447_v20 = vsub.f32 %v2423_v39, %v2439_v55  ;;  %v2445_v49 = vsub.f32 %v5888_v30, %v2437_v31  ;;  %v5954_v16 = vsub.f32 %v1198_v6, %v1214_v18  ;;  %v1709_v4 = vmul.f32 0.8333333, %v7220_v10  ;;  %v4362_v30 = vld [vmem:[#allocation3 + $0xc0] sm:$0xff]   ;;  %v7224_v26 = vld [vmem:[#allocation91_spill] sm:$0xff]  ;;  %v4367_v10 = vld [vmem:[#allocation3 + $0x1d0] sm:$0xff]  }
 0x137   : > { %v5956_v17 = vsub.f32 %v1199_v40, %v1215_v28  ;;  %v1716_v33 = vmul.f32 %v1708_v21, %v7221_v13  ;;  %v1724_v14 = vmul.f32 0.8333333, %v5291_v2  ;;  %v1725_v42 = vmul.f32 0.8333333, %v7152_v54  ;;  %v7223_v31 = vld [vmem:[#allocation90_spill] sm:$0xff] }
 0x138   : > { %v2453_v53 = vpack.c.bf16 %v2447_v20, %v2446_v12  ;;  %v2452_v60 = vpack.c.bf16 %v2445_v49, %v2444_v44  ;;  %v1717_v39 = vmul.f32 %v1709_v4, %v7222_v50  ;;  %vm518_vm0 = vcmp.ge.f32.partialorder %v5817_v58, 1.4  ;;  %v7226_v20 = vld [vmem:[#allocation94_spill] sm:$0xff]  ;;  %v4364_v49 = vld [vmem:[#allocation3 + $0xc8] sm:$0xff]  }
 0x139   : > { %4057 = vmatpush3.bf16.msra.mxu1 %v4358_v23  ;;  %vm519_vm1 = vcmp.ge.f32.partialorder %v5840_v25, 1.4  ;;  %v1732_v61 = vmul.f32 %v1724_v14, %v5954_v16  ;;  %v1733_v55 = vmul.f32 %v1725_v42, %v5956_v17  ;;  %v5968_v18 = vsel %vm518_vm0, 1.0, %v5677_v37 }
 0x13a   : > { %4058 = vmatprep.subr.bf16.mxu1 %v4360_v32  ;;  %v5971_v2 = vsel %vm519_vm1, 1.0, %v5677_v37  ;;  %4156 = vmatprep.mubr.bf16.mxu0 %v2452_v60  ;;  %v5975_v54 = vsub.f32 %v5680_v46, %v5968_v18  ;;  %v990_v6 = vmul.f32 %v7223_v31, %v5691_v52  ;;  %v991_v40 = vmul.f32 %v7224_v26, %v5697_v8  ;;  %v7225_v46 = vld [vmem:[#allocation89_spill] sm:$0xff]  ;;  %v7230_v60 = vld [vmem:[#allocation106_spill] sm:$0xff]  ;;  %v7234_v26 = vld [vmem:[#allocation107_spill] sm:$0xff] }
 0x13b   : > { %v5979_v23 = vsub.f32 %v5687_v41, %v5971_v2  ;;  %4157 = vmatmul.mubr.bf16.vlgmr.msra.gmra.mrb[0].mxu0 %v2453_v53  ;;  %v1740_v19 = vsub.f32 %v1716_v33, %v1732_v61  ;;  %v1741_v28 = vsub.f32 %v1717_v39, %v1733_v55  ;;  %v3790_v44 = vadd.f32 -1.4, %v5817_v58  ;;  %v7227_v8 = vld [vmem:[#allocation105_spill] sm:$0xff]  ;;  %v7231_v39 = vld [vmem:[#allocation108_spill] sm:$0xff] }
 0x13c   : > { %v3791_v12 = vadd.f32 -1.4, %v5840_v25  ;;  %4165 = vmatpush3.bf16.msra.mxu0 %v5883_v34  ;;  %v1326_v41 = vmul.f32 %v7225_v46, %v5738_v43  ;;  %v1327_v7 = vmul.f32 %v7226_v20, %v5740_v15  ;;  %v5993_v52 = vmul.f32 %v1724_v14, %v5762_v51  ;;  %v7232_v55 = vld [vmem:[#allocation117_spill] sm:$0xff] }
 0x13d   : > { %4059 = vmatpush3.bf16.msra.mxu1 %v4360_v32  ;;  %v1192_v21 = vmul.f32 1.25, %v7227_v8  ;;  %4166 = vmatprep.subr.bf16.mxu0 %v4365_v3  ;;  %v1746_v4 = vpack.c.bf16 %v1741_v28, %v1740_v19  ;;  %v5996_v53 = vmul.f32 2.5, %v3790_v44  ;;  %v1334_v34 = vmul.f32 1.25, %v3790_v44  ;;  %v7235_v19 = vld [vmem:[#allocation12_spill] sm:$0xff] }
 0x13e   : > { %4068 = vmatprep.subr.bf16.mxu1 %v4362_v30  ;;  %v5998_v32 = vmul.f32 2.5, %v3791_v12  ;;  %v1335_v13 = vmul.f32 1.25, %v3791_v12  ;;  %v6001_v43 = vmul.f32 %v1725_v42, %v5764_v47  ;;  %v2432_v15 = vmul.f32 0.8333333, %v3790_v44  ;;  %v7233_v42 = vld [vmem:[#allocation119_spill] sm:$0xff]  ;;  %v4366_v44 = vld [vmem:[#allocation3 + $0xd0] sm:$0xff]  }
 0x13f   : > { %7228 = vst [vmem:[#allocation16_spill] sm:$0xff] %v5996_v53  ;;  %v2433_v33 = vmul.f32 0.8333333, %v3791_v12  ;;  %v1014_v51 = vmul.f32 %v5996_v53, %v5975_v54  ;;  %v1193_v50 = vmul.f32 1.25, %v7230_v60  ;;  %v1200_v61 = vmul.f32 %v1192_v21, %v7231_v39  ;;  %v4369_v12 = vld [vmem:[#allocation3 + $0x1d8] sm:$0xff]   ;;  %v7237_v21 = vld [vmem:[#allocation110_spill] sm:$0xff] }
 0x140   : > { %7229 = vst [vmem:[#allocation37_spill] sm:$0xff] %v5998_v32  ;;  %4061 = vmatmul.mubr.bf16.vlgmr.msra.gmra.mrb[0].mxu1 %v5937_v1  ;;  %v1015_v14 = vmul.f32 %v5998_v32, %v5979_v23  ;;  %4167 = vmatpush3.bf16.msra.mxu0 %v4365_v3  ;;  %v1216_v47 = vmul.f32 %v5777_v27, %v7232_v55  ;;  %v1710_v1 = vmul.f32 0.8333333, %v7234_v26  ;;  %v1711_v28 = vmul.f32 0.8333333, %v7235_v19  ;;  %v7238_v55 = vld [vmem:[#allocation111_spill] sm:$0xff] }
 0x141   : > { %4069 = vmatpush3.bf16.msra.mxu1 %v4362_v30  ;;  %v1217_v31 = vmul.f32 %v5784_v24, %v7233_v42  ;;  %4168 = vmatprep.subr.bf16.mxu0 %v4367_v10  ;;  %v6016_v46 = vsub.f32 %v990_v6, %v1014_v51  ;;  %v7236_v30 = vld [vmem:[#allocation109_spill] sm:$0xff]  ;;  %v1726_v27 = vmul.f32 0.8333333, %v5517_v36  ;;  %v1727_v26 = vmul.f32 0.8333333, %v5520_v48  ;;  %v6032_v51 = vld [vmem:[%s4580_s10 + $0x30] sm:$0xff] }
 0x142   : > { %4070 = vmatprep.subr.bf16.mxu1 %v4364_v49  ;;  %v6018_v20 = vsub.f32 %v991_v40, %v1015_v14  ;;  %v1201_v3 = vmul.f32 %v1193_v50, %v7236_v30  ;;  %4064 = vmatprep.mubr.bf16.mxu1 %v1746_v4  ;;  %v6022_v24 = vsub.f32 %v1200_v61, %v1216_v47  ;;  %vm520_vm2 = vcmp.ge.f32.partialorder %v6032_v51, 1.4  ;;  %v6037_v4 = vld [vmem:[%s4580_s10 + $0x38] sm:$0xff]  ;;  %v4371_v50 = vld [vmem:[#allocation3 + $0x1e0] sm:$0xff]  }
 0x143   : > { %v1718_v39 = vmul.f32 %v1710_v1, %v7237_v21  ;;  %v1719_v42 = vmul.f32 %v1711_v28, %v7238_v55  ;;  %v1342_v19 = vmul.f32 %v1334_v34, %v6016_v46  ;;  %vm521_vm3 = vcmp.ge.f32.partialorder %v6037_v4, 1.4  ;;  %v7240_v34 = vld [vmem:[#allocation115_spill] sm:$0xff]  ;;  %v4368_v14 = vld [vmem:[#allocation3 + $0xd8] sm:$0xff]   ;;  %v7242_v1 = vld [vmem:[#allocation104_spill] sm:$0xff] }
 0x144   : > { %v1343_v6 = vmul.f32 %v1335_v13, %v6018_v20  ;;  %v6029_v40 = vsub.f32 %v1201_v3, %v1217_v31  ;;  %4169 = vmatpush3.bf16.msra.mxu0 %v4367_v10  ;;  %v1734_v36 = vmul.f32 %v1726_v27, %v6022_v24  ;;  %v6041_v48 = vsel %vm520_vm2, 1.0, %v5677_v37  ;;  %v7245_v3 = vld [vmem:[#allocation97_spill] sm:$0xff]  ;;  %v7246_v21 = vld [vmem:[#allocation116_spill] sm:$0xff] }
 0x145   : > { %4071 = vmatpush3.bf16.msra.mxu1 %v4364_v49  ;;  %7239 = vst [vmem:[#allocation21_spill] sm:$0xff] %v6041_v48  ;;  %v992_v13 = vmul.f32 %v7240_v34, %v5760_v56  ;;  %4170 = vmatprep.subr.bf16.mxu0 %v4369_v12  ;;  %v6045_v61 = vsub.f32 %v1326_v41, %v1342_v19  ;;  %v6051_v47 = vsel %vm521_vm3, 1.0, %v5677_v37  ;;  %v7243_v56 = vld [vmem:[#allocation82_spill] sm:$0xff]  ;;  %vm542_vm6 = vcmp.ge.f32.partialorder %v5817_v58, 1.8 }
 0x146   : > { %4072 = vmatprep.subr.bf16.mxu1 %v4366_v44  ;;  %v6047_v49 = vsub.f32 %v1327_v7, %v1343_v6  ;;  %v1735_v10 = vmul.f32 %v1727_v26, %v6029_v40  ;;  %7241 = vst [vmem:[#allocation36_spill] sm:$0xff] %v6051_v47  ;;  %v1742_v31 = vsub.f32 %v1718_v39, %v1734_v36  ;;  %v3792_v6 = vadd.f32 -1.4, %v6032_v51  ;;  %v7247_v36 = vld [vmem:[#allocation114_spill] sm:$0xff] }
 0x147   : > { %v6055_v28 = vsub.f32 %v7242_v1, %v6041_v48  ;;  %v6059_v30 = vsub.f32 %v7243_v56, %v6051_v47  ;;  %v993_v41 = vmul.f32 %v7246_v21, %v7245_v3  ;;  %v2440_v7 = vmul.f32 %v2432_v15, %v6045_v61  ;;  %v7248_v1 = vld [vmem:[#allocation118_spill] sm:$0xff] }
 0x148   : > { %v2441_v55 = vmul.f32 %v2433_v33, %v6047_v49  ;;  %v1743_v19 = vsub.f32 %v1719_v42, %v1735_v10  ;;  %4171 = vmatpush3.bf16.msra.mxu0 %v4369_v12  ;;  %v3793_v39 = vadd.f32 -1.4, %v6037_v4  ;;  %v1328_v34 = vmul.f32 %v7247_v36, %v5810_v59  ;;  %v4370_v15 = vld [vmem:[#allocation3 + $0xe0] sm:$0xff]   ;;  %v4373_v33 = vld [vmem:[#allocation3 + $0x1e8] sm:$0xff]  }
 0x149   : > { %7244 = vst [vmem:[#allocation40_spill] sm:$0xff] %v6059_v30  ;;  %4073 = vmatpush3.bf16.msra.mxu1 %v4366_v44  ;;  %v1329_v56 = vmul.f32 %v7248_v1, %v5812_v35  ;;  %v6072_v32 = vmul.f32 %v1726_v27, %v5828_v29  ;;  %4172 = vmatprep.subr.bf16.mxu0 %v4371_v50  ;;  %v6076_v10 = vmul.f32 2.5, %v3792_v6  ;;  %v1336_v59 = vmul.f32 1.25, %v3792_v6  ;;  %v4372_v29 = vld [vmem:[#allocation3 + $0xe8] sm:$0xff]   ;;  %v7262_v48 = vld [vmem:[#allocation34_spill] sm:$0xff] }
 0x14a   : > { %4074 = vmatprep.subr.bf16.mxu1 %v4368_v14  ;;  %v2448_v42 = vsub.f32 %v5993_v52, %v2440_v7  ;;  %v2449_v44 = vsub.f32 %v6001_v43, %v2441_v55  ;;  %v1747_v12 = vpack.c.bf16 %v1743_v19, %v1742_v31  ;;  %v6078_v3 = vmul.f32 2.5, %v3793_v39  ;;  %v4375_v7 = vld [vmem:[#allocation3 + $0x1f0] sm:$0xff]   ;;  %v7251_v31 = vld [vmem:[#allocation6_spill] sm:$0xff]  ;;  %v7252_v19 = vld [vmem:[#allocation7_spill] sm:$0xff] }
 0x14b   : > { %7249 = vst [vmem:[#allocation23_spill] sm:$0xff] %v6076_v10  ;;  %v1337_v21 = vmul.f32 1.25, %v3793_v39  ;;  %v6081_v35 = vmul.f32 %v1727_v26, %v5830_v38  ;;  %v1016_v36 = vmul.f32 %v6076_v10, %v6055_v28  ;;  %v2434_v1 = vmul.f32 0.8333333, %v3792_v6  ;;  %v7253_v38 = vld [vmem:[#allocation19_spill] sm:$0xff]  ;;  %v7256_v6 = vld [vmem:[#allocation126_spill] sm:$0xff] }
 0x14c   : > { %7250 = vst [vmem:[#allocation22_spill] sm:$0xff] %v6078_v3  ;;  %v2454_v27 = vpack.c.bf16 %v2449_v44, %v2448_v42  ;;  %4065 = vmatmul.mubr.bf16.gmra.mrb[4].mxu1 %v1747_v12  ;;  %v2435_v52 = vmul.f32 0.8333333, %v3793_v39  ;;  %4173 = vmatpush3.bf16.msra.mxu0 %v4371_v50  ;;  %v1017_v43 = vmul.f32 %v6078_v3, %v6059_v30  ;;  %v1885_v55 = vmul.f32 0.8333333, %v7251_v31  ;;  %v7255_v44 = vld [vmem:[#allocation20_spill] sm:$0xff] }
 0x14d   : > { %4075 = vmatpush3.bf16.msra.mxu1 %v4368_v14  ;;  %v1886_v53 = vmul.f32 0.8333333, %v7252_v19  ;;  %v1901_v26 = vmul.f32 0.8333333, %v7253_v38  ;;  %4174 = vmatprep.subr.bf16.mxu0 %v4373_v33  ;;  %v6090_v42 = vsub.f32 %v992_v13, %v1016_v36  ;;  %v1902_v12 = vmul.f32 0.8333333, %v7255_v44 }
 0x14e   : > { %4076 = vmatprep.subr.bf16.mxu1 %v4370_v15  ;;  %vm538_vm4 = vcmp.ge.f32.partialorder %v7256_v6, 1.8  ;;  %v7257_v39 = vld [vmem:[#allocation127_spill] sm:$0xff]  ;;  %4160 = vmatprep.mubr.bf16.mxu0 %v2454_v27  ;;  %v6095_v14 = vsub.f32 %v993_v41, %v1017_v43  ;;  %v7259_v50 = vld [vmem:[#allocation24_spill] sm:$0xff]  ;;  %v7260_v31 = vld [vmem:[#allocation10_spill] sm:$0xff]  ;;  %vm3094_vm0 = vcmask 1046528  }
 0x14f   : > { %7254 = vst [vmem:[#allocation26_spill] sm:$0xff] %v6090_v42  ;;  %vm539_vm5 = vcmp.ge.f32.partialorder %v7257_v39, 1.8  ;;  %v1893_v3 = vmul.f32 %v1885_v55, %v7259_v50  ;;  %v1894_v10 = vmul.f32 %v1886_v53, %v7260_v31  ;;  %v7261_v19 = vld [vmem:[#allocation33_spill] sm:$0xff]  ;;  %v1344_v38 = vmul.f32 %v1336_v59, %v6090_v42  ;;  %v7264_v43 = vld [vmem:[#allocation11_spill] sm:$0xff]  ;;  %v4374_v59 = vld [vmem:[#allocation3 + $0xf0] sm:$0xff]  }
 0x150   : > { %7258 = vst [vmem:[#allocation59_spill] sm:$0xff] %v6095_v14  ;;  %v1909_v47 = vmul.f32 %v1901_v26, %v7261_v19  ;;  %v1910_v13 = vmul.f32 %v1902_v12, %v7262_v48  ;;  %v6103_v36 = vsel %vm538_vm4, 1.0, %v5677_v37  ;;  %v6106_v44 = vsel %vm539_vm5, 1.0, %v5677_v37  ;;  %4175 = vmatpush3.bf16.msra.mxu0 %v4373_v33  ;;  %v4377_v50 = vld [vmem:[#allocation3 + $0x1f8] sm:$0xff]  }
 0x151   : > { %7263 = vst [vmem:[#allocation41_spill] sm:$0xff] %v6103_v36  ;;  %4077 = vmatpush3.bf16.msra.mxu1 %v4370_v15  ;;  %v1345_v41 = vmul.f32 %v1337_v21, %v6095_v14  ;;  %v6111_v53 = vsub.f32 %v7264_v43, %v6103_v36  ;;  %v3794_v55 = vadd.f32 -1.8, %v7256_v6  ;;  %v6114_v48 = vsub.f32 %v1328_v34, %v1344_v38  ;;  %v7265_v19 = vld [vmem:[#allocation25_spill] sm:$0xff]  ;;  %v7267_v21 = vld [vmem:[#allocation128_spill] sm:$0xff] }
 0x152   : > { %v1917_v27 = vsub.f32 %v1893_v3, %v1909_v47  ;;  %4078 = vmatprep.subr.bf16.mxu1 %v4372_v29  ;;  %4176 = vmatprep.subr.bf16.mxu0 %v4375_v7  ;;  %v1918_v31 = vsub.f32 %v1894_v10, %v1910_v13  ;;  %v6118_v15 = vsub.f32 %v7265_v19, %v6106_v44  ;;  %v3795_v33 = vadd.f32 -1.8, %v7257_v39  ;;  %v7266_v3 = vld [vmem:[#allocation8_spill] sm:$0xff]  ;;  %v7268_v36 = vld [vmem:[#allocation9_spill] sm:$0xff]  ;;  %v7270_v10 = vld [vmem:[#allocation27_spill] sm:$0xff] }
 0x153   : > { %v6121_v47 = vsub.f32 %v1329_v56, %v1345_v41  ;;  %v1026_v43 = vmul.f32 %v7267_v21, %v7266_v3  ;;  %v7269_v6 = vld [vmem:[#allocation17_spill] sm:$0xff]  ;;  %v1042_v42 = vmul.f32 2.5, %v3794_v55  ;;  %v2442_v34 = vmul.f32 %v2434_v1, %v6114_v48 }
 0x154   : > { %v1027_v14 = vmul.f32 %v7269_v6, %v7268_v36  ;;  %v1925_v38 = vpack.c.bf16 %v1918_v31, %v1917_v27  ;;  %v1043_v30 = vmul.f32 2.5, %v3795_v33  ;;  %v1354_v13 = vmul.f32 %v7270_v10, %v5909_v45  ;;  %4177 = vmatpush3.bf16.msra.mxu0 %v4375_v7  ;;  %v7271_v39 = vld [vmem:[#allocation29_spill] sm:$0xff]  ;;  %v7272_v6 = vld [vmem:[#allocation38_spill] sm:$0xff]  ;;  %v7273_v10 = vld [vmem:[#allocation39_spill] sm:$0xff] }
 0x155   : > { %4079 = vmatpush3.bf16.msra.mxu1 %v4372_v29  ;;  %v2443_v19 = vmul.f32 %v2435_v52, %v6121_v47  ;;  %v1050_v56 = vmul.f32 %v1042_v42, %v6111_v53  ;;  %v1355_v41 = vmul.f32 %v7271_v39, %v5914_v62  ;;  %v1362_v3 = vmul.f32 1.25, %v3794_v55  ;;  %v4376_v21 = vld [vmem:[#allocation3 + $0xf8] sm:$0xff]   ;;  %4178 = vmatprep.subr.bf16.mxu0 %v4377_v50  ;;  %v6141_v62 = vld [vmem:[#allocation3 + $0x200] sm:$0xff]  }
 0x156   : > { %4080 = vmatprep.subr.bf16.mxu1 %v4374_v59  ;;  %v2450_v36 = vsub.f32 %v6072_v32, %v2442_v34  ;;  %v1051_v1 = vmul.f32 %v1043_v30, %v6118_v15  ;;  %v1363_v27 = vmul.f32 1.25, %v3795_v33  ;;  %v2593_v45 = vmul.f32 %v1901_v26, %v5926_v22  ;;  %4084 = vmatprep.mubr.bf16.mxu1 %v1925_v38  ;;  %v7277_v38 = vld [vmem:[#allocation68_spill] sm:$0xff] }
 0x157   : > { %v2451_v29 = vsub.f32 %v6081_v35, %v2443_v19  ;;  %v6138_v52 = vsub.f32 %v1026_v43, %v1050_v56  ;;  %v2594_v7 = vmul.f32 %v1902_v12, %v5935_v11  ;;  %v2601_v42 = vmul.f32 0.8333333, %v3794_v55  ;;  %v7274_v35 = vld [vmem:[#allocation67_spill] sm:$0xff]  ;;  %v7275_v43 = vld [vmem:[#allocation56_spill] sm:$0xff]  ;;  %v7276_v55 = vld [vmem:[#allocation18_spill] sm:$0xff] }
 0x158   : > { %v6143_v31 = vsub.f32 %v1027_v14, %v1051_v1  ;;  %v2602_v32 = vmul.f32 0.8333333, %v3795_v33  ;;  %v1887_v34 = vmul.f32 0.8333333, %v7272_v6  ;;  %v1888_v30 = vmul.f32 0.8333333, %v7273_v10  ;;  %4179 = vmatpush3.bf16.msra.mxu0 %v4377_v50 }
 0x159   : > { %v2455_v39 = vpack.c.bf16 %v2451_v29, %v2450_v36  ;;  %4081 = vmatpush3.bf16.msra.mxu1 %v4374_v59  ;;  %v1370_v22 = vmul.f32 %v1362_v3, %v6138_v52  ;;  %v2595_v26 = vmul.f32 %v7274_v35, %v5929_v9  ;;  %v2603_v11 = vmul.f32 0.8333333, %v7275_v43  ;;  %v7278_v50 = vld [vmem:[#allocation57_spill] sm:$0xff]  ;;  %v7279_v3 = vld [vmem:[#allocation71_spill] sm:$0xff]  ;;  %4188 = vmatprep.subr.bf16.mxu0 %v6141_v62  ;;  %v7281_v29 = vld [vmem:[#allocation70_spill] sm:$0xff] }
 0x15a   : > { %4082 = vmatprep.subr.bf16.mxu1 %v4376_v21  ;;  %v1371_v12 = vmul.f32 %v1363_v27, %v6143_v31  ;;  %v1895_v14 = vmul.f32 %v1887_v34, %v5897_v5  ;;  %v1896_v33 = vmul.f32 %v1888_v30, %v7276_v55  ;;  %v2596_v19 = vmul.f32 %v7277_v38, %v5932_v63  ;;  %v7280_v27 = vld [vmem:[#allocation69_spill] sm:$0xff]  ;;  %v7283_v43 = vld [vmem:[#allocation86_spill] sm:$0xff]  ;;  %v7286_v55 = vld [vmem:[#allocation48_spill] sm:$0xff] }
 0x15b   : > { %4161 = vmatmul.mubr.bf16.gmra.mrb[4].mxu0 %v2455_v39  ;;  %v6156_v59 = vsub.f32 %v1354_v13, %v1370_v22  ;;  %v2604_v56 = vmul.f32 0.8333333, %v7278_v50  ;;  %v2611_v36 = vmul.f32 %v2603_v11, %v7279_v3  ;;  %v1889_v9 = vmul.f32 0.8333333, %v7213_v57  ;;  %v7282_v13 = vld [vmem:[#allocation72_spill] sm:$0xff]  ;;  %v4379_v57 = vld [vmem:[#allocation3 + $0x208] sm:$0xff]  }
 0x15c   : > { %v6162_v1 = vsub.f32 %v1355_v41, %v1371_v12  ;;  %v1919_v5 = vsub.f32 %v1895_v14, %v7280_v27  ;;  %v1920_v6 = vsub.f32 %v1896_v33, %v7281_v29  ;;  %v1890_v34 = vmul.f32 0.8333333, %v7214_v0  ;;  %v7287_v33 = vld [vmem:[#allocation46_spill] sm:$0xff] }
 0x15d   : > { %4083 = vmatpush3.bf16.msra.mxu1 %v4376_v21  ;;  %v2609_v63 = vmul.f32 %v2601_v42, %v6156_v59  ;;  %v2612_v10 = vmul.f32 %v2604_v56, %v7282_v13  ;;  %v2619_v30 = vsub.f32 %v2595_v26, %v2611_v36  ;;  %v1897_v39 = vmul.f32 %v1889_v9, %v5954_v16  ;;  %v7284_v21 = vld [vmem:[#allocation88_spill] sm:$0xff] }
 0x15e   : > { %v2610_v22 = vmul.f32 %v2602_v32, %v6162_v1  ;;  %v1926_v35 = vpack.c.bf16 %v1920_v6, %v1919_v5  ;;  %4212 = vmatprep.subr.bf16.mxu1 %v6141_v62  ;;  %v1898_v41 = vmul.f32 %v1890_v34, %v5956_v17  ;;  %v1905_v11 = vmul.f32 0.8333333, %v7283_v43  ;;  %v7285_v26 = vld [vmem:[#allocation100_spill] sm:$0xff]  ;;  %v7289_v5 = vld [vmem:[#allocation13_spill] sm:$0xff] }
 0x15f   : > { %v2617_v12 = vsub.f32 %v2593_v45, %v2609_v63  ;;  %v2620_v0 = vsub.f32 %v2596_v19, %v2612_v10  ;;  %v1906_v14 = vmul.f32 0.8333333, %v7284_v21  ;;  %vm543_vm7 = vcmp.ge.f32.partialorder %v5840_v25, 1.8  ;;  %v7288_v45 = vld [vmem:[#allocation102_spill] sm:$0xff]  ;;  %v6196_v9 = vld [vmem:[#allocation3 + $0x210] sm:$0xff]  }
 0x160   : > { %v2618_v42 = vsub.f32 %v2594_v7, %v2610_v22  ;;  %4085 = vmatmul.mubr.bf16.vlgmr.msra.gmra.mrb[0].mxu1 %v1926_v35  ;;  %v1913_v16 = vmul.f32 %v1905_v11, %v7285_v26  ;;  %v6179_v32 = vsel %vm542_vm6, 1.0, %v5677_v37  ;;  %v669_v17 = vsub.f32 %v7287_v33, %v7286_v55  ;;  %v7290_v34 = vld [vmem:[#allocation85_spill] sm:$0xff] }
 0x161   : > { %v2626_v38 = vpack.c.bf16 %v2620_v0, %v2619_v30  ;;  %4220 = vmatpush3.bf16.msra.mxu1 %v6141_v62  ;;  %v1914_v19 = vmul.f32 %v1906_v14, %v7288_v45  ;;  %v6186_v50 = vsel %vm543_vm7, 1.0, %v5677_v37  ;;  %v6190_v3 = vsub.f32 %v5968_v18, %v6179_v32  ;;  %v7291_v18 = vld [vmem:[#allocation95_spill] sm:$0xff]  ;;  %v6214_v35 = vld [vmem:[#allocation3 + $0x218] sm:$0xff]  }
 0x162   : > { %v2625_v7 = vpack.c.bf16 %v2618_v42, %v2617_v12  ;;  %4213 = vmatprep.subr.bf16.mxu1 %v4379_v57  ;;  %v1921_v56 = vsub.f32 %v1897_v39, %v1913_v16  ;;  %v6194_v36 = vsub.f32 %v5971_v2, %v6186_v50  ;;  %v1030_v29 = vmul.f32 %v7289_v5, %v5975_v54  ;;  %v7292_v2 = vld [vmem:[#allocation96_spill] sm:$0xff] }
 0x163   : > { %v1922_v27 = vsub.f32 %v1898_v41, %v1914_v19  ;;  %v3798_v37 = vadd.f32 -1.8, %v5817_v58  ;;  %v3799_v6 = vadd.f32 -1.8, %v5840_v25  ;;  %v1031_v63 = vmul.f32 %v7290_v34, %v5979_v23  ;;  %v7293_v12 = vld [vmem:[#allocation112_spill] sm:$0xff] }
 0x164   : > { %4180 = vmatprep.mubr.bf16.mxu0 %v2625_v7  ;;  %v1358_v13 = vmul.f32 %v7291_v18, %v6016_v46  ;;  %v1359_v10 = vmul.f32 %v7292_v2, %v6018_v20  ;;  %v6209_v30 = vmul.f32 %v1905_v11, %v6045_v61  ;;  %v6212_v22 = vmul.f32 %v1906_v14, %v6047_v49  ;;  %v7295_v14 = vld [vmem:[#allocation98_spill] sm:$0xff]  ;;  %v7297_v19 = vld [vmem:[#allocation124_spill] sm:$0xff]  ;;  %v7299_v2 = vld [vmem:[#allocation87_spill] sm:$0xff] }
 0x165   : > { %4181 = vmatmul.mubr.bf16.vlgmr.msra.gmra.mrb[0].mxu0 %v2626_v38  ;;  %4221 = vmatpush3.bf16.msra.mxu1 %v4379_v57  ;;  %v1927_v54 = vpack.c.bf16 %v1922_v27, %v1921_v56  ;;  %v1046_v39 = vmul.f32 2.5, %v3798_v37  ;;  %v1047_v58 = vmul.f32 2.5, %v3799_v6  ;;  %v1366_v23 = vmul.f32 1.25, %v3798_v37  ;;  %v7296_v38 = vld [vmem:[#allocation122_spill] sm:$0xff]  ;;  %v7298_v18 = vld [vmem:[#allocation40_spill] sm:$0xff] }
 0x166   : > { %4189 = vmatpush3.bf16.msra.mxu0 %v6141_v62  ;;  %v1367_v46 = vmul.f32 1.25, %v3799_v6  ;;  %v2605_v41 = vmul.f32 0.8333333, %v3798_v37  ;;  %v2606_v43 = vmul.f32 0.8333333, %v3799_v6  ;;  %4214 = vmatprep.subr.bf16.mxu1 %v6196_v9  ;;  %v7294_v62 = vld [vmem:[#allocation113_spill] sm:$0xff]  ;;  %v6231_v42 = vmul.f32 %v7295_v14, %v6055_v28 }
 0x167   : > { %4190 = vmatprep.subr.bf16.mxu0 %v4379_v57  ;;  %4088 = vmatprep.mubr.bf16.mxu1 %v1927_v54  ;;  %v1054_v20 = vmul.f32 %v1046_v39, %v6190_v3  ;;  %v1055_v61 = vmul.f32 %v1047_v58, %v6194_v36  ;;  %v1891_v11 = vmul.f32 0.8333333, %v7227_v8  ;;  %v1892_v49 = vmul.f32 0.8333333, %v7230_v60  ;;  %v6245_v28 = vld [vmem:[#allocation2] sm:$0xff]  ;;  %v7300_v58 = vld [vmem:[#allocation21_spill] sm:$0xff] }
 0x168   : > { %v6223_v0 = vmul.f32 0.8333333, %v7293_v12  ;;  %v6226_v21 = vmul.f32 0.8333333, %v7294_v62  ;;  %vm544_vm8 = vcmp.ge.f32.partialorder %v6032_v51, 1.8  ;;  %v1033_v54 = vmul.f32 %v7299_v2, %v7298_v18 }
 0x169   : > { %v6233_v26 = vsub.f32 %v1030_v29, %v1054_v20  ;;  %v6235_v16 = vsub.f32 %v1031_v63, %v1055_v61  ;;  %v1899_v8 = vmul.f32 %v1891_v11, %v6022_v24  ;;  %v1900_v60 = vmul.f32 %v1892_v49, %v6029_v40  ;;  %4222 = vmatpush3.bf16.msra.mxu1 %v6196_v9  ;;  %v4382_v27 = vld [vmem:[#allocation3 + $0x220] sm:$0xff]   ;;  %v4383_v11 = vld [vmem:[#allocation3 + $0x228] sm:$0xff]   ;;  %v7307_v2 = vld [vmem:[#allocation121_spill] sm:$0xff] }
 0x16a   : > { %4191 = vmatpush3.bf16.msra.mxu0 %v4379_v57  ;;  %v1915_v45 = vmul.f32 %v6223_v0, %v7296_v38  ;;  %v1916_v7 = vmul.f32 %v6226_v21, %v7297_v19  ;;  %vm545_vm9 = vcmp.ge.f32.partialorder %v6037_v4, 1.8  ;;  %v3704_v56 = vsel %vm544_vm8, 1.0, %v6245_v28  ;;  %4215 = vmatprep.subr.bf16.mxu1 %v6214_v35  ;;  %v7302_v14 = vld [vmem:[#allocation23_spill] sm:$0xff]  ;;  %v7303_v19 = vld [vmem:[#allocation22_spill] sm:$0xff] }
 0x16b   : > { %v1374_v24 = vmul.f32 %v1366_v23, %v6233_v26  ;;  %v1375_v40 = vmul.f32 %v1367_v46, %v6235_v16  ;;  %v3705_v57 = vsel %vm545_vm9, 1.0, %v6245_v28  ;;  %vm568_vm10 = vcmp.ge.f32.partialorder %v6032_v51, 2.2  ;;  %4192 = vmatprep.subr.bf16.mxu0 %v6196_v9  ;;  %v7301_v46 = vld [vmem:[#allocation36_spill] sm:$0xff]  ;;  %v7306_v18 = vld [vmem:[#allocation59_spill] sm:$0xff] }
 0x16c   : > { %v1923_v5 = vsub.f32 %v1899_v8, %v1915_v45  ;;  %v1924_v29 = vsub.f32 %v1900_v60, %v1916_v7  ;;  %vm569_vm11 = vcmp.ge.f32.partialorder %v6037_v4, 2.2  ;;  %v3712_v37 = vsel %vm568_vm10, 1.0, %v6245_v28 }
 0x16d   : > { %v6256_v6 = vsub.f32 %v1358_v13, %v1374_v24  ;;  %v6258_v34 = vsub.f32 %v1359_v10, %v1375_v40  ;;  %v3713_v63 = vsel %vm569_vm11, 1.0, %v6245_v28  ;;  %4223 = vmatpush3.bf16.msra.mxu1 %v6214_v35  ;;  %v664_v23 = vsub.f32 %v7300_v58, %v3704_v56  ;;  %v7304_v40 = vld [vmem:[#allocation26_spill] sm:$0xff] }
 0x16e   : > { %v1928_v39 = vpack.c.bf16 %v1924_v29, %v1923_v5  ;;  %v665_v20 = vsub.f32 %v7301_v46, %v3705_v57  ;;  %v672_v61 = vsub.f32 %v3704_v56, %v3712_v37  ;;  %4193 = vmatpush3.bf16.msra.mxu0 %v6196_v9  ;;  %v3800_v49 = vadd.f32 -1.8, %v6032_v51  ;;  %4216 = vmatprep.subr.bf16.mxu1 %v4382_v27 }
 0x16f   : > { %v2613_v13 = vmul.f32 %v2605_v41, %v6256_v6  ;;  %v2614_v10 = vmul.f32 %v2606_v43, %v6258_v34  ;;  %v3801_v12 = vadd.f32 -1.8, %v6037_v4  ;;  %4194 = vmatprep.subr.bf16.mxu0 %v6214_v35  ;;  %v673_v62 = vsub.f32 %v3705_v57, %v3713_v63 }
 0x170   : > { %4089 = vmatmul.mubr.bf16.gmra.mrb[4].mxu1 %v1928_v39  ;;  %v6273_v8 = vmul.f32 %v7302_v14, %v664_v23  ;;  %v6276_v60 = vadd.f32 -2.2, %v6032_v51  ;;  %v6279_v9 = vadd.f32 -2.2, %v6037_v4  ;;  %v1048_v38 = vmul.f32 2.5, %v3800_v49  ;;  %v7305_v51 = vld [vmem:[#allocation120_spill] sm:$0xff] }
 0x171   : > { %v2621_v41 = vsub.f32 %v6209_v30, %v2613_v13  ;;  %v2622_v43 = vsub.f32 %v6212_v22, %v2614_v10  ;;  %v1049_v45 = vmul.f32 2.5, %v3801_v12  ;;  %4224 = vmatpush3.bf16.msra.mxu1 %v4382_v27  ;;  %v6284_v7 = vmul.f32 %v7303_v19, %v665_v20  ;;  %v4384_v4 = vld [vmem:[#allocation3 + $0x230] sm:$0xff]   ;;  %v4431_v10 = vld [vmem:[%s4580_s10] sm:$0xff] }
 0x172   : > { %v1088_v56 = vmul.f32 2.5, %v6276_v60  ;;  %v1089_v24 = vmul.f32 2.5, %v6279_v9  ;;  %v1360_v57 = vmul.f32 %v7305_v51, %v7304_v40  ;;  %4195 = vmatpush3.bf16.msra.mxu0 %v6214_v35  ;;  %4217 = vmatprep.subr.bf16.mxu1 %v4383_v11  ;;  %v1056_v5 = vmul.f32 %v1048_v38, %v664_v23 }
 0x173   : > { %v2627_v30 = vpack.c.bf16 %v2622_v43, %v2621_v41  ;;  %v1057_v22 = vmul.f32 %v1049_v45, %v665_v20  ;;  %v1368_v29 = vmul.f32 1.25, %v3800_v49  ;;  %4196 = vmatprep.subr.bf16.mxu0 %v4382_v27  ;;  %v1361_v39 = vmul.f32 %v7307_v2, %v7306_v18  ;;  %v4385_v20 = vld [vmem:[#allocation3 + $0x238] sm:$0xff]   ;;  %v7310_v45 = vld [vmem:[#allocation131_spill] sm:$0xff]  ;;  %v7314_v18 = vld [vmem:[#allocation28_spill] sm:$0xff] }
 0x174   : > { %v6291_v37 = vmul.f32 %v1088_v56, %v672_v61  ;;  %v6293_v63 = vmul.f32 %v1089_v24, %v673_v62  ;;  %v1369_v58 = vmul.f32 1.25, %v3801_v12  ;;  %v1064_v35 = vsub.f32 %v6231_v42, %v1056_v5  ;;  %v4432_v62 = vld [vmem:[%s4580_s10 + $0x8] sm:$0xff]  ;;  %v7308_v42 = vld [vmem:[#allocation14_spill] sm:$0xff] }
 0x175   : > { %4184 = vmatprep.mubr.bf16.mxu0 %v2627_v30  ;;  %v1065_v46 = vsub.f32 %v1033_v54, %v1057_v22  ;;  %v2599_v23 = vmul.f32 %v6223_v0, %v6114_v48  ;;  %4225 = vmatpush3.bf16.msra.mxu1 %v4383_v11  ;;  %v2600_v61 = vmul.f32 %v6226_v21, %v6121_v47  ;;  %v2607_v13 = vmul.f32 0.8333333, %v3800_v49  ;;  %v7309_v48 = vld [vmem:[#allocation130_spill] sm:$0xff]  ;;  %v7312_v24 = vld [vmem:[#allocation15_spill] sm:$0xff]  ;;  %v7313_v22 = vld [vmem:[#allocation129_spill] sm:$0xff] }
 0x176   : > { %4197 = vmatpush3.bf16.msra.mxu0 %v4382_v27  ;;  %4218 = vmatprep.subr.bf16.mxu1 %v4384_v4  ;;  %vm562_vm12 = vcmp.ge.f32.partialorder %v4431_v10, 2.2  ;;  %vm563_vm13 = vcmp.ge.f32.partialorder %v4432_v62, 2.2  ;;  %v1376_v14 = vmul.f32 %v1368_v29, %v1064_v35  ;;  %v2608_v43 = vmul.f32 0.8333333, %v3801_v12 }
 0x177   : > { %v1377_v41 = vmul.f32 %v1369_v58, %v1065_v46  ;;  %4198 = vmatprep.subr.bf16.mxu0 %v4383_v11  ;;  %v1066_v54 = vmul.f32 %v7308_v42, %v6111_v53  ;;  %v6307_v0 = vmul.f32 %v7309_v48, %v1064_v35  ;;  %v3706_v38 = vsel %vm562_vm12, 1.0, %v6245_v28  ;;  %v7311_v12 = vld [vmem:[#allocation41_spill] sm:$0xff]  ;;  %v4433_v42 = vld [vmem:[%s4580_s10 + $0x20] sm:$0xff] }
 0x178   : > { %v3707_v47 = vsel %vm563_vm13, 1.0, %v6245_v28  ;;  %v3802_v21 = vadd.f32 -2.2, %v4431_v10  ;;  %v6311_v27 = vsub.f32 %v1360_v57, %v1376_v14  ;;  %v6316_v19 = vmul.f32 %v7310_v45, %v1065_v46  ;;  %v7315_v46 = vld [vmem:[#allocation31_spill] sm:$0xff]  ;;  %v7316_v10 = vld [vmem:[#allocation32_spill] sm:$0xff] }
 0x179   : > { %v6313_v49 = vsub.f32 %v1361_v39, %v1377_v41  ;;  %4226 = vmatpush3.bf16.msra.mxu1 %v4384_v4  ;;  %v666_v56 = vsub.f32 %v7311_v12, %v3706_v38  ;;  %v667_v53 = vsub.f32 %v6106_v44, %v3707_v47  ;;  %v1067_v40 = vmul.f32 %v7312_v24, %v6118_v15  ;;  %v7318_v47 = vld [vmem:[#allocation37_spill] sm:$0xff] }
 0x17a   : > { %4199 = vmatpush3.bf16.msra.mxu0 %v4383_v11  ;;  %4219 = vmatprep.subr.bf16.mxu1 %v4385_v20  ;;  %v3803_v51 = vadd.f32 -2.2, %v4432_v62  ;;  %v1082_v30 = vmul.f32 2.5, %v3802_v21  ;;  %v2615_v57 = vmul.f32 %v2607_v13, %v6311_v27  ;;  %v1386_v29 = vmul.f32 %v7313_v22, %v6138_v52 }
 0x17b   : > { %v2616_v5 = vmul.f32 %v2608_v43, %v6313_v49  ;;  %4200 = vmatprep.subr.bf16.mxu0 %v4384_v4  ;;  %v1387_v2 = vmul.f32 %v7314_v18, %v6143_v31  ;;  %v1394_v44 = vmul.f32 1.25, %v3802_v21  ;;  %v2766_v13 = vmul.f32 %v7315_v46, %v6156_v59  ;;  %v7322_v18 = vld [vmem:[#allocation101_spill] sm:$0xff] }
 0x17c   : > { %v1083_v11 = vmul.f32 2.5, %v3803_v51  ;;  %v1090_v39 = vmul.f32 %v1082_v30, %v666_v56  ;;  %v1395_v58 = vmul.f32 1.25, %v3803_v51  ;;  %v2623_v35 = vsub.f32 %v2599_v23, %v2615_v57  ;;  %v7317_v23 = vld [vmem:[#allocation16_spill] sm:$0xff]  ;;  %v4434_v56 = vld [vmem:[%s4580_s10 + $0x28] sm:$0xff] }
 0x17d   : > { %v2624_v15 = vsub.f32 %v2600_v61, %v2616_v5  ;;  %4227 = vmatpush3.bf16.msra.mxu1 %v4385_v20  ;;  %v2767_v62 = vmul.f32 %v7316_v10, %v6162_v1  ;;  %v2774_v41 = vmul.f32 0.8333333, %v3802_v21  ;;  %v2775_v43 = vmul.f32 0.8333333, %v3803_v51  ;;  %v7320_v51 = vld [vmem:[#allocation81_spill] sm:$0xff] }
 0x17e   : > { %4201 = vmatpush3.bf16.msra.mxu0 %v4384_v4  ;;  %v1091_v14 = vmul.f32 %v1083_v11, %v667_v53  ;;  %v1098_v52 = vsub.f32 %v1066_v54, %v1090_v39  ;;  %vm566_vm14 = vcmp.ge.f32.partialorder %v4433_v42, 2.2  ;;  %vm567_vm15 = vcmp.ge.f32.partialorder %v5840_v25, 2.2  ;;  %v7319_v53 = vld [vmem:[#allocation103_spill] sm:$0xff] }
 0x17f   : > { %v2628_v31 = vpack.c.bf16 %v2624_v15, %v2623_v35  ;;  %4202 = vmatprep.subr.bf16.mxu0 %v4385_v20  ;;  %v1070_v61 = vmul.f32 %v7317_v23, %v6190_v3  ;;  %v3710_v38 = vsel %vm566_vm14, 1.0, %v6245_v28  ;;  %v3711_v1 = vsel %vm567_vm15, 1.0, %v6245_v28  ;;  %v7324_v15 = vld [vmem:[#allocation55_spill] sm:$0xff] }
 0x180   : > { %v1099_v48 = vsub.f32 %v1067_v40, %v1091_v14  ;;  %v1402_v59 = vmul.f32 %v1394_v44, %v1098_v52  ;;  %v670_v4 = vsub.f32 %v6179_v32, %v3710_v38  ;;  %v671_v54 = vsub.f32 %v6186_v50, %v3711_v1  ;;  %v7321_v32 = vld [vmem:[#allocation99_spill] sm:$0xff]  ;;  %v7325_v14 = vld [vmem:[#allocation50_spill] sm:$0xff]  ;;  %v4435_v52 = vld [vmem:[%s4580_s10 + $0x10] sm:$0xff] }
 0x181   : > { %4185 = vmatmul.mubr.bf16.gmra.mrb[4].mxu0 %v2628_v31  ;;  %v1071_v21 = vmul.f32 %v7318_v47, %v6194_v36  ;;  %v3806_v45 = vadd.f32 -2.2, %v4433_v42  ;;  %v3807_v3 = vadd.f32 -2.2, %v4434_v56  ;;  %v1390_v24 = vmul.f32 %v7319_v53, %v6233_v26  ;;  %v4436_v31 = vld [vmem:[%s4580_s10 + $0x18] sm:$0xff]  ;;  %v7329_v1 = vld [vmem:[#allocation64_spill] sm:$0xff] }
 0x182   : > { %4203 = vmatpush3.bf16.msra.mxu0 %v4385_v20  ;;  %v1403_v25 = vmul.f32 %v1395_v58, %v1099_v48  ;;  %v1410_v12 = vsub.f32 %v1386_v29, %v1402_v59  ;;  %v1391_v30 = vmul.f32 %v7320_v51, %v6235_v16  ;;  %v2770_v50 = vmul.f32 %v7321_v32, %v6256_v6  ;;  %v7323_v16 = vld [vmem:[#allocation49_spill] sm:$0xff]  ;;  %v7326_v6 = vld [vmem:[#allocation58_spill] sm:$0xff]  ;;  %v7327_v59 = vld [vmem:[#allocation63_spill] sm:$0xff] }
 0x183   : > { %v1086_v40 = vmul.f32 2.5, %v3806_v45  ;;  %v1398_v57 = vmul.f32 1.25, %v3806_v45  ;;  %v1087_v20 = vmul.f32 2.5, %v3807_v3  ;;  %v1399_v22 = vmul.f32 1.25, %v3807_v3  ;;  %v7331_v53 = vld [vmem:[#allocation45_spill] sm:$0xff] }
 0x184   : > { %v1411_v5 = vsub.f32 %v1387_v2, %v1403_v25  ;;  %v2782_v36 = vmul.f32 %v2774_v41, %v1410_v12  ;;  %v2771_v11 = vmul.f32 %v7322_v18, %v6258_v34  ;;  %v2778_v39 = vmul.f32 0.8333333, %v3806_v45  ;;  %v7328_v34 = vld [vmem:[#allocation30_spill] sm:$0xff] }
 0x185   : > { %v1094_v29 = vmul.f32 %v1086_v40, %v670_v4  ;;  %v2779_v26 = vmul.f32 0.8333333, %v3807_v3  ;;  %v1095_v35 = vmul.f32 %v1087_v20, %v671_v54  ;;  %v1068_v46 = vmul.f32 %v7324_v15, %v7323_v16  ;;  %v7332_v40 = vld [vmem:[#allocation47_spill] sm:$0xff]  ;;  %v7335_v16 = vld [vmem:[#allocation125_spill] sm:$0xff] }
 0x186   : > { %v2783_v44 = vmul.f32 %v2775_v43, %v1411_v5  ;;  %v2790_v58 = vsub.f32 %v2766_v13, %v2782_v36  ;;  %v1069_v2 = vmul.f32 %v7326_v6, %v7325_v14  ;;  %v3804_v41 = vadd.f32 -2.2, %v4435_v52  ;;  %v7330_v43 = vld [vmem:[#allocation35_spill] sm:$0xff]  ;;  %v7336_v52 = vld [vmem:[#allocation73_spill] sm:$0xff] }
 0x187   : > { %v1102_v10 = vsub.f32 %v1070_v61, %v1094_v29  ;;  %v3805_v42 = vadd.f32 -2.2, %v4436_v31  ;;  %v1103_v48 = vsub.f32 %v1071_v21, %v1095_v35  ;;  %v1388_v38 = vmul.f32 %v7328_v34, %v7327_v59 }
 0x188   : > { %v2791_v23 = vsub.f32 %v2767_v62, %v2783_v44  ;;  %v1389_v13 = vmul.f32 %v7330_v43, %v7329_v1  ;;  %v1084_v54 = vmul.f32 2.5, %v3804_v41  ;;  %v1396_v45 = vmul.f32 1.25, %v3804_v41 }
 0x189   : > { %v1406_v4 = vmul.f32 %v1398_v57, %v1102_v10  ;;  %v1085_v47 = vmul.f32 2.5, %v3805_v42  ;;  %v1407_v25 = vmul.f32 %v1399_v22, %v1103_v48  ;;  %v1397_v12 = vmul.f32 1.25, %v3805_v42 }
 0x18a   : > { %v2798_v61 = vpack.c.bf16 %v2791_v23, %v2790_v58  ;;  %v2776_v56 = vmul.f32 0.8333333, %v3804_v41  ;;  %v7333_v51 = vsub.f32 %v7331_v53, %v7332_v40  ;;  %v2777_v32 = vmul.f32 0.8333333, %v3805_v42  ;;  %v2989_v53 = vld [vmem:[%s6832_s2] sm:$0xff] }
 0x18b   : > { %v1414_v3 = vsub.f32 %v1390_v24, %v1406_v4  ;;  %v1093_v21 = vmul.f32 %v1085_v47, %v669_v17  ;;  %v1415_v5 = vsub.f32 %v1391_v30, %v1407_v25  ;;  %v1104_v57 = vsub.f32 %v6273_v8, %v6291_v37  ;;  %v7334_v37 = vld [vmem:[#allocation123_spill] sm:$0xff] }
 0x18c   : > { %v1092_v62 = vmul.f32 %v1084_v54, %v7333_v51  ;;  %4204 = vmatprep.mubr.bf16.mxu0 %v2798_v61  ;;  %v1105_v36 = vsub.f32 %v6284_v7, %v6293_v63  ;;  %v1400_v20 = vmul.f32 1.25, %v6276_v60  ;;  %v1401_v18 = vmul.f32 1.25, %v6279_v9 }
 0x18d   : > { %v2786_v24 = vmul.f32 %v2778_v39, %v1414_v3  ;;  %v1101_v29 = vsub.f32 %v1069_v2, %v1093_v21  ;;  %v2787_v44 = vmul.f32 %v2779_v26, %v1415_v5  ;;  %v2780_v55 = vmul.f32 0.8333333, %v6276_v60 }
 0x18e   : > { %v1100_v22 = vsub.f32 %v1068_v46, %v1092_v62  ;;  %v1408_v58 = vmul.f32 %v1400_v20, %v1104_v57  ;;  %v2781_v33 = vmul.f32 0.8333333, %v6279_v9  ;;  %v1409_v8 = vmul.f32 %v1401_v18, %v1105_v36  ;;  %v2988_v18 = vld [vmem:[#allocation2 + $0x98] sm:$0x3] }
 0x18f   : > { %v2794_v17 = vsub.f32 %v2770_v50, %v2786_v24  ;;  %v1405_v35 = vmul.f32 %v1397_v12, %v1101_v29  ;;  %v2772_v7 = vmul.f32 %v7334_v37, %v6311_v27  ;;  %v2795_v63 = vsub.f32 %v2771_v11, %v2787_v44  ;;  %v7337_v27 = vld [vmem:[#allocation74_spill] sm:$0xff]  ;;  %v2970_v44 = vld [vmem:[#allocation2 + $0x8] sm:$0x3] }
 0x190   : > { %v1404_v30 = vmul.f32 %v1396_v45, %v1100_v22  ;;  %v1416_v39 = vsub.f32 %v6307_v0, %v1408_v58  ;;  %v2773_v15 = vmul.f32 %v7335_v16, %v6313_v49  ;;  %v1417_v10 = vsub.f32 %v6316_v19, %v1409_v8 }
 0x191   : > { %v1413_v26 = vsub.f32 %v1389_v13, %v1405_v35  ;;  %v2800_v60 = vpack.c.bf16 %v2795_v63, %v2794_v17  ;;  %v2998_v12 = vlaneseq  ;;  %vm3323_vm1 = vcmask 1045504  }
 0x192   : > { %v1412_v46 = vsub.f32 %v1388_v38, %v1404_v30  ;;  %v2788_v14 = vmul.f32 %v2780_v55, %v1416_v39  ;;  %v2789_v6 = vmul.f32 %v2781_v33, %v1417_v10 }
 0x193   : > { %v2785_v50 = vmul.f32 %v2777_v32, %v1413_v26  ;;  %4208 = vmatprep.mubr.bf16.mxu1 %v2800_v60 }
 0x194   : > { %v2784_v9 = vmul.f32 %v2776_v56, %v1412_v46  ;;  %v2796_v2 = vsub.f32 %v2772_v7, %v2788_v14  ;;  %v2797_v31 = vsub.f32 %v2773_v15, %v2789_v6  ;;  %v6383_v56 = vshrl.u32 %v2998_v12, 7  ;;  %v6408_v15 = vld [vmem:[%s6832_s2 + $0x8] ss:$0 sm:$0xff] }
 0x195   : > { %v2793_v11 = vsub.f32 %v7337_v27, %v2785_v50  ;;  %v3458_v50 = vmul.f32 %v6245_v28, %v6408_v15  ;;  %v3459_v6 = vmul.f32 %v6408_v15, %v2988_v18 }
 0x196   : > { %v2792_v41 = vsub.f32 %v7336_v52, %v2784_v9  ;;  %v2801_v42 = vpack.c.bf16 %v2797_v31, %v2796_v2  ;;  %v3000_v3 = vsub.s32 0, %v6383_v56  ;;  %v3060_v40 = vsub.s32 1, %v6383_v56  ;;  %v6428_v31 = vld [vmem:[%s6833_s3] ss:$0 sm:$0xff] }
 0x197   : > { %v3213_v51 = vsub.s32 7, %v6383_v56  ;;  %v3289_v62 = vsub.s32 2, %v6383_v56  ;;  %v3137_v58 = vsub.s32 4, %v6383_v56  ;;  %v3020_v14 = vsub.s32 3, %v6383_v56 }
 0x198   : > { %v2799_v0 = vpack.c.bf16 %v2793_v11, %v2792_v41  ;;  %4209 = vmatmul.mubr.bf16.vlgmr.msra.gmra.mrb[8].mxu1 %v2801_v42  ;;  %v6392_v32 = vrot.slane %v2989_v53, %v3000_v3  ;;  %v6394_v36 = vrot.slane %v2989_v53, %v3060_v40  ;;  %v3040_v9 = vsub.s32 6, %v6383_v56 }
 0x199   : > { %v6396_v20 = vrot.slane %v2989_v53, %v3213_v51  ;;  %v6399_v55 = vrot.slane %v2989_v53, %v3289_v62  ;;  %v3366_v2 = vsub.s32 5, %v6383_v56  ;;  %v6421_v27 = vrot.slane %v2989_v53, %v3137_v58 }
 0x19a   : > { %4205 = vmatmul.mubr.bf16.vlgmr.msra.gmra.mrb[0].mxu0 %v2799_v0  ;;  %v3062_v8 = vmul.f32 %v6245_v28, %v6394_v36  ;;  %v3063_v10 = vmul.f32 %v6394_v36, %v2970_v44  ;;  %v3002_v11 = vmul.f32 %v6245_v28, %v6392_v32 }
 0x19b   : > { %v3229_v63 = vmul.f32 %v6245_v28, %v6396_v20  ;;  %v3230_v46 = vmul.f32 %v6396_v20, %v2988_v18  ;;  %v3291_v52 = vmul.f32 %v6245_v28, %v6399_v55  ;;  %v3292_v41 = vmul.f32 %v6399_v55, %v2970_v44 }
 0x19c   : > { %v3095_v0 = vrot.slane %v3062_v8, 1 }
 0x19d   : > { %v3268_v42 = vrot.slane %v3229_v63, 1 }
 0x233   : > { %v4086_v49 = vpop.f32.mrb[0].mxu1 }
 0x234   : > { %v2027_v23 = vpop.f32.mrb[1].mxu1 }
 0x235   : > { %v4087_v48 = vpop.f32.mrb[2].mxu1 }
 0x236   : > { %v2030_v19 = vpop.f32.mrb[3].mxu1 }
 0x243   : > { %v4090_v59 = vpop.f32.mrb[4].mxu1 }
 0x244   : > { %v2043_v34 = vpop.f32.mrb[5].mxu1 }
 0x245   : > { %v4091_v38 = vpop.f32.mrb[6].mxu1 }
 0x246   : > { %v2046_v1 = vpop.f32.mrb[7].mxu1 }
 0x254   : > { %v4186_v43 = vpop.f32.mrb[4].mxu0 }
 0x255   : > { %v4232_v13 = vadd.f32 %v4186_v43, %v4090_v59  ;;  %v2743_v4 = vpop.f32.mrb[5].mxu0  ;;  %v3497_v59 = vrot.slane %v3458_v50, 2  ;;  %v6434_v43 = vrot.slane %v2989_v53, %v3366_v2 }
 0x256   : > { %v4234_v54 = vadd.f32 %v2743_v4, %v2043_v34  ;;  %v4187_v47 = vpop.f32.mrb[6].mxu0  ;;  %v3498_v34 = vrot.slane %v3459_v6, 2  ;;  %v3325_v4 = vrot.slane %v3292_v41, 2 }
 0x257   : > { %v4236_v45 = vadd.f32 %v4187_v47, %v4091_v38  ;;  %v2746_v61 = vpop.f32.mrb[7].mxu0  ;;  %v6438_v47 = vadd.f32 %v6428_v31, %v3002_v11 }
 0x258   : > { %v4238_v25 = vadd.f32 %v2746_v61, %v2046_v1  ;;  %v6456_v51 = vsel %vm3323_vm1, %v3497_v59, %v3498_v34 }
 0x26b   : > { %v4210_v5 = vpop.f32.mrb[8].mxu1 }
 0x26c   : > { %v4233_v24 = vadd.f32 %v4232_v13, %v4210_v5  ;;  %v2916_v29 = vpop.f32.mrb[9].mxu1  ;;  %v3324_v13 = vrot.slane %v3291_v52, 2 }
 0x26d   : > { %v4206_v21 = vpop.f32.mrb[0].mxu0  ;;  %v4235_v17 = vadd.f32 %v4234_v54, %v2916_v29  ;;  %v4211_v35 = vpop.f32.mrb[10].mxu1 }
 0x26e   : > { %v4228_v57 = vadd.f32 %v4206_v21, %v4086_v49  ;;  %v2900_v22 = vpop.f32.mrb[1].mxu0  ;;  %2967 = vst [vmem:[#allocation2 + $0x71] sm:$0xff] %v4233_v24  ;;  %v4237_v7 = vadd.f32 %v4236_v45, %v4211_v35  ;;  %v2919_v16 = vpop.f32.mrb[11].mxu1  ;;  %v3269_v49 = vrot.slane %v3230_v46, 1  ;;  %v6464_v5 = vsel %vm3323_vm1, %v3324_v13, %v3325_v4 }
 0x26f   : > { %v4229_v33 = vadd.f32 %v2900_v22, %v2027_v23  ;;  %v4207_v30 = vpop.f32.mrb[2].mxu0  ;;  %2965 = vst [vmem:[#allocation2 + $0x51] sm:$0xff] %v4235_v17  ;;  %v4239_v60 = vadd.f32 %v4238_v25, %v2919_v16  ;;  %v3096_v23 = vrot.slane %v3063_v10, 1 }
 0x270   : > { %2963 = vst [vmem:[#allocation2 + $0x31] sm:$0xff] %v4228_v57  ;;  %v4230_v37 = vadd.f32 %v4207_v30, %v4087_v48  ;;  %v2903_v39 = vpop.f32.mrb[3].mxu0  ;;  %2968 = vst [vmem:[#allocation2 + $0x81] sm:$0xff] %v4237_v7  ;;  %v6430_v48 = vrot.slane %v2989_v53, %v3020_v14  ;;  %v6447_v12 = vsel %vm3094_vm0, %v3268_v42, %v3269_v49 }
 0x271   : > { %2961 = vst [vmem:[#allocation2 + $0x11] sm:$0xff] %v4229_v33  ;;  %v4231_v26 = vadd.f32 %v2903_v39, %v2030_v19  ;;  %2966 = vst [vmem:[#allocation2 + $0x61] sm:$0xff] %v4239_v60  ;;  %v6432_v19 = vrot.slane %v2989_v53, %v3040_v9  ;;  %v6450_v56 = vsel %vm3094_vm0, %v3095_v0, %v3096_v23 }
 0x272   : > { %2964 = vst [vmem:[#allocation2 + $0x41] sm:$0xff] %v4230_v37 }
 0x273   : > { %2962 = vst [vmem:[#allocation2 + $0x21] sm:$0xff] %v4231_v26  ;;  %v6442_v45 = vmul.f32 %v6245_v28, %v6432_v19 }
 0x275   : > { %v6473_v17 = vld [vmem:[#allocation2 + $0x70] sm:$0xff]  ;;  %v2984_v7 = vld [vmem:[#allocation2 + $0x78] sm:$0x3] }
 0x276   : > { %v3151_v14 = vmul.f32 %v6421_v27, %v6473_v17  ;;  %v6482_v9 = vmul.f32 %v6394_v36, %v2984_v7  ;;  %v3152_v50 = vmul.f32 %v6421_v27, %v2984_v7  ;;  %v3225_v6 = vmul.f32 %v6396_v20, %v6473_v17 }
 0x277   : > { %v2975_v38 = vld [vmem:[#allocation2 + $0x30] sm:$0xff]  ;;  %v2976_v1 = vld [vmem:[#allocation2 + $0x38] sm:$0x3]  ;;  %v3226_v2 = vmul.f32 %v6396_v20, %v2984_v7  ;;  %v6498_v0 = vmul.f32 %v6399_v55, %v2984_v7  ;;  %v6505_v49 = vmul.f32 %v6430_v48, %v6473_v17  ;;  %v6509_v23 = vmul.f32 %v6432_v19, %v6473_v17 }
 0x278   : > { %v3068_v54 = vmul.f32 %v6394_v36, %v2975_v38  ;;  %v3069_v61 = vmul.f32 %v6394_v36, %v2976_v1  ;;  %v3143_v25 = vmul.f32 %v6421_v27, %v2975_v38  ;;  %v3144_v3 = vmul.f32 %v6421_v27, %v2976_v1  ;;  %v2971_v34 = vld [vmem:[#allocation2 + $0x10] sm:$0xff] }
 0x279   : > { %v3217_v53 = vmul.f32 %v6396_v20, %v2975_v38  ;;  %v3218_v40 = vmul.f32 %v6396_v20, %v2976_v1  ;;  %v3005_v28 = vmul.f32 %v6392_v32, %v2975_v38  ;;  %v6460_v62 = vmul.f32 %v6430_v48, %v2975_v38  ;;  %7338 = vst [vmem:[#allocation61_spill] sm:$0xff] %v6509_v23 }
 0x27a   : > { %v3297_v21 = vmul.f32 %v6399_v55, %v2975_v38  ;;  %v6467_v57 = vmul.f32 %v6432_v19, %v2975_v38  ;;  %v3104_v24 = vrot.slane %v3068_v54, 1  ;;  %v3298_v22 = vmul.f32 %v6399_v55, %v2976_v1  ;;  %v2972_v54 = vld [vmem:[#allocation2 + $0x18] sm:$0x3] }
 0x27b   : > { %v3372_v29 = vmul.f32 %v6434_v43, %v2975_v38  ;;  %v3105_v18 = vrot.slane %v3069_v61, 1  ;;  %v3177_v44 = vrot.slane %v3143_v25, 1  ;;  %v3373_v58 = vmul.f32 %v6434_v43, %v2976_v1 }
 0x27c   : > { %v3446_v33 = vmul.f32 %v6408_v15, %v2975_v38  ;;  %v3178_v30 = vrot.slane %v3144_v3, 1  ;;  %v3250_v35 = vrot.slane %v3217_v53, 1  ;;  %v3251_v8 = vrot.slane %v3218_v40, 1 }
 0x27d   : > { %v3447_v37 = vmul.f32 %v6408_v15, %v2976_v1  ;;  %v6477_v63 = vadd.f32 %v6428_v31, %v3005_v28  ;;  %v3333_v39 = vrot.slane %v3297_v21, 2  ;;  %v3334_v16 = vrot.slane %v3298_v22, 2 }
 0x27e   : > { %v3406_v46 = vrot.slane %v3372_v29, 2  ;;  %v3407_v26 = vrot.slane %v3373_v58, 2  ;;  %v3479_v10 = vrot.slane %v3446_v33, 2  ;;  %v6489_v52 = vsel %vm3094_vm0, %v3104_v24, %v3105_v18 }
 0x27f   : > { %v3480_v60 = vrot.slane %v3447_v37, 2  ;;  %v6492_v41 = vsel %vm3094_vm0, %v3177_v44, %v3178_v30  ;;  %v6495_v11 = vsel %vm3094_vm0, %v3250_v35, %v3251_v8  ;;  %v6501_v42 = vsel %vm3323_vm1, %v3333_v39, %v3334_v16  ;;  %v2979_v16 = vld [vmem:[#allocation2 + $0x50] sm:$0xff] }
 0x280   : > { %v3189_v59 = vrot.slane %v3151_v14, 1  ;;  %v3190_v38 = vrot.slane %v3152_v50, 1  ;;  %v3262_v1 = vrot.slane %v3225_v6, 1  ;;  %v3263_v13 = vrot.slane %v3226_v2, 1  ;;  %v2980_v14 = vld [vmem:[#allocation2 + $0x58] sm:$0x3] }
 0x281   : > { %v6513_v4 = vmul.f32 %v6434_v43, %v6473_v17  ;;  %v6516_v61 = vsel %vm3323_vm1, %v3406_v46, %v3407_v26  ;;  %v6519_v25 = vsel %vm3323_vm1, %v3479_v10, %v3480_v60  ;;  %v6523_v53 = vmul.f32 %v6434_v43, %v2984_v7 }
 0x282   : > { %v6528_v28 = vmul.f32 %v6408_v15, %v6473_v17  ;;  %v6531_v21 = vmul.f32 %v6408_v15, %v2984_v7  ;;  %v3003_v24 = vmul.f32 %v6392_v32, %v2971_v34  ;;  %v3022_v22 = vmul.f32 %v6430_v48, %v2971_v34 }
 0x283   : > { %7339 = vst [vmem:[#allocation42_spill] sm:$0xff] %v6513_v4  ;;  %7340 = vst [vmem:[#allocation51_spill] sm:$0xff] %v6523_v53  ;;  %v3064_v29 = vmul.f32 %v6394_v36, %v2971_v34  ;;  %v3065_v18 = vmul.f32 %v6394_v36, %v2972_v54  ;;  %v3139_v44 = vmul.f32 %v6421_v27, %v2971_v34 }
 0x284   : > { %7341 = vst [vmem:[#allocation52_spill] sm:$0xff] %v6528_v28  ;;  %7342 = vst [vmem:[#allocation53_spill] sm:$0xff] %v6531_v21  ;;  %v6539_v58 = vsel %vm3094_vm0, %v3189_v59, %v3190_v38  ;;  %v6542_v33 = vsel %vm3094_vm0, %v3262_v1, %v3263_v13  ;;  %v3140_v35 = vmul.f32 %v6421_v27, %v2972_v54 }
 0x285   : > { %7343 = vst [vmem:[#allocation54_spill] sm:$0xff] %v6539_v58  ;;  %7344 = vst [vmem:[#allocation60_spill] sm:$0xff] %v6542_v33  ;;  %v3098_v37 = vrot.slane %v3064_v29, 1  ;;  %v3099_v7 = vrot.slane %v3065_v18, 1  ;;  %v3293_v39 = vmul.f32 %v6399_v55, %v2971_v34  ;;  %v3294_v26 = vmul.f32 %v6399_v55, %v2972_v54 }
 0x286   : > { %v3368_v10 = vmul.f32 %v6434_v43, %v2971_v34  ;;  %v3369_v60 = vmul.f32 %v6434_v43, %v2972_v54  ;;  %v6554_v6 = vadd.f32 %v6428_v31, %v3003_v24  ;;  %v6557_v2 = vadd.f32 %v3022_v22, %v6438_v47 }
 0x287   : > { %v3171_v59 = vrot.slane %v3139_v44, 1  ;;  %v6560_v38 = vsel %vm3094_vm0, %v3098_v37, %v3099_v7  ;;  %v3172_v1 = vrot.slane %v3140_v35, 1  ;;  %v3327_v13 = vrot.slane %v3293_v39, 2 }
 0x288   : > { %v3007_v29 = vmul.f32 %v6392_v32, %v2979_v16  ;;  %v3328_v34 = vrot.slane %v3294_v26, 2  ;;  %v6564_v54 = vmul.f32 %v6430_v48, %v2979_v16  ;;  %v3072_v18 = vmul.f32 %v6394_v36, %v2979_v16 }
 0x289   : > { %v3073_v24 = vmul.f32 %v6394_v36, %v2980_v14  ;;  %v3400_v46 = vrot.slane %v3368_v10, 2  ;;  %v3401_v50 = vrot.slane %v3369_v60, 2  ;;  %v3147_v47 = vmul.f32 %v6421_v27, %v2979_v16 }
 0x28a   : > { %v3148_v22 = vmul.f32 %v6421_v27, %v2980_v14  ;;  %v3110_v44 = vrot.slane %v3072_v18, 1  ;;  %v3221_v35 = vmul.f32 %v6396_v20, %v2979_v16  ;;  %v3222_v7 = vmul.f32 %v6396_v20, %v2980_v14 }
 0x28b   : > { %v3111_v37 = vrot.slane %v3073_v24, 1  ;;  %v3183_v39 = vrot.slane %v3147_v47, 1  ;;  %v6573_v30 = vmul.f32 %v6399_v55, %v2979_v16  ;;  %v6576_v8 = vmul.f32 %v6399_v55, %v2980_v14  ;;  %v6584_v24 = vld [vmem:[#allocation2 + $0x40] sm:$0xff] }
 0x28c   : > { %v3184_v26 = vrot.slane %v3148_v22, 1  ;;  %v6579_v10 = vsel %vm3094_vm0, %v3171_v59, %v3172_v1  ;;  %v3256_v60 = vrot.slane %v3221_v35, 1  ;;  %v3257_v40 = vrot.slane %v3222_v7, 1  ;;  %v2978_v59 = vld [vmem:[#allocation2 + $0x48] sm:$0x3] }
 0x28d   : > { %7345 = vst [vmem:[#allocation62_spill] sm:$0xff] %v6573_v30  ;;  %7346 = vst [vmem:[#allocation43_spill] sm:$0xff] %v6576_v8  ;;  %v6582_v18 = vmul.f32 %v6434_v43, %v2979_v16  ;;  %v6587_v3 = vsel %vm3323_vm1, %v3327_v13, %v3328_v34  ;;  %v6590_v47 = vsel %vm3323_vm1, %v3400_v46, %v3401_v50 }
 0x28e   : > { %v6593_v22 = vadd.f32 %v6428_v31, %v3007_v29  ;;  %v3045_v28 = vmul.f32 %v6432_v19, %v2979_v16  ;;  %v6597_v1 = vsel %vm3094_vm0, %v3110_v44, %v3111_v37  ;;  %v6600_v35 = vsel %vm3094_vm0, %v3183_v39, %v3184_v26 }
 0x28f   : > { %7347 = vst [vmem:[#allocation44_spill] sm:$0xff] %v6582_v18  ;;  %7348 = vst [vmem:[#allocation65_spill] sm:$0xff] %v6597_v1  ;;  %v3450_v7 = vmul.f32 %v6408_v15, %v2979_v16  ;;  %v3451_v13 = vmul.f32 %v6408_v15, %v2980_v14  ;;  %v6607_v50 = vmul.f32 %v6434_v43, %v2980_v14 }
 0x290   : > { %7349 = vst [vmem:[#allocation66_spill] sm:$0xff] %v6600_v35  ;;  %v3025_v29 = vmul.f32 %v6430_v48, %v6584_v24  ;;  %v3258_v44 = vsel %vm3094_vm0, %v3256_v60, %v3257_v40  ;;  %v3070_v39 = vmul.f32 %v6394_v36, %v6584_v24  ;;  %v3071_v16 = vmul.f32 %v6394_v36, %v2978_v59 }
 0x291   : > { %7350 = vst [vmem:[#allocation75_spill] sm:$0xff] %v6607_v50  ;;  %v3485_v26 = vrot.slane %v3450_v7, 2  ;;  %v3006_v34 = vmul.f32 %v6392_v32, %v6584_v24  ;;  %v3145_v14 = vmul.f32 %v6421_v27, %v6584_v24  ;;  %v3486_v21 = vrot.slane %v3451_v13, 2  ;;  %v2985_v50 = vld [vmem:[#allocation2 + $0x80] sm:$0xff] }
 0x292   : > { %v3033_v46 = vadd.f32 %v3025_v29, %v6477_v63  ;;  %v3107_v4 = vrot.slane %v3070_v39, 1  ;;  %v3108_v53 = vrot.slane %v3071_v16, 1  ;;  %v3146_v40 = vmul.f32 %v6421_v27, %v2978_v59 }
 0x293   : > { %v3180_v37 = vrot.slane %v3145_v14, 1  ;;  %v3219_v18 = vmul.f32 %v6396_v20, %v6584_v24  ;;  %v3220_v7 = vmul.f32 %v6396_v20, %v2978_v59  ;;  %v3299_v63 = vmul.f32 %v6399_v55, %v6584_v24 }
 0x294   : > { %v3053_v60 = vadd.f32 %v3045_v28, %v3033_v46  ;;  %v3181_v8 = vrot.slane %v3146_v40, 1  ;;  %v3300_v29 = vmul.f32 %v6399_v55, %v2978_v59  ;;  %v3374_v28 = vmul.f32 %v6434_v43, %v6584_v24 }
 0x295   : > { %v3253_v39 = vrot.slane %v3219_v18, 1  ;;  %v3254_v16 = vrot.slane %v3220_v7, 1  ;;  %v3487_v46 = vsel %vm3323_vm1, %v3485_v26, %v3486_v21  ;;  %v6634_v14 = vadd.f32 %v6428_v31, %v3006_v34  ;;  %v2986_v26 = vld [vmem:[#allocation2 + $0x88] sm:$0x3] }
 0x296   : > { %v3130_v13 = vadd.f32 %v6489_v52, %v3053_v60  ;;  %v3182_v30 = vsel %vm3094_vm0, %v3180_v37, %v3181_v8  ;;  %v3375_v40 = vmul.f32 %v6434_v43, %v2978_v59  ;;  %v6639_v33 = vsel %vm3094_vm0, %v3107_v4, %v3108_v53 }
 0x297   : > { %7351 = vst [vmem:[#allocation76_spill] sm:$0xff] %v6639_v33  ;;  %v3409_v52 = vrot.slane %v3374_v28, 2  ;;  %v3448_v18 = vmul.f32 %v6408_v15, %v6584_v24  ;;  %v3336_v60 = vrot.slane %v3299_v63, 2  ;;  %v3449_v21 = vmul.f32 %v6408_v15, %v2978_v59 }
 0x298   : > { %v3206_v58 = vadd.f32 %v3182_v30, %v3130_v13  ;;  %v3410_v7 = vrot.slane %v3375_v40, 2  ;;  %v3009_v34 = vmul.f32 %v6392_v32, %v6473_v17  ;;  %v6647_v8 = vsel %vm3094_vm0, %v3253_v39, %v3254_v16 }
 0x299   : > { %v3337_v35 = vrot.slane %v3300_v29, 2  ;;  %v3029_v4 = vmul.f32 %v6430_v48, %v2985_v50  ;;  %v3482_v30 = vrot.slane %v3448_v18, 2  ;;  %v3076_v63 = vmul.f32 %v6394_v36, %v6473_v17 }
 0x29a   : > { %v3282_v37 = vadd.f32 %v3258_v44, %v3206_v58  ;;  %v3411_v53 = vsel %vm3323_vm1, %v3409_v52, %v3410_v7  ;;  %v3017_v13 = vadd.f32 %v6428_v31, %v3009_v34  ;;  %v3153_v28 = vmul.f32 %v6421_v27, %v2985_v50 }
 0x29b   : > { %v3154_v40 = vmul.f32 %v6421_v27, %v2986_v26  ;;  %v3227_v39 = vmul.f32 %v6396_v20, %v2985_v50  ;;  %v3483_v58 = vrot.slane %v3449_v21, 2  ;;  %v3116_v29 = vrot.slane %v3076_v63, 1 }
 0x29c   : > { %v3359_v59 = vadd.f32 %v6501_v42, %v3282_v37  ;;  %v3037_v44 = vadd.f32 %v3029_v4, %v3017_v13  ;;  %v3228_v16 = vmul.f32 %v6396_v20, %v2986_v26  ;;  %v6660_v52 = vsel %vm3323_vm1, %v3336_v60, %v3337_v35  ;;  %v6670_v60 = vld [vmem:[#allocation2 + $0x20] sm:$0xff] }
 0x29d   : > { %v3192_v7 = vrot.slane %v3153_v28, 1  ;;  %v3193_v34 = vrot.slane %v3154_v40, 1  ;;  %v3265_v37 = vrot.slane %v3227_v39, 1  ;;  %v3305_v33 = vmul.f32 %v6399_v55, %v6473_v17 }
 0x29e   : > { %v3435_v18 = vadd.f32 %v3411_v53, %v3359_v59  ;;  %v3057_v42 = vadd.f32 %v6442_v45, %v3037_v44  ;;  %v3266_v1 = vrot.slane %v3228_v16, 1  ;;  %v7352_v21 = vrot.slane %v6482_v9, 1 }
 0x29f   : > { %v3382_v13 = vmul.f32 %v6434_v43, %v2985_v50  ;;  %v3383_v35 = vmul.f32 %v6434_v43, %v2986_v26  ;;  %v6680_v45 = vsel %vm3323_vm1, %v3482_v30, %v3483_v58  ;;  %v6683_v17 = vmul.f32 %v6432_v19, %v2985_v50 }
 0x2a0   : > { %v3511_v23 = vadd.f32 %v3487_v46, %v3435_v18  ;;  %v3118_v4 = vsel %vm3094_vm0, %v3116_v29, %v7352_v21  ;;  %v3345_v46 = vrot.slane %v3305_v33, 2  ;;  %v3194_v63 = vsel %vm3094_vm0, %v3192_v7, %v3193_v34  ;;  %v2974_v29 = vld [vmem:[#allocation2 + $0x28] sm:$0x3] }
 0x2a1   : > { %v3134_v9 = vadd.f32 %v3118_v4, %v3057_v42  ;;  %v3421_v59 = vrot.slane %v3382_v13, 2  ;;  %v3422_v28 = vrot.slane %v3383_v35, 2  ;;  %v6687_v39 = vsel %vm3094_vm0, %v3265_v37, %v3266_v1 }
 0x2a2   : > { %v3519_v53 = vmax.f32 %v3511_v23, 0.0  ;;  %v6690_v44 = vmul.f32 %v6408_v15, %v2985_v50  ;;  %v3004_v30 = vmul.f32 %v6392_v32, %v6670_v60  ;;  %v7353_v58 = vrot.slane %v6498_v0, 2 }
 0x2a3   : > { %v3210_v40 = vadd.f32 %v3194_v63, %v3134_v9  ;;  %v6699_v33 = vmul.f32 %v6408_v15, %v2986_v26  ;;  %v3023_v16 = vmul.f32 %v6430_v48, %v6670_v60  ;;  %v3042_v1 = vmul.f32 %v6432_v19, %v6670_v60 }
 0x2a4   : > { %3527 = vst [vmem:[%s6677_s21 + $0x18] sm:$0xff] %v3519_v53  ;;  %v3347_v23 = vsel %vm3323_vm1, %v3345_v46, %v7353_v58  ;;  %v3423_v18 = vsel %vm3323_vm1, %v3421_v59, %v3422_v28  ;;  %v3012_v7 = vadd.f32 %v6428_v31, %v3004_v30  ;;  %v3066_v0 = vmul.f32 %v6394_v36, %v6670_v60 }
 0x2a5   : > { %v3286_v50 = vadd.f32 %v6447_v12, %v3210_v40  ;;  %v3031_v34 = vadd.f32 %v3023_v16, %v6554_v6  ;;  %v3044_v26 = vmul.f32 %v6432_v19, %v6584_v24  ;;  %v3050_v42 = vadd.f32 %v3042_v1, %v6557_v2 }
 0x2a6   : > { %v3067_v37 = vmul.f32 %v6394_v36, %v2974_v29  ;;  %v3032_v4 = vadd.f32 %v6460_v62, %v3012_v7  ;;  %v3101_v12 = vrot.slane %v3066_v0, 1  ;;  %v3141_v13 = vmul.f32 %v6421_v27, %v6670_v60 }
 0x2a7   : > { %v3363_v21 = vadd.f32 %v3347_v23, %v3286_v50  ;;  %v3051_v35 = vadd.f32 %v6467_v57, %v3031_v34  ;;  %v3127_v46 = vadd.f32 %v6450_v56, %v3050_v42  ;;  %v3142_v6 = vmul.f32 %v6421_v27, %v2974_v29  ;;  %v6736_v42 = vld [vmem:[#allocation2 + $0x60] sm:$0xff] }
 0x2a8   : > { %v3102_v9 = vrot.slane %v3067_v37, 1  ;;  %v3052_v24 = vadd.f32 %v3044_v26, %v3032_v4  ;;  %v3174_v63 = vrot.slane %v3141_v13, 1  ;;  %v3215_v2 = vmul.f32 %v6396_v20, %v6670_v60 }
 0x2a9   : > { %v3439_v53 = vadd.f32 %v3423_v18, %v3363_v21  ;;  %v3128_v62 = vadd.f32 %v6560_v38, %v3051_v35  ;;  %v3175_v28 = vrot.slane %v3142_v6, 1  ;;  %v3203_v40 = vadd.f32 %v6579_v10, %v3127_v46 }
 0x2aa   : > { %v3103_v59 = vsel %vm3094_vm0, %v3101_v12, %v3102_v9  ;;  %v3216_v56 = vmul.f32 %v6396_v20, %v2974_v29  ;;  %v3247_v58 = vrot.slane %v3215_v2, 1  ;;  %v3295_v16 = vmul.f32 %v6399_v55, %v6670_v60 }
 0x2ab   : > { %v3515_v57 = vadd.f32 %v6456_v51, %v3439_v53  ;;  %v3129_v30 = vadd.f32 %v3103_v59, %v3052_v24  ;;  %v3176_v23 = vsel %vm3094_vm0, %v3174_v63, %v3175_v28  ;;  %v3296_v1 = vmul.f32 %v6399_v55, %v2974_v29 }
 0x2ac   : > { %v3370_v38 = vmul.f32 %v6434_v43, %v6670_v60  ;;  %v3204_v18 = vadd.f32 %v3176_v23, %v3128_v62  ;;  %v3248_v51 = vrot.slane %v3216_v56, 1  ;;  %v3330_v7 = vrot.slane %v3295_v16, 2  ;;  %v2982_v62 = vld [vmem:[#allocation2 + $0x68] sm:$0x3]  ;;  %v7355_v16 = vld [vmem:[#allocation76_spill] sm:$0xff] }
 0x2ad   : > { %v3523_v50 = vmax.f32 %v3515_v57, 0.0  ;;  %v3205_v10 = vadd.f32 %v6492_v41, %v3129_v30  ;;  %v3331_v0 = vrot.slane %v3296_v1, 2  ;;  %v3371_v34 = vmul.f32 %v6434_v43, %v2974_v29  ;;  %v7354_v57 = vld [vmem:[#allocation61_spill] sm:$0xff] }
 0x2ae   : > { %v3403_v26 = vrot.slane %v3370_v38, 2  ;;  %v3249_v37 = vsel %vm3094_vm0, %v3247_v58, %v3248_v51  ;;  %v3280_v21 = vadd.f32 %v6495_v11, %v3204_v18  ;;  %v3444_v12 = vmul.f32 %v6408_v15, %v6670_v60  ;;  %v7357_v51 = vld [vmem:[#allocation66_spill] sm:$0xff] }
 0x2af   : > { %3531 = vst [vmem:[%s6677_s21 + $0x38] sm:$0xff] %v3523_v50  ;;  %v3281_v4 = vadd.f32 %v6647_v8, %v3205_v10  ;;  %v3279_v13 = vadd.f32 %v3249_v37, %v3203_v40  ;;  %v3332_v41 = vsel %vm3323_vm1, %v3330_v7, %v3331_v0  ;;  %v3404_v35 = vrot.slane %v3371_v34, 2 }
 0x2b0   : > { %v3445_v9 = vmul.f32 %v6408_v15, %v2974_v29  ;;  %v3357_v46 = vadd.f32 %v6587_v3, %v3280_v21  ;;  %v3476_v53 = vrot.slane %v3444_v12, 2  ;;  %v3008_v24 = vmul.f32 %v6392_v32, %v6736_v42 }
 0x2b1   : > { %v3358_v6 = vadd.f32 %v3332_v41, %v3281_v4  ;;  %v3356_v11 = vadd.f32 %v6464_v5, %v3279_v13  ;;  %v3405_v8 = vsel %vm3323_vm1, %v3403_v26, %v3404_v35  ;;  %v3027_v60 = vmul.f32 %v6430_v48, %v6736_v42  ;;  %v7358_v35 = vld [vmem:[#allocation54_spill] sm:$0xff] }
 0x2b2   : > { %v3477_v63 = vrot.slane %v3445_v9, 2  ;;  %v3433_v2 = vadd.f32 %v3405_v8, %v3357_v46  ;;  %v3016_v29 = vadd.f32 %v6428_v31, %v3008_v24  ;;  %v3034_v3 = vadd.f32 %v6564_v54, %v6634_v14 }
 0x2b3   : > { %v3434_v59 = vadd.f32 %v6516_v61, %v3358_v6  ;;  %v3432_v28 = vadd.f32 %v6590_v47, %v3356_v11  ;;  %v3035_v5 = vadd.f32 %v3027_v60, %v6593_v22  ;;  %v3046_v40 = vmul.f32 %v6432_v19, %v6736_v42 }
 0x2b4   : > { %v3478_v32 = vsel %vm3323_vm1, %v3476_v53, %v3477_v63  ;;  %v3509_v48 = vadd.f32 %v6519_v25, %v3433_v2  ;;  %v3036_v31 = vadd.f32 %v6505_v49, %v3016_v29  ;;  %v3074_v54 = vmul.f32 %v6394_v36, %v6736_v42  ;;  %v7356_v49 = vld [vmem:[#allocation65_spill] sm:$0xff]  ;;  %v7359_v29 = vld [vmem:[#allocation60_spill] sm:$0xff] }
 0x2b5   : > { %v3510_v61 = vadd.f32 %v6680_v45, %v3434_v59  ;;  %v3508_v14 = vadd.f32 %v3478_v32, %v3432_v28  ;;  %v3054_v47 = vadd.f32 %v3046_v40, %v3034_v3  ;;  %v3055_v30 = vadd.f32 %v7354_v57, %v3035_v5  ;;  %v7370_v57 = vld [vmem:[#allocation44_spill] sm:$0xff] }
 0x2b6   : > { %v3075_v22 = vmul.f32 %v6394_v36, %v2982_v62  ;;  %v3517_v56 = vmax.f32 %v3509_v48, 0.0  ;;  %v3056_v25 = vadd.f32 %v6683_v17, %v3036_v31  ;;  %v3113_v58 = vrot.slane %v3074_v54, 1  ;;  %v7364_v31 = vld [vmem:[#allocation51_spill] sm:$0xff] }
 0x2b7   : > { %v3518_v19 = vmax.f32 %v3510_v61, 0.0  ;;  %v3516_v23 = vmax.f32 %v3508_v14, 0.0  ;;  %v3131_v1 = vadd.f32 %v7355_v16, %v3054_v47  ;;  %v3132_v38 = vadd.f32 %v7356_v49, %v3055_v30  ;;  %v7368_v14 = vld [vmem:[#allocation75_spill] sm:$0xff]  ;;  %v7372_v16 = vld [vmem:[#allocation53_spill] sm:$0xff]  ;;  %v7374_v49 = vld [vmem:[#allocation52_spill] sm:$0xff] }
 0x2b8   : > { %v3114_v45 = vrot.slane %v3075_v22, 1  ;;  %3525 = vst [vmem:[%s6677_s21 + $0x8] sm:$0xff] %v3517_v56  ;;  %v3149_v50 = vmul.f32 %v6421_v27, %v6736_v42  ;;  %v3150_v18 = vmul.f32 %v6421_v27, %v2982_v62  ;;  %v3223_v36 = vmul.f32 %v6396_v20, %v6736_v42 }
 0x2b9   : > { %3526 = vst [vmem:[%s6677_s21 + $0x10] sm:$0xff] %v3518_v19  ;;  %v3224_v10 = vmul.f32 %v6396_v20, %v2982_v62  ;;  %3524 = vst [vmem:[%s6677_s21] sm:$0xff] %v3516_v23  ;;  %v3207_v7 = vadd.f32 %v7357_v51, %v3131_v1  ;;  %v3303_v0 = vmul.f32 %v6399_v55, %v6736_v42  ;;  %v3495_v59 = vrot.slane %v6699_v33, 2 }
 0x2ba   : > { %v3115_v17 = vsel %vm3094_vm0, %v3113_v58, %v3114_v45  ;;  %v3304_v34 = vmul.f32 %v6399_v55, %v2982_v62  ;;  %v3186_v37 = vrot.slane %v3149_v50, 1  ;;  %v3187_v21 = vrot.slane %v3150_v18, 1 }
 0x2bb   : > { %v3133_v26 = vadd.f32 %v3115_v17, %v3056_v25  ;;  %v3259_v4 = vrot.slane %v3223_v36, 1  ;;  %v3260_v27 = vrot.slane %v3224_v10, 1  ;;  %v3342_v12 = vrot.slane %v3303_v0, 2 }
 0x2bc   : > { %v3343_v13 = vrot.slane %v3304_v34, 2  ;;  %v3378_v20 = vmul.f32 %v6434_v43, %v6736_v42  ;;  %v3188_v41 = vsel %vm3094_vm0, %v3186_v37, %v3187_v21  ;;  %v3379_v46 = vmul.f32 %v6434_v43, %v2982_v62 }
 0x2bd   : > { %v3209_v9 = vadd.f32 %v7358_v35, %v3133_v26  ;;  %v3452_v6 = vmul.f32 %v6408_v15, %v6736_v42  ;;  %v3494_v55 = vrot.slane %v6690_v44, 2  ;;  %v3208_v53 = vadd.f32 %v3188_v41, %v3132_v38  ;;  %v7360_v42 = vld [vmem:[#allocation43_spill] sm:$0xff]  ;;  %v7362_v44 = vld [vmem:[#allocation62_spill] sm:$0xff] }
 0x2be   : > { %v3261_v24 = vsel %vm3094_vm0, %v3259_v4, %v3260_v27  ;;  %v3415_v11 = vrot.slane %v3378_v20, 2  ;;  %v3416_v60 = vrot.slane %v3379_v46, 2  ;;  %v3453_v2 = vmul.f32 %v6408_v15, %v2982_v62  ;;  %v7366_v15 = vld [vmem:[#allocation42_spill] sm:$0xff] }
 0x2bf   : > { %v3283_v8 = vadd.f32 %v3261_v24, %v3207_v7  ;;  %v3285_v63 = vadd.f32 %v6687_v39, %v3209_v9  ;;  %v3284_v3 = vadd.f32 %v7359_v29, %v3208_v53  ;;  %v3344_v43 = vsel %vm3323_vm1, %v3342_v12, %v3343_v13 }
 0x2c0   : > { %v3488_v28 = vrot.slane %v3452_v6, 2  ;;  %v7361_v32 = vrot.slane %v7360_v42, 2  ;;  %v7363_v5 = vrot.slane %v7362_v44, 2  ;;  %v3489_v39 = vrot.slane %v3453_v2, 2 }
 0x2c1   : > { %v3360_v48 = vadd.f32 %v6660_v52, %v3283_v8  ;;  %v3362_v61 = vadd.f32 %v3344_v43, %v3285_v63  ;;  %v7365_v54 = vrot.slane %v7364_v31, 2  ;;  %v7367_v62 = vrot.slane %v7366_v15, 2 }
 0x2c2   : > { %v3341_v40 = vsel %vm3323_vm1, %v7363_v5, %v7361_v32  ;;  %v7369_v47 = vrot.slane %v7368_v14, 2  ;;  %v7371_v30 = vrot.slane %v7370_v57, 2  ;;  %v3417_v52 = vsel %vm3323_vm1, %v3415_v11, %v3416_v60 }
 0x2c3   : > { %v3420_v33 = vsel %vm3323_vm1, %v7367_v62, %v7365_v54  ;;  %v3361_v56 = vadd.f32 %v3341_v40, %v3284_v3  ;;  %v3496_v58 = vsel %vm3323_vm1, %v3494_v55, %v3495_v59  ;;  %v3490_v45 = vsel %vm3323_vm1, %v3488_v28, %v3489_v39 }
 0x2c4   : > { %v3414_v22 = vsel %vm3323_vm1, %v7371_v30, %v7369_v47  ;;  %v3438_v25 = vadd.f32 %v3420_v33, %v3362_v61  ;;  %v7373_v1 = vrot.slane %v7372_v16, 2  ;;  %v7375_v38 = vrot.slane %v7374_v49, 2 }
 0x2c5   : > { %v3436_v19 = vadd.f32 %v3414_v22, %v3360_v48  ;;  %v3437_v23 = vadd.f32 %v3417_v52, %v3361_v56 }
 0x2c6   : > { %v3493_v50 = vsel %vm3323_vm1, %v7375_v38, %v7373_v1  ;;  %v3514_v36 = vadd.f32 %v3496_v58, %v3438_v25 }
 0x2c7   : > { %v3512_v18 = vadd.f32 %v3490_v45, %v3436_v19  ;;  %v3513_v10 = vadd.f32 %v3493_v50, %v3437_v23 }
 0x2c8   : > { %v3522_v51 = vmax.f32 %v3514_v36, 0.0 }
 0x2c9   : > { %v3520_v17 = vmax.f32 %v3512_v18, 0.0  ;;  %v3521_v7 = vmax.f32 %v3513_v10, 0.0 }
 0x2ca   : > { %3530 = vst [vmem:[%s6677_s21 + $0x30] sm:$0xff] %v3522_v51 }
 0x2cb   : > { %3528 = vst [vmem:[%s6677_s21 + $0x20] sm:$0xff] %v3520_v17  ;;  %3529 = vst [vmem:[%s6677_s21 + $0x28] sm:$0xff] %v3521_v7 }
 0x2cc PF: > { %s15_s15 = sadd.s32 1, %s4475_s15  }
 0x2cd   : > { %p12_p3 = scmp.ge.s32.totalorder %s15_s15, 4  }
 0x2cf   :  { %14 = sbr.rel (!%p12_p3) target bundleno = 1 (0x1), region = 73 }
 0x2d6   :  { %3553 = vsyncpa [#allocation4], 1 }
 0x2d7   :  { %3555 = vsyncpa [#allocation4 + $0x1], 1 }

// kernel: kan_layer_forward.4
= control target key start
LH: loop header
LB: loop body
LE: loop exit
PB: predicated region body
PF: predicated region fallthrough
CT: control target
= control target key end

     0   :  { %s4429_s15 = smov 0   ;;  %s6946_s0 = inlined_call_operand.vmem [shape: f32[2,64,128], index: 0, kind: input, shape index: {}]   ;;  %s6947_s1 = inlined_call_operand.vmem [shape: bf16[1152,128], index: 1, kind: input, shape index: {}]   ;;  %s6948_s2 = inlined_call_operand.vmem [shape: f32[9,128], index: 2, kind: input, shape index: {}]   ;;  %s6949_s3 = inlined_call_operand.vmem [shape: f32[1,128], index: 3, kind: input, shape index: {}]   ;;  %s6950_s4 = inlined_call_operand.vmem [shape: f32[2,64,128], index: 4, kind: output, shape index: {}]  }
   0x1 LB: > { %s3572_s16 = sadd.s32 4294967295, %s4401_s15   ;;  %p3576_p0 = scmp.ge.s32.totalorder %s4401_s15, 1  ;;  %s4401_s15 = sphi %s4429_s15, %s14_s15  }
   0x2   : > { %p162_p1 = scmp.lt.s32.totalorder %s4401_s15, 3 }
   0x4   : > { %p163_p2 = pnand %p3576_p0, %p162_p1 }
   0x6   : > { %166 = sbr.rel (%p163_p2) target bundleno = 685 (0x2ad), region = 36 }
   0xd   : > { %v4272_v0 = vld [vmem:[%s6947_s1 + $0x40] sm:$0xff]   ;;  %v4274_v2 = vld [vmem:[%s6947_s1 + $0x48] sm:$0xff]   ;;  %p4448_p3 = scmp.lt.s32.totalorder %s3572_s16, 1  ;;  %v6952_v3 = vmov 0.0   ;;  %v4276_v5 = vld [vmem:[%s6947_s1 + $0x50] sm:$0xff]  }
   0xe   : > { %v4273_v1 = vld [vmem:[%s6947_s1 + $0x100] sm:$0xff]   ;;  %3967 = vmatprep.subr.bf16.mxu1 %v4272_v0  ;;  %2924 = vst [vmem:[#allocation2] sm:$0xff] %v6952_v3  ;;  %2925 = vst [vmem:[#allocation2 + $0x8] sm:$0x3] %v6952_v3  ;;  %v4275_v4 = vld [vmem:[%s6947_s1 + $0x108] sm:$0xff]  }
   0xf   : > { %2928 = vst [vmem:[#allocation2 + $0x98] sm:$0x3] %v6952_v3  ;;  %2930 = vst [vmem:[#allocation2 + $0x10] sm:$0x1] %v6952_v3  ;;  %4063 = vmatprep.subr.bf16.mxu0 %v4273_v1  ;;  %3968 = vmatpush3.bf16.msra.mxu1 %v4272_v0  ;;  %v4277_v6 = vld [vmem:[%s6947_s1 + $0x110] sm:$0xff]   ;;  %s7488_s16 = smov (!%p4448_p3, %s3572_s16), 1 }
  0x10   : > { %2931 = vst [vmem:[#allocation2 + $0x20] sm:$0x1] %v6952_v3  ;;  %2932 = vst [vmem:[#allocation2 + $0x30] sm:$0x1] %v6952_v3  ;;  %4064 = vmatpush3.bf16.msra.mxu0 %v4273_v1  ;;  %3969 = vmatprep.subr.bf16.mxu1 %v4274_v2  ;;  %v4278_v7 = vld [vmem:[%s6947_s1 + $0x58] sm:$0xff]   ;;  %s3857_s8 = sshll.u32 %s7488_s16, 6 }
  0x11   : > { %2933 = vst [vmem:[#allocation2 + $0x40] sm:$0x1] %v6952_v3  ;;  %2934 = vst [vmem:[#allocation2 + $0x50] sm:$0x1] %v6952_v3  ;;  %4065 = vmatprep.subr.bf16.mxu0 %v4275_v4  ;;  %v4279_v8 = vld [vmem:[%s6947_s1 + $0x118] sm:$0xff]   ;;  %v4280_v9 = vld [vmem:[%s6947_s1 + $0x60] sm:$0xff]   ;;  %s4504_s17 = scalar_lea.vmem %s6946_s0, %s3857_s8  ;;  %s6793_s21 = scalar_lea.vmem %s6950_s4, %s3857_s8 }
  0x12   : > { %2935 = vst [vmem:[#allocation2 + $0x60] sm:$0x1] %v6952_v3  ;;  %2936 = vst [vmem:[#allocation2 + $0x70] sm:$0x1] %v6952_v3  ;;  %v4281_v10 = vld [vmem:[%s6947_s1 + $0x120] sm:$0xff]   ;;  %v4282_v11 = vld [vmem:[%s6947_s1 + $0x68] sm:$0xff]  }
  0x13   : > { %2937 = vst [vmem:[#allocation2 + $0x80] sm:$0x1] %v6952_v3  ;;  %2938 = vst [vmem:[#allocation2 + $0x19] sm:$0x1] %v6952_v3  ;;  %3970 = vmatpush3.bf16.msra.mxu1 %v4274_v2  ;;  %v4283_v12 = vld [vmem:[%s6947_s1 + $0x128] sm:$0xff]   ;;  %v4513_v13 = vld [vmem:[%s4504_s17] sm:$0xff] }
  0x14   : > { %2939 = vst [vmem:[#allocation2 + $0x29] sm:$0x1] %v6952_v3  ;;  %2940 = vst [vmem:[#allocation2 + $0x39] sm:$0x1] %v6952_v3  ;;  %4066 = vmatpush3.bf16.msra.mxu0 %v4275_v4  ;;  %3971 = vmatprep.subr.bf16.mxu1 %v4276_v5  ;;  %v4516_v14 = vld [vmem:[%s4504_s17 + $0x8] sm:$0xff]  ;;  %v4284_v15 = vld [vmem:[%s6947_s1 + $0x70] sm:$0xff]  }
  0x15   : > { %2941 = vst [vmem:[#allocation2 + $0x49] sm:$0x1] %v6952_v3  ;;  %2942 = vst [vmem:[#allocation2 + $0x59] sm:$0x1] %v6952_v3  ;;  %4067 = vmatprep.subr.bf16.mxu0 %v4277_v6  ;;  %vm283_vm0 = vcmp.ge.f32.partialorder %v4513_v13, -2.2 }
  0x16   : > { %2943 = vst [vmem:[#allocation2 + $0x69] sm:$0x1] %v6952_v3  ;;  %2944 = vst [vmem:[#allocation2 + $0x79] sm:$0x1] %v6952_v3  ;;  %vm284_vm1 = vcmp.ge.f32.partialorder %v4516_v14, -2.2 }
  0x17   : > { %2945 = vst [vmem:[#allocation2 + $0x89] sm:$0x1] %v6952_v3  ;;  %3972 = vmatpush3.bf16.msra.mxu1 %v4276_v5  ;;  %vm307_vm2 = vcmp.ge.f32.partialorder %v4513_v13, -1.8  ;;  %v3589_v16 = vsel %vm283_vm0, 1.0, %v6952_v3  ;;  %v3590_v17 = vsel %vm284_vm1, 1.0, %v6952_v3 }
  0x18   : > { %4068 = vmatpush3.bf16.msra.mxu0 %v4277_v6  ;;  %3973 = vmatprep.subr.bf16.mxu1 %v4278_v7  ;;  %vm308_vm3 = vcmp.ge.f32.partialorder %v4516_v14, -1.8  ;;  %v3597_v18 = vsel %vm307_vm2, 1.0, %v6952_v3  ;;  %vm331_vm4 = vcmp.ge.f32.partialorder %v4513_v13, -1.4  ;;  %vm355_vm6 = vcmp.ge.f32.partialorder %v4513_v13, -1.0 }
  0x19   : > { %4069 = vmatprep.subr.bf16.mxu0 %v4279_v8  ;;  %v3598_v19 = vsel %vm308_vm3, 1.0, %v6952_v3  ;;  %vm332_vm5 = vcmp.ge.f32.partialorder %v4516_v14, -1.4  ;;  %v3605_v20 = vsel %vm331_vm4, 1.0, %v6952_v3  ;;  %vm356_vm7 = vcmp.ge.f32.partialorder %v4516_v14, -1.0  ;;  %v4285_v23 = vld [vmem:[%s6947_s1 + $0x130] sm:$0xff]  }
  0x1a   : > { %v3606_v21 = vsel %vm332_vm5, 1.0, %v6952_v3  ;;  %v3613_v22 = vsel %vm355_vm6, 1.0, %v6952_v3  ;;  %v3614_v24 = vsel %vm356_vm7, 1.0, %v6952_v3  ;;  %vm379_vm8 = vcmp.ge.f32.partialorder %v4513_v13, -0.6  ;;  %v4286_v29 = vld [vmem:[%s6947_s1 + $0x78] sm:$0xff]  }
  0x1b   : > { %3974 = vmatpush3.bf16.msra.mxu1 %v4278_v7  ;;  %vm380_vm9 = vcmp.ge.f32.partialorder %v4516_v14, -0.6  ;;  %v4543_v25 = vsel %vm379_vm8, 1.0, %v6952_v3  ;;  %v571_v27 = vsub.f32 %v3589_v16, %v3597_v18  ;;  %v572_v28 = vsub.f32 %v3590_v17, %v3598_v19  ;;  %v4287_v30 = vld [vmem:[%s6947_s1 + $0x138] sm:$0xff]   ;;  %v4596_v55 = vld [vmem:[%s6947_s1] sm:$0xff]  }
  0x1c   : > { %4070 = vmatpush3.bf16.msra.mxu0 %v4279_v8  ;;  %3975 = vmatprep.subr.bf16.mxu1 %v4280_v9  ;;  %v4546_v26 = vsel %vm380_vm9, 1.0, %v6952_v3  ;;  %v579_v31 = vsub.f32 %v3597_v18, %v3605_v20  ;;  %v580_v32 = vsub.f32 %v3598_v19, %v3606_v21  ;;  %v587_v33 = vsub.f32 %v3605_v20, %v3613_v22  ;;  %v4289_v60 = vld [vmem:[%s6947_s1 + $0x140] sm:$0xff]  }
  0x1d   : > { %4071 = vmatprep.subr.bf16.mxu0 %v4281_v10  ;;  %v588_v34 = vsub.f32 %v3606_v21, %v3614_v24  ;;  %v4555_v35 = vsub.f32 %v3613_v22, %v4543_v25  ;;  %v4558_v36 = vadd.f32 2.2, %v4513_v13  ;;  %v4561_v37 = vadd.f32 2.2, %v4516_v14 }
  0x1e   : > { %v4564_v38 = vadd.f32 1.4, %v4513_v13  ;;  %v4567_v39 = vsub.f32 %v3614_v24, %v4546_v26  ;;  %v4570_v40 = vadd.f32 1.4, %v4516_v14  ;;  %v4573_v41 = vadd.f32 1.8, %v4513_v13 }
  0x1f   : > { %3976 = vmatpush3.bf16.msra.mxu1 %v4280_v9  ;;  %v4576_v42 = vadd.f32 1.8, %v4516_v14  ;;  %v667_v43 = vmul.f32 2.5, %v4558_v36  ;;  %v668_v44 = vmul.f32 2.5, %v4561_v37  ;;  %v4582_v46 = vadd.f32 1.0, %v4513_v13 }
  0x20   : > { %4072 = vmatpush3.bf16.msra.mxu0 %v4281_v10  ;;  %3977 = vmatprep.subr.bf16.mxu1 %v4282_v11  ;;  %7124 = vst [vmem:[#allocation3_spill] sm:$0xff] %v4564_v38  ;;  %7125 = vst [vmem:[#allocation4_spill] sm:$0xff] %v4570_v40  ;;  %v691_v45 = vmul.f32 2.5, %v4564_v38  ;;  %v692_v47 = vmul.f32 2.5, %v4570_v40  ;;  %v723_v48 = vmul.f32 2.5, %v4573_v41  ;;  %v4588_v50 = vadd.f32 1.0, %v4516_v14 }
  0x21   : > { %4073 = vmatprep.subr.bf16.mxu0 %v4283_v12  ;;  %7126 = vst [vmem:[#allocation5_spill] sm:$0xff] %v4573_v41  ;;  %7127 = vst [vmem:[#allocation6_spill] sm:$0xff] %v4576_v42  ;;  %v724_v49 = vmul.f32 2.5, %v4576_v42  ;;  %v675_v51 = vmul.f32 %v667_v43, %v571_v27  ;;  %v676_v52 = vmul.f32 %v668_v44, %v572_v28  ;;  %v4591_v54 = vmul.f32 2.5, %v4582_v46 }
  0x22   : > { %v699_v53 = vmul.f32 %v691_v45, %v579_v31  ;;  %v700_v56 = vmul.f32 %v692_v47, %v580_v32  ;;  %v731_v57 = vmul.f32 %v723_v48, %v579_v31  ;;  %v4599_v59 = vmul.f32 2.5, %v4588_v50 }
  0x23   : > { %3978 = vmatpush3.bf16.msra.mxu1 %v4282_v11  ;;  %v732_v58 = vmul.f32 %v724_v49, %v580_v32  ;;  %v755_v62 = vmul.f32 %v4591_v54, %v587_v33  ;;  %v771_v63 = vmul.f32 %v691_v45, %v587_v33  ;;  %v772_v0 = vmul.f32 %v692_v47, %v588_v34 }
  0x24   : > { %4074 = vmatpush3.bf16.msra.mxu0 %v4283_v12  ;;  %3979 = vmatprep.subr.bf16.mxu1 %v4284_v15  ;;  %v707_v61 = vsub.f32 %v675_v51, %v699_v53  ;;  %v708_v1 = vsub.f32 %v676_v52, %v700_v56  ;;  %v756_v2 = vmul.f32 %v4599_v59, %v588_v34  ;;  %v3717_v4 = vadd.f32 0.6, %v4513_v13 }
  0x25   : > { %4075 = vmatprep.subr.bf16.mxu0 %v4285_v23  ;;  %v3718_v5 = vadd.f32 0.6, %v4516_v14  ;;  %v763_v6 = vsub.f32 %v731_v57, %v755_v62  ;;  %v1091_v7 = vmul.f32 1.25, %v4558_v36  ;;  %v1092_v8 = vmul.f32 1.25, %v4561_v37 }
  0x26   : > { %v4611_v9 = vmul.f32 1.25, %v4582_v46  ;;  %v764_v10 = vsub.f32 %v732_v58, %v756_v2  ;;  %v787_v11 = vmul.f32 2.5, %v3717_v4  ;;  %v1131_v19 = vmul.f32 1.25, %v4573_v41 }
  0x27   : > { %3980 = vmatpush3.bf16.msra.mxu1 %v4284_v15  ;;  %v788_v12 = vmul.f32 2.5, %v3718_v5  ;;  %v4615_v15 = vmul.f32 1.25, %v4588_v50  ;;  %v1099_v16 = vmul.f32 %v1091_v7, %v707_v61  ;;  %v1100_v17 = vmul.f32 %v1092_v8, %v708_v1 }
  0x28   : > { %4076 = vmatpush3.bf16.msra.mxu0 %v4285_v23  ;;  %3981 = vmatprep.subr.bf16.mxu1 %v4286_v29  ;;  %v1115_v18 = vmul.f32 %v4611_v9, %v763_v6  ;;  %v795_v20 = vmul.f32 %v787_v11, %v4555_v35  ;;  %v1132_v23 = vmul.f32 1.25, %v4576_v42  ;;  %v1139_v27 = vmul.f32 %v1131_v19, %v763_v6 }
  0x29   : > { %4077 = vmatprep.subr.bf16.mxu0 %v4287_v30  ;;  %v796_v21 = vmul.f32 %v788_v12, %v4567_v39  ;;  %v1116_v22 = vmul.f32 %v4615_v15, %v764_v10  ;;  %v4623_v28 = vmul.f32 1.25, %v3717_v4  ;;  %v1403_v34 = vmul.f32 0.8333333, %v4558_v36 }
  0x2a   : > { %v1123_v24 = vsub.f32 %v1099_v16, %v1115_v18  ;;  %v1140_v33 = vmul.f32 %v1132_v23, %v764_v10  ;;  %v1404_v43 = vmul.f32 0.8333333, %v4561_v37  ;;  %v4633_v44 = vmul.f32 0.8333333, %v3717_v4 }
  0x2b   : > { %3982 = vmatpush3.bf16.msra.mxu1 %v4286_v29  ;;  %v4625_v29 = vmul.f32 1.25, %v3718_v5  ;;  %v4629_v31 = vsub.f32 %v772_v0, %v796_v21  ;;  %v1124_v32 = vsub.f32 %v1100_v17, %v1116_v22  ;;  %v4639_v48 = vmul.f32 0.8333333, %v3718_v5 }
  0x2c   : > { %4078 = vmatpush3.bf16.msra.mxu0 %v4287_v30  ;;  %3991 = vmatprep.subr.bf16.mxu1 %v4596_v55  ;;  %v4627_v30 = vsub.f32 %v771_v63, %v795_v20  ;;  %7130 = vst [vmem:[#allocation9_spill] sm:$0xff] %v4633_v44  ;;  %vm403_vm10 = vcmp.ge.f32.partialorder %v4513_v13, -0.2  ;;  %v1411_v49 = vmul.f32 %v1403_v34, %v1123_v24  ;;  %vm404_vm11 = vcmp.ge.f32.partialorder %v4516_v14, -0.2 }
  0x2d   : > { %4087 = vmatprep.subr.bf16.mxu0 %v4289_v60  ;;  %7129 = vst [vmem:[#allocation8_spill] sm:$0xff] %v4629_v31  ;;  %v1156_v47 = vmul.f32 %v4625_v29, %v4629_v31  ;;  %7131 = vst [vmem:[#allocation10_spill] sm:$0xff] %v4639_v48  ;;  %v1412_v51 = vmul.f32 %v1404_v43, %v1124_v32  ;;  %v3629_v37 = vsel %vm403_vm10, 1.0, %v6952_v3  ;;  %vm427_vm12 = vcmp.ge.f32.partialorder %v4513_v13, 0.2 }
  0x2e   : > { %7128 = vst [vmem:[#allocation7_spill] sm:$0xff] %v4627_v30  ;;  %v1155_v45 = vmul.f32 %v4623_v28, %v4627_v30  ;;  %v3630_v53 = vsel %vm404_vm11, 1.0, %v6952_v3  ;;  %vm428_vm13 = vcmp.ge.f32.partialorder %v4516_v14, 0.2  ;;  %vm451_vm14 = vcmp.ge.f32.partialorder %v4513_v13, 0.6 }
  0x2f   : > { %v4645_v36 = vsub.f32 %v1140_v33, %v1156_v47  ;;  %vm475_vm15 = vcmp.ge.f32.partialorder %v4513_v13, 1.0  ;;  %v3637_v58 = vsel %vm427_vm12, 1.0, %v6952_v3  ;;  %vm452_vm0 = vcmp.ge.f32.partialorder %v4516_v14, 0.6 }
  0x30   : > { %v4643_v52 = vsub.f32 %v1139_v27, %v1155_v45  ;;  %v3638_v60 = vsel %vm428_vm13, 1.0, %v6952_v3  ;;  %v4661_v61 = vsel %vm451_vm14, 1.0, %v6952_v3  ;;  %v4664_v62 = vsel %vm452_vm0, 1.0, %v6952_v3 }
  0x31   : > { %7133 = vst [vmem:[#allocation12_spill] sm:$0xff] %v4645_v36  ;;  %v1428_v57 = vmul.f32 %v4639_v48, %v4645_v36  ;;  %v4667_v1 = vsel %vm475_vm15, 1.0, %v6952_v3  ;;  %v603_v2 = vsub.f32 %v4543_v25, %v3629_v37  ;;  %v604_v4 = vsub.f32 %v4546_v26, %v3630_v53 }
  0x32   : > { %7132 = vst [vmem:[#allocation11_spill] sm:$0xff] %v4643_v52  ;;  %v1427_v56 = vmul.f32 %v4633_v44, %v4643_v52  ;;  %7134 = vst [vmem:[#allocation13_spill] sm:$0xff] %v4667_v1  ;;  %v611_v5 = vsub.f32 %v3629_v37, %v3637_v58  ;;  %v811_v6 = vmul.f32 %v4591_v54, %v4555_v35  ;;  %v4682_v18 = vadd.f32 0.2, %v4513_v13 }
  0x33   : > { %v1436_v0 = vsub.f32 %v1412_v51, %v1428_v57  ;;  %v612_v8 = vsub.f32 %v3630_v53, %v3638_v60  ;;  %v4674_v10 = vsub.f32 %v3637_v58, %v4661_v61  ;;  %v4677_v16 = vsub.f32 %v3638_v60, %v4664_v62  ;;  %v4725_v53 = vld [vmem:[%s4504_s17 + $0x10] sm:$0xff] }
  0x34   : > { %v1435_v63 = vsub.f32 %v1411_v49, %v1427_v56  ;;  %v812_v17 = vmul.f32 %v4599_v59, %v4567_v39  ;;  %7135 = vst [vmem:[#allocation14_spill] sm:$0xff] %v4682_v18  ;;  %v4685_v25 = vadd.f32 0.2, %v4516_v14  ;;  %v851_v26 = vmul.f32 %v787_v11, %v603_v2 }
  0x35   : > { %v852_v35 = vmul.f32 %v788_v12, %v604_v4  ;;  %v4688_v54 = vadd.f32 -0.2, %v4513_v13  ;;  %v4691_v19 = vadd.f32 -0.2, %v4516_v14  ;;  %v3741_v20 = vadd.f32 -0.6, %v4513_v13 }
  0x36   : > { %v1443_v7 = vpack.c.bf16 %v1436_v0, %v1435_v63  ;;  %7136 = vst [vmem:[#allocation15_spill] sm:$0xff] %v4685_v25  ;;  %v827_v21 = vmul.f32 2.5, %v4682_v18  ;;  %v828_v39 = vmul.f32 2.5, %v4685_v25  ;;  %v3742_v59 = vadd.f32 -0.6, %v4516_v14 }
  0x37   : > { %7137 = vst [vmem:[#allocation16_spill] sm:$0xff] %v4688_v54  ;;  %7138 = vst [vmem:[#allocation17_spill] sm:$0xff] %v4691_v19  ;;  %v2051_v22 = vmul.f32 0.8333333, %v4582_v46  ;;  %v4699_v11 = vmul.f32 2.5, %v4688_v54  ;;  %v4702_v12 = vmul.f32 2.5, %v4691_v19 }
  0x38   : > { %3983 = vmatprep.mubr.bf16.mxu1 %v1443_v7  ;;  %v4704_v23 = vmul.f32 2.5, %v3741_v20  ;;  %v4707_v24 = vmul.f32 1.25, %v4688_v54  ;;  %v835_v13 = vmul.f32 %v827_v21, %v603_v2  ;;  %v836_v27 = vmul.f32 %v828_v39, %v604_v4 }
  0x39   : > { %v891_v32 = vmul.f32 %v827_v21, %v611_v5  ;;  %v892_v33 = vmul.f32 %v828_v39, %v612_v8  ;;  %v875_v34 = vmul.f32 %v4699_v11, %v611_v5  ;;  %v876_v46 = vmul.f32 %v4702_v12, %v612_v8  ;;  %v4740_v5 = vld [vmem:[%s4504_s17 + $0x18] sm:$0xff] }
  0x3a   : > { %7139 = vst [vmem:[#allocation18_spill] sm:$0xff] %v4704_v23  ;;  %7140 = vst [vmem:[#allocation19_spill] sm:$0xff] %v4707_v24  ;;  %v4711_v43 = vmul.f32 2.5, %v3742_v59  ;;  %v915_v45 = vmul.f32 %v4704_v23, %v4674_v10  ;;  %v4715_v47 = vsub.f32 %v811_v6, %v835_v13  ;;  %v4717_v49 = vsub.f32 %v812_v17, %v836_v27 }
  0x3b   : > { %v4720_v51 = vmul.f32 1.25, %v4691_v19  ;;  %v4722_v37 = vmul.f32 1.25, %v3741_v20  ;;  %vm476_vm1 = vcmp.ge.f32.partialorder %v4516_v14, 1.0  ;;  %v883_v56 = vsub.f32 %v851_v26, %v875_v34 }
  0x3c   : > { %7141 = vst [vmem:[#allocation20_spill] sm:$0xff] %v4711_v43  ;;  %7142 = vst [vmem:[#allocation21_spill] sm:$0xff] %v4715_v47  ;;  %v884_v57 = vsub.f32 %v852_v35, %v876_v46  ;;  %v916_v58 = vmul.f32 %v4711_v43, %v4677_v16  ;;  %v4730_v60 = vsub.f32 %v891_v32, %v915_v45  ;;  %v4736_v2 = vmul.f32 1.25, %v3742_v59 }
  0x3d   : > { %7143 = vst [vmem:[#allocation22_spill] sm:$0xff] %v4717_v49  ;;  %7144 = vst [vmem:[#allocation23_spill] sm:$0xff] %v4720_v51  ;;  %v1211_v63 = vmul.f32 %v4611_v9, %v4715_v47  ;;  %v1212_v0 = vmul.f32 %v4615_v15, %v4717_v49  ;;  %v2052_v4 = vmul.f32 0.8333333, %v4588_v50  ;;  %v1227_v7 = vmul.f32 %v4707_v24, %v883_v56 }
  0x3e   : > { %7145 = vst [vmem:[#allocation24_spill] sm:$0xff] %v4722_v37  ;;  %7146 = vst [vmem:[#allocation25_spill] sm:$0xff] %v4730_v60  ;;  %v4742_v6 = vsub.f32 %v892_v33, %v916_v58  ;;  %v1228_v8 = vmul.f32 %v4720_v51, %v884_v57  ;;  %v1243_v17 = vmul.f32 %v4623_v28, %v883_v56  ;;  %v4750_v15 = vmul.f32 0.8333333, %v3741_v20 }
  0x3f   : > { %7147 = vst [vmem:[#allocation26_spill] sm:$0xff] %v4736_v2  ;;  %v1244_v26 = vmul.f32 %v4625_v29, %v884_v57  ;;  %v1259_v9 = vmul.f32 %v4722_v37, %v4730_v60  ;;  %v4752_v35 = vmul.f32 0.8333333, %v3742_v59  ;;  %v4754_v50 = vsub.f32 %v1211_v63, %v1227_v7 }
  0x40   : > { %7148 = vst [vmem:[#allocation27_spill] sm:$0xff] %v4742_v6  ;;  %7149 = vst [vmem:[#allocation28_spill] sm:$0xff] %v4750_v15  ;;  %v4756_v21 = vsub.f32 %v1212_v0, %v1228_v8  ;;  %v1260_v39 = vmul.f32 %v4736_v2, %v4742_v6  ;;  %vm285_vm2 = vcmp.ge.f32.partialorder %v4725_v53, -2.2  ;;  %vm286_vm3 = vcmp.ge.f32.partialorder %v4740_v5, -2.2 }
  0x41   : > { %7150 = vst [vmem:[#allocation29_spill] sm:$0xff] %v4752_v35  ;;  %7151 = vst [vmem:[#allocation30_spill] sm:$0xff] %v4754_v50  ;;  %v4761_v13 = vsub.f32 %v1243_v17, %v1259_v9  ;;  %v3591_v28 = vsel %vm285_vm2, 1.0, %v6952_v3  ;;  %vm309_vm4 = vcmp.ge.f32.partialorder %v4725_v53, -1.8  ;;  %v2059_v20 = vmul.f32 %v2051_v22, %v4754_v50 }
  0x42   : > { %7152 = vst [vmem:[#allocation31_spill] sm:$0xff] %v4756_v21  ;;  %v4766_v29 = vsub.f32 %v1244_v26, %v1260_v39  ;;  %v2060_v59 = vmul.f32 %v2052_v4, %v4756_v21  ;;  %v3592_v27 = vsel %vm286_vm3, 1.0, %v6952_v3  ;;  %vm310_vm5 = vcmp.ge.f32.partialorder %v4740_v5, -1.8 }
  0x43   : > { %v2075_v32 = vmul.f32 %v4750_v15, %v4761_v13  ;;  %v3599_v33 = vsel %vm309_vm4, 1.0, %v6952_v3  ;;  %vm333_vm6 = vcmp.ge.f32.partialorder %v4725_v53, -1.4  ;;  %v3600_v46 = vsel %vm310_vm5, 1.0, %v6952_v3 }
  0x44   : > { %7153 = vst [vmem:[#allocation32_spill] sm:$0xff] %v4766_v29  ;;  %v2076_v34 = vmul.f32 %v4752_v35, %v4766_v29  ;;  %vm334_vm7 = vcmp.ge.f32.partialorder %v4740_v5, -1.4  ;;  %v3607_v22 = vsel %vm333_vm6, 1.0, %v6952_v3  ;;  %vm357_vm8 = vcmp.ge.f32.partialorder %v4725_v53, -1.0 }
  0x45   : > { %v2083_v45 = vsub.f32 %v2059_v20, %v2075_v32  ;;  %v3608_v56 = vsel %vm334_vm7, 1.0, %v6952_v3  ;;  %vm358_vm9 = vcmp.ge.f32.partialorder %v4740_v5, -1.0  ;;  %v3615_v58 = vsel %vm357_vm8, 1.0, %v6952_v3 }
  0x46   : > { %v2084_v57 = vsub.f32 %v2060_v59, %v2076_v34  ;;  %v3616_v63 = vsel %vm358_vm9, 1.0, %v6952_v3  ;;  %vm381_vm10 = vcmp.ge.f32.partialorder %v4725_v53, -0.6  ;;  %v4790_v0 = vsel %vm476_vm1, 1.0, %v6952_v3 }
  0x47   : > { %7154 = vst [vmem:[#allocation33_spill] sm:$0xff] %v4790_v0  ;;  %v4794_v4 = vsub.f32 %v4661_v61, %v4667_v1  ;;  %vm382_vm11 = vcmp.ge.f32.partialorder %v4740_v5, -0.6  ;;  %v4798_v7 = vsel %vm381_vm10, 1.0, %v6952_v3  ;;  %v573_v26 = vsub.f32 %v3591_v28, %v3599_v33 }
  0x48   : > { %v2091_v8 = vpack.c.bf16 %v2084_v57, %v2083_v45  ;;  %v4801_v17 = vsel %vm382_vm11, 1.0, %v6952_v3  ;;  %v574_v9 = vsub.f32 %v3592_v27, %v3600_v46  ;;  %v581_v39 = vsub.f32 %v3599_v33, %v3607_v22 }
  0x49   : > { %7155 = vst [vmem:[#allocation34_spill] sm:$0xff] %v4794_v4  ;;  %v582_v20 = vsub.f32 %v3600_v46, %v3608_v56  ;;  %v589_v14 = vsub.f32 %v3607_v22, %v3615_v58  ;;  %v590_v59 = vsub.f32 %v3608_v56, %v3616_v63  ;;  %v4804_v32 = vsub.f32 %v3615_v58, %v4798_v7 }
  0x4a   : > { %4079 = vmatprep.mubr.bf16.mxu0 %v2091_v8  ;;  %v3687_v61 = vadd.f32 2.2, %v4725_v53  ;;  %v3688_v34 = vadd.f32 2.2, %v4740_v5  ;;  %v4809_v35 = vadd.f32 1.4, %v4725_v53  ;;  %v4812_v45 = vsub.f32 %v3616_v63, %v4801_v17 }
  0x4b   : > { %v4815_v28 = vadd.f32 1.4, %v4740_v5  ;;  %v4818_v27 = vadd.f32 1.8, %v4725_v53  ;;  %v4821_v33 = vadd.f32 1.8, %v4740_v5 }
  0x4c   : > { %7156 = vst [vmem:[#allocation35_spill] sm:$0xff] %v4809_v35  ;;  %v669_v46 = vmul.f32 2.5, %v3687_v61  ;;  %v670_v22 = vmul.f32 2.5, %v3688_v34  ;;  %v693_v56 = vmul.f32 2.5, %v4809_v35  ;;  %v4825_v57 = vadd.f32 1.0, %v4725_v53 }
  0x4d   : > { %7157 = vst [vmem:[#allocation36_spill] sm:$0xff] %v4815_v28  ;;  %v694_v58 = vmul.f32 2.5, %v4815_v28  ;;  %v725_v63 = vmul.f32 2.5, %v4818_v27  ;;  %v726_v8 = vmul.f32 2.5, %v4821_v33  ;;  %v4831_v3 = vadd.f32 1.0, %v4740_v5 }
  0x4e   : > { %v677_v15 = vmul.f32 %v669_v46, %v573_v26  ;;  %v678_v2 = vmul.f32 %v670_v22, %v574_v9  ;;  %v701_v37 = vmul.f32 %v693_v56, %v581_v39  ;;  %v4834_v21 = vmul.f32 2.5, %v4825_v57 }
  0x4f   : > { %v702_v50 = vmul.f32 %v694_v58, %v582_v20  ;;  %v733_v19 = vmul.f32 %v725_v63, %v581_v39  ;;  %v734_v54 = vmul.f32 %v726_v8, %v582_v20  ;;  %v4837_v51 = vmul.f32 2.5, %v4831_v3 }
  0x50   : > { %v709_v24 = vsub.f32 %v677_v15, %v701_v37  ;;  %v757_v43 = vmul.f32 %v4834_v21, %v589_v14  ;;  %v773_v23 = vmul.f32 %v693_v56, %v589_v14  ;;  %v774_v1 = vmul.f32 %v694_v58, %v590_v59 }
  0x51   : > { %v710_v36 = vsub.f32 %v678_v2, %v702_v50  ;;  %v758_v52 = vmul.f32 %v4837_v51, %v590_v59  ;;  %v3719_v26 = vadd.f32 0.6, %v4725_v53  ;;  %v3720_v9 = vadd.f32 0.6, %v4740_v5 }
  0x52   : > { %v765_v46 = vsub.f32 %v733_v19, %v757_v43  ;;  %v1093_v22 = vmul.f32 1.25, %v3687_v61  ;;  %v1094_v42 = vmul.f32 1.25, %v3688_v34  ;;  %v4844_v39 = vmul.f32 1.25, %v4825_v57 }
  0x53   : > { %v766_v20 = vsub.f32 %v734_v54, %v758_v52  ;;  %v4846_v63 = vmul.f32 2.5, %v3719_v26  ;;  %v4848_v37 = vmul.f32 2.5, %v3720_v9  ;;  %v4851_v15 = vmul.f32 1.25, %v4831_v3 }
  0x54   : > { %v1101_v2 = vmul.f32 %v1093_v22, %v709_v24  ;;  %v1102_v50 = vmul.f32 %v1094_v42, %v710_v36  ;;  %v1117_v14 = vmul.f32 %v4844_v39, %v765_v46  ;;  %v1133_v59 = vmul.f32 1.25, %v4818_v27 }
  0x55   : > { %v797_v19 = vmul.f32 %v4846_v63, %v4804_v32  ;;  %v798_v43 = vmul.f32 %v4848_v37, %v4812_v45  ;;  %v1118_v52 = vmul.f32 %v4851_v15, %v766_v20  ;;  %v1134_v54 = vmul.f32 1.25, %v4821_v33 }
  0x56   : > { %v1125_v56 = vsub.f32 %v1101_v2, %v1117_v14  ;;  %v1141_v58 = vmul.f32 %v1133_v59, %v765_v46  ;;  %v4861_v8 = vmul.f32 1.25, %v3719_v26  ;;  %v4863_v24 = vmul.f32 1.25, %v3720_v9 }
  0x57   : > { %v805_v42 = vsub.f32 %v773_v23, %v797_v19  ;;  %v806_v36 = vsub.f32 %v774_v1, %v798_v43  ;;  %v1126_v22 = vsub.f32 %v1102_v50, %v1118_v52  ;;  %v1142_v41 = vmul.f32 %v1134_v54, %v766_v20 }
  0x58   : > { %v1173_v49 = vmul.f32 1.25, %v4809_v35  ;;  %v1174_v31 = vmul.f32 1.25, %v4815_v28  ;;  %v1405_v30 = vmul.f32 0.8333333, %v3687_v61  ;;  %v1406_v47 = vmul.f32 0.8333333, %v3688_v34 }
  0x59   : > { %v1157_v40 = vmul.f32 %v4861_v8, %v805_v42  ;;  %v1158_v38 = vmul.f32 %v4863_v24, %v806_v36  ;;  %v4869_v2 = vmul.f32 0.8333333, %v3719_v26  ;;  %v4871_v46 = vmul.f32 0.8333333, %v3720_v9 }
  0x5a   : > { %v4875_v23 = vsub.f32 %v4664_v62, %v4790_v0  ;;  %v4877_v1 = vmul.f32 %v1173_v49, %v805_v42  ;;  %v1413_v20 = vmul.f32 %v1405_v30, %v1125_v56  ;;  %v1414_v50 = vmul.f32 %v1406_v47, %v1126_v22 }
  0x5b   : > { %v1165_v14 = vsub.f32 %v1141_v58, %v1157_v40  ;;  %v1166_v59 = vsub.f32 %v1142_v41, %v1158_v38  ;;  %v1691_v61 = vmul.f32 0.8333333, %v4818_v27  ;;  %v1692_v34 = vmul.f32 0.8333333, %v4821_v33  ;;  %v4290_v58 = vld [vmem:[%s6947_s1 + $0x8] sm:$0xff]  }
  0x5c   : > { %7158 = vst [vmem:[#allocation37_spill] sm:$0xff] %v4875_v23  ;;  %7159 = vst [vmem:[#allocation38_spill] sm:$0xff] %v4877_v1  ;;  %v4881_v19 = vmul.f32 %v1174_v31, %v806_v36  ;;  %vm405_vm12 = vcmp.ge.f32.partialorder %v4725_v53, -0.2  ;;  %vm406_vm13 = vcmp.ge.f32.partialorder %v4740_v5, -0.2  ;;  %v813_v42 = vmul.f32 %v4834_v21, %v4804_v32 }
  0x5d   : > { %vm429_vm14 = vcmp.ge.f32.partialorder %v4725_v53, 0.2  ;;  %v1429_v62 = vmul.f32 %v4869_v2, %v1165_v14  ;;  %v1430_v49 = vmul.f32 %v4871_v46, %v1166_v59  ;;  %v4888_v30 = vmul.f32 %v1691_v61, %v1165_v14  ;;  %v4929_v32 = vld [vmem:[#allocation2] sm:$0xff] }
  0x5e   : > { %7160 = vst [vmem:[#allocation39_spill] sm:$0xff] %v4881_v19  ;;  %v4890_v40 = vmul.f32 %v1692_v34, %v1166_v59  ;;  %v7163_v38 = vmov 0.0   ;;  %vm430_vm15 = vcmp.ge.f32.partialorder %v4740_v5, 0.2  ;;  %vm453_vm0 = vcmp.ge.f32.partialorder %v4725_v53, 0.6 }
  0x5f   : > { %7161 = vst [vmem:[#allocation40_spill] sm:$0xff] %v4888_v30  ;;  %v3631_v41 = vsel %vm405_vm12, 1.0, %v7163_v38  ;;  %v3632_v47 = vsel %vm406_vm13, 1.0, %v7163_v38  ;;  %v3639_v31 = vsel %vm429_vm14, 1.0, %v7163_v38  ;;  %v1437_v27 = vsub.f32 %v1413_v20, %v1429_v62  ;;  %v4296_v1 = vld [vmem:[%s6947_s1 + $0x20] sm:$0xff]  }
  0x60   : > { %7162 = vst [vmem:[#allocation41_spill] sm:$0xff] %v4890_v40  ;;  %v1438_v33 = vsub.f32 %v1414_v50, %v1430_v49  ;;  %v3640_v26 = vsel %vm430_vm15, 1.0, %v7163_v38  ;;  %vm454_vm1 = vcmp.ge.f32.partialorder %v4740_v5, 0.6  ;;  %v3647_v9 = vsel %vm453_vm0, 1.0, %v7163_v38  ;;  %v4292_v50 = vld [vmem:[%s6947_s1 + $0x10] sm:$0xff]  }
  0x61   : > { %vm477_vm2 = vcmp.ge.f32.partialorder %v4725_v53, 1.0  ;;  %vm478_vm3 = vcmp.ge.f32.partialorder %v4740_v5, 1.0  ;;  %v3648_v52 = vsel %vm454_vm1, 1.0, %v7163_v38  ;;  %vm501_vm4 = vcmp.ge.f32.partialorder %v4725_v53, 1.4 }
  0x62   : > { %v1444_v43 = vpack.c.bf16 %v1438_v33, %v1437_v27  ;;  %v3655_v54 = vsel %vm477_vm2, 1.0, %v7163_v38  ;;  %v3656_v56 = vsel %vm478_vm3, 1.0, %v7163_v38  ;;  %vm502_vm5 = vcmp.ge.f32.partialorder %v4740_v5, 1.4 }
  0x63   : > { %vm525_vm6 = vcmp.ge.f32.partialorder %v4725_v53, 1.8  ;;  %v3663_v36 = vsel %vm501_vm4, 1.0, %v7163_v38  ;;  %v3664_v22 = vsel %vm502_vm5, 1.0, %v7163_v38  ;;  %vm526_vm7 = vcmp.ge.f32.partialorder %v4740_v5, 1.8 }
  0x64   : > { %3984 = vmatmul.mubr.bf16.vlgmr.msra.gmra.mrb[0].mxu1 %v1444_v43  ;;  %v605_v20 = vsub.f32 %v4798_v7, %v3631_v41  ;;  %v4922_v14 = vsel %vm525_vm6, 1.0, %v7163_v38  ;;  %v4925_v21 = vsel %vm526_vm7, 1.0, %v7163_v38  ;;  %vm549_vm8 = vcmp.ge.f32.partialorder %v4725_v53, 2.2 }
  0x65   : > { %3992 = vmatpush3.bf16.msra.mxu1 %v4596_v55  ;;  %7164 = vst [vmem:[#allocation42_spill] sm:$0xff] %v4922_v14  ;;  %7165 = vst [vmem:[#allocation43_spill] sm:$0xff] %v4925_v21  ;;  %vm550_vm9 = vcmp.ge.f32.partialorder %v4740_v5, 2.2  ;;  %v4932_v7 = vsel %vm549_vm8, 1.0, %v4929_v32  ;;  %v606_v55 = vsub.f32 %v4801_v17, %v3632_v47  ;;  %v613_v61 = vsub.f32 %v3631_v41, %v3639_v31 }
  0x66   : > { %7166 = vst [vmem:[#allocation44_spill] sm:$0xff] %v4932_v7  ;;  %v4935_v59 = vsel %vm550_vm9, 1.0, %v4929_v32  ;;  %3993 = vmatprep.subr.bf16.mxu1 %v4290_v58  ;;  %v614_v34 = vsub.f32 %v3632_v47, %v3640_v26  ;;  %v621_v62 = vsub.f32 %v3639_v31, %v3647_v9  ;;  %v622_v49 = vsub.f32 %v3640_v26, %v3648_v52 }
  0x67   : > { %7167 = vst [vmem:[#allocation45_spill] sm:$0xff] %v4935_v59  ;;  %v629_v38 = vsub.f32 %v3647_v9, %v3655_v54  ;;  %v630_v27 = vsub.f32 %v3648_v52, %v3656_v56  ;;  %v4938_v33 = vsub.f32 %v3655_v54, %v3663_v36  ;;  %v4940_v43 = vsub.f32 %v3656_v56, %v3664_v22  ;;  %v4294_v59 = vld [vmem:[%s6947_s1 + $0x18] sm:$0xff]  }
  0x68   : > { %v4943_v28 = vsub.f32 %v3663_v36, %v4922_v14  ;;  %v4949_v17 = vsub.f32 %v3664_v22, %v4925_v21  ;;  %v814_v47 = vmul.f32 %v4837_v51, %v4812_v45  ;;  %v4956_v31 = vadd.f32 0.2, %v4725_v53 }
  0x69   : > { %3994 = vmatpush3.bf16.msra.mxu1 %v4290_v58  ;;  %v4959_v26 = vadd.f32 0.2, %v4740_v5  ;;  %v853_v9 = vmul.f32 %v4846_v63, %v605_v20  ;;  %v854_v52 = vmul.f32 %v4848_v37, %v606_v55  ;;  %v4964_v54 = vadd.f32 -0.2, %v4725_v53 }
  0x6a   : > { %7168 = vst [vmem:[#allocation46_spill] sm:$0xff] %v4943_v28  ;;  %7169 = vst [vmem:[#allocation47_spill] sm:$0xff] %v4949_v17  ;;  %3995 = vmatprep.subr.bf16.mxu1 %v4292_v50  ;;  %v829_v56 = vmul.f32 2.5, %v4956_v31  ;;  %v4968_v36 = vadd.f32 -0.2, %v4740_v5  ;;  %v4974_v45 = vadd.f32 -1.0, %v4725_v53 }
  0x6b   : > { %7170 = vst [vmem:[#allocation48_spill] sm:$0xff] %v4956_v31  ;;  %7171 = vst [vmem:[#allocation49_spill] sm:$0xff] %v4959_v26  ;;  %v4971_v51 = vadd.f32 -0.6, %v4725_v53  ;;  %v830_v58 = vmul.f32 2.5, %v4959_v26  ;;  %v869_v63 = vmul.f32 2.5, %v4964_v54 }
  0x6c   : > { %v4979_v37 = vadd.f32 -0.6, %v4740_v5  ;;  %v4982_v22 = vadd.f32 -1.0, %v4740_v5  ;;  %v837_v41 = vmul.f32 %v829_v56, %v605_v20  ;;  %v870_v7 = vmul.f32 2.5, %v4968_v36 }
  0x6d   : > { %v893_v14 = vmul.f32 %v829_v56, %v613_v61  ;;  %v909_v21 = vmul.f32 2.5, %v4971_v51  ;;  %3996 = vmatpush3.bf16.msra.mxu1 %v4292_v50  ;;  %v838_v35 = vmul.f32 %v830_v58, %v606_v55  ;;  %v877_v40 = vmul.f32 %v869_v63, %v613_v61 }
  0x6e   : > { %v894_v30 = vmul.f32 %v830_v58, %v614_v34  ;;  %v910_v19 = vmul.f32 2.5, %v4979_v37  ;;  %3997 = vmatprep.subr.bf16.mxu1 %v4294_v59  ;;  %v845_v0 = vsub.f32 %v813_v42, %v837_v41  ;;  %v878_v48 = vmul.f32 %v870_v7, %v614_v34 }
  0x6f   : > { %v917_v29 = vmul.f32 %v909_v21, %v621_v62  ;;  %v933_v20 = vmul.f32 %v869_v63, %v621_v62  ;;  %v846_v6 = vsub.f32 %v814_v47, %v838_v35  ;;  %v885_v23 = vsub.f32 %v853_v9, %v877_v40  ;;  %v4298_v35 = vld [vmem:[%s6947_s1 + $0x28] sm:$0xff]  }
  0x70   : > { %v918_v56 = vmul.f32 %v910_v19, %v622_v49  ;;  %v934_v60 = vmul.f32 %v870_v7, %v622_v49  ;;  %v886_v4 = vsub.f32 %v854_v52, %v878_v48  ;;  %v949_v55 = vmul.f32 2.5, %v4974_v45 }
  0x71   : > { %v925_v50 = vsub.f32 %v893_v14, %v917_v29  ;;  %v950_v61 = vmul.f32 2.5, %v4982_v22  ;;  %3998 = vmatpush3.bf16.msra.mxu1 %v4294_v59  ;;  %v973_v25 = vmul.f32 %v909_v21, %v629_v38  ;;  %v974_v18 = vmul.f32 %v910_v19, %v630_v27 }
  0x72   : > { %v926_v58 = vsub.f32 %v894_v30, %v918_v56  ;;  %v4993_v44 = vadd.f32 -1.4, %v4725_v53  ;;  %3999 = vmatprep.subr.bf16.mxu1 %v4296_v1  ;;  %v957_v40 = vmul.f32 %v949_v55, %v629_v38  ;;  %v4999_v48 = vadd.f32 -1.4, %v4740_v5 }
  0x73   : > { %v958_v42 = vmul.f32 %v950_v61, %v630_v27  ;;  %v1013_v29 = vmul.f32 %v949_v55, %v4938_v33  ;;  %v1014_v19 = vmul.f32 %v950_v61, %v4940_v43  ;;  %v5007_v30 = vadd.f32 -1.8, %v4725_v53 }
  0x74   : > { %7172 = vst [vmem:[#allocation50_spill] sm:$0xff] %v4993_v44  ;;  %7173 = vst [vmem:[#allocation51_spill] sm:$0xff] %v4999_v48  ;;  %v5003_v14 = vmul.f32 2.5, %v4993_v44  ;;  %v5010_v21 = vadd.f32 -1.8, %v4740_v5  ;;  %v5012_v7 = vsub.f32 %v933_v20, %v957_v40  ;;  %v5017_v34 = vmul.f32 2.5, %v4999_v48 }
  0x75   : > { %7175 = vst [vmem:[#allocation53_spill] sm:$0xff] %v5007_v30  ;;  %v5014_v59 = vsub.f32 %v934_v60, %v958_v42  ;;  %v1189_v62 = vmul.f32 1.25, %v4956_v31  ;;  %4000 = vmatpush3.bf16.msra.mxu1 %v4296_v1  ;;  %v1029_v38 = vmul.f32 2.5, %v5007_v30  ;;  %v1190_v5 = vmul.f32 1.25, %v4959_v26  ;;  %v4300_v60 = vld [vmem:[%s6947_s1 + $0x30] sm:$0xff]  }
  0x76   : > { %7174 = vst [vmem:[#allocation52_spill] sm:$0xff] %v5003_v14  ;;  %7176 = vst [vmem:[#allocation54_spill] sm:$0xff] %v5010_v21  ;;  %v997_v49 = vmul.f32 %v5003_v14, %v4938_v33  ;;  %v1030_v53 = vmul.f32 2.5, %v5010_v21  ;;  %4001 = vmatprep.subr.bf16.mxu1 %v4298_v35  ;;  %v998_v27 = vmul.f32 %v5017_v34, %v4940_v43  ;;  %v1221_v56 = vmul.f32 1.25, %v4964_v54 }
  0x77   : > { %7177 = vst [vmem:[#allocation55_spill] sm:$0xff] %v5017_v34  ;;  %v5030_v41 = vmul.f32 %v1189_v62, %v845_v0  ;;  %v1213_v1 = vmul.f32 %v4844_v39, %v845_v0  ;;  %v1214_v33 = vmul.f32 %v4851_v15, %v846_v6  ;;  %v1037_v9 = vmul.f32 %v1029_v38, %v4943_v28 }
  0x78   : > { %v5034_v47 = vsub.f32 %v973_v25, %v997_v49  ;;  %v1038_v52 = vmul.f32 %v1030_v53, %v4949_v17  ;;  %v5038_v63 = vmul.f32 %v1190_v5, %v846_v6  ;;  %v5040_v20 = vsub.f32 %v974_v18, %v998_v27  ;;  %v4302_v18 = vld [vmem:[%s6947_s1 + $0x38] sm:$0xff]  }
  0x79   : > { %7178 = vst [vmem:[#allocation56_spill] sm:$0xff] %v5030_v41  ;;  %v1222_v43 = vmul.f32 1.25, %v4968_v36  ;;  %v1245_v55 = vmul.f32 %v4861_v8, %v885_v23  ;;  %4002 = vmatpush3.bf16.msra.mxu1 %v4298_v35  ;;  %v5045_v0 = vsub.f32 %v1013_v29, %v1037_v9  ;;  %v1246_v25 = vmul.f32 %v4863_v24, %v886_v4 }
  0x7a   : > { %7179 = vst [vmem:[#allocation57_spill] sm:$0xff] %v5034_v47  ;;  %7180 = vst [vmem:[#allocation58_spill] sm:$0xff] %v5038_v63  ;;  %v5047_v39 = vsub.f32 %v1014_v19, %v1038_v52  ;;  %v1253_v15 = vmul.f32 1.25, %v4971_v51  ;;  %4003 = vmatprep.subr.bf16.mxu1 %v4300_v60  ;;  %v1229_v6 = vmul.f32 %v1221_v56, %v885_v23  ;;  %v1254_v40 = vmul.f32 1.25, %v4979_v37 }
  0x7b   : > { %7181 = vst [vmem:[#allocation59_spill] sm:$0xff] %v5040_v20  ;;  %7182 = vst [vmem:[#allocation60_spill] sm:$0xff] %v5045_v0  ;;  %v1230_v61 = vmul.f32 %v1222_v43, %v886_v4  ;;  %v5055_v42 = vmul.f32 %v1189_v62, %v925_v50  ;;  %v5057_v35 = vmul.f32 %v1190_v5, %v926_v58  ;;  %v1350_v62 = vmul.f32 1.25, %v5010_v21  ;;  %v4304_v5 = vld [vmem:[%s6947_s1 + $0x80] sm:$0xff]  }
  0x7c   : > { %7183 = vst [vmem:[#allocation61_spill] sm:$0xff] %v5047_v39  ;;  %v1261_v8 = vmul.f32 %v1253_v15, %v925_v50  ;;  %v5060_v29 = vmul.f32 %v1221_v56, %v5012_v7  ;;  %v5063_v24 = vmul.f32 %v1222_v43, %v5014_v59  ;;  %v1237_v19 = vsub.f32 %v1213_v1, %v1229_v6  ;;  %v5084_v43 = vld [vmem:[%s4504_s17 + $0x20] sm:$0xff] }
  0x7d   : > { %v1238_v49 = vsub.f32 %v1214_v33, %v1230_v61  ;;  %v1262_v38 = vmul.f32 %v1254_v40, %v926_v58  ;;  %v1341_v53 = vmul.f32 %v1253_v15, %v5034_v47  ;;  %4004 = vmatpush3.bf16.msra.mxu1 %v4300_v60  ;;  %v1342_v23 = vmul.f32 %v1254_v40, %v5040_v20 }
  0x7e   : > { %7184 = vst [vmem:[#allocation62_spill] sm:$0xff] %v5060_v29  ;;  %7185 = vst [vmem:[#allocation63_spill] sm:$0xff] %v5063_v24  ;;  %v1269_v4 = vsub.f32 %v1245_v55, %v1261_v8  ;;  %v1349_v50 = vmul.f32 1.25, %v5007_v30  ;;  %4005 = vmatprep.subr.bf16.mxu1 %v4302_v18  ;;  %v5073_v58 = vmul.f32 0.8333333, %v4964_v54  ;;  %v1358_v9 = vmul.f32 %v1350_v62, %v5047_v39 }
  0x7f   : > { %v1270_v27 = vsub.f32 %v1246_v25, %v1262_v38  ;;  %v5076_v1 = vmul.f32 0.8333333, %v4968_v36  ;;  %v2053_v60 = vmul.f32 0.8333333, %v4825_v57  ;;  %v2054_v52 = vmul.f32 0.8333333, %v4831_v3 }
  0x80   : > { %7186 = vst [vmem:[#allocation64_spill] sm:$0xff] %v5073_v58  ;;  %v1357_v33 = vmul.f32 %v1349_v50, %v5045_v0  ;;  %v2069_v56 = vmul.f32 0.8333333, %v4971_v51  ;;  %v5087_v55 = vmul.f32 %v5073_v58, %v1237_v19  ;;  %v2070_v25 = vmul.f32 0.8333333, %v4979_v37  ;;  %v5094_v57 = vld [vmem:[%s4504_s17 + $0x28] sm:$0xff] }
  0x81   : > { %7187 = vst [vmem:[#allocation65_spill] sm:$0xff] %v5076_v1  ;;  %v5090_v54 = vmul.f32 %v5076_v1, %v1238_v49  ;;  %v2061_v36 = vmul.f32 %v2053_v60, %v1237_v19  ;;  %4006 = vmatpush3.bf16.msra.mxu1 %v4302_v18  ;;  %v5098_v6 = vsub.f32 %v1342_v23, %v1358_v9  ;;  %vm287_vm10 = vcmp.ge.f32.partialorder %v5084_v43, -2.2  ;;  %v4377_v9 = vld [vmem:[%s6947_s1 + $0x140] sm:$0xff]  }
  0x82   : > { %7188 = vst [vmem:[#allocation66_spill] sm:$0xff] %v5087_v55  ;;  %v5096_v15 = vsub.f32 %v1341_v53, %v1357_v33  ;;  %v2062_v3 = vmul.f32 %v2054_v52, %v1238_v49  ;;  %v2077_v51 = vmul.f32 %v2069_v56, %v1269_v4  ;;  %4015 = vmatprep.subr.bf16.mxu1 %v4304_v5  ;;  %vm288_vm11 = vcmp.ge.f32.partialorder %v5094_v57, -2.2 }
  0x83   : > { %7189 = vst [vmem:[#allocation67_spill] sm:$0xff] %v5090_v54  ;;  %7191 = vst [vmem:[#allocation69_spill] sm:$0xff] %v5098_v6  ;;  %v2078_v61 = vmul.f32 %v2070_v25, %v1270_v27  ;;  %v5101_v40 = vmul.f32 %v4869_v2, %v1269_v4  ;;  %v5104_v8 = vmul.f32 %v4871_v46, %v1270_v27  ;;  %v3593_v38 = vsel %vm287_vm10, 1.0, %v4929_v32  ;;  %v4291_v4 = vld [vmem:[%s6947_s1 + $0x148] sm:$0xff]  }
  0x84   : > { %7190 = vst [vmem:[#allocation68_spill] sm:$0xff] %v5096_v15  ;;  %v2085_v37 = vsub.f32 %v2061_v36, %v2077_v51  ;;  %v5108_v19 = vmul.f32 %v2069_v56, %v5096_v15  ;;  %v5111_v18 = vmul.f32 %v2070_v25, %v5098_v6  ;;  %v3594_v2 = vsel %vm288_vm11, 1.0, %v4929_v32 }
  0x85   : > { %v2086_v49 = vsub.f32 %v2062_v3, %v2078_v61  ;;  %vm311_vm12 = vcmp.ge.f32.partialorder %v5084_v43, -1.8  ;;  %vm312_vm13 = vcmp.ge.f32.partialorder %v5094_v57, -1.8  ;;  %vm335_vm14 = vcmp.ge.f32.partialorder %v5084_v43, -1.4 }
  0x86   : > { %7192 = vst [vmem:[#allocation70_spill] sm:$0xff] %v5108_v19  ;;  %7193 = vst [vmem:[#allocation71_spill] sm:$0xff] %v5111_v18  ;;  %v3601_v46 = vsel %vm311_vm12, 1.0, %v4929_v32  ;;  %vm359_vm15 = vcmp.ge.f32.partialorder %v5084_v43, -1.0  ;;  %v3602_v23 = vsel %vm312_vm13, 1.0, %v4929_v32  ;;  %v3609_v50 = vsel %vm335_vm14, 1.0, %v4929_v32 }
  0x87   : > { %v2092_v53 = vpack.c.bf16 %v2086_v49, %v2085_v37  ;;  %vm336_vm0 = vcmp.ge.f32.partialorder %v5094_v57, -1.4  ;;  %vm360_vm1 = vcmp.ge.f32.partialorder %v5094_v57, -1.0  ;;  %v3617_v5 = vsel %vm359_vm15, 1.0, %v4929_v32  ;;  %v4293_v3 = vld [vmem:[%s6947_s1 + $0x150] sm:$0xff]   ;;  %v4295_v18 = vld [vmem:[%s6947_s1 + $0x158] sm:$0xff]  }
  0x88   : > { %v3610_v62 = vsel %vm336_vm0, 1.0, %v4929_v32  ;;  %vm383_vm2 = vcmp.ge.f32.partialorder %v5084_v43, -0.6  ;;  %v3618_v27 = vsel %vm360_vm1, 1.0, %v4929_v32  ;;  %vm384_vm3 = vcmp.ge.f32.partialorder %v5094_v57, -0.6 }
  0x89   : > { %4080 = vmatmul.mubr.bf16.vlgmr.msra.gmra.mrb[0].mxu0 %v2092_v53  ;;  %v5134_v60 = vsel %vm383_vm2, 1.0, %v4929_v32  ;;  %v575_v33 = vsub.f32 %v3593_v38, %v3601_v46  ;;  %v5140_v52 = vsel %vm384_vm3, 1.0, %v4929_v32  ;;  %v576_v56 = vsub.f32 %v3594_v2, %v3602_v23 }
  0x8a   : > { %4088 = vmatpush3.bf16.msra.mxu0 %v4377_v9  ;;  %v583_v36 = vsub.f32 %v3601_v46, %v3609_v50  ;;  %v584_v25 = vsub.f32 %v3602_v23, %v3610_v62  ;;  %v591_v51 = vsub.f32 %v3609_v50, %v3617_v5  ;;  %v592_v61 = vsub.f32 %v3610_v62, %v3618_v27 }
  0x8b   : > { %4089 = vmatprep.subr.bf16.mxu0 %v4291_v4  ;;  %v5146_v37 = vsub.f32 %v3617_v5, %v5134_v60  ;;  %v5149_v49 = vsub.f32 %v3618_v27, %v5140_v52  ;;  %v5152_v38 = vadd.f32 2.2, %v5084_v43  ;;  %v5155_v2 = vadd.f32 2.2, %v5094_v57 }
  0x8c   : > { %v5158_v46 = vadd.f32 1.4, %v5084_v43  ;;  %v5162_v53 = vmul.f32 %v4699_v11, %v4674_v10  ;;  %v5165_v23 = vadd.f32 1.4, %v5094_v57  ;;  %v5168_v50 = vadd.f32 1.8, %v5084_v43 }
  0x8d   : > { %v5171_v62 = vadd.f32 1.8, %v5094_v57  ;;  %v5175_v5 = vmul.f32 %v4702_v12, %v4677_v16  ;;  %v671_v27 = vmul.f32 2.5, %v5152_v38  ;;  %v672_v9 = vmul.f32 2.5, %v5155_v2 }
  0x8e   : > { %7194 = vst [vmem:[#allocation72_spill] sm:$0xff] %v5158_v46  ;;  %7195 = vst [vmem:[#allocation73_spill] sm:$0xff] %v5165_v23  ;;  %4090 = vmatpush3.bf16.msra.mxu0 %v4291_v4  ;;  %v695_v10 = vmul.f32 2.5, %v5158_v46  ;;  %v5181_v11 = vadd.f32 1.0, %v5084_v43  ;;  %v696_v19 = vmul.f32 2.5, %v5165_v23  ;;  %v727_v16 = vmul.f32 2.5, %v5168_v50 }
  0x8f   : > { %7196 = vst [vmem:[#allocation74_spill] sm:$0xff] %v5168_v50  ;;  %7197 = vst [vmem:[#allocation75_spill] sm:$0xff] %v5171_v62  ;;  %4091 = vmatprep.subr.bf16.mxu0 %v4293_v3  ;;  %v728_v12 = vmul.f32 2.5, %v5171_v62  ;;  %v5190_v4 = vadd.f32 1.0, %v5094_v57  ;;  %v679_v39 = vmul.f32 %v671_v27, %v575_v33  ;;  %v680_v0 = vmul.f32 %v672_v9, %v576_v56  ;;  %v4297_v33 = vld [vmem:[%s6947_s1 + $0x160] sm:$0xff]  }
  0x90   : > { %v703_v34 = vmul.f32 %v695_v10, %v583_v36  ;;  %v751_v17 = vmul.f32 2.5, %v5181_v11  ;;  %v704_v14 = vmul.f32 %v696_v19, %v584_v25  ;;  %v735_v28 = vmul.f32 %v727_v16, %v583_v36 }
  0x91   : > { %v736_v6 = vmul.f32 %v728_v12, %v584_v25  ;;  %v5194_v54 = vmul.f32 2.5, %v5190_v4  ;;  %v775_v21 = vmul.f32 %v695_v10, %v591_v51  ;;  %v776_v1 = vmul.f32 %v696_v19, %v592_v61  ;;  %v4299_v10 = vld [vmem:[%s6947_s1 + $0x168] sm:$0xff]  }
  0x92   : > { %4092 = vmatpush3.bf16.msra.mxu0 %v4293_v3  ;;  %v711_v55 = vsub.f32 %v679_v39, %v703_v34  ;;  %v759_v15 = vmul.f32 %v751_v17, %v591_v51  ;;  %v712_v56 = vsub.f32 %v680_v0, %v704_v14  ;;  %v3721_v9 = vadd.f32 0.6, %v5084_v43 }
  0x93   : > { %4093 = vmatprep.subr.bf16.mxu0 %v4295_v18  ;;  %v760_v27 = vmul.f32 %v5194_v54, %v592_v61  ;;  %v3722_v36 = vadd.f32 0.6, %v5094_v57  ;;  %v1095_v16 = vmul.f32 1.25, %v5152_v38  ;;  %v1096_v34 = vmul.f32 1.25, %v5155_v2 }
  0x94   : > { %v767_v25 = vsub.f32 %v735_v28, %v759_v15  ;;  %v5205_v39 = vmul.f32 1.25, %v5181_v11  ;;  %v5207_v3 = vmul.f32 2.5, %v3721_v9  ;;  %v5212_v14 = vmul.f32 1.25, %v5190_v4 }
  0x95   : > { %v768_v19 = vsub.f32 %v736_v6, %v760_v27  ;;  %v5209_v51 = vmul.f32 2.5, %v3722_v36  ;;  %v1103_v0 = vmul.f32 %v1095_v16, %v711_v55  ;;  %v1104_v61 = vmul.f32 %v1096_v34, %v712_v56 }
  0x96   : > { %4094 = vmatpush3.bf16.msra.mxu0 %v4295_v18  ;;  %v1119_v28 = vmul.f32 %v5205_v39, %v767_v25  ;;  %v1135_v15 = vmul.f32 1.25, %v5168_v50  ;;  %v799_v6 = vmul.f32 %v5207_v3, %v5146_v37  ;;  %v1136_v55 = vmul.f32 1.25, %v5171_v62 }
  0x97   : > { %4095 = vmatprep.subr.bf16.mxu0 %v4297_v33  ;;  %v800_v12 = vmul.f32 %v5209_v51, %v5149_v49  ;;  %v1120_v27 = vmul.f32 %v5212_v14, %v768_v19  ;;  %v5225_v16 = vmul.f32 1.25, %v3721_v9  ;;  %v5227_v34 = vmul.f32 1.25, %v3722_v36 }
  0x98   : > { %v1127_v18 = vsub.f32 %v1103_v0, %v1119_v28  ;;  %v1143_v56 = vmul.f32 %v1135_v15, %v767_v25  ;;  %v5229_v30 = vsub.f32 %v775_v21, %v799_v6  ;;  %v1144_v23 = vmul.f32 %v1136_v55, %v768_v19 }
  0x99   : > { %v5231_v58 = vsub.f32 %v776_v1, %v800_v12  ;;  %v1128_v50 = vsub.f32 %v1104_v61, %v1120_v27  ;;  %v1407_v46 = vmul.f32 0.8333333, %v5152_v38  ;;  %v1408_v24 = vmul.f32 0.8333333, %v5155_v2  ;;  %v4301_v38 = vld [vmem:[%s6947_s1 + $0x170] sm:$0xff]   ;;  %v4303_v61 = vld [vmem:[%s6947_s1 + $0x178] sm:$0xff]  }
  0x9a   : > { %7198 = vst [vmem:[#allocation76_spill] sm:$0xff] %v5229_v30  ;;  %4096 = vmatpush3.bf16.msra.mxu0 %v4297_v33  ;;  %v5235_v29 = vmul.f32 0.8333333, %v3721_v9  ;;  %v5238_v0 = vmul.f32 %v751_v17, %v5146_v37  ;;  %v1159_v25 = vmul.f32 %v5225_v16, %v5229_v30  ;;  %v5244_v1 = vmul.f32 0.8333333, %v3722_v36 }
  0x9b   : > { %7199 = vst [vmem:[#allocation77_spill] sm:$0xff] %v5231_v58  ;;  %4097 = vmatprep.subr.bf16.mxu0 %v4299_v10  ;;  %v1160_v21 = vmul.f32 %v5227_v34, %v5231_v58  ;;  %vm407_vm4 = vcmp.ge.f32.partialorder %v5084_v43, -0.2  ;;  %v1415_v2 = vmul.f32 %v1407_v46, %v1127_v18  ;;  %v1416_v33 = vmul.f32 %v1408_v24, %v1128_v50 }
  0x9c   : > { %7200 = vst [vmem:[#allocation78_spill] sm:$0xff] %v5235_v29  ;;  %7201 = vst [vmem:[#allocation79_spill] sm:$0xff] %v5244_v1  ;;  %vm408_vm5 = vcmp.ge.f32.partialorder %v5094_v57, -0.2  ;;  %v3633_v17 = vsel %vm407_vm4, 1.0, %v4929_v32  ;;  %v5252_v37 = vsub.f32 %v1143_v56, %v1159_v25  ;;  %v816_v56 = vmul.f32 %v5194_v54, %v5149_v49  ;;  %v5300_v54 = vld [vmem:[%s6947_s1 + $0x180] sm:$0xff]  }
  0x9d   : > { %v5254_v9 = vsub.f32 %v1144_v23, %v1160_v21  ;;  %v3634_v19 = vsel %vm408_vm5, 1.0, %v4929_v32  ;;  %vm431_vm6 = vcmp.ge.f32.partialorder %v5084_v43, 0.2  ;;  %vm432_vm7 = vcmp.ge.f32.partialorder %v5094_v57, 0.2  ;;  %7206 = vst [vmem:[#allocation84_spill] sm:$0xff] %v5300_v54 }
  0x9e   : > { %7202 = vst [vmem:[#allocation80_spill] sm:$0xff] %v5252_v37  ;;  %4098 = vmatpush3.bf16.msra.mxu0 %v4299_v10  ;;  %v3641_v36 = vsel %vm431_vm6, 1.0, %v4929_v32  ;;  %vm455_vm8 = vcmp.ge.f32.partialorder %v5084_v43, 0.6  ;;  %v607_v24 = vsub.f32 %v5134_v60, %v3633_v17  ;;  %v1431_v46 = vmul.f32 %v5235_v29, %v5252_v37 }
  0x9f   : > { %7203 = vst [vmem:[#allocation81_spill] sm:$0xff] %v5254_v9  ;;  %v1432_v23 = vmul.f32 %v5244_v1, %v5254_v9  ;;  %v3642_v50 = vsel %vm432_vm7, 1.0, %v4929_v32  ;;  %vm456_vm9 = vcmp.ge.f32.partialorder %v5094_v57, 0.6  ;;  %4099 = vmatprep.subr.bf16.mxu0 %v4301_v38  ;;  %v5272_v28 = vsel %vm455_vm8, 1.0, %v4929_v32 }
  0xa0   : > { %v5275_v60 = vsel %vm456_vm9, 1.0, %v4929_v32  ;;  %v608_v15 = vsub.f32 %v5140_v52, %v3634_v19  ;;  %v615_v10 = vsub.f32 %v3633_v17, %v3641_v36  ;;  %v1439_v6 = vsub.f32 %v1415_v2, %v1431_v46 }
  0xa1   : > { %v1440_v12 = vsub.f32 %v1416_v33, %v1432_v23  ;;  %v616_v27 = vsub.f32 %v3634_v19, %v3642_v50  ;;  %v5279_v55 = vsub.f32 %v3641_v36, %v5272_v28  ;;  %v5282_v18 = vsub.f32 %v3642_v50, %v5275_v60 }
  0xa2   : > { %v5287_v25 = vadd.f32 0.2, %v5084_v43  ;;  %v5290_v21 = vadd.f32 0.2, %v5094_v57  ;;  %4100 = vmatpush3.bf16.msra.mxu0 %v4301_v38  ;;  %v855_v2 = vmul.f32 %v5207_v3, %v607_v24  ;;  %v856_v33 = vmul.f32 %v5209_v51, %v608_v15 }
  0xa3   : > { %v1445_v52 = vpack.c.bf16 %v1440_v12, %v1439_v6  ;;  %v5295_v17 = vadd.f32 -0.2, %v5084_v43  ;;  %4101 = vmatprep.subr.bf16.mxu0 %v4303_v61  ;;  %v5305_v38 = vadd.f32 -0.2, %v5094_v57  ;;  %v3745_v3 = vadd.f32 -0.6, %v5084_v43 }
  0xa4   : > { %7204 = vst [vmem:[#allocation82_spill] sm:$0xff] %v5290_v21  ;;  %v831_v49 = vmul.f32 2.5, %v5287_v25  ;;  %v832_v19 = vmul.f32 2.5, %v5290_v21  ;;  %v3746_v36 = vadd.f32 -0.6, %v5094_v57 }
  0xa5   : > { %7205 = vst [vmem:[#allocation83_spill] sm:$0xff] %v5295_v17  ;;  %7207 = vst [vmem:[#allocation85_spill] sm:$0xff] %v5305_v38  ;;  %3987 = vmatprep.mubr.bf16.mxu1 %v1445_v52  ;;  %v5309_v51 = vmul.f32 2.5, %v5295_v17  ;;  %v5313_v46 = vmul.f32 1.25, %v5295_v17  ;;  %v2055_v23 = vmul.f32 0.8333333, %v5181_v11 }
  0xa6   : > { %v839_v50 = vmul.f32 %v831_v49, %v607_v24  ;;  %v840_v6 = vmul.f32 %v832_v19, %v608_v15  ;;  %v5317_v12 = vmul.f32 2.5, %v5305_v38  ;;  %v895_v9 = vmul.f32 %v831_v49, %v615_v10  ;;  %4102 = vmatpush3.bf16.msra.mxu0 %v4303_v61 }
  0xa7   : > { %7208 = vst [vmem:[#allocation86_spill] sm:$0xff] %v5313_v46  ;;  %v879_v37 = vmul.f32 %v5309_v51, %v615_v10  ;;  %v896_v52 = vmul.f32 %v832_v19, %v616_v27  ;;  %v5320_v62 = vmul.f32 2.5, %v3745_v3  ;;  %v5322_v58 = vmul.f32 2.5, %v3746_v36  ;;  %4111 = vmatprep.subr.bf16.mxu0 %v5300_v54 }
  0xa8   : > { %v5326_v17 = vsub.f32 %v5238_v0, %v839_v50  ;;  %v5328_v11 = vsub.f32 %v816_v56, %v840_v6  ;;  %v880_v24 = vmul.f32 %v5317_v12, %v616_v27  ;;  %v5332_v61 = vmul.f32 1.25, %v5305_v38 }
  0xa9   : > { %7209 = vst [vmem:[#allocation87_spill] sm:$0xff] %v5320_v62  ;;  %7210 = vst [vmem:[#allocation88_spill] sm:$0xff] %v5322_v58  ;;  %v887_v15 = vsub.f32 %v855_v2, %v879_v37  ;;  %v919_v10 = vmul.f32 %v5320_v62, %v5279_v55  ;;  %v920_v49 = vmul.f32 %v5322_v58, %v5282_v18  ;;  %v5338_v19 = vmul.f32 1.25, %v3745_v3  ;;  %v5353_v58 = vld [vmem:[%s4504_s17 + $0x30] sm:$0xff]  ;;  %v5356_v62 = vld [vmem:[%s4504_s17 + $0x38] sm:$0xff] }
  0xaa   : > { %7211 = vst [vmem:[#allocation89_spill] sm:$0xff] %v5326_v17  ;;  %7212 = vst [vmem:[#allocation90_spill] sm:$0xff] %v5328_v11  ;;  %v888_v0 = vsub.f32 %v856_v33, %v880_v24  ;;  %v1215_v56 = vmul.f32 %v5205_v39, %v5326_v17  ;;  %v1216_v50 = vmul.f32 %v5212_v14, %v5328_v11  ;;  %v5344_v27 = vmul.f32 1.25, %v3746_v36 }
  0xab   : > { %7213 = vst [vmem:[#allocation91_spill] sm:$0xff] %v5332_v61  ;;  %7214 = vst [vmem:[#allocation92_spill] sm:$0xff] %v5338_v19  ;;  %v5346_v6 = vsub.f32 %v895_v9, %v919_v10  ;;  %v5348_v37 = vsub.f32 %v896_v52, %v920_v49  ;;  %v1231_v2 = vmul.f32 %v5313_v46, %v887_v15  ;;  %v2056_v14 = vmul.f32 0.8333333, %v5190_v4 }
  0xac   : > { %7215 = vst [vmem:[#allocation93_spill] sm:$0xff] %v5344_v27  ;;  %v1247_v38 = vmul.f32 %v5225_v16, %v887_v15  ;;  %v1232_v33 = vmul.f32 %v5332_v61, %v888_v0  ;;  %v1248_v39 = vmul.f32 %v5227_v34, %v888_v0  ;;  %v5361_v24 = vmul.f32 0.8333333, %v3745_v3 }
  0xad   : > { %7216 = vst [vmem:[#allocation94_spill] sm:$0xff] %v5346_v6  ;;  %7217 = vst [vmem:[#allocation95_spill] sm:$0xff] %v5348_v37  ;;  %v5363_v9 = vsub.f32 %v1215_v56, %v1231_v2  ;;  %v1263_v52 = vmul.f32 %v5338_v19, %v5346_v6  ;;  %v1264_v16 = vmul.f32 %v5344_v27, %v5348_v37  ;;  %v5369_v15 = vmul.f32 0.8333333, %v3746_v36 }
  0xae   : > { %7218 = vst [vmem:[#allocation96_spill] sm:$0xff] %v5361_v24  ;;  %v5371_v10 = vsub.f32 %v1216_v50, %v1232_v33  ;;  %vm289_vm10 = vcmp.ge.f32.partialorder %v5353_v58, -2.2  ;;  %vm290_vm11 = vcmp.ge.f32.partialorder %v5356_v62, -2.2  ;;  %vm361_vm0 = vcmp.ge.f32.partialorder %v5353_v58, -1.0 }
  0xaf   : > { %7219 = vst [vmem:[#allocation97_spill] sm:$0xff] %v5363_v9  ;;  %7220 = vst [vmem:[#allocation98_spill] sm:$0xff] %v5369_v15  ;;  %vm313_vm12 = vcmp.ge.f32.partialorder %v5353_v58, -1.8  ;;  %v5376_v4 = vsub.f32 %v1247_v38, %v1263_v52  ;;  %v5378_v34 = vsub.f32 %v1248_v39, %v1264_v16  ;;  %v2063_v3 = vmul.f32 %v2055_v23, %v5363_v9 }
  0xb0   : > { %7221 = vst [vmem:[#allocation99_spill] sm:$0xff] %v5371_v10  ;;  %v3595_v49 = vsel %vm289_vm10, 1.0, %v4929_v32  ;;  %v2064_v0 = vmul.f32 %v2056_v14, %v5371_v10  ;;  %v3596_v36 = vsel %vm290_vm11, 1.0, %v4929_v32  ;;  %vm314_vm13 = vcmp.ge.f32.partialorder %v5356_v62, -1.8 }
  0xb1   : > { %7222 = vst [vmem:[#allocation100_spill] sm:$0xff] %v5376_v4  ;;  %7223 = vst [vmem:[#allocation101_spill] sm:$0xff] %v5378_v34  ;;  %v3603_v56 = vsel %vm313_vm12, 1.0, %v4929_v32  ;;  %v2079_v50 = vmul.f32 %v5361_v24, %v5376_v4  ;;  %v2080_v38 = vmul.f32 %v5369_v15, %v5378_v34  ;;  %v3604_v2 = vsel %vm314_vm13, 1.0, %v4929_v32 }
  0xb2   : > { %vm337_vm14 = vcmp.ge.f32.partialorder %v5353_v58, -1.4  ;;  %vm338_vm15 = vcmp.ge.f32.partialorder %v5356_v62, -1.4  ;;  %vm362_vm1 = vcmp.ge.f32.partialorder %v5356_v62, -1.0  ;;  %v3619_v52 = vsel %vm361_vm0, 1.0, %v4929_v32 }
  0xb3   : > { %v3611_v23 = vsel %vm337_vm14, 1.0, %v4929_v32  ;;  %v2087_v33 = vsub.f32 %v2063_v3, %v2079_v50  ;;  %v2088_v39 = vsub.f32 %v2064_v0, %v2080_v38  ;;  %v3612_v14 = vsel %vm338_vm15, 1.0, %v4929_v32 }
  0xb4   : > { %v3620_v16 = vsel %vm362_vm1, 1.0, %v4929_v32  ;;  %vm385_vm2 = vcmp.ge.f32.partialorder %v5353_v58, -0.6  ;;  %vm386_vm3 = vcmp.ge.f32.partialorder %v5356_v62, -0.6  ;;  %v577_v15 = vsub.f32 %v3595_v49, %v3603_v56 }
  0xb5   : > { %v2093_v24 = vpack.c.bf16 %v2088_v39, %v2087_v33  ;;  %v5402_v27 = vsel %vm385_vm2, 1.0, %v4929_v32  ;;  %v5405_v19 = vsel %vm386_vm3, 1.0, %v4929_v32  ;;  %v578_v3 = vsub.f32 %v3596_v36, %v3604_v2 }
  0xb6   : > { %v585_v0 = vsub.f32 %v3603_v56, %v3611_v23  ;;  %v586_v50 = vsub.f32 %v3604_v2, %v3612_v14  ;;  %v593_v38 = vsub.f32 %v3611_v23, %v3619_v52  ;;  %v594_v10 = vsub.f32 %v3612_v14, %v3620_v16 }
  0xb7   : > { %4083 = vmatprep.mubr.bf16.mxu0 %v2093_v24  ;;  %v5408_v9 = vsub.f32 %v3619_v52, %v5402_v27  ;;  %v5411_v61 = vsub.f32 %v3620_v16, %v5405_v19  ;;  %v3691_v49 = vadd.f32 2.2, %v5353_v58  ;;  %v3692_v33 = vadd.f32 2.2, %v5356_v62  ;;  %v7227_v24 = vld [vmem:[#allocation9_spill] sm:$0xff] }
  0xb8   : > { %v5416_v39 = vadd.f32 1.4, %v5353_v58  ;;  %v5419_v36 = vadd.f32 1.4, %v5356_v62  ;;  %v5422_v56 = vadd.f32 1.8, %v5353_v58  ;;  %v5426_v2 = vmul.f32 %v7227_v24, %v4761_v13 }
  0xb9   : > { %v673_v23 = vmul.f32 2.5, %v3691_v49  ;;  %v674_v14 = vmul.f32 2.5, %v3692_v33  ;;  %v5429_v52 = vadd.f32 1.8, %v5356_v62  ;;  %v5432_v16 = vadd.f32 1.0, %v5353_v58 }
  0xba   : > { %7224 = vst [vmem:[#allocation102_spill] sm:$0xff] %v5416_v39  ;;  %7225 = vst [vmem:[#allocation103_spill] sm:$0xff] %v5419_v36  ;;  %v697_v46 = vmul.f32 2.5, %v5416_v39  ;;  %v698_v11 = vmul.f32 2.5, %v5419_v36  ;;  %v729_v30 = vmul.f32 2.5, %v5422_v56  ;;  %v5438_v17 = vadd.f32 1.0, %v5356_v62 }
  0xbb   : > { %7226 = vst [vmem:[#allocation104_spill] sm:$0xff] %v5422_v56  ;;  %7228 = vst [vmem:[#allocation9_spill] sm:$0xff] %v5429_v52  ;;  %v681_v20 = vmul.f32 %v673_v23, %v577_v15  ;;  %v682_v13 = vmul.f32 %v674_v14, %v578_v3  ;;  %v730_v24 = vmul.f32 2.5, %v5429_v52  ;;  %v5442_v47 = vmul.f32 2.5, %v5432_v16 }
  0xbc   : > { %v705_v48 = vmul.f32 %v697_v46, %v585_v0  ;;  %v706_v44 = vmul.f32 %v698_v11, %v586_v50  ;;  %v737_v26 = vmul.f32 %v729_v30, %v585_v0  ;;  %v5445_v31 = vmul.f32 2.5, %v5438_v17 }
  0xbd   : > { %v738_v39 = vmul.f32 %v730_v24, %v586_v50  ;;  %v761_v36 = vmul.f32 %v5442_v47, %v593_v38  ;;  %v777_v63 = vmul.f32 %v697_v46, %v593_v38  ;;  %v778_v41 = vmul.f32 %v698_v11, %v594_v10 }
  0xbe   : > { %v713_v54 = vsub.f32 %v681_v20, %v705_v48  ;;  %v714_v37 = vsub.f32 %v682_v13, %v706_v44  ;;  %v762_v15 = vmul.f32 %v5445_v31, %v594_v10  ;;  %v3723_v3 = vadd.f32 0.6, %v5353_v58 }
  0xbf   : > { %v769_v23 = vsub.f32 %v737_v26, %v761_v36  ;;  %v3724_v14 = vadd.f32 0.6, %v5356_v62  ;;  %v1097_v6 = vmul.f32 1.25, %v3691_v49  ;;  %v1098_v1 = vmul.f32 1.25, %v3692_v33 }
  0xc0   : > { %v770_v30 = vsub.f32 %v738_v39, %v762_v15  ;;  %v793_v0 = vmul.f32 2.5, %v3723_v3  ;;  %v5452_v34 = vmul.f32 1.25, %v5432_v16  ;;  %v5455_v50 = vmul.f32 1.25, %v5438_v17 }
  0xc1   : > { %v794_v46 = vmul.f32 2.5, %v3724_v14  ;;  %v1105_v48 = vmul.f32 %v1097_v6, %v713_v54  ;;  %v1106_v44 = vmul.f32 %v1098_v1, %v714_v37  ;;  %v1137_v20 = vmul.f32 1.25, %v5422_v56 }
  0xc2   : > { %v801_v11 = vmul.f32 %v793_v0, %v5408_v9  ;;  %v1121_v26 = vmul.f32 %v5452_v34, %v769_v23  ;;  %v1122_v10 = vmul.f32 %v5455_v50, %v770_v30  ;;  %v1138_v38 = vmul.f32 1.25, %v5429_v52 }
  0xc3   : > { %v802_v39 = vmul.f32 %v794_v46, %v5411_v61  ;;  %v1145_v36 = vmul.f32 %v1137_v20, %v769_v23  ;;  %v5463_v13 = vmul.f32 1.25, %v3723_v3  ;;  %v5465_v24 = vmul.f32 1.25, %v3724_v14 }
  0xc4   : > { %v5467_v15 = vsub.f32 %v777_v63, %v801_v11  ;;  %v1129_v1 = vsub.f32 %v1105_v48, %v1121_v26  ;;  %v1130_v54 = vsub.f32 %v1106_v44, %v1122_v10  ;;  %v1146_v6 = vmul.f32 %v1138_v38, %v770_v30 }
  0xc5   : > { %v5469_v37 = vsub.f32 %v778_v41, %v802_v39  ;;  %v1409_v56 = vmul.f32 0.8333333, %v3691_v49  ;;  %v1410_v29 = vmul.f32 0.8333333, %v3692_v33  ;;  %v5471_v4 = vmul.f32 0.8333333, %v3723_v3 }
  0xc6   : > { %7229 = vst [vmem:[#allocation105_spill] sm:$0xff] %v5467_v15  ;;  %v1161_v52 = vmul.f32 %v5463_v13, %v5467_v15  ;;  %v5475_v21 = vmul.f32 0.8333333, %v3724_v14  ;;  %vm409_vm4 = vcmp.ge.f32.partialorder %v5353_v58, -0.2  ;;  %vm479_vm10 = vcmp.ge.f32.partialorder %v5084_v43, 1.0 }
  0xc7   : > { %7230 = vst [vmem:[#allocation106_spill] sm:$0xff] %v5469_v37  ;;  %vm410_vm5 = vcmp.ge.f32.partialorder %v5356_v62, -0.2  ;;  %v1162_v63 = vmul.f32 %v5465_v24, %v5469_v37  ;;  %v1417_v23 = vmul.f32 %v1409_v56, %v1129_v1  ;;  %v1418_v30 = vmul.f32 %v1410_v29, %v1130_v54 }
  0xc8   : > { %v3635_v41 = vsel %vm409_vm4, 1.0, %v4929_v32  ;;  %v5482_v49 = vsub.f32 %v1145_v36, %v1161_v52  ;;  %v3636_v33 = vsel %vm410_vm5, 1.0, %v4929_v32  ;;  %vm433_vm6 = vcmp.ge.f32.partialorder %v5353_v58, 0.2 }
  0xc9   : > { %vm434_vm7 = vcmp.ge.f32.partialorder %v5356_v62, 0.2  ;;  %v5487_v3 = vsub.f32 %v1146_v6, %v1162_v63  ;;  %v3643_v14 = vsel %vm433_vm6, 1.0, %v4929_v32  ;;  %vm457_vm8 = vcmp.ge.f32.partialorder %v5353_v58, 0.6 }
  0xca   : > { %7231 = vst [vmem:[#allocation107_spill] sm:$0xff] %v5482_v49  ;;  %v3644_v48 = vsel %vm434_vm7, 1.0, %v4929_v32  ;;  %v1433_v29 = vmul.f32 %v5471_v4, %v5482_v49  ;;  %vm458_vm9 = vcmp.ge.f32.partialorder %v5356_v62, 0.6  ;;  %v5496_v56 = vsel %vm457_vm8, 1.0, %v4929_v32 }
  0xcb   : > { %7232 = vst [vmem:[#allocation108_spill] sm:$0xff] %v5487_v3  ;;  %v609_v52 = vsub.f32 %v5402_v27, %v3635_v41  ;;  %v1434_v44 = vmul.f32 %v5475_v21, %v5487_v3  ;;  %v5502_v20 = vsel %vm458_vm9, 1.0, %v4929_v32  ;;  %v610_v11 = vsub.f32 %v5405_v19, %v3636_v33 }
  0xcc   : > { %v617_v26 = vsub.f32 %v3635_v41, %v3643_v14  ;;  %v1441_v10 = vsub.f32 %v1417_v23, %v1433_v29  ;;  %v618_v38 = vsub.f32 %v3636_v33, %v3644_v48  ;;  %v5506_v39 = vsub.f32 %v3643_v14, %v5496_v56 }
  0xcd   : > { %v5509_v36 = vsub.f32 %v3644_v48, %v5502_v20  ;;  %v1442_v1 = vsub.f32 %v1418_v30, %v1434_v44  ;;  %v817_v27 = vmul.f32 %v5442_v47, %v5408_v9  ;;  %v818_v54 = vmul.f32 %v5445_v31, %v5411_v61 }
  0xce   : > { %v5516_v32 = vadd.f32 0.2, %v5353_v58  ;;  %v5519_v19 = vadd.f32 0.2, %v5356_v62  ;;  %v857_v6 = vmul.f32 %v793_v0, %v609_v52  ;;  %v858_v63 = vmul.f32 %v794_v46, %v610_v11 }
  0xcf   : > { %v5522_v23 = vadd.f32 -0.2, %v5353_v58  ;;  %v1446_v41 = vpack.c.bf16 %v1442_v1, %v1441_v10  ;;  %v5526_v33 = vadd.f32 -0.2, %v5356_v62  ;;  %v3747_v47 = vadd.f32 -0.6, %v5353_v58 }
  0xd0   : > { %v833_v30 = vmul.f32 2.5, %v5516_v32  ;;  %v834_v31 = vmul.f32 2.5, %v5519_v19  ;;  %v3748_v9 = vadd.f32 -0.6, %v5356_v62  ;;  %vm480_vm11 = vcmp.ge.f32.partialorder %v5094_v57, 1.0 }
  0xd1   : > { %7233 = vst [vmem:[#allocation109_spill] sm:$0xff] %v5522_v23  ;;  %7234 = vst [vmem:[#allocation110_spill] sm:$0xff] %v5526_v33  ;;  %v5531_v61 = vmul.f32 2.5, %v5522_v23  ;;  %v5535_v0 = vmul.f32 1.25, %v5522_v23  ;;  %3988 = vmatmul.mubr.bf16.gmra.mrb[4].mxu1 %v1446_v41  ;;  %v5538_v14 = vmul.f32 2.5, %v5526_v33  ;;  %v5540_v29 = vmul.f32 2.5, %v3747_v47 }
  0xd2   : > { %v841_v46 = vmul.f32 %v833_v30, %v609_v52  ;;  %v897_v48 = vmul.f32 %v833_v30, %v617_v26  ;;  %v842_v44 = vmul.f32 %v834_v31, %v610_v11  ;;  %v898_v1 = vmul.f32 %v834_v31, %v618_v38 }
  0xd3   : > { %7235 = vst [vmem:[#allocation111_spill] sm:$0xff] %v5535_v0  ;;  %7236 = vst [vmem:[#allocation112_spill] sm:$0xff] %v5540_v29  ;;  %v881_v10 = vmul.f32 %v5531_v61, %v617_v26  ;;  %v5543_v3 = vmul.f32 2.5, %v3748_v9  ;;  %v882_v37 = vmul.f32 %v5538_v14, %v618_v38  ;;  %v921_v41 = vmul.f32 %v5540_v29, %v5506_v39  ;;  %v7260_v29 = vld [vmem:[#allocation10_spill] sm:$0xff] }
  0xd4   : > { %v5545_v49 = vsub.f32 %v817_v27, %v841_v46  ;;  %v5551_v52 = vmul.f32 1.25, %v5526_v33  ;;  %v5553_v23 = vsub.f32 %v818_v54, %v842_v44  ;;  %v5557_v26 = vmul.f32 1.25, %v3747_v47 }
  0xd5   : > { %7237 = vst [vmem:[#allocation113_spill] sm:$0xff] %v5543_v3  ;;  %v889_v30 = vsub.f32 %v857_v6, %v881_v10  ;;  %v922_v11 = vmul.f32 %v5543_v3, %v5509_v36  ;;  %v890_v31 = vsub.f32 %v858_v63, %v882_v37  ;;  %v5559_v15 = vsub.f32 %v897_v48, %v921_v41  ;;  %v7259_v3 = vld [vmem:[#allocation32_spill] sm:$0xff] }
  0xd6   : > { %7238 = vst [vmem:[#allocation114_spill] sm:$0xff] %v5545_v49  ;;  %7239 = vst [vmem:[#allocation115_spill] sm:$0xff] %v5551_v52  ;;  %v1217_v38 = vmul.f32 %v5452_v34, %v5545_v49  ;;  %v5563_v27 = vmul.f32 1.25, %v3748_v9  ;;  %v1218_v54 = vmul.f32 %v5455_v50, %v5553_v23  ;;  %v2057_v48 = vmul.f32 0.8333333, %v5432_v16 }
  0xd7   : > { %7240 = vst [vmem:[#allocation116_spill] sm:$0xff] %v5553_v23  ;;  %7241 = vst [vmem:[#allocation117_spill] sm:$0xff] %v5557_v26  ;;  %v5565_v46 = vsub.f32 %v898_v1, %v922_v11  ;;  %v1233_v6 = vmul.f32 %v5535_v0, %v889_v30  ;;  %v1249_v44 = vmul.f32 %v5463_v13, %v889_v30  ;;  %v2058_v50 = vmul.f32 0.8333333, %v5438_v17 }
  0xd8   : > { %7242 = vst [vmem:[#allocation118_spill] sm:$0xff] %v5563_v27  ;;  %v1234_v37 = vmul.f32 %v5551_v52, %v890_v31  ;;  %v1250_v63 = vmul.f32 %v5465_v24, %v890_v31  ;;  %v1265_v34 = vmul.f32 %v5557_v26, %v5559_v15  ;;  %v5581_v41 = vmul.f32 0.8333333, %v3747_v47  ;;  %v5590_v24 = vld [vmem:[%s4504_s17] sm:$0xff]  ;;  %v7257_v52 = vld [vmem:[#allocation37_spill] sm:$0xff] }
  0xd9   : > { %v5576_v10 = vsub.f32 %v1217_v38, %v1233_v6  ;;  %v1266_v1 = vmul.f32 %v5563_v27, %v5565_v46  ;;  %v5587_v11 = vmul.f32 0.8333333, %v3748_v9  ;;  %7247 = vst [vmem:[#allocation123_spill] sm:$0xff] %v5590_v24  ;;  %v3581_v31 = vmul.f32 -1.442695, %v5590_v24  ;;  %v5597_v6 = vld [vmem:[%s4504_s17 + $0x8] sm:$0xff] }
  0xda   : > { %7244 = vst [vmem:[#allocation120_spill] sm:$0xff] %v5581_v41  ;;  %v5583_v13 = vsub.f32 %v1218_v54, %v1234_v37  ;;  %v5585_v30 = vsub.f32 %v1249_v44, %v1265_v34  ;;  %7248 = vst [vmem:[#allocation124_spill] sm:$0xff] %v5597_v6  ;;  %v3582_v17 = vmul.f32 -1.442695, %v5597_v6  ;;  %v3749_v47 = vadd.f32 -1.0, %v5590_v24  ;;  %v7250_v34 = vld [vmem:[#allocation14_spill] sm:$0xff] }
  0xdb   : > { %7243 = vst [vmem:[#allocation119_spill] sm:$0xff] %v5576_v10  ;;  %7246 = vst [vmem:[#allocation122_spill] sm:$0xff] %v5587_v11  ;;  %v5593_v16 = vsub.f32 %v1250_v63, %v1266_v1  ;;  %v2065_v38 = vmul.f32 %v2057_v48, %v5576_v10  ;;  %4344 = vpow2.f32 %v3581_v31  ;;  %v3750_v44 = vadd.f32 -1.0, %v5597_v6 }
  0xdc   : > { %7245 = vst [vmem:[#allocation121_spill] sm:$0xff] %v5583_v13  ;;  %v2066_v54 = vmul.f32 %v2058_v50, %v5583_v13  ;;  %v2081_v9 = vmul.f32 %v5581_v41, %v5585_v30  ;;  %4346 = vpow2.f32 %v3582_v17  ;;  %v5607_v63 = vmul.f32 2.5, %v3749_v47  ;;  %v7252_v50 = vld [vmem:[#allocation15_spill] sm:$0xff]  ;;  %v7254_v13 = vld [vmem:[#allocation34_spill] sm:$0xff]  ;;  %v7255_v17 = vld [vmem:[#allocation25_spill] sm:$0xff] }
  0xdd   : > { %v2082_v37 = vmul.f32 %v5587_v11, %v5593_v16  ;;  %v5610_v48 = vmul.f32 1.25, %v7250_v34  ;;  %v5612_v27 = vmul.f32 2.5, %v3750_v44  ;;  %v5615_v26 = vmul.f32 1.25, %v7252_v50 }
  0xde   : > { %7249 = vst [vmem:[#allocation125_spill] sm:$0xff] %v5607_v63  ;;  %v2089_v1 = vsub.f32 %v2065_v38, %v2081_v9  ;;  %v5617_v31 = vmul.f32 1.25, %v3749_v47  ;;  %v955_v11 = vmul.f32 %v5607_v63, %v7254_v13  ;;  %v5623_v33 = vmul.f32 1.25, %v3750_v44  ;;  %v7258_v9 = vld [vmem:[#allocation27_spill] sm:$0xff]  ;;  %v5635_v63 = vld [vmem:[%s4504_s17 + $0x10] sm:$0xff] }
  0xdf   : > { %7251 = vst [vmem:[#allocation14_spill] sm:$0xff] %v5612_v27  ;;  %v2090_v41 = vsub.f32 %v2066_v54, %v2082_v37  ;;  %v1275_v10 = vmul.f32 %v5610_v48, %v7255_v17  ;;  %v956_v38 = vmul.f32 %v5612_v27, %v7257_v52  ;;  %v1276_v0 = vmul.f32 %v5615_v26, %v7258_v9  ;;  %v5642_v27 = vld [vmem:[%s4504_s17 + $0x18] sm:$0xff] }
  0xe0   : > { %7253 = vst [vmem:[#allocation126_spill] sm:$0xff] %v5617_v31  ;;  %7256 = vst [vmem:[#allocation25_spill] sm:$0xff] %v5623_v33  ;;  %v2233_v23 = vmul.f32 %v7260_v29, %v7259_v3  ;;  %v2240_v49 = vmul.f32 0.8333333, %v3749_v47  ;;  %v5632_v54 = vsub.f32 %v5162_v53, %v955_v11  ;;  %v2241_v37 = vmul.f32 0.8333333, %v3750_v44 }
  0xe1   : > { %v2094_v50 = vpack.c.bf16 %v2090_v41, %v2089_v1  ;;  %v3583_v17 = vmul.f32 -1.442695, %v5635_v63  ;;  %v5639_v13 = vsub.f32 %v5175_v5, %v956_v38  ;;  %v3584_v9 = vmul.f32 -1.442695, %v5642_v27 }
  0xe2   : > { %v5646_v52 = vmul.f32 1.25, %v4974_v45  ;;  %v5649_v3 = vmul.f32 1.25, %v4982_v22  ;;  %v1291_v53 = vmul.f32 %v5617_v31, %v5632_v54  ;;  %v2242_v29 = vmul.f32 0.8333333, %v4974_v45 }
  0xe3   : > { %4084 = vmatmul.mubr.bf16.gmra.mrb[4].mxu0 %v2094_v50  ;;  %4348 = vpow2.f32 %v3583_v17  ;;  %v2243_v5 = vmul.f32 0.8333333, %v4982_v22  ;;  %v1292_v41 = vmul.f32 %v5623_v33, %v5639_v13  ;;  %v3585_v1 = vmul.f32 -1.442695, %v5084_v43 }
  0xe4   : > { %7261 = vst [vmem:[#allocation27_spill] sm:$0xff] %v5646_v52  ;;  %7262 = vst [vmem:[#allocation32_spill] sm:$0xff] %v5649_v3  ;;  %4350 = vpow2.f32 %v3584_v9  ;;  %v1293_v11 = vmul.f32 %v5646_v52, %v5012_v7  ;;  %v1294_v47 = vmul.f32 %v5649_v3, %v5014_v59  ;;  %v5661_v44 = vsub.f32 %v1275_v10, %v1291_v53  ;;  %v5676_v9 = vld [vmem:[#allocation2] sm:$0xff] }
  0xe5   : > { %v3586_v50 = vmul.f32 -1.442695, %v5094_v57  ;;  %v4345_v45 = vpop.eup %4344  ;;  %v5666_v22 = vsub.f32 %v1276_v0, %v1292_v41  ;;  %4352 = vpow2.f32 %v3585_v1  ;;  %v5679_v53 = vsel %vm479_vm10, 1.0, %v5676_v9 }
  0xe6   : > { %v5669_v38 = vsub.f32 %v5055_v42, %v1293_v11  ;;  %v5672_v17 = vsub.f32 %v5057_v35, %v1294_v47  ;;  %v4347_v7 = vpop.eup %4346  ;;  %v231_v59 = vadd.f32 1.0, %v4345_v45  ;;  %v2248_v10 = vmul.f32 %v2240_v49, %v5661_v44 }
  0xe7   : > { %v232_v0 = vadd.f32 1.0, %v4347_v7  ;;  %v2249_v41 = vmul.f32 %v2241_v37, %v5666_v22  ;;  %v5686_v47 = vsel %vm480_vm11, 1.0, %v5676_v9  ;;  %v5690_v49 = vsub.f32 %v5272_v28, %v5679_v53 }
  0xe8   : > { %v2250_v42 = vmul.f32 %v2242_v29, %v5669_v38  ;;  %v2251_v35 = vmul.f32 %v2243_v5, %v5672_v17  ;;  %4354 = vrcp.f32 %v231_v59  ;;  %v2256_v11 = vsub.f32 %v5426_v2, %v2248_v10 }
  0xe9   : > { %4356 = vrcp.f32 %v232_v0  ;;  %v2257_v1 = vsub.f32 %v2233_v23, %v2249_v41  ;;  %v5696_v29 = vsub.f32 %v5275_v60, %v5686_v47  ;;  %v935_v2 = vmul.f32 %v5309_v51, %v5279_v55  ;;  %v7264_v55 = vld [vmem:[#allocation100_spill] sm:$0xff]  ;;  %v7265_v51 = vld [vmem:[#allocation78_spill] sm:$0xff]  ;;  %v7267_v0 = vld [vmem:[#allocation79_spill] sm:$0xff] }
  0xea   : > { %v2258_v45 = vsub.f32 %v5101_v40, %v2250_v42  ;;  %v2259_v37 = vsub.f32 %v5104_v8, %v2251_v35  ;;  %4358 = vpow2.f32 %v3586_v50  ;;  %v936_v5 = vmul.f32 %v5317_v12, %v5282_v18  ;;  %v4307_v8 = vld [vmem:[%s6947_s1 + $0x188] sm:$0xff]   ;;  %v7263_v50 = vld [vmem:[#allocation82_spill] sm:$0xff]  ;;  %v7266_v12 = vld [vmem:[#allocation101_spill] sm:$0xff] }
  0xeb   : > { %v2264_v7 = vpack.c.bf16 %v2257_v1, %v2256_v11  ;;  %v3753_v59 = vadd.f32 -1.0, %v5084_v43  ;;  %v3754_v23 = vadd.f32 -1.0, %v5094_v57  ;;  %v5708_v60 = vmul.f32 1.25, %v5287_v25 }
  0xec   : > { %v2265_v28 = vpack.c.bf16 %v2259_v37, %v2258_v45  ;;  %v5711_v10 = vmul.f32 1.25, %v7263_v50  ;;  %v5715_v18 = vmul.f32 %v7265_v51, %v7264_v55  ;;  %v5719_v43 = vmul.f32 %v7267_v0, %v7266_v12  ;;  %v7271_v45 = vld [vmem:[#allocation94_spill] sm:$0xff]  ;;  %v7272_v55 = vld [vmem:[#allocation95_spill] sm:$0xff]  ;;  %v7274_v12 = vld [vmem:[#allocation84_spill] sm:$0xff] }
  0xed   : > { %v4349_v40 = vpop.eup %4348  ;;  %4103 = vmatprep.mubr.bf16.mxu0 %v2264_v7  ;;  %v5721_v42 = vmul.f32 2.5, %v3753_v59  ;;  %v5723_v35 = vmul.f32 2.5, %v3754_v23  ;;  %v5725_v11 = vmul.f32 1.25, %v3753_v59  ;;  %v1279_v37 = vmul.f32 %v5708_v60, %v7271_v45  ;;  %v4309_v7 = vld [vmem:[%s6947_s1 + $0x190] sm:$0xff]  }
  0xee   : > { %v4351_v57 = vpop.eup %4350  ;;  %v233_v41 = vadd.f32 1.0, %v4349_v40  ;;  %4104 = vmatmul.mubr.bf16.vlgmr.msra.gmra.mrb[0].mxu0 %v2265_v28  ;;  %v1280_v51 = vmul.f32 %v5711_v10, %v7272_v55  ;;  %v5731_v3 = vmul.f32 1.25, %v3754_v23  ;;  %v2244_v0 = vmul.f32 0.8333333, %v3753_v59 }
  0xef   : > { %7268 = vst [vmem:[#allocation10_spill] sm:$0xff] %v5721_v42  ;;  %7269 = vst [vmem:[#allocation82_spill] sm:$0xff] %v5723_v35  ;;  %v234_v1 = vadd.f32 1.0, %v4351_v57  ;;  %4112 = vmatpush3.bf16.msra.mxu0 %v7274_v12  ;;  %v959_v40 = vmul.f32 %v5721_v42, %v5690_v49  ;;  %v960_v28 = vmul.f32 %v5723_v35, %v5696_v29  ;;  %v4353_v57 = vpop.eup %4352  ;;  %v2245_v45 = vmul.f32 0.8333333, %v3754_v23 }
  0xf0   : > { %7270 = vst [vmem:[#allocation100_spill] sm:$0xff] %v5725_v11  ;;  %7273 = vst [vmem:[#allocation78_spill] sm:$0xff] %v5731_v3  ;;  %4360 = vrcp.f32 %v233_v41  ;;  %4113 = vmatprep.subr.bf16.mxu0 %v4307_v8  ;;  %v3587_v55 = vmul.f32 -1.442695, %v5353_v58  ;;  %v3588_v41 = vmul.f32 -1.442695, %v5356_v62  ;;  %v937_v23 = vmul.f32 %v5531_v61, %v5506_v39 }
  0xf1   : > { %4362 = vrcp.f32 %v234_v1  ;;  %v235_v12 = vadd.f32 1.0, %v4353_v57  ;;  %v5743_v52 = vsub.f32 %v935_v2, %v959_v40  ;;  %v5745_v33 = vsub.f32 %v936_v5, %v960_v28  ;;  %v4311_v57 = vld [vmem:[%s6947_s1 + $0x198] sm:$0xff]  }
  0xf2   : > { %vm481_vm12 = vcmp.ge.f32.partialorder %v5353_v58, 1.0  ;;  %v4355_v31 = vpop.eup %4354  ;;  %4364 = vpow2.f32 %v3587_v55  ;;  %vm482_vm13 = vcmp.ge.f32.partialorder %v5356_v62, 1.0  ;;  %vm499_vm14 = vcmp.ge.f32.partialorder %v5590_v24, 1.4 }
  0xf3   : > { %v5750_v59 = vsel %vm481_vm12, 1.0, %v5676_v9  ;;  %v4357_v1 = vpop.eup %4356  ;;  %v255_v35 = vmul.f32 %v5590_v24, %v4355_v31  ;;  %4114 = vmatpush3.bf16.msra.mxu0 %v4307_v8  ;;  %4366 = vrcp.f32 %v235_v12  ;;  %v1295_v2 = vmul.f32 %v5725_v11, %v5743_v52 }
  0xf4   : > { %v1296_v5 = vmul.f32 %v5731_v3, %v5745_v33  ;;  %v4359_v40 = vpop.eup %4358  ;;  %v256_v28 = vmul.f32 %v5597_v6, %v4357_v1  ;;  %4115 = vmatprep.subr.bf16.mxu0 %v4309_v7  ;;  %4368 = vpow2.f32 %v3588_v41  ;;  %v5764_v39 = vsel %vm482_vm13, 1.0, %v5676_v9 }
  0xf5   : > { %7275 = vst [vmem:[#allocation101_spill] sm:$0xff] %v5764_v39  ;;  %v5768_v61 = vsub.f32 %v5496_v56, %v5750_v59  ;;  %v236_v31 = vadd.f32 1.0, %v4359_v40  ;;  %v5770_v8 = vsub.f32 %v1279_v37, %v1295_v2  ;;  %v5776_v12 = vsub.f32 %v5502_v20, %v5764_v39  ;;  %v4313_v20 = vld [vmem:[%s6947_s1 + $0x1a0] sm:$0xff]  }
  0xf6   : > { %v5772_v55 = vsub.f32 %v1280_v51, %v1296_v5  ;;  %v263_v1 = vpack.c.bf16 %v256_v28, %v255_v35  ;;  %v938_v41 = vmul.f32 %v5538_v14, %v5509_v36  ;;  %v3755_v3 = vadd.f32 -1.0, %v5353_v58 }
  0xf7   : > { %7276 = vst [vmem:[#allocation79_spill] sm:$0xff] %v5776_v12  ;;  %v3756_v11 = vadd.f32 -1.0, %v5356_v62  ;;  %4116 = vmatpush3.bf16.msra.mxu0 %v4309_v7  ;;  %4370 = vrcp.f32 %v236_v31  ;;  %v2252_v56 = vmul.f32 %v2244_v0, %v5770_v8  ;;  %v5785_v51 = vmul.f32 1.25, %v5516_v32 }
  0xf8   : > { %v2253_v37 = vmul.f32 %v2245_v45, %v5772_v55  ;;  %4007 = vmatprep.mubr.bf16.mxu1 %v263_v1  ;;  %4117 = vmatprep.subr.bf16.mxu0 %v4311_v57  ;;  %v5790_v36 = vmul.f32 2.5, %v3755_v3  ;;  %v5795_v35 = vmul.f32 1.25, %v5519_v19  ;;  %v5797_v7 = vmul.f32 1.25, %v3755_v3 }
  0xf9   : > { %v5792_v14 = vmul.f32 2.5, %v3756_v11  ;;  %v2260_v45 = vsub.f32 %v5715_v18, %v2252_v56  ;;  %v1281_v5 = vmul.f32 %v5785_v51, %v5559_v15  ;;  %v5803_v40 = vmul.f32 1.25, %v3756_v11 }
  0xfa   : > { %7277 = vst [vmem:[#allocation94_spill] sm:$0xff] %v5790_v36  ;;  %7279 = vst [vmem:[#allocation84_spill] sm:$0xff] %v5797_v7  ;;  %v4361_v0 = vpop.eup %4360  ;;  %v2261_v2 = vsub.f32 %v5719_v43, %v2253_v37  ;;  %v961_v1 = vmul.f32 %v5790_v36, %v5768_v61  ;;  %v1282_v39 = vmul.f32 %v5795_v35, %v5565_v46  ;;  %v4315_v37 = vld [vmem:[%s6947_s1 + $0x1a8] sm:$0xff]   ;;  %vm500_vm15 = vcmp.ge.f32.partialorder %v5597_v6, 1.4 }
  0xfb   : > { %7278 = vst [vmem:[#allocation95_spill] sm:$0xff] %v5792_v14  ;;  %7280 = vst [vmem:[#allocation127_spill] sm:$0xff] %v5803_v40  ;;  %v4363_v28 = vpop.eup %4362  ;;  %v257_v31 = vmul.f32 %v5635_v63, %v4361_v0  ;;  %v962_v42 = vmul.f32 %v5792_v14, %v5776_v12  ;;  %4118 = vmatpush3.bf16.msra.mxu0 %v4311_v57  ;;  %v5815_v15 = vmul.f32 %v5471_v4, %v5585_v30  ;;  %v5834_v12 = vld [vmem:[%s4504_s17 + $0x20] sm:$0xff] }
  0xfc   : > { %v258_v18 = vmul.f32 %v5642_v27, %v4363_v28  ;;  %v2266_v43 = vpack.c.bf16 %v2261_v2, %v2260_v45  ;;  %v5819_v63 = vmul.f32 %v5475_v21, %v5593_v16  ;;  %v4365_v56 = vpop.eup %4364  ;;  %4119 = vmatprep.subr.bf16.mxu0 %v4313_v20  ;;  %v5824_v46 = vsub.f32 %v937_v23, %v961_v1  ;;  %v4306_v21 = vld [vmem:[%s6947_s1 + $0x88] sm:$0xff]   ;;  %v7281_v16 = vld [vmem:[#allocation3_spill] sm:$0xff]  ;;  %v7283_v23 = vld [vmem:[#allocation21_spill] sm:$0xff] }
  0xfd   : > { %v5826_v27 = vsub.f32 %v938_v41, %v962_v42  ;;  %v2246_v57 = vmul.f32 0.8333333, %v3755_v3  ;;  %v2247_v0 = vmul.f32 0.8333333, %v3756_v11  ;;  %v4367_v45 = vpop.eup %4366  ;;  %v237_v30 = vadd.f32 1.0, %v4365_v56  ;;  %v7282_v28 = vld [vmem:[#allocation4_spill] sm:$0xff] }
  0xfe   : > { %v264_v4 = vpack.c.bf16 %v258_v18, %v257_v31  ;;  %4107 = vmatprep.mubr.bf16.mxu0 %v2266_v43  ;;  %v1171_v2 = vmul.f32 1.25, %v7281_v16  ;;  %v1172_v14 = vmul.f32 1.25, %v7282_v28  ;;  %v4369_v36 = vpop.eup %4368  ;;  %v259_v42 = vmul.f32 %v5834_v12, %v4367_v45  ;;  %v7284_v1 = vld [vmem:[#allocation7_spill] sm:$0xff]  ;;  %v7285_v43 = vld [vmem:[#allocation8_spill] sm:$0xff] }
  0xff   : > { %v1297_v3 = vmul.f32 %v5797_v7, %v5824_v46  ;;  %v1298_v11 = vmul.f32 %v5803_v40, %v5826_v27  ;;  %v1195_v41 = vmul.f32 %v5610_v48, %v7283_v23  ;;  %4120 = vmatpush3.bf16.msra.mxu0 %v4313_v20  ;;  %v238_v31 = vadd.f32 1.0, %v4369_v36  ;;  %v4384_v45 = vld [vmem:[%s6947_s1 + $0x80] sm:$0xff]   ;;  %v4317_v40 = vld [vmem:[%s6947_s1 + $0x1b0] sm:$0xff]   ;;  %v7287_v36 = vld [vmem:[#allocation22_spill] sm:$0xff] }
 0x100   : > { %4008 = vmatmul.mubr.bf16.vlgmr.msra.gmra.mrb[0].mxu1 %v264_v4  ;;  %4372 = vrcp.f32 %v237_v30  ;;  %v1179_v18 = vmul.f32 %v1171_v2, %v7284_v1  ;;  %v1180_v56 = vmul.f32 %v1172_v14, %v7285_v43  ;;  %4121 = vmatprep.subr.bf16.mxu0 %v4315_v37  ;;  %v1196_v4 = vmul.f32 %v5615_v26, %v7287_v36  ;;  %v7288_v30 = vld [vmem:[#allocation5_spill] sm:$0xff]  ;;  %v7290_v43 = vld [vmem:[#allocation6_spill] sm:$0xff] }
 0x101   : > { %4016 = vmatpush3.bf16.msra.mxu1 %v4384_v45  ;;  %v5851_v48 = vsub.f32 %v1281_v5, %v1297_v3  ;;  %v5853_v20 = vsub.f32 %v1282_v39, %v1298_v11  ;;  %v1689_v14 = vmul.f32 0.8333333, %v7288_v30  ;;  %v4371_v2 = vpop.eup %4370  ;;  %v4308_v23 = vld [vmem:[%s6947_s1 + $0x90] sm:$0xff]   ;;  %4374 = vrcp.f32 %v238_v31  ;;  %v5866_v39 = vld [vmem:[%s4504_s17 + $0x28] sm:$0xff]  ;;  %v7292_v30 = vld [vmem:[#allocation11_spill] sm:$0xff] }
 0x102   : > { %4017 = vmatprep.subr.bf16.mxu1 %v4306_v21  ;;  %v5861_v1 = vsub.f32 %v1179_v18, %v1195_v41  ;;  %v1690_v45 = vmul.f32 0.8333333, %v7290_v43  ;;  %v1705_v5 = vmul.f32 0.8333333, %v7250_v34  ;;  %v260_v3 = vmul.f32 %v5866_v39, %v4371_v2  ;;  %v7293_v31 = vld [vmem:[#allocation12_spill] sm:$0xff]  ;;  %v7294_v18 = vld [vmem:[#allocation15_spill] sm:$0xff] }
 0x103   : > { %7286 = vst [vmem:[#allocation21_spill] sm:$0xff] %v5853_v20  ;;  %v2254_v26 = vmul.f32 %v2246_v57, %v5851_v48  ;;  %v2255_v11 = vmul.f32 %v2247_v0, %v5853_v20  ;;  %v5871_v36 = vsub.f32 %v1180_v56, %v1196_v4  ;;  %4122 = vmatpush3.bf16.msra.mxu0 %v4315_v37  ;;  %v1706_v28 = vmul.f32 0.8333333, %v7294_v18  ;;  %v4310_v37 = vld [vmem:[%s6947_s1 + $0x98] sm:$0xff]   ;;  %v7297_v4 = vld [vmem:[#allocation13_spill] sm:$0xff]  ;;  %v7304_v18 = vld [vmem:[#allocation20_spill] sm:$0xff] }
 0x104   : > { %7289 = vst [vmem:[#allocation7_spill] sm:$0xff] %v5861_v1  ;;  %v1697_v7 = vmul.f32 %v1689_v14, %v7292_v30  ;;  %v1698_v41 = vmul.f32 %v1690_v45, %v7293_v31  ;;  %v1713_v43 = vmul.f32 %v1705_v5, %v5861_v1  ;;  %v265_v34 = vpack.c.bf16 %v260_v3, %v259_v42  ;;  %v4319_v0 = vld [vmem:[%s6947_s1 + $0x1b8] sm:$0xff]   ;;  %v7303_v31 = vld [vmem:[#allocation37_spill] sm:$0xff]  ;;  %v7312_v1 = vld [vmem:[#allocation39_spill] sm:$0xff] }
 0x105   : > { %7291 = vst [vmem:[#allocation8_spill] sm:$0xff] %v5871_v36  ;;  %4018 = vmatpush3.bf16.msra.mxu1 %v4306_v21  ;;  %4123 = vmatprep.subr.bf16.mxu0 %v4317_v40  ;;  %v2262_v2 = vsub.f32 %v5815_v15, %v2254_v26  ;;  %v2263_v57 = vsub.f32 %v5819_v63, %v2255_v11  ;;  %v5889_v15 = vsel %vm499_vm14, 1.0, %v5676_v9  ;;  %v5892_v42 = vsel %vm500_vm15, 1.0, %v5676_v9  ;;  %v7299_v45 = vld [vmem:[#allocation34_spill] sm:$0xff]  ;;  %v7319_v20 = vld [vmem:[#allocation40_spill] sm:$0xff] }
 0x106   : > { %4019 = vmatprep.subr.bf16.mxu1 %v4308_v23  ;;  %v1714_v56 = vmul.f32 %v1706_v28, %v5871_v36  ;;  %v1721_v21 = vsub.f32 %v1697_v7, %v1713_v43  ;;  %7295 = vst [vmem:[#allocation22_spill] sm:$0xff] %v5889_v15  ;;  %4011 = vmatprep.mubr.bf16.mxu1 %v265_v34  ;;  %7296 = vst [vmem:[#allocation5_spill] sm:$0xff] %v5892_v42  ;;  %v7300_v3 = vld [vmem:[#allocation18_spill] sm:$0xff]  ;;  %v7301_v7 = vld [vmem:[#allocation33_spill] sm:$0xff]  ;;  %v3757_v34 = vadd.f32 -1.4, %v5590_v24 }
 0x107   : > { %v2267_v63 = vpack.c.bf16 %v2263_v57, %v2262_v2  ;;  %v5896_v14 = vsub.f32 %v7297_v4, %v5889_v15  ;;  %v971_v26 = vmul.f32 %v7300_v3, %v7299_v45  ;;  %4124 = vmatpush3.bf16.msra.mxu0 %v4317_v40  ;;  %v5902_v30 = vsub.f32 %v7301_v7, %v5892_v42  ;;  %v7305_v57 = vld [vmem:[#allocation19_spill] sm:$0xff]  ;;  %v7309_v15 = vld [vmem:[#allocation56_spill] sm:$0xff]  ;;  %v7311_v36 = vld [vmem:[#allocation58_spill] sm:$0xff] }
 0x108   : > { %v1722_v11 = vsub.f32 %v1698_v41, %v1714_v56  ;;  %v972_v43 = vmul.f32 %v7304_v18, %v7303_v31  ;;  %v3758_v2 = vadd.f32 -1.4, %v5597_v6  ;;  %v1307_v4 = vmul.f32 %v7305_v57, %v5632_v54  ;;  %v7306_v45 = vld [vmem:[#allocation23_spill] sm:$0xff]  ;;  %4125 = vmatprep.subr.bf16.mxu0 %v4319_v0 }
 0x109   : > { %7298 = vst [vmem:[#allocation6_spill] sm:$0xff] %v5896_v14  ;;  %7302 = vst [vmem:[#allocation11_spill] sm:$0xff] %v5902_v30  ;;  %4020 = vmatpush3.bf16.msra.mxu1 %v4308_v23  ;;  %4108 = vmatmul.mubr.bf16.gmra.mrb[4].mxu0 %v2267_v63  ;;  %v1308_v40 = vmul.f32 %v7306_v45, %v5639_v13  ;;  %v5913_v41 = vmul.f32 %v1705_v5, %v5661_v44  ;;  %v5918_v56 = vld [vmem:[%s6947_s1 + $0x1c0] sm:$0xff]   ;;  %v5923_v54 = vmul.f32 2.5, %v3757_v34 }
 0x10a   : > { %v4373_v3 = vpop.eup %4372  ;;  %4021 = vmatprep.subr.bf16.mxu1 %v4310_v37  ;;  %v4312_v23 = vld [vmem:[%s6947_s1 + $0xa0] sm:$0xff]   ;;  %v1729_v63 = vpack.c.bf16 %v1722_v11, %v1721_v21  ;;  %v1315_v7 = vmul.f32 1.25, %v3757_v34  ;;  %v5926_v13 = vmul.f32 %v1706_v28, %v5666_v22  ;;  %v5929_v5 = vmul.f32 2.5, %v3758_v2  ;;  %v7310_v21 = vld [vmem:[#allocation38_spill] sm:$0xff] }
 0x10b   : > { %7307 = vst [vmem:[#allocation12_spill] sm:$0xff] %v5923_v54  ;;  %v261_v44 = vmul.f32 %v4373_v3, %v5353_v58  ;;  %v1316_v31 = vmul.f32 1.25, %v3758_v2  ;;  %v2413_v18 = vmul.f32 0.8333333, %v3757_v34  ;;  %v4375_v57 = vpop.eup %4374  ;;  %4126 = vmatpush3.bf16.msra.mxu0 %v4319_v0  ;;  %v995_v45 = vmul.f32 %v5923_v54, %v5896_v14  ;;  %v7313_v0 = vld [vmem:[#allocation48_spill] sm:$0xff]  ;;  %v7314_v3 = vld [vmem:[#allocation49_spill] sm:$0xff] }
 0x10c   : > { %7308 = vst [vmem:[#allocation15_spill] sm:$0xff] %v5929_v5  ;;  %v2414_v42 = vmul.f32 0.8333333, %v3758_v2  ;;  %v5935_v11 = vsub.f32 %v7310_v21, %v7309_v15  ;;  %v5939_v22 = vsub.f32 %v7312_v1, %v7311_v36  ;;  %v262_v58 = vmul.f32 %v4375_v57, %v5356_v62  ;;  %4135 = vmatprep.subr.bf16.mxu0 %v5918_v56  ;;  %v4314_v15 = vld [vmem:[%s6947_s1 + $0xa8] sm:$0xff]   ;;  %v7315_v1 = vld [vmem:[#allocation50_spill] sm:$0xff]  ;;  %v7317_v14 = vld [vmem:[#allocation57_spill] sm:$0xff] }
 0x10d   : > { %4022 = vmatpush3.bf16.msra.mxu1 %v4310_v37  ;;  %v996_v28 = vmul.f32 %v5929_v5, %v5902_v30  ;;  %v1707_v34 = vmul.f32 0.8333333, %v7313_v0  ;;  %v1708_v2 = vmul.f32 0.8333333, %v7314_v3  ;;  %v5950_v21 = vsub.f32 %v971_v26, %v995_v45  ;;  %v7316_v37 = vld [vmem:[#allocation51_spill] sm:$0xff] }
 0x10e   : > { %4023 = vmatprep.subr.bf16.mxu1 %v4312_v23  ;;  %v1317_v36 = vmul.f32 1.25, %v7315_v1  ;;  %v1318_v62 = vmul.f32 1.25, %v7316_v37  ;;  %v2415_v57 = vmul.f32 0.8333333, %v7315_v1  ;;  %v266_v5 = vpack.c.bf16 %v262_v58, %v261_v44  ;;  %v7318_v24 = vld [vmem:[#allocation59_spill] sm:$0xff]  ;;  %v7320_v44 = vld [vmem:[#allocation41_spill] sm:$0xff] }
 0x10f   : > { %v5955_v54 = vsub.f32 %v972_v43, %v996_v28  ;;  %v1715_v0 = vmul.f32 %v1707_v34, %v5935_v11  ;;  %v1716_v3 = vmul.f32 %v1708_v2, %v5939_v22  ;;  %v1323_v30 = vmul.f32 %v1315_v7, %v5950_v21  ;;  %v4316_v7 = vld [vmem:[%s6947_s1 + $0xb0] sm:$0xff]  }
 0x110   : > { %v1325_v6 = vmul.f32 %v1317_v36, %v7317_v14  ;;  %v1326_v26 = vmul.f32 %v1318_v62, %v7318_v24  ;;  %v2407_v45 = vmul.f32 %v1707_v34, %v5669_v38  ;;  %v2408_v58 = vmul.f32 %v1708_v2, %v5672_v17  ;;  %4012 = vmatmul.mubr.bf16.gmra.mrb[4].mxu1 %v266_v5  ;;  %v7321_v24 = vld [vmem:[#allocation62_spill] sm:$0xff]  ;;  %v7322_v38 = vld [vmem:[#allocation63_spill] sm:$0xff]  ;;  %v7323_v34 = vld [vmem:[#allocation72_spill] sm:$0xff] }
 0x111   : > { %4024 = vmatpush3.bf16.msra.mxu1 %v4312_v23  ;;  %v1324_v16 = vmul.f32 %v1316_v31, %v5955_v54  ;;  %v1723_v1 = vsub.f32 %v7319_v20, %v1715_v0  ;;  %v1724_v43 = vsub.f32 %v7320_v44, %v1716_v3  ;;  %v5970_v14 = vsub.f32 %v1307_v4, %v1323_v30  ;;  %v7324_v36 = vld [vmem:[#allocation73_spill] sm:$0xff] }
 0x112   : > { %4025 = vmatprep.subr.bf16.mxu1 %v4314_v15  ;;  %v5973_v28 = vsub.f32 %v7321_v24, %v1325_v6  ;;  %v5976_v23 = vsub.f32 %v7322_v38, %v1326_v26  ;;  %v2416_v20 = vmul.f32 0.8333333, %v7316_v37  ;;  %4031 = vmatprep.mubr.bf16.mxu1 %v1729_v63  ;;  %v1175_v2 = vmul.f32 1.25, %v7323_v34  ;;  %v7325_v5 = vld [vmem:[#allocation89_spill] sm:$0xff]  ;;  %v7328_v26 = vld [vmem:[#allocation90_spill] sm:$0xff] }
 0x113   : > { %v5979_v31 = vsub.f32 %v1308_v40, %v1324_v16  ;;  %v5981_v17 = vpack.c.bf16 %v1724_v43, %v1723_v1  ;;  %v1176_v62 = vmul.f32 1.25, %v7324_v36  ;;  %v2421_v30 = vmul.f32 %v2413_v18, %v5970_v14  ;;  %v7326_v16 = vld [vmem:[#allocation76_spill] sm:$0xff]  ;;  %v7327_v37 = vld [vmem:[#allocation77_spill] sm:$0xff]  ;;  %v4318_v18 = vld [vmem:[%s6947_s1 + $0xb8] sm:$0xff]  }
 0x114   : > { %v2423_v4 = vmul.f32 %v2415_v57, %v5973_v28  ;;  %v2424_v6 = vmul.f32 %v2416_v20, %v5976_v23  ;;  %v1199_v0 = vmul.f32 %v5708_v60, %v7325_v5  ;;  %v1183_v40 = vmul.f32 %v1175_v2, %v7326_v16  ;;  %v7329_v60 = vld [vmem:[#allocation74_spill] sm:$0xff]  ;;  %v7330_v20 = vld [vmem:[#allocation75_spill] sm:$0xff] }
 0x115   : > { %4026 = vmatpush3.bf16.msra.mxu1 %v4314_v15  ;;  %v2422_v63 = vmul.f32 %v2414_v42, %v5979_v31  ;;  %v1184_v3 = vmul.f32 %v1176_v62, %v7327_v37  ;;  %v1200_v1 = vmul.f32 %v5711_v10, %v7328_v26  ;;  %v2429_v57 = vsub.f32 %v5913_v41, %v2421_v30  ;;  %v7331_v62 = vld [vmem:[#allocation80_spill] sm:$0xff] }
 0x116   : > { %4027 = vmatprep.subr.bf16.mxu1 %v4316_v7  ;;  %v2431_v44 = vsub.f32 %v2407_v45, %v2423_v4  ;;  %v2432_v43 = vsub.f32 %v2408_v58, %v2424_v6  ;;  %v1693_v15 = vmul.f32 0.8333333, %v7329_v60  ;;  %v6001_v24 = vsub.f32 %v1183_v40, %v1199_v0  ;;  %v7332_v45 = vld [vmem:[#allocation81_spill] sm:$0xff]  ;;  %v4323_v30 = vld [vmem:[%s6947_s1 + $0x1c8] sm:$0xff]   ;;  %v7336_v60 = vld [vmem:[#allocation91_spill] sm:$0xff] }
 0x117   : > { %v2430_v42 = vsub.f32 %v5926_v13, %v2422_v63  ;;  %v6003_v38 = vsub.f32 %v1184_v3, %v1200_v1  ;;  %v1694_v2 = vmul.f32 0.8333333, %v7330_v20  ;;  %v1709_v16 = vmul.f32 0.8333333, %v5287_v25  ;;  %v4320_v13 = vld [vmem:[%s6947_s1 + $0xc0] sm:$0xff]   ;;  %v7334_v3 = vld [vmem:[#allocation88_spill] sm:$0xff] }
 0x118   : > { %v2438_v10 = vpack.c.bf16 %v2432_v43, %v2431_v44  ;;  %v1701_v5 = vmul.f32 %v1693_v15, %v7331_v62  ;;  %v1710_v37 = vmul.f32 0.8333333, %v7263_v50  ;;  %vm503_vm0 = vcmp.ge.f32.partialorder %v5834_v12, 1.4  ;;  %v7333_v63 = vld [vmem:[#allocation87_spill] sm:$0xff]  ;;  %v4322_v20 = vld [vmem:[%s6947_s1 + $0xc8] sm:$0xff]  }
 0x119   : > { %4028 = vmatpush3.bf16.msra.mxu1 %v4316_v7  ;;  %v2437_v41 = vpack.c.bf16 %v2430_v42, %v2429_v57  ;;  %v1702_v58 = vmul.f32 %v1694_v2, %v7332_v45  ;;  %vm504_vm1 = vcmp.ge.f32.partialorder %v5866_v39, 1.4  ;;  %v1717_v25 = vmul.f32 %v1709_v16, %v6001_v24  ;;  %v7340_v45 = vld [vmem:[#allocation103_spill] sm:$0xff] }
 0x11a   : > { %4029 = vmatprep.subr.bf16.mxu1 %v4318_v18  ;;  %v1718_v50 = vmul.f32 %v1710_v37, %v6003_v38  ;;  %v6021_v7 = vsel %vm503_vm0, 1.0, %v5676_v9  ;;  %v6024_v4 = vsel %vm504_vm1, 1.0, %v5676_v9  ;;  %v975_v40 = vmul.f32 %v7333_v63, %v5690_v49  ;;  %v7342_v63 = vld [vmem:[#allocation114_spill] sm:$0xff] }
 0x11b   : > { %4127 = vmatprep.mubr.bf16.mxu0 %v2437_v41  ;;  %v6028_v6 = vsub.f32 %v5679_v53, %v6021_v7  ;;  %v6032_v0 = vsub.f32 %v5686_v47, %v6024_v4  ;;  %v976_v26 = vmul.f32 %v7334_v3, %v5696_v29  ;;  %v1725_v1 = vsub.f32 %v1701_v5, %v1717_v25  ;;  %v7335_v53 = vld [vmem:[#allocation86_spill] sm:$0xff]  ;;  %v7341_v25 = vld [vmem:[#allocation105_spill] sm:$0xff] }
 0x11c   : > { %4128 = vmatmul.mubr.bf16.vlgmr.msra.gmra.mrb[0].mxu0 %v2438_v10  ;;  %v1726_v57 = vsub.f32 %v1702_v58, %v1718_v50  ;;  %v3761_v44 = vadd.f32 -1.4, %v5834_v12  ;;  %v3762_v43 = vadd.f32 -1.4, %v5866_v39  ;;  %v1311_v47 = vmul.f32 %v7335_v53, %v5743_v52  ;;  %v7337_v29 = vld [vmem:[#allocation102_spill] sm:$0xff] }
 0x11d   : > { %4030 = vmatpush3.bf16.msra.mxu1 %v4318_v18  ;;  %4136 = vmatpush3.bf16.msra.mxu0 %v5918_v56  ;;  %v1312_v15 = vmul.f32 %v7336_v60, %v5745_v33  ;;  %v6046_v49 = vmul.f32 %v1709_v16, %v5770_v8  ;;  %v1177_v42 = vmul.f32 1.25, %v7337_v29  ;;  %v4325_v56 = vld [vmem:[%s6947_s1 + $0x1d0] sm:$0xff]   ;;  %v6060_v10 = vmul.f32 %v1710_v37, %v5772_v55  ;;  %v7343_v37 = vld [vmem:[#allocation116_spill] sm:$0xff] }
 0x11e   : > { %4039 = vmatprep.subr.bf16.mxu1 %v4320_v13  ;;  %4137 = vmatprep.subr.bf16.mxu0 %v4323_v30  ;;  %v1731_v18 = vpack.c.bf16 %v1726_v57, %v1725_v1  ;;  %v6055_v52 = vmul.f32 2.5, %v3761_v44  ;;  %v6057_v2 = vmul.f32 2.5, %v3762_v43  ;;  %v1319_v33 = vmul.f32 1.25, %v3761_v44  ;;  %v7344_v1 = vld [vmem:[#allocation104_spill] sm:$0xff]  ;;  %v7345_v57 = vld [vmem:[#allocation9_spill] sm:$0xff] }
 0x11f   : > { %v1320_v8 = vmul.f32 1.25, %v3762_v43  ;;  %v2417_v62 = vmul.f32 0.8333333, %v3761_v44  ;;  %v2418_v5 = vmul.f32 0.8333333, %v3762_v43  ;;  %v1178_v58 = vmul.f32 1.25, %v7340_v45 }
 0x120   : > { %7338 = vst [vmem:[#allocation13_spill] sm:$0xff] %v6055_v52  ;;  %7339 = vst [vmem:[#allocation34_spill] sm:$0xff] %v6057_v2  ;;  %4032 = vmatmul.mubr.bf16.vlgmr.msra.gmra.mrb[0].mxu1 %v5981_v17  ;;  %v999_v16 = vmul.f32 %v6055_v52, %v6028_v6  ;;  %v1000_v41 = vmul.f32 %v6057_v2, %v6032_v0  ;;  %v1185_v50 = vmul.f32 %v1177_v42, %v7341_v25  ;;  %v4324_v43 = vld [vmem:[%s6947_s1 + $0xd0] sm:$0xff]   ;;  %v7347_v25 = vld [vmem:[#allocation107_spill] sm:$0xff]  ;;  %vm3079_vm0 = vcmask 1046528  }
 0x121   : > { %4040 = vmatpush3.bf16.msra.mxu1 %v4320_v13  ;;  %4138 = vmatpush3.bf16.msra.mxu0 %v4323_v30  ;;  %v1201_v55 = vmul.f32 %v5785_v51, %v7342_v63  ;;  %v1202_v3 = vmul.f32 %v5795_v35, %v7343_v37  ;;  %v1695_v17 = vmul.f32 0.8333333, %v7344_v1  ;;  %v1696_v44 = vmul.f32 0.8333333, %v7345_v57  ;;  %v4327_v13 = vld [vmem:[%s6947_s1 + $0x1d8] sm:$0xff]   ;;  %v7348_v37 = vld [vmem:[#allocation108_spill] sm:$0xff] }
 0x122   : > { %4041 = vmatprep.subr.bf16.mxu1 %v4322_v20  ;;  %4139 = vmatprep.subr.bf16.mxu0 %v4325_v56  ;;  %v6081_v30 = vsub.f32 %v975_v40, %v999_v16  ;;  %v6083_v51 = vsub.f32 %v976_v26, %v1000_v41  ;;  %v7346_v35 = vld [vmem:[#allocation106_spill] sm:$0xff]  ;;  %v1711_v60 = vmul.f32 0.8333333, %v5516_v32  ;;  %v1712_v57 = vmul.f32 0.8333333, %v5519_v19  ;;  %v6097_v16 = vld [vmem:[%s4504_s17 + $0x30] sm:$0xff] }
 0x123   : > { %v1186_v53 = vmul.f32 %v1178_v58, %v7346_v35  ;;  %4035 = vmatprep.mubr.bf16.mxu1 %v1731_v18  ;;  %v6087_v42 = vsub.f32 %v1185_v50, %v1201_v55  ;;  %v1703_v63 = vmul.f32 %v1695_v17, %v7347_v25  ;;  %v1704_v1 = vmul.f32 %v1696_v44, %v7348_v37  ;;  %v6102_v18 = vld [vmem:[%s4504_s17 + $0x38] sm:$0xff]  ;;  %v7353_v17 = vld [vmem:[#allocation101_spill] sm:$0xff]  ;;  %v7355_v35 = vld [vmem:[#allocation79_spill] sm:$0xff] }
 0x124   : > { %v1327_v2 = vmul.f32 %v1319_v33, %v6081_v30  ;;  %v1328_v40 = vmul.f32 %v1320_v8, %v6083_v51  ;;  %vm505_vm2 = vcmp.ge.f32.partialorder %v6097_v16, 1.4  ;;  %7349 = vst [vmem:[#allocation18_spill] sm:$0xff] %v6102_v18  ;;  %vm506_vm3 = vcmp.ge.f32.partialorder %v6102_v18, 1.4  ;;  %v7351_v33 = vld [vmem:[#allocation112_spill] sm:$0xff] }
 0x125   : > { %v6094_v26 = vsub.f32 %v1186_v53, %v1202_v3  ;;  %4042 = vmatpush3.bf16.msra.mxu1 %v4322_v20  ;;  %4140 = vmatpush3.bf16.msra.mxu0 %v4325_v56  ;;  %v1719_v32 = vmul.f32 %v1711_v60, %v6087_v42  ;;  %v6106_v19 = vsel %vm505_vm2, 1.0, %v5676_v9  ;;  %v977_v8 = vmul.f32 %v7351_v33, %v5768_v61  ;;  %v4326_v41 = vld [vmem:[%s6947_s1 + $0xd8] sm:$0xff]   ;;  %v4329_v20 = vld [vmem:[%s6947_s1 + $0x1e0] sm:$0xff]   ;;  %v7356_v53 = vld [vmem:[#allocation113_spill] sm:$0xff] }
 0x126   : > { %7350 = vst [vmem:[#allocation33_spill] sm:$0xff] %v6106_v19  ;;  %4043 = vmatprep.subr.bf16.mxu1 %v4324_v43  ;;  %4141 = vmatprep.subr.bf16.mxu0 %v4327_v13  ;;  %v6116_v56 = vsub.f32 %v1311_v47, %v1327_v2  ;;  %v6118_v58 = vsub.f32 %v1312_v15, %v1328_v40  ;;  %v6122_v55 = vsel %vm506_vm3, 1.0, %v5676_v9  ;;  %v3763_v37 = vadd.f32 -1.4, %v6097_v16  ;;  %v7367_v52 = vld [vmem:[#allocation123_spill] sm:$0xff] }
 0x127   : > { %v1720_v50 = vmul.f32 %v1712_v57, %v6094_v26  ;;  %7352 = vst [vmem:[#allocation37_spill] sm:$0xff] %v6122_v55  ;;  %v1727_v61 = vsub.f32 %v1703_v63, %v1719_v32  ;;  %v6126_v3 = vsub.f32 %v5750_v59, %v6106_v19  ;;  %v6130_v44 = vsub.f32 %v7353_v17, %v6122_v55  ;;  %v7357_v59 = vld [vmem:[#allocation111_spill] sm:$0xff] }
 0x128   : > { %v978_v47 = vmul.f32 %v7356_v53, %v7355_v35  ;;  %v2425_v15 = vmul.f32 %v2417_v62, %v6116_v56  ;;  %v2426_v2 = vmul.f32 %v2418_v5, %v6118_v58  ;;  %v3764_v63 = vadd.f32 -1.4, %v6102_v18  ;;  %v7358_v32 = vld [vmem:[#allocation115_spill] sm:$0xff]  ;;  %v4331_v5 = vld [vmem:[%s6947_s1 + $0x1e8] sm:$0xff]  }
 0x129   : > { %7354 = vst [vmem:[#allocation20_spill] sm:$0xff] %v6130_v44  ;;  %v1728_v25 = vsub.f32 %v1704_v1, %v1720_v50  ;;  %4044 = vmatpush3.bf16.msra.mxu1 %v4324_v43  ;;  %4142 = vmatpush3.bf16.msra.mxu0 %v4327_v13  ;;  %v1313_v40 = vmul.f32 %v7357_v59, %v5824_v46  ;;  %v4328_v62 = vld [vmem:[%s6947_s1 + $0xe0] sm:$0xff]   ;;  %v6153_v1 = vmul.f32 2.5, %v3763_v37  ;;  %v7361_v50 = vld [vmem:[#allocation21_spill] sm:$0xff]  ;;  %v4330_v53 = vld [vmem:[%s6947_s1 + $0xe8] sm:$0xff]   ;;  %vm3308_vm1 = vcmask 1045504  }
 0x12a   : > { %v1314_v33 = vmul.f32 %v7358_v32, %v5826_v27  ;;  %v6143_v17 = vmul.f32 %v1711_v60, %v5851_v48  ;;  %4045 = vmatprep.subr.bf16.mxu1 %v4326_v41  ;;  %4143 = vmatprep.subr.bf16.mxu0 %v4329_v20  ;;  %v2433_v43 = vsub.f32 %v6046_v49, %v2425_v15  ;;  %v6155_v27 = vmul.f32 2.5, %v3764_v63  ;;  %v4333_v15 = vld [vmem:[%s6947_s1 + $0x1f0] sm:$0xff]   ;;  %v7363_v32 = vld [vmem:[#allocation4_spill] sm:$0xff] }
 0x12b   : > { %v2434_v46 = vsub.f32 %v6060_v10, %v2426_v2  ;;  %v1732_v13 = vpack.c.bf16 %v1728_v25, %v1727_v61  ;;  %7359 = vst [vmem:[#allocation19_spill] sm:$0xff] %v6153_v1  ;;  %v1321_v48 = vmul.f32 1.25, %v3763_v37  ;;  %v1322_v60 = vmul.f32 1.25, %v3764_v63  ;;  %v7362_v2 = vld [vmem:[#allocation3_spill] sm:$0xff] }
 0x12c   : > { %7360 = vst [vmem:[#allocation23_spill] sm:$0xff] %v6155_v27  ;;  %v6158_v35 = vmul.f32 %v1712_v57, %v7361_v50  ;;  %v1001_v49 = vmul.f32 %v6153_v1, %v6126_v3  ;;  %v2419_v10 = vmul.f32 0.8333333, %v3763_v37  ;;  %v2420_v61 = vmul.f32 0.8333333, %v3764_v63  ;;  %v7366_v37 = vld [vmem:[#allocation17_spill] sm:$0xff] }
 0x12d   : > { %v2439_v59 = vpack.c.bf16 %v2434_v46, %v2433_v43  ;;  %4036 = vmatmul.mubr.bf16.gmra.mrb[4].mxu1 %v1732_v13  ;;  %4144 = vmatpush3.bf16.msra.mxu0 %v4329_v20  ;;  %v1002_v57 = vmul.f32 %v6155_v27, %v6130_v44  ;;  %v1870_v25 = vmul.f32 0.8333333, %v7362_v2  ;;  %v1871_v50 = vmul.f32 0.8333333, %v7363_v32  ;;  %v7364_v43 = vld [vmem:[#allocation16_spill] sm:$0xff]  ;;  %v7370_v20 = vld [vmem:[#allocation7_spill] sm:$0xff] }
 0x12e   : > { %4046 = vmatpush3.bf16.msra.mxu1 %v4326_v41  ;;  %v1886_v46 = vmul.f32 0.8333333, %v7364_v43  ;;  %4145 = vmatprep.subr.bf16.mxu0 %v4331_v5  ;;  %v6173_v13 = vsub.f32 %v977_v8, %v1001_v49  ;;  %v1887_v63 = vmul.f32 0.8333333, %v7366_v37  ;;  %vm523_vm4 = vcmp.ge.f32.partialorder %v7367_v52, 1.8 }
 0x12f   : > { %4047 = vmatprep.subr.bf16.mxu1 %v4328_v62  ;;  %v7368_v1 = vld [vmem:[#allocation124_spill] sm:$0xff]  ;;  %4131 = vmatprep.mubr.bf16.mxu0 %v2439_v59  ;;  %v6178_v41 = vsub.f32 %v978_v47, %v1002_v57  ;;  %v1878_v27 = vmul.f32 %v1870_v25, %v7370_v20  ;;  %v7372_v32 = vld [vmem:[#allocation30_spill] sm:$0xff]  ;;  %v7373_v44 = vld [vmem:[#allocation31_spill] sm:$0xff]  ;;  %v6186_v49 = vsel %vm523_vm4, 1.0, %v5676_v9  ;;  %vm527_vm6 = vcmp.ge.f32.partialorder %v5834_v12, 1.8 }
 0x130   : > { %7365 = vst [vmem:[#allocation56_spill] sm:$0xff] %v6173_v13  ;;  %vm524_vm5 = vcmp.ge.f32.partialorder %v7368_v1, 1.8  ;;  %v7371_v2 = vld [vmem:[#allocation8_spill] sm:$0xff]  ;;  %v1894_v19 = vmul.f32 %v1886_v46, %v7372_v32  ;;  %v1329_v43 = vmul.f32 %v1321_v48, %v6173_v13  ;;  %v1895_v8 = vmul.f32 %v1887_v63, %v7373_v44  ;;  %7374 = vst [vmem:[#allocation58_spill] sm:$0xff] %v6186_v49  ;;  %v7375_v57 = vld [vmem:[#allocation22_spill] sm:$0xff] }
 0x131   : > { %7369 = vst [vmem:[#allocation38_spill] sm:$0xff] %v6178_v41  ;;  %v1879_v55 = vmul.f32 %v1871_v50, %v7371_v2  ;;  %v6189_v37 = vsel %vm524_vm5, 1.0, %v5676_v9  ;;  %4146 = vmatpush3.bf16.msra.mxu0 %v4331_v5  ;;  %v1330_v47 = vmul.f32 %v1322_v60, %v6178_v41  ;;  %v6194_v25 = vsub.f32 %v7375_v57, %v6186_v49  ;;  %v4332_v44 = vld [vmem:[%s6947_s1 + $0xf0] sm:$0xff]   ;;  %v7377_v20 = vld [vmem:[#allocation6_spill] sm:$0xff]  ;;  %v7379_v57 = vld [vmem:[#allocation11_spill] sm:$0xff] }
 0x132   : > { %4048 = vmatpush3.bf16.msra.mxu1 %v4328_v62  ;;  %v1902_v59 = vsub.f32 %v1878_v27, %v1894_v19  ;;  %v3765_v50 = vadd.f32 -1.8, %v7367_v52  ;;  %v6200_v48 = vsub.f32 %v1313_v40, %v1329_v43  ;;  %4147 = vmatprep.subr.bf16.mxu0 %v4333_v15  ;;  %v4335_v62 = vld [vmem:[%s6947_s1 + $0x1f8] sm:$0xff]   ;;  %v7376_v19 = vld [vmem:[#allocation5_spill] sm:$0xff]  ;;  %v3766_v60 = vadd.f32 -1.8, %v7368_v1 }
 0x133   : > { %4049 = vmatprep.subr.bf16.mxu1 %v4330_v53  ;;  %v1903_v5 = vsub.f32 %v1879_v55, %v1895_v8  ;;  %v6207_v27 = vsub.f32 %v7376_v19, %v6189_v37  ;;  %v6210_v52 = vsub.f32 %v1314_v33, %v1330_v47  ;;  %v7378_v2 = vld [vmem:[#allocation125_spill] sm:$0xff]  ;;  %v7380_v40 = vld [vmem:[#allocation14_spill] sm:$0xff]  ;;  %v7381_v55 = vld [vmem:[#allocation24_spill] sm:$0xff]  ;;  %vm528_vm7 = vcmp.ge.f32.partialorder %v5866_v39, 1.8 }
 0x134   : > { %v1011_v32 = vmul.f32 %v7378_v2, %v7377_v20  ;;  %v1012_v43 = vmul.f32 %v7380_v40, %v7379_v57  ;;  %v1027_v49 = vmul.f32 2.5, %v3765_v50  ;;  %v2427_v41 = vmul.f32 %v2419_v10, %v6200_v48  ;;  %v7382_v1 = vld [vmem:[#allocation26_spill] sm:$0xff]  ;;  %v7384_v40 = vld [vmem:[#allocation36_spill] sm:$0xff] }
 0x135   : > { %v1910_v13 = vpack.c.bf16 %v1903_v5, %v1902_v59  ;;  %v1028_v18 = vmul.f32 2.5, %v3766_v60  ;;  %v1339_v8 = vmul.f32 %v7381_v55, %v5950_v21  ;;  %v2428_v19 = vmul.f32 %v2420_v61, %v6210_v52  ;;  %4148 = vmatpush3.bf16.msra.mxu0 %v4333_v15  ;;  %v4334_v10 = vld [vmem:[%s6947_s1 + $0xf8] sm:$0xff]   ;;  %v7387_v55 = vld [vmem:[#allocation65_spill] sm:$0xff] }
 0x136   : > { %4050 = vmatpush3.bf16.msra.mxu1 %v4330_v53  ;;  %v1035_v33 = vmul.f32 %v1027_v49, %v6194_v25  ;;  %v1340_v47 = vmul.f32 %v7382_v1, %v5955_v54  ;;  %v1347_v20 = vmul.f32 1.25, %v3765_v50  ;;  %v2435_v2 = vsub.f32 %v6143_v17, %v2427_v41  ;;  %4149 = vmatprep.subr.bf16.mxu0 %v4335_v62  ;;  %v6236_v17 = vld [vmem:[%s6947_s1 + $0x200] sm:$0xff]   ;;  %v7389_v1 = vld [vmem:[#allocation68_spill] sm:$0xff] }
 0x137   : > { %4051 = vmatprep.subr.bf16.mxu1 %v4332_v44  ;;  %v1036_v21 = vmul.f32 %v1028_v18, %v6207_v27  ;;  %v1348_v53 = vmul.f32 1.25, %v3766_v60  ;;  %v2578_v61 = vmul.f32 %v1886_v46, %v5970_v14  ;;  %v2436_v15 = vsub.f32 %v6158_v35, %v2428_v19  ;;  %4055 = vmatprep.mubr.bf16.mxu1 %v1910_v13  ;;  %v7383_v18 = vld [vmem:[#allocation35_spill] sm:$0xff] }
 0x138   : > { %v6230_v49 = vsub.f32 %v1011_v32, %v1035_v33  ;;  %v2579_v54 = vmul.f32 %v1887_v63, %v5979_v31  ;;  %v2586_v59 = vmul.f32 0.8333333, %v3765_v50  ;;  %v2587_v5 = vmul.f32 0.8333333, %v3766_v60  ;;  %v7385_v31 = vld [vmem:[#allocation64_spill] sm:$0xff]  ;;  %v7386_v63 = vld [vmem:[#allocation53_spill] sm:$0xff] }
 0x139   : > { %v6238_v41 = vsub.f32 %v1012_v43, %v1036_v21  ;;  %v1872_v57 = vmul.f32 0.8333333, %v7383_v18  ;;  %v1873_v14 = vmul.f32 0.8333333, %v7384_v40  ;;  %v2440_v46 = vpack.c.bf16 %v2436_v15, %v2435_v2  ;;  %4150 = vmatpush3.bf16.msra.mxu0 %v4335_v62  ;;  %v7388_v62 = vld [vmem:[#allocation54_spill] sm:$0xff] }
 0x13a   : > { %4052 = vmatpush3.bf16.msra.mxu1 %v4332_v44  ;;  %v1355_v35 = vmul.f32 %v1347_v20, %v6230_v49  ;;  %v2580_v13 = vmul.f32 %v7385_v31, %v5973_v28  ;;  %v2588_v50 = vmul.f32 0.8333333, %v7386_v63  ;;  %v2581_v19 = vmul.f32 %v7387_v55, %v5976_v23  ;;  %4159 = vmatprep.subr.bf16.mxu0 %v6236_v17  ;;  %v7390_v21 = vld [vmem:[#allocation66_spill] sm:$0xff]  ;;  %v7394_v31 = vld [vmem:[#allocation85_spill] sm:$0xff] }
 0x13b   : > { %4053 = vmatprep.subr.bf16.mxu1 %v4334_v10  ;;  %v1356_v32 = vmul.f32 %v1348_v53, %v6238_v41  ;;  %v1880_v43 = vmul.f32 %v1872_v57, %v5935_v11  ;;  %v1881_v60 = vmul.f32 %v1873_v14, %v5939_v22  ;;  %4132 = vmatmul.mubr.bf16.gmra.mrb[4].mxu0 %v2440_v46  ;;  %v2589_v33 = vmul.f32 0.8333333, %v7388_v62  ;;  %v7391_v53 = vld [vmem:[#allocation67_spill] sm:$0xff] }
 0x13c   : > { %v6251_v44 = vsub.f32 %v1339_v8, %v1355_v35  ;;  %v2596_v20 = vmul.f32 %v2588_v50, %v7389_v1  ;;  %v1874_v28 = vmul.f32 0.8333333, %v7323_v34  ;;  %v1875_v15 = vmul.f32 0.8333333, %v7324_v36  ;;  %v7392_v8 = vld [vmem:[#allocation69_spill] sm:$0xff]  ;;  %v4337_v34 = vld [vmem:[%s6947_s1 + $0x208] sm:$0xff]  }
 0x13d   : > { %v6257_v2 = vsub.f32 %v1340_v47, %v1356_v32  ;;  %v1904_v11 = vsub.f32 %v1880_v43, %v7390_v21  ;;  %v1905_v22 = vsub.f32 %v1881_v60, %v7391_v53  ;;  %v2597_v18 = vmul.f32 %v2589_v33, %v7392_v8  ;;  %v7393_v36 = vld [vmem:[#allocation83_spill] sm:$0xff]  ;;  %v7396_v32 = vld [vmem:[#allocation45_spill] sm:$0xff] }
 0x13e   : > { %4054 = vmatpush3.bf16.msra.mxu1 %v4334_v10  ;;  %v2594_v23 = vmul.f32 %v2586_v59, %v6251_v44  ;;  %v2604_v57 = vsub.f32 %v2580_v13, %v2596_v20  ;;  %v1882_v40 = vmul.f32 %v1874_v28, %v6001_v24  ;;  %v1883_v47 = vmul.f32 %v1875_v15, %v6003_v38  ;;  %v7397_v43 = vld [vmem:[#allocation43_spill] sm:$0xff]  ;;  %v6297_v20 = vld [vmem:[%s6947_s1 + $0x210] sm:$0xff]  }
 0x13f   : > { %v2595_v14 = vmul.f32 %v2587_v5, %v6257_v2  ;;  %v1911_v46 = vpack.c.bf16 %v1905_v22, %v1904_v11  ;;  %4183 = vmatprep.subr.bf16.mxu1 %v6236_v17  ;;  %v1890_v10 = vmul.f32 0.8333333, %v7393_v36  ;;  %v2605_v59 = vsub.f32 %v2581_v19, %v2597_v18  ;;  %v7395_v5 = vld [vmem:[#allocation97_spill] sm:$0xff] }
 0x140   : > { %v2602_v35 = vsub.f32 %v2578_v61, %v2594_v23  ;;  %v1891_v63 = vmul.f32 0.8333333, %v7394_v31  ;;  %v6277_v50 = vsel %vm527_vm6, 1.0, %v5676_v9  ;;  %v654_v38 = vsub.f32 %v7397_v43, %v7396_v32  ;;  %v7398_v61 = vld [vmem:[#allocation99_spill] sm:$0xff]  ;;  %v7402_v23 = vld [vmem:[#allocation93_spill] sm:$0xff]  ;;  %v7405_v31 = vld [vmem:[#allocation94_spill] sm:$0xff] }
 0x141   : > { %v2603_v24 = vsub.f32 %v2579_v54, %v2595_v14  ;;  %4056 = vmatmul.mubr.bf16.vlgmr.msra.gmra.mrb[0].mxu1 %v1911_v46  ;;  %v1898_v13 = vmul.f32 %v1890_v10, %v7395_v5  ;;  %v2611_v60 = vpack.c.bf16 %v2605_v59, %v2604_v57  ;;  %v6284_v19 = vsel %vm528_vm7, 1.0, %v5676_v9  ;;  %v7399_v9 = vld [vmem:[#allocation10_spill] sm:$0xff] }
 0x142   : > { %4191 = vmatpush3.bf16.msra.mxu1 %v6236_v17  ;;  %v1899_v55 = vmul.f32 %v1891_v63, %v7398_v61  ;;  %v6288_v33 = vsub.f32 %v6021_v7, %v6277_v50  ;;  %v6292_v1 = vsub.f32 %v6024_v4, %v6284_v19  ;;  %v1015_v21 = vmul.f32 %v7399_v9, %v6028_v6  ;;  %v7400_v7 = vld [vmem:[#allocation82_spill] sm:$0xff]  ;;  %v7401_v4 = vld [vmem:[#allocation92_spill] sm:$0xff]  ;;  %v7407_v61 = vld [vmem:[#allocation121_spill] sm:$0xff] }
 0x143   : > { %v2610_v54 = vpack.c.bf16 %v2603_v24, %v2602_v35  ;;  %4184 = vmatprep.subr.bf16.mxu1 %v4337_v34  ;;  %v1906_v62 = vsub.f32 %v1882_v40, %v1898_v13  ;;  %v3769_v11 = vadd.f32 -1.8, %v5834_v12  ;;  %v3770_v53 = vadd.f32 -1.8, %v5866_v39  ;;  %v7406_v13 = vld [vmem:[#allocation119_spill] sm:$0xff] }
 0x144   : > { %v1907_v28 = vsub.f32 %v1883_v47, %v1899_v55  ;;  %v1016_v22 = vmul.f32 %v7400_v7, %v6032_v0  ;;  %v1343_v15 = vmul.f32 %v7401_v4, %v6081_v30  ;;  %v1344_v8 = vmul.f32 %v7402_v23, %v6083_v51  ;;  %v6318_v0 = vld [vmem:[%s6947_s1 + $0x218] sm:$0xff]   ;;  %v7409_v4 = vld [vmem:[#allocation20_spill] sm:$0xff]  ;;  %v7410_v23 = vld [vmem:[#allocation95_spill] sm:$0xff] }
 0x145   : > { %4151 = vmatprep.mubr.bf16.mxu0 %v2610_v54  ;;  %v6310_v18 = vmul.f32 %v1890_v10, %v6116_v56  ;;  %v1031_v57 = vmul.f32 2.5, %v3769_v11  ;;  %v1032_v12 = vmul.f32 2.5, %v3770_v53  ;;  %v6313_v40 = vmul.f32 %v1891_v63, %v6118_v58  ;;  %v7403_v10 = vld [vmem:[#allocation109_spill] sm:$0xff]  ;;  %v7408_v54 = vld [vmem:[#allocation18_spill] sm:$0xff] }
 0x146   : > { %4152 = vmatmul.mubr.bf16.vlgmr.msra.gmra.mrb[0].mxu0 %v2611_v60  ;;  %4192 = vmatpush3.bf16.msra.mxu1 %v4337_v34  ;;  %v1912_v6 = vpack.c.bf16 %v1907_v28, %v1906_v62  ;;  %v1351_v30 = vmul.f32 1.25, %v3769_v11  ;;  %v1352_v51 = vmul.f32 1.25, %v3770_v53  ;;  %v2590_v14 = vmul.f32 0.8333333, %v3769_v11  ;;  %v4340_v28 = vld [vmem:[%s6947_s1 + $0x220] sm:$0xff]  }
 0x147   : > { %4160 = vmatpush3.bf16.msra.mxu0 %v6236_v17  ;;  %v2591_v56 = vmul.f32 0.8333333, %v3770_v53  ;;  %4185 = vmatprep.subr.bf16.mxu1 %v6297_v20  ;;  %v1039_v46 = vmul.f32 %v1031_v57, %v6288_v33  ;;  %v1040_v58 = vmul.f32 %v1032_v12, %v6292_v1  ;;  %v1876_v47 = vmul.f32 0.8333333, %v7337_v29  ;;  %v7404_v17 = vld [vmem:[#allocation110_spill] sm:$0xff]  ;;  %v7411_v12 = vld [vmem:[#allocation33_spill] sm:$0xff] }
 0x148   : > { %4161 = vmatprep.subr.bf16.mxu0 %v4337_v34  ;;  %4059 = vmatprep.mubr.bf16.mxu1 %v1912_v6  ;;  %v1877_v36 = vmul.f32 0.8333333, %v7340_v45  ;;  %v6327_v35 = vmul.f32 0.8333333, %v7403_v10  ;;  %v6330_v59 = vmul.f32 0.8333333, %v7404_v17  ;;  %v6335_v63 = vmul.f32 %v7405_v31, %v6126_v3 }
 0x149   : > { %vm529_vm8 = vcmp.ge.f32.partialorder %v6097_v16, 1.8  ;;  %v6337_v24 = vsub.f32 %v1015_v21, %v1039_v46  ;;  %v6339_v5 = vsub.f32 %v1016_v22, %v1040_v58  ;;  %v1884_v29 = vmul.f32 %v1876_v47, %v6087_v42  ;;  %v6349_v3 = vld [vmem:[#allocation2] sm:$0xff] }
 0x14a   : > { %v1885_v45 = vmul.f32 %v1877_v36, %v6094_v26  ;;  %4193 = vmatpush3.bf16.msra.mxu1 %v6297_v20  ;;  %v1900_v60 = vmul.f32 %v6327_v35, %v7406_v13  ;;  %v1901_v55 = vmul.f32 %v6330_v59, %v7407_v61  ;;  %vm530_vm9 = vcmp.ge.f32.partialorder %v7408_v54, 1.8  ;;  %v7413_v31 = vld [vmem:[#allocation19_spill] sm:$0xff] }
 0x14b   : > { %4162 = vmatpush3.bf16.msra.mxu0 %v4337_v34  ;;  %v3675_v62 = vsel %vm529_vm8, 1.0, %v6349_v3  ;;  %4186 = vmatprep.subr.bf16.mxu1 %v6318_v0  ;;  %v1359_v42 = vmul.f32 %v1351_v30, %v6337_v24  ;;  %v1360_v26 = vmul.f32 %v1352_v51, %v6339_v5  ;;  %v3676_v34 = vsel %vm530_vm9, 1.0, %v6349_v3  ;;  %v7412_v51 = vld [vmem:[#allocation37_spill] sm:$0xff]  ;;  %v7414_v61 = vld [vmem:[#allocation23_spill] sm:$0xff] }
 0x14c   : > { %vm553_vm10 = vcmp.ge.f32.partialorder %v6097_v16, 2.2  ;;  %4163 = vmatprep.subr.bf16.mxu0 %v6297_v20  ;;  %v1908_v9 = vsub.f32 %v1884_v29, %v1900_v60  ;;  %v1909_v21 = vsub.f32 %v1885_v45, %v1901_v55  ;;  %vm554_vm11 = vcmp.ge.f32.partialorder %v7408_v54, 2.2 }
 0x14d   : > { %v3683_v11 = vsel %vm553_vm10, 1.0, %v6349_v3  ;;  %v6363_v53 = vsub.f32 %v1343_v15, %v1359_v42  ;;  %v6365_v7 = vsub.f32 %v1344_v8, %v1360_v26  ;;  %v3684_v22 = vsel %vm554_vm11, 1.0, %v6349_v3  ;;  %v4341_v15 = vld [vmem:[%s6947_s1 + $0x228] sm:$0xff]  }
 0x14e   : > { %v1018_v6 = vmul.f32 %v7410_v23, %v7409_v4  ;;  %4194 = vmatpush3.bf16.msra.mxu1 %v6318_v0  ;;  %v1913_v57 = vpack.c.bf16 %v1909_v21, %v1908_v9  ;;  %v649_v30 = vsub.f32 %v7411_v12, %v3675_v62  ;;  %v650_v46 = vsub.f32 %v7412_v51, %v3676_v34  ;;  %v7415_v26 = vld [vmem:[#allocation56_spill] sm:$0xff]  ;;  %v7417_v4 = vld [vmem:[#allocation38_spill] sm:$0xff] }
 0x14f   : > { %v657_v58 = vsub.f32 %v3675_v62, %v3683_v11  ;;  %4164 = vmatpush3.bf16.msra.mxu0 %v6297_v20  ;;  %v2598_v8 = vmul.f32 %v2590_v14, %v6363_v53  ;;  %v2599_v47 = vmul.f32 %v2591_v56, %v6365_v7  ;;  %v3771_v36 = vadd.f32 -1.8, %v6097_v16  ;;  %4187 = vmatprep.subr.bf16.mxu1 %v4340_v28  ;;  %v7418_v23 = vld [vmem:[#allocation118_spill] sm:$0xff] }
 0x150   : > { %v3772_v10 = vadd.f32 -1.8, %v7408_v54  ;;  %4165 = vmatprep.subr.bf16.mxu0 %v6318_v0  ;;  %4060 = vmatmul.mubr.bf16.gmra.mrb[4].mxu1 %v1913_v57  ;;  %v658_v17 = vsub.f32 %v3676_v34, %v3684_v22  ;;  %v6383_v29 = vmul.f32 %v7413_v31, %v649_v30  ;;  %v6386_v20 = vadd.f32 -2.2, %v6097_v16  ;;  %v7416_v16 = vld [vmem:[#allocation117_spill] sm:$0xff] }
 0x151   : > { %v6389_v45 = vadd.f32 -2.2, %v7408_v54  ;;  %v2606_v14 = vsub.f32 %v6310_v18, %v2598_v8  ;;  %v2607_v56 = vsub.f32 %v6313_v40, %v2599_v47  ;;  %v1033_v13 = vmul.f32 2.5, %v3771_v36  ;;  %v4342_v18 = vld [vmem:[%s6947_s1 + $0x230] sm:$0xff]   ;;  %v4389_v47 = vld [vmem:[%s4504_s17] sm:$0xff] }
 0x152   : > { %v1034_v60 = vmul.f32 2.5, %v3772_v10  ;;  %4195 = vmatpush3.bf16.msra.mxu1 %v4340_v28  ;;  %v6394_v55 = vmul.f32 %v7414_v61, %v650_v46  ;;  %v1073_v62 = vmul.f32 2.5, %v6386_v20  ;;  %v1345_v34 = vmul.f32 %v7416_v16, %v7415_v26 }
 0x153   : > { %v1074_v42 = vmul.f32 2.5, %v6389_v45  ;;  %4166 = vmatpush3.bf16.msra.mxu0 %v6318_v0  ;;  %4188 = vmatprep.subr.bf16.mxu1 %v4341_v15  ;;  %v2612_v40 = vpack.c.bf16 %v2607_v56, %v2606_v14  ;;  %v1041_v54 = vmul.f32 %v1033_v13, %v649_v30  ;;  %v1353_v21 = vmul.f32 1.25, %v3771_v36  ;;  %v7420_v14 = vld [vmem:[#allocation84_spill] sm:$0xff] }
 0x154   : > { %v1042_v9 = vmul.f32 %v1034_v60, %v650_v46  ;;  %4167 = vmatprep.subr.bf16.mxu0 %v4340_v28  ;;  %v6404_v11 = vmul.f32 %v1073_v62, %v657_v58  ;;  %v1346_v57 = vmul.f32 %v7418_v23, %v7417_v4  ;;  %v1354_v0 = vmul.f32 1.25, %v3772_v10  ;;  %v4343_v46 = vld [vmem:[%s6947_s1 + $0x238] sm:$0xff]   ;;  %v7421_v60 = vld [vmem:[#allocation127_spill] sm:$0xff]  ;;  %v7425_v4 = vld [vmem:[#allocation25_spill] sm:$0xff] }
 0x155   : > { %v6406_v22 = vmul.f32 %v1074_v42, %v658_v17  ;;  %4155 = vmatprep.mubr.bf16.mxu0 %v2612_v40  ;;  %v1049_v12 = vsub.f32 %v6335_v63, %v1041_v54  ;;  %v2584_v30 = vmul.f32 %v6327_v35, %v6200_v48  ;;  %v2585_v58 = vmul.f32 %v6330_v59, %v6210_v52  ;;  %v4390_v17 = vld [vmem:[%s4504_s17 + $0x8] sm:$0xff]  ;;  %v7423_v42 = vld [vmem:[#allocation15_spill] sm:$0xff] }
 0x156   : > { %v1050_v51 = vsub.f32 %v1018_v6, %v1042_v9  ;;  %4196 = vmatpush3.bf16.msra.mxu1 %v4341_v15  ;;  %v2592_v8 = vmul.f32 0.8333333, %v3771_v36  ;;  %vm547_vm12 = vcmp.ge.f32.partialorder %v4389_v47, 2.2  ;;  %vm548_vm13 = vcmp.ge.f32.partialorder %v4390_v17, 2.2 }
 0x157   : > { %4168 = vmatpush3.bf16.msra.mxu0 %v4340_v28  ;;  %4189 = vmatprep.subr.bf16.mxu1 %v4342_v18  ;;  %v1361_v63 = vmul.f32 %v1353_v21, %v1049_v12  ;;  %v2593_v31 = vmul.f32 0.8333333, %v3772_v10  ;;  %v7419_v48 = vld [vmem:[#allocation12_spill] sm:$0xff]  ;;  %v6423_v56 = vmul.f32 %v7420_v14, %v1049_v12  ;;  %v3677_v13 = vsel %vm547_vm12, 1.0, %v6349_v3  ;;  %v7422_v10 = vld [vmem:[#allocation58_spill] sm:$0xff] }
 0x158   : > { %v1362_v6 = vmul.f32 %v1354_v0, %v1050_v51  ;;  %4169 = vmatprep.subr.bf16.mxu0 %v4341_v15  ;;  %v1051_v35 = vmul.f32 %v7419_v48, %v6194_v25  ;;  %v3678_v52 = vsel %vm548_vm13, 1.0, %v6349_v3  ;;  %v3773_v59 = vadd.f32 -2.2, %v4389_v47  ;;  %v7424_v9 = vld [vmem:[#allocation126_spill] sm:$0xff]  ;;  %v7427_v47 = vld [vmem:[#allocation29_spill] sm:$0xff]  ;;  %v4391_v48 = vld [vmem:[%s4504_s17 + $0x20] sm:$0xff] }
 0x159   : > { %v6427_v28 = vsub.f32 %v1345_v34, %v1361_v63  ;;  %v6432_v61 = vmul.f32 %v7421_v60, %v1050_v51  ;;  %v651_v62 = vsub.f32 %v7422_v10, %v3677_v13  ;;  %v652_v25 = vsub.f32 %v6189_v37, %v3678_v52  ;;  %v7426_v51 = vld [vmem:[#allocation28_spill] sm:$0xff]  ;;  %v7429_v52 = vld [vmem:[#allocation34_spill] sm:$0xff] }
 0x15a   : > { %v6429_v36 = vsub.f32 %v1346_v57, %v1362_v6  ;;  %4197 = vmatpush3.bf16.msra.mxu1 %v4342_v18  ;;  %v1052_v26 = vmul.f32 %v7423_v42, %v6207_v27  ;;  %v3774_v16 = vadd.f32 -2.2, %v4390_v17  ;;  %v1067_v40 = vmul.f32 2.5, %v3773_v59 }
 0x15b   : > { %4170 = vmatpush3.bf16.msra.mxu0 %v4341_v15  ;;  %4190 = vmatprep.subr.bf16.mxu1 %v4343_v46  ;;  %v2600_v34 = vmul.f32 %v2592_v8, %v6427_v28  ;;  %v1371_v21 = vmul.f32 %v7424_v9, %v6230_v49  ;;  %v1372_v23 = vmul.f32 %v7425_v4, %v6238_v41  ;;  %v1379_v37 = vmul.f32 1.25, %v3773_v59  ;;  %v7433_v4 = vld [vmem:[#allocation98_spill] sm:$0xff] }
 0x15c   : > { %v2601_v54 = vmul.f32 %v2593_v31, %v6429_v36  ;;  %4171 = vmatprep.subr.bf16.mxu0 %v4342_v18  ;;  %v1068_v15 = vmul.f32 2.5, %v3774_v16  ;;  %v1075_v57 = vmul.f32 %v1067_v40, %v651_v62  ;;  %v1380_v0 = vmul.f32 1.25, %v3774_v16  ;;  %v4392_v62 = vld [vmem:[%s4504_s17 + $0x28] sm:$0xff] }
 0x15d   : > { %v2608_v12 = vsub.f32 %v2584_v30, %v2600_v34  ;;  %v2751_v8 = vmul.f32 %v7426_v51, %v6251_v44  ;;  %v2752_v17 = vmul.f32 %v7427_v47, %v6257_v2  ;;  %v2759_v6 = vmul.f32 0.8333333, %v3773_v59  ;;  %v7428_v30 = vld [vmem:[#allocation13_spill] sm:$0xff] }
 0x15e   : > { %v2609_v27 = vsub.f32 %v2585_v58, %v2601_v54  ;;  %4198 = vmatpush3.bf16.msra.mxu1 %v4343_v46  ;;  %v1076_v63 = vmul.f32 %v1068_v15, %v652_v25  ;;  %v1083_v49 = vsub.f32 %v1051_v35, %v1075_v57  ;;  %v2760_v31 = vmul.f32 0.8333333, %v3774_v16  ;;  %v7430_v25 = vld [vmem:[#allocation100_spill] sm:$0xff]  ;;  %v7431_v16 = vld [vmem:[#allocation78_spill] sm:$0xff] }
 0x15f   : > { %4172 = vmatpush3.bf16.msra.mxu0 %v4342_v18  ;;  %vm551_vm14 = vcmp.ge.f32.partialorder %v4391_v48, 2.2  ;;  %vm552_vm15 = vcmp.ge.f32.partialorder %v5866_v39, 2.2  ;;  %v1055_v58 = vmul.f32 %v7428_v30, %v6288_v33  ;;  %v1056_v59 = vmul.f32 %v7429_v52, %v6292_v1 }
 0x160   : > { %v2613_v41 = vpack.c.bf16 %v2609_v27, %v2608_v12  ;;  %4173 = vmatprep.subr.bf16.mxu0 %v4343_v46  ;;  %v1084_v14 = vsub.f32 %v1052_v26, %v1076_v63  ;;  %v1387_v44 = vmul.f32 %v1379_v37, %v1083_v49  ;;  %v3681_v13 = vsel %vm551_vm14, 1.0, %v6349_v3  ;;  %v7435_v27 = vld [vmem:[#allocation52_spill] sm:$0xff]  ;;  %v7436_v63 = vld [vmem:[#allocation47_spill] sm:$0xff]  ;;  %v4393_v49 = vld [vmem:[%s4504_s17 + $0x10] sm:$0xff] }
 0x161   : > { %v3682_v2 = vsel %vm552_vm15, 1.0, %v6349_v3  ;;  %v655_v18 = vsub.f32 %v6277_v50, %v3681_v13  ;;  %v3777_v60 = vadd.f32 -2.2, %v4391_v48  ;;  %v3778_v33 = vadd.f32 -2.2, %v4392_v62  ;;  %v7432_v50 = vld [vmem:[#allocation96_spill] sm:$0xff] }
 0x162   : > { %4156 = vmatmul.mubr.bf16.gmra.mrb[4].mxu0 %v2613_v41  ;;  %v656_v35 = vsub.f32 %v6284_v19, %v3682_v2  ;;  %v1388_v39 = vmul.f32 %v1380_v0, %v1084_v14  ;;  %v1395_v10 = vsub.f32 %v1371_v21, %v1387_v44  ;;  %v1375_v42 = vmul.f32 %v7430_v25, %v6337_v24  ;;  %v4394_v41 = vld [vmem:[%s4504_s17 + $0x18] sm:$0xff]  ;;  %v7438_v44 = vld [vmem:[#allocation60_spill] sm:$0xff]  ;;  %v7440_v2 = vld [vmem:[#allocation61_spill] sm:$0xff] }
 0x163   : > { %4174 = vmatpush3.bf16.msra.mxu0 %v4343_v46  ;;  %v1071_v26 = vmul.f32 2.5, %v3777_v60  ;;  %v1376_v40 = vmul.f32 %v7431_v16, %v6339_v5  ;;  %v1383_v34 = vmul.f32 1.25, %v3777_v60  ;;  %v2755_v19 = vmul.f32 %v7432_v50, %v6363_v53  ;;  %v7434_v5 = vld [vmem:[#allocation46_spill] sm:$0xff]  ;;  %v7437_v53 = vld [vmem:[#allocation55_spill] sm:$0xff] }
 0x164   : > { %v1396_v54 = vsub.f32 %v1372_v23, %v1388_v39  ;;  %v2767_v1 = vmul.f32 %v2759_v6, %v1395_v10  ;;  %v1072_v46 = vmul.f32 2.5, %v3778_v33  ;;  %v1384_v9 = vmul.f32 1.25, %v3778_v33  ;;  %v7442_v25 = vld [vmem:[#allocation42_spill] sm:$0xff] }
 0x165   : > { %v1079_v21 = vmul.f32 %v1071_v26, %v655_v18  ;;  %v2756_v15 = vmul.f32 %v7433_v4, %v6365_v7  ;;  %v2763_v57 = vmul.f32 0.8333333, %v3777_v60  ;;  %v2764_v24 = vmul.f32 0.8333333, %v3778_v33  ;;  %v7439_v7 = vld [vmem:[#allocation27_spill] sm:$0xff]  ;;  %v7443_v26 = vld [vmem:[#allocation44_spill] sm:$0xff] }
 0x166   : > { %v2768_v37 = vmul.f32 %v2760_v31, %v1396_v54  ;;  %v2775_v0 = vsub.f32 %v2751_v8, %v2767_v1  ;;  %v1080_v12 = vmul.f32 %v1072_v46, %v656_v35  ;;  %v1053_v51 = vmul.f32 %v7435_v27, %v7434_v5  ;;  %v7441_v31 = vld [vmem:[#allocation32_spill] sm:$0xff]  ;;  %v7446_v5 = vld [vmem:[#allocation122_spill] sm:$0xff] }
 0x167   : > { %v1087_v47 = vsub.f32 %v1055_v58, %v1079_v21  ;;  %v1054_v23 = vmul.f32 %v7437_v53, %v7436_v63  ;;  %v3775_v6 = vadd.f32 -2.2, %v4393_v49  ;;  %v3776_v48 = vadd.f32 -2.2, %v4394_v41  ;;  %v7447_v49 = vld [vmem:[#allocation70_spill] sm:$0xff] }
 0x168   : > { %v2776_v30 = vsub.f32 %v2752_v17, %v2768_v37  ;;  %v1088_v14 = vsub.f32 %v1056_v59, %v1080_v12  ;;  %v1373_v13 = vmul.f32 %v7439_v7, %v7438_v44  ;;  %v1374_v8 = vmul.f32 %v7441_v31, %v7440_v2 }
 0x169   : > { %v1391_v18 = vmul.f32 %v1383_v34, %v1087_v47  ;;  %v1069_v35 = vmul.f32 2.5, %v3775_v6  ;;  %v1070_v52 = vmul.f32 2.5, %v3776_v48  ;;  %v1381_v60 = vmul.f32 1.25, %v3775_v6 }
 0x16a   : > { %v2783_v58 = vpack.c.bf16 %v2776_v30, %v2775_v0  ;;  %v1392_v39 = vmul.f32 %v1384_v9, %v1088_v14  ;;  %v1382_v10 = vmul.f32 1.25, %v3776_v48  ;;  %v2761_v62 = vmul.f32 0.8333333, %v3775_v6 }
 0x16b   : > { %v1399_v33 = vsub.f32 %v1375_v42, %v1391_v18  ;;  %v7444_v16 = vsub.f32 %v7442_v25, %v7443_v26  ;;  %v1078_v59 = vmul.f32 %v1070_v52, %v654_v38  ;;  %v2762_v50 = vmul.f32 0.8333333, %v3776_v48  ;;  %v2974_v25 = vld [vmem:[%s6948_s2] sm:$0xff] }
 0x16c   : > { %4175 = vmatprep.mubr.bf16.mxu0 %v2783_v58  ;;  %v1400_v54 = vsub.f32 %v1376_v40, %v1392_v39  ;;  %v1089_v34 = vsub.f32 %v6383_v29, %v6404_v11  ;;  %v1090_v1 = vsub.f32 %v6394_v55, %v6406_v22  ;;  %v1385_v46 = vmul.f32 1.25, %v6386_v20  ;;  %v7445_v11 = vld [vmem:[#allocation120_spill] sm:$0xff] }
 0x16d   : > { %v1077_v17 = vmul.f32 %v1069_v35, %v7444_v16  ;;  %v2771_v42 = vmul.f32 %v2763_v57, %v1399_v33  ;;  %v1086_v21 = vsub.f32 %v1054_v23, %v1078_v59  ;;  %v1386_v4 = vmul.f32 1.25, %v6389_v45 }
 0x16e   : > { %v2772_v37 = vmul.f32 %v2764_v24, %v1400_v54  ;;  %v1393_v0 = vmul.f32 %v1385_v46, %v1089_v34  ;;  %v2765_v32 = vmul.f32 0.8333333, %v6386_v20  ;;  %v2766_v43 = vmul.f32 0.8333333, %v6389_v45 }
 0x16f   : > { %v1085_v9 = vsub.f32 %v1053_v51, %v1077_v17  ;;  %v2779_v38 = vsub.f32 %v2755_v19, %v2771_v42  ;;  %v1390_v12 = vmul.f32 %v1382_v10, %v1086_v21  ;;  %v1394_v29 = vmul.f32 %v1386_v4, %v1090_v1  ;;  %v2973_v4 = vld [vmem:[#allocation2 + $0x98] sm:$0x3] }
 0x170   : > { %v2757_v55 = vmul.f32 %v7445_v11, %v6427_v28  ;;  %v2780_v22 = vsub.f32 %v2756_v15, %v2772_v37  ;;  %v1401_v57 = vsub.f32 %v6423_v56, %v1393_v0  ;;  %v2758_v27 = vmul.f32 %v7446_v5, %v6429_v36  ;;  %v7448_v28 = vld [vmem:[#allocation71_spill] sm:$0xff]  ;;  %v2955_v37 = vld [vmem:[#allocation2 + $0x8] sm:$0x3] }
 0x171   : > { %v1389_v40 = vmul.f32 %v1381_v60, %v1085_v9  ;;  %v1398_v24 = vsub.f32 %v1374_v8, %v1390_v12  ;;  %v1402_v47 = vsub.f32 %v6432_v61, %v1394_v29  ;;  %v2983_v10 = vlaneseq }
 0x172   : > { %v2785_v20 = vpack.c.bf16 %v2780_v22, %v2779_v38  ;;  %v2773_v63 = vmul.f32 %v2765_v32, %v1401_v57 }
 0x173   : > { %v1397_v51 = vsub.f32 %v1373_v13, %v1389_v40  ;;  %v2770_v19 = vmul.f32 %v2762_v50, %v1398_v24  ;;  %v2774_v53 = vmul.f32 %v2766_v43, %v1402_v47 }
 0x174   : > { %4179 = vmatprep.mubr.bf16.mxu1 %v2785_v20  ;;  %v2781_v23 = vsub.f32 %v2757_v55, %v2773_v63 }
 0x175   : > { %v2769_v45 = vmul.f32 %v2761_v62, %v1397_v51  ;;  %v2778_v15 = vsub.f32 %v7448_v28, %v2770_v19  ;;  %v2782_v41 = vsub.f32 %v2758_v27, %v2774_v53  ;;  %v6499_v62 = vshrl.u32 %v2983_v10, 7  ;;  %v6524_v27 = vld [vmem:[%s6948_s2 + $0x8] ss:$0 sm:$0xff] }
 0x176   : > { %v3443_v19 = vmul.f32 %v6349_v3, %v6524_v27  ;;  %v3444_v53 = vmul.f32 %v6524_v27, %v2973_v4 }
 0x177   : > { %v2777_v6 = vsub.f32 %v7447_v49, %v2769_v45  ;;  %v2786_v48 = vpack.c.bf16 %v2782_v41, %v2781_v23  ;;  %v2985_v33 = vsub.s32 0, %v6499_v62  ;;  %v3045_v26 = vsub.s32 1, %v6499_v62  ;;  %v6544_v41 = vld [vmem:[%s6949_s3] ss:$0 sm:$0xff] }
 0x178   : > { %v3198_v16 = vsub.s32 7, %v6499_v62  ;;  %v3274_v17 = vsub.s32 2, %v6499_v62  ;;  %v3122_v0 = vsub.s32 4, %v6499_v62  ;;  %v3005_v63 = vsub.s32 3, %v6499_v62 }
 0x179   : > { %v2784_v56 = vpack.c.bf16 %v2778_v15, %v2777_v6  ;;  %4180 = vmatmul.mubr.bf16.vlgmr.msra.gmra.mrb[8].mxu1 %v2786_v48  ;;  %v6508_v50 = vrot.slane %v2974_v25, %v2985_v33  ;;  %v6510_v1 = vrot.slane %v2974_v25, %v3045_v26  ;;  %v3025_v45 = vsub.s32 6, %v6499_v62 }
 0x17a   : > { %v6512_v46 = vrot.slane %v2974_v25, %v3198_v16  ;;  %v6515_v32 = vrot.slane %v2974_v25, %v3274_v17  ;;  %v3351_v23 = vsub.s32 5, %v6499_v62  ;;  %v6537_v28 = vrot.slane %v2974_v25, %v3122_v0 }
 0x17b   : > { %4176 = vmatmul.mubr.bf16.vlgmr.msra.gmra.mrb[0].mxu0 %v2784_v56  ;;  %v3047_v29 = vmul.f32 %v6349_v3, %v6510_v1  ;;  %v3048_v47 = vmul.f32 %v6510_v1, %v2955_v37  ;;  %v2987_v15 = vmul.f32 %v6349_v3, %v6508_v50 }
 0x17c   : > { %v3214_v22 = vmul.f32 %v6349_v3, %v6512_v46  ;;  %v3215_v51 = vmul.f32 %v6512_v46, %v2973_v4  ;;  %v3276_v49 = vmul.f32 %v6349_v3, %v6515_v32  ;;  %v3277_v6 = vmul.f32 %v6515_v32, %v2955_v37 }
 0x17d   : > { %v3080_v56 = vrot.slane %v3047_v29, 1 }
 0x17e   : > { %v3253_v48 = vrot.slane %v3214_v22, 1 }
 0x214   : > { %v4057_v36 = vpop.f32.mrb[0].mxu1 }
 0x215   : > { %v2012_v30 = vpop.f32.mrb[1].mxu1 }
 0x216   : > { %v4058_v14 = vpop.f32.mrb[2].mxu1 }
 0x217   : > { %v2015_v61 = vpop.f32.mrb[3].mxu1 }
 0x223   : > { %v4061_v44 = vpop.f32.mrb[4].mxu1 }
 0x224   : > { %v2028_v7 = vpop.f32.mrb[5].mxu1 }
 0x225   : > { %v4062_v13 = vpop.f32.mrb[6].mxu1 }
 0x226   : > { %v2031_v2 = vpop.f32.mrb[7].mxu1 }
 0x235   : > { %v4157_v31 = vpop.f32.mrb[4].mxu0 }
 0x236   : > { %v4203_v8 = vadd.f32 %v4157_v31, %v4061_v44  ;;  %v2728_v18 = vpop.f32.mrb[5].mxu0  ;;  %v3482_v44 = vrot.slane %v3443_v19, 2  ;;  %v6550_v31 = vrot.slane %v2974_v25, %v3351_v23 }
 0x237   : > { %v4205_v35 = vadd.f32 %v2728_v18, %v2028_v7  ;;  %v4158_v52 = vpop.f32.mrb[6].mxu0  ;;  %v3483_v7 = vrot.slane %v3444_v53, 2  ;;  %v3310_v18 = vrot.slane %v3277_v6, 2 }
 0x238   : > { %v4207_v60 = vadd.f32 %v4158_v52, %v4062_v13  ;;  %v2731_v58 = vpop.f32.mrb[7].mxu0  ;;  %v6554_v52 = vadd.f32 %v6544_v41, %v2987_v15 }
 0x239   : > { %v4209_v39 = vadd.f32 %v2731_v58, %v2031_v2  ;;  %v6572_v16 = vsel %vm3308_vm1, %v3482_v44, %v3483_v7 }
 0x24c   : > { %v4181_v54 = vpop.f32.mrb[8].mxu1 }
 0x24d   : > { %v4204_v42 = vadd.f32 %v4203_v8, %v4181_v54  ;;  %v2901_v21 = vpop.f32.mrb[9].mxu1  ;;  %v3309_v8 = vrot.slane %v3276_v49, 2 }
 0x24e   : > { %v4177_v59 = vpop.f32.mrb[0].mxu0  ;;  %v4206_v38 = vadd.f32 %v4205_v35, %v2901_v21  ;;  %v4182_v12 = vpop.f32.mrb[10].mxu1 }
 0x24f   : > { %v4199_v34 = vadd.f32 %v4177_v59, %v4057_v36  ;;  %v2885_v9 = vpop.f32.mrb[1].mxu0  ;;  %2952 = vst [vmem:[#allocation2 + $0x71] sm:$0xff] %v4204_v42  ;;  %v4208_v55 = vadd.f32 %v4207_v60, %v4182_v12  ;;  %v2904_v5 = vpop.f32.mrb[11].mxu1  ;;  %v3254_v36 = vrot.slane %v3215_v51, 1  ;;  %v6580_v54 = vsel %vm3308_vm1, %v3309_v8, %v3310_v18 }
 0x250   : > { %v4200_v43 = vadd.f32 %v2885_v9, %v2012_v30  ;;  %v4178_v40 = vpop.f32.mrb[2].mxu0  ;;  %2950 = vst [vmem:[#allocation2 + $0x51] sm:$0xff] %v4206_v38  ;;  %v4210_v20 = vadd.f32 %v4209_v39, %v2904_v5  ;;  %v3081_v30 = vrot.slane %v3048_v47, 1 }
 0x251   : > { %2948 = vst [vmem:[#allocation2 + $0x31] sm:$0xff] %v4199_v34  ;;  %v4201_v11 = vadd.f32 %v4178_v40, %v4058_v14  ;;  %v2888_v57 = vpop.f32.mrb[3].mxu0  ;;  %2953 = vst [vmem:[#allocation2 + $0x81] sm:$0xff] %v4208_v55  ;;  %v6546_v14 = vrot.slane %v2974_v25, %v3005_v63  ;;  %v6563_v10 = vsel %vm3079_vm0, %v3253_v48, %v3254_v36 }
 0x252   : > { %2946 = vst [vmem:[#allocation2 + $0x11] sm:$0xff] %v4200_v43  ;;  %v4202_v24 = vadd.f32 %v2888_v57, %v2015_v61  ;;  %2951 = vst [vmem:[#allocation2 + $0x61] sm:$0xff] %v4210_v20  ;;  %v6548_v61 = vrot.slane %v2974_v25, %v3025_v45  ;;  %v6566_v62 = vsel %vm3079_vm0, %v3080_v56, %v3081_v30 }
 0x253   : > { %2949 = vst [vmem:[#allocation2 + $0x41] sm:$0xff] %v4201_v11 }
 0x254   : > { %2947 = vst [vmem:[#allocation2 + $0x21] sm:$0xff] %v4202_v24  ;;  %v6558_v60 = vmul.f32 %v6349_v3, %v6548_v61 }
 0x256   : > { %v6589_v38 = vld [vmem:[#allocation2 + $0x70] sm:$0xff]  ;;  %v2969_v55 = vld [vmem:[#allocation2 + $0x78] sm:$0x3] }
 0x257   : > { %v3136_v63 = vmul.f32 %v6537_v28, %v6589_v38  ;;  %v6598_v45 = vmul.f32 %v6510_v1, %v2969_v55  ;;  %v3137_v19 = vmul.f32 %v6537_v28, %v2969_v55  ;;  %v3210_v53 = vmul.f32 %v6512_v46, %v6589_v38 }
 0x258   : > { %v2960_v13 = vld [vmem:[#allocation2 + $0x30] sm:$0xff]  ;;  %v2961_v2 = vld [vmem:[#allocation2 + $0x38] sm:$0x3]  ;;  %v3211_v23 = vmul.f32 %v6512_v46, %v2969_v55  ;;  %v6614_v56 = vmul.f32 %v6515_v32, %v2969_v55  ;;  %v6621_v36 = vmul.f32 %v6546_v14, %v6589_v38  ;;  %v6625_v30 = vmul.f32 %v6548_v61, %v6589_v38 }
 0x259   : > { %v3053_v35 = vmul.f32 %v6510_v1, %v2960_v13  ;;  %v3054_v58 = vmul.f32 %v6510_v1, %v2961_v2  ;;  %v3128_v39 = vmul.f32 %v6537_v28, %v2960_v13  ;;  %v3129_v33 = vmul.f32 %v6537_v28, %v2961_v2  ;;  %v2956_v7 = vld [vmem:[#allocation2 + $0x10] sm:$0xff] }
 0x25a   : > { %v3202_v25 = vmul.f32 %v6512_v46, %v2960_v13  ;;  %v3203_v26 = vmul.f32 %v6512_v46, %v2961_v2  ;;  %v2990_v3 = vmul.f32 %v6508_v50, %v2960_v13  ;;  %v6576_v17 = vmul.f32 %v6546_v14, %v2960_v13  ;;  %7449 = vst [vmem:[#allocation39_spill] sm:$0xff] %v6625_v30 }
 0x25b   : > { %v3282_v59 = vmul.f32 %v6515_v32, %v2960_v13  ;;  %v6583_v34 = vmul.f32 %v6548_v61, %v2960_v13  ;;  %v3089_v42 = vrot.slane %v3053_v35, 1  ;;  %v3283_v9 = vmul.f32 %v6515_v32, %v2961_v2  ;;  %v2957_v35 = vld [vmem:[#allocation2 + $0x18] sm:$0x3] }
 0x25c   : > { %v3357_v21 = vmul.f32 %v6550_v31, %v2960_v13  ;;  %v3090_v4 = vrot.slane %v3054_v58, 1  ;;  %v3162_v37 = vrot.slane %v3128_v39, 1  ;;  %v3358_v0 = vmul.f32 %v6550_v31, %v2961_v2 }
 0x25d   : > { %v3431_v43 = vmul.f32 %v6524_v27, %v2960_v13  ;;  %v3163_v40 = vrot.slane %v3129_v33, 1  ;;  %v3235_v12 = vrot.slane %v3202_v25, 1  ;;  %v3236_v29 = vrot.slane %v3203_v26, 1 }
 0x25e   : > { %v3432_v11 = vmul.f32 %v6524_v27, %v2961_v2  ;;  %v6593_v22 = vadd.f32 %v6544_v41, %v2990_v3  ;;  %v3318_v57 = vrot.slane %v3282_v59, 2  ;;  %v3319_v5 = vrot.slane %v3283_v9, 2 }
 0x25f   : > { %v3391_v51 = vrot.slane %v3357_v21, 2  ;;  %v3392_v24 = vrot.slane %v3358_v0, 2  ;;  %v3464_v47 = vrot.slane %v3431_v43, 2  ;;  %v6605_v49 = vsel %vm3079_vm0, %v3089_v42, %v3090_v4 }
 0x260   : > { %v3465_v20 = vrot.slane %v3432_v11, 2  ;;  %v6608_v6 = vsel %vm3079_vm0, %v3162_v37, %v3163_v40  ;;  %v6611_v15 = vsel %vm3079_vm0, %v3235_v12, %v3236_v29  ;;  %v6617_v48 = vsel %vm3308_vm1, %v3318_v57, %v3319_v5  ;;  %v2964_v5 = vld [vmem:[#allocation2 + $0x50] sm:$0xff] }
 0x261   : > { %v3174_v44 = vrot.slane %v3136_v63, 1  ;;  %v3175_v13 = vrot.slane %v3137_v19, 1  ;;  %v3247_v2 = vrot.slane %v3210_v53, 1  ;;  %v3248_v8 = vrot.slane %v3211_v23, 1  ;;  %v2965_v63 = vld [vmem:[#allocation2 + $0x58] sm:$0x3] }
 0x262   : > { %v6629_v18 = vmul.f32 %v6550_v31, %v6589_v38  ;;  %v6632_v58 = vsel %vm3308_vm1, %v3391_v51, %v3392_v24  ;;  %v6635_v39 = vsel %vm3308_vm1, %v3464_v47, %v3465_v20  ;;  %v6639_v25 = vmul.f32 %v6550_v31, %v2969_v55 }
 0x263   : > { %v6644_v3 = vmul.f32 %v6524_v27, %v6589_v38  ;;  %v6647_v59 = vmul.f32 %v6524_v27, %v2969_v55  ;;  %v2988_v42 = vmul.f32 %v6508_v50, %v2956_v7  ;;  %v3007_v9 = vmul.f32 %v6546_v14, %v2956_v7 }
 0x264   : > { %7450 = vst [vmem:[#allocation48_spill] sm:$0xff] %v6629_v18  ;;  %7451 = vst [vmem:[#allocation49_spill] sm:$0xff] %v6639_v25  ;;  %v3049_v21 = vmul.f32 %v6510_v1, %v2956_v7  ;;  %v3050_v4 = vmul.f32 %v6510_v1, %v2957_v35  ;;  %v3124_v37 = vmul.f32 %v6537_v28, %v2956_v7 }
 0x265   : > { %7452 = vst [vmem:[#allocation50_spill] sm:$0xff] %v6644_v3  ;;  %7453 = vst [vmem:[#allocation51_spill] sm:$0xff] %v6647_v59  ;;  %v6655_v0 = vsel %vm3079_vm0, %v3174_v44, %v3175_v13  ;;  %v6658_v43 = vsel %vm3079_vm0, %v3247_v2, %v3248_v8  ;;  %v3125_v12 = vmul.f32 %v6537_v28, %v2957_v35 }
 0x266   : > { %7454 = vst [vmem:[#allocation57_spill] sm:$0xff] %v6655_v0  ;;  %7455 = vst [vmem:[#allocation59_spill] sm:$0xff] %v6658_v43  ;;  %v3083_v11 = vrot.slane %v3049_v21, 1  ;;  %v3084_v55 = vrot.slane %v3050_v4, 1  ;;  %v3278_v57 = vmul.f32 %v6515_v32, %v2956_v7  ;;  %v3279_v24 = vmul.f32 %v6515_v32, %v2957_v35 }
 0x267   : > { %v3353_v47 = vmul.f32 %v6550_v31, %v2956_v7  ;;  %v3354_v20 = vmul.f32 %v6550_v31, %v2957_v35  ;;  %v6670_v53 = vadd.f32 %v6544_v41, %v2988_v42  ;;  %v6673_v23 = vadd.f32 %v3007_v9, %v6554_v52 }
 0x268   : > { %v3156_v44 = vrot.slane %v3124_v37, 1  ;;  %v6676_v13 = vsel %vm3079_vm0, %v3083_v11, %v3084_v55  ;;  %v3157_v2 = vrot.slane %v3125_v12, 1  ;;  %v3312_v8 = vrot.slane %v3278_v57, 2 }
 0x269   : > { %v2992_v21 = vmul.f32 %v6508_v50, %v2964_v5  ;;  %v3313_v7 = vrot.slane %v3279_v24, 2  ;;  %v6680_v35 = vmul.f32 %v6546_v14, %v2964_v5  ;;  %v3057_v4 = vmul.f32 %v6510_v1, %v2964_v5 }
 0x26a   : > { %v3058_v42 = vmul.f32 %v6510_v1, %v2965_v63  ;;  %v3385_v51 = vrot.slane %v3353_v47, 2  ;;  %v3386_v19 = vrot.slane %v3354_v20, 2  ;;  %v3132_v52 = vmul.f32 %v6537_v28, %v2964_v5 }
 0x26b   : > { %v3133_v9 = vmul.f32 %v6537_v28, %v2965_v63  ;;  %v3095_v37 = vrot.slane %v3057_v4, 1  ;;  %v3206_v12 = vmul.f32 %v6512_v46, %v2964_v5  ;;  %v3207_v55 = vmul.f32 %v6512_v46, %v2965_v63 }
 0x26c   : > { %v3096_v11 = vrot.slane %v3058_v42, 1  ;;  %v3168_v57 = vrot.slane %v3132_v52, 1  ;;  %v6689_v40 = vmul.f32 %v6515_v32, %v2964_v5  ;;  %v6692_v29 = vmul.f32 %v6515_v32, %v2965_v63  ;;  %v6700_v42 = vld [vmem:[#allocation2 + $0x40] sm:$0xff] }
 0x26d   : > { %v3169_v24 = vrot.slane %v3133_v9, 1  ;;  %v6695_v47 = vsel %vm3079_vm0, %v3156_v44, %v3157_v2  ;;  %v3241_v20 = vrot.slane %v3206_v12, 1  ;;  %v3242_v26 = vrot.slane %v3207_v55, 1  ;;  %v2963_v44 = vld [vmem:[#allocation2 + $0x48] sm:$0x3] }
 0x26e   : > { %7456 = vst [vmem:[#allocation40_spill] sm:$0xff] %v6689_v40  ;;  %7457 = vst [vmem:[#allocation41_spill] sm:$0xff] %v6692_v29  ;;  %v6698_v4 = vmul.f32 %v6550_v31, %v2964_v5  ;;  %v6703_v33 = vsel %vm3308_vm1, %v3312_v8, %v3313_v7  ;;  %v6706_v52 = vsel %vm3308_vm1, %v3385_v51, %v3386_v19 }
 0x26f   : > { %v6709_v9 = vadd.f32 %v6544_v41, %v2992_v21  ;;  %v3030_v3 = vmul.f32 %v6548_v61, %v2964_v5  ;;  %v6713_v2 = vsel %vm3079_vm0, %v3095_v37, %v3096_v11  ;;  %v6716_v12 = vsel %vm3079_vm0, %v3168_v57, %v3169_v24 }
 0x270   : > { %7458 = vst [vmem:[#allocation62_spill] sm:$0xff] %v6698_v4  ;;  %7459 = vst [vmem:[#allocation63_spill] sm:$0xff] %v6713_v2  ;;  %v3435_v55 = vmul.f32 %v6524_v27, %v2964_v5  ;;  %v3436_v8 = vmul.f32 %v6524_v27, %v2965_v63  ;;  %v6723_v19 = vmul.f32 %v6550_v31, %v2965_v63 }
 0x271   : > { %7460 = vst [vmem:[#allocation72_spill] sm:$0xff] %v6716_v12  ;;  %v3010_v21 = vmul.f32 %v6546_v14, %v6700_v42  ;;  %v3243_v37 = vsel %vm3079_vm0, %v3241_v20, %v3242_v26  ;;  %v3055_v57 = vmul.f32 %v6510_v1, %v6700_v42  ;;  %v3056_v5 = vmul.f32 %v6510_v1, %v2963_v44 }
 0x272   : > { %7461 = vst [vmem:[#allocation73_spill] sm:$0xff] %v6723_v19  ;;  %v3470_v24 = vrot.slane %v3435_v55, 2  ;;  %v2991_v7 = vmul.f32 %v6508_v50, %v6700_v42  ;;  %v3130_v63 = vmul.f32 %v6537_v28, %v6700_v42  ;;  %v3471_v59 = vrot.slane %v3436_v8, 2  ;;  %v2970_v19 = vld [vmem:[#allocation2 + $0x80] sm:$0xff] }
 0x273   : > { %v3018_v51 = vadd.f32 %v3010_v21, %v6593_v22  ;;  %v3092_v18 = vrot.slane %v3055_v57, 1  ;;  %v3093_v25 = vrot.slane %v3056_v5, 1  ;;  %v3131_v26 = vmul.f32 %v6537_v28, %v2963_v44 }
 0x274   : > { %v3165_v11 = vrot.slane %v3130_v63, 1  ;;  %v3204_v4 = vmul.f32 %v6512_v46, %v6700_v42  ;;  %v3205_v55 = vmul.f32 %v6512_v46, %v2963_v44  ;;  %v3284_v22 = vmul.f32 %v6515_v32, %v6700_v42 }
 0x275   : > { %v3038_v20 = vadd.f32 %v3030_v3, %v3018_v51  ;;  %v3166_v29 = vrot.slane %v3131_v26, 1  ;;  %v3285_v21 = vmul.f32 %v6515_v32, %v2963_v44  ;;  %v3359_v3 = vmul.f32 %v6550_v31, %v6700_v42 }
 0x276   : > { %v3238_v57 = vrot.slane %v3204_v4, 1  ;;  %v3239_v5 = vrot.slane %v3205_v55, 1  ;;  %v3472_v51 = vsel %vm3308_vm1, %v3470_v24, %v3471_v59  ;;  %v6750_v63 = vadd.f32 %v6544_v41, %v2991_v7  ;;  %v2971_v24 = vld [vmem:[#allocation2 + $0x88] sm:$0x3] }
 0x277   : > { %v3115_v8 = vadd.f32 %v6605_v49, %v3038_v20  ;;  %v3167_v40 = vsel %vm3079_vm0, %v3165_v11, %v3166_v29  ;;  %v3360_v26 = vmul.f32 %v6550_v31, %v2963_v44  ;;  %v6755_v43 = vsel %vm3079_vm0, %v3092_v18, %v3093_v25 }
 0x278   : > { %7462 = vst [vmem:[#allocation89_spill] sm:$0xff] %v6755_v43  ;;  %v3394_v49 = vrot.slane %v3359_v3, 2  ;;  %v3433_v4 = vmul.f32 %v6524_v27, %v6700_v42  ;;  %v3321_v20 = vrot.slane %v3284_v22, 2  ;;  %v3434_v59 = vmul.f32 %v6524_v27, %v2963_v44 }
 0x279   : > { %v3191_v0 = vadd.f32 %v3167_v40, %v3115_v8  ;;  %v3395_v55 = vrot.slane %v3360_v26, 2  ;;  %v2994_v7 = vmul.f32 %v6508_v50, %v6589_v38  ;;  %v6763_v29 = vsel %vm3079_vm0, %v3238_v57, %v3239_v5 }
 0x27a   : > { %v3322_v12 = vrot.slane %v3285_v21, 2  ;;  %v3014_v18 = vmul.f32 %v6546_v14, %v2970_v19  ;;  %v3467_v40 = vrot.slane %v3433_v4, 2  ;;  %v3061_v22 = vmul.f32 %v6510_v1, %v6589_v38 }
 0x27b   : > { %v3267_v11 = vadd.f32 %v3243_v37, %v3191_v0  ;;  %v3396_v25 = vsel %vm3308_vm1, %v3394_v49, %v3395_v55  ;;  %v3002_v8 = vadd.f32 %v6544_v41, %v2994_v7  ;;  %v3138_v3 = vmul.f32 %v6537_v28, %v2970_v19 }
 0x27c   : > { %v3139_v26 = vmul.f32 %v6537_v28, %v2971_v24  ;;  %v3212_v57 = vmul.f32 %v6512_v46, %v2970_v19  ;;  %v3468_v0 = vrot.slane %v3434_v59, 2  ;;  %v3101_v21 = vrot.slane %v3061_v22, 1 }
 0x27d   : > { %v3344_v44 = vadd.f32 %v6617_v48, %v3267_v11  ;;  %v3022_v37 = vadd.f32 %v3014_v18, %v3002_v8  ;;  %v3213_v5 = vmul.f32 %v6512_v46, %v2971_v24  ;;  %v6776_v49 = vsel %vm3308_vm1, %v3321_v20, %v3322_v12  ;;  %v6786_v20 = vld [vmem:[#allocation2 + $0x20] sm:$0xff] }
 0x27e   : > { %v3177_v55 = vrot.slane %v3138_v3, 1  ;;  %v3178_v7 = vrot.slane %v3139_v26, 1  ;;  %v3250_v11 = vrot.slane %v3212_v57, 1  ;;  %v3290_v43 = vmul.f32 %v6515_v32, %v6589_v38 }
 0x27f   : > { %v3420_v4 = vadd.f32 %v3396_v25, %v3344_v44  ;;  %v3042_v48 = vadd.f32 %v6558_v60, %v3022_v37  ;;  %v3251_v2 = vrot.slane %v3213_v5, 1  ;;  %v7463_v59 = vrot.slane %v6598_v45, 1 }
 0x280   : > { %v3367_v8 = vmul.f32 %v6550_v31, %v2970_v19  ;;  %v3368_v12 = vmul.f32 %v6550_v31, %v2971_v24  ;;  %v6796_v60 = vsel %vm3308_vm1, %v3467_v40, %v3468_v0  ;;  %v6799_v38 = vmul.f32 %v6548_v61, %v2970_v19 }
 0x281   : > { %v3496_v30 = vadd.f32 %v3472_v51, %v3420_v4  ;;  %v3103_v18 = vsel %vm3079_vm0, %v3101_v21, %v7463_v59  ;;  %v3330_v51 = vrot.slane %v3290_v43, 2  ;;  %v3179_v22 = vsel %vm3079_vm0, %v3177_v55, %v3178_v7  ;;  %v2959_v21 = vld [vmem:[#allocation2 + $0x28] sm:$0x3] }
 0x282   : > { %v3119_v45 = vadd.f32 %v3103_v18, %v3042_v48  ;;  %v3406_v44 = vrot.slane %v3367_v8, 2  ;;  %v3407_v3 = vrot.slane %v3368_v12, 2  ;;  %v6803_v57 = vsel %vm3079_vm0, %v3250_v11, %v3251_v2 }
 0x283   : > { %v3504_v25 = vmax.f32 %v3496_v30, 0.0  ;;  %v6806_v37 = vmul.f32 %v6524_v27, %v2970_v19  ;;  %v2989_v40 = vmul.f32 %v6508_v50, %v6786_v20  ;;  %v7464_v0 = vrot.slane %v6614_v56, 2 }
 0x284   : > { %v3195_v26 = vadd.f32 %v3179_v22, %v3119_v45  ;;  %v6815_v43 = vmul.f32 %v6524_v27, %v2971_v24  ;;  %v3008_v5 = vmul.f32 %v6546_v14, %v6786_v20  ;;  %v3027_v2 = vmul.f32 %v6548_v61, %v6786_v20 }
 0x285   : > { %3512 = vst [vmem:[%s6793_s21 + $0x18] sm:$0xff] %v3504_v25  ;;  %v3332_v30 = vsel %vm3308_vm1, %v3330_v51, %v7464_v0  ;;  %v3408_v4 = vsel %vm3308_vm1, %v3406_v44, %v3407_v3  ;;  %v2997_v55 = vadd.f32 %v6544_v41, %v2989_v40  ;;  %v3051_v56 = vmul.f32 %v6510_v1, %v6786_v20 }
 0x286   : > { %v3271_v19 = vadd.f32 %v6563_v10, %v3195_v26  ;;  %v3016_v7 = vadd.f32 %v3008_v5, %v6670_v53  ;;  %v3029_v24 = vmul.f32 %v6548_v61, %v6700_v42  ;;  %v3035_v48 = vadd.f32 %v3027_v2, %v6673_v23 }
 0x287   : > { %v3052_v11 = vmul.f32 %v6510_v1, %v2959_v21  ;;  %v3017_v18 = vadd.f32 %v6576_v17, %v2997_v55  ;;  %v3086_v10 = vrot.slane %v3051_v56, 1  ;;  %v3126_v8 = vmul.f32 %v6537_v28, %v6786_v20 }
 0x288   : > { %v3348_v59 = vadd.f32 %v3332_v30, %v3271_v19  ;;  %v3036_v12 = vadd.f32 %v6583_v34, %v3016_v7  ;;  %v3112_v51 = vadd.f32 %v6566_v62, %v3035_v48  ;;  %v3127_v53 = vmul.f32 %v6537_v28, %v2959_v21  ;;  %v6852_v48 = vld [vmem:[#allocation2 + $0x60] sm:$0xff] }
 0x289   : > { %v3087_v45 = vrot.slane %v3052_v11, 1  ;;  %v3037_v42 = vadd.f32 %v3029_v24, %v3017_v18  ;;  %v3159_v22 = vrot.slane %v3126_v8, 1  ;;  %v3200_v23 = vmul.f32 %v6512_v46, %v6786_v20 }
 0x28a   : > { %v3424_v25 = vadd.f32 %v3408_v4, %v3348_v59  ;;  %v3113_v17 = vadd.f32 %v6676_v13, %v3036_v12  ;;  %v3160_v3 = vrot.slane %v3127_v53, 1  ;;  %v3188_v26 = vadd.f32 %v6695_v47, %v3112_v51 }
 0x28b   : > { %v3088_v44 = vsel %vm3079_vm0, %v3086_v10, %v3087_v45  ;;  %v3201_v62 = vmul.f32 %v6512_v46, %v2959_v21  ;;  %v3232_v0 = vrot.slane %v3200_v23, 1  ;;  %v3280_v5 = vmul.f32 %v6515_v32, %v6786_v20 }
 0x28c   : > { %v3500_v34 = vadd.f32 %v6572_v16, %v3424_v25  ;;  %v3114_v40 = vadd.f32 %v3088_v44, %v3037_v42  ;;  %v3161_v30 = vsel %vm3079_vm0, %v3159_v22, %v3160_v3  ;;  %v3281_v2 = vmul.f32 %v6515_v32, %v2959_v21 }
 0x28d   : > { %v3355_v13 = vmul.f32 %v6550_v31, %v6786_v20  ;;  %v3189_v4 = vadd.f32 %v3161_v30, %v3113_v17  ;;  %v3233_v16 = vrot.slane %v3201_v62, 1  ;;  %v3315_v55 = vrot.slane %v3280_v5, 2  ;;  %v2967_v17 = vld [vmem:[#allocation2 + $0x68] sm:$0x3]  ;;  %v7466_v5 = vld [vmem:[#allocation89_spill] sm:$0xff] }
 0x28e   : > { %v3508_v19 = vmax.f32 %v3500_v34, 0.0  ;;  %v3190_v47 = vadd.f32 %v6608_v6, %v3114_v40  ;;  %v3316_v56 = vrot.slane %v3281_v2, 2  ;;  %v3356_v7 = vmul.f32 %v6550_v31, %v2959_v21  ;;  %v7465_v34 = vld [vmem:[#allocation39_spill] sm:$0xff] }
 0x28f   : > { %v3388_v24 = vrot.slane %v3355_v13, 2  ;;  %v3234_v11 = vsel %vm3079_vm0, %v3232_v0, %v3233_v16  ;;  %v3265_v59 = vadd.f32 %v6611_v15, %v3189_v4  ;;  %v3429_v10 = vmul.f32 %v6524_v27, %v6786_v20  ;;  %v7468_v16 = vld [vmem:[#allocation72_spill] sm:$0xff] }
 0x290   : > { %3516 = vst [vmem:[%s6793_s21 + $0x38] sm:$0xff] %v3508_v19  ;;  %v3266_v18 = vadd.f32 %v6763_v29, %v3190_v47  ;;  %v3264_v8 = vadd.f32 %v3234_v11, %v3188_v26  ;;  %v3317_v6 = vsel %vm3308_vm1, %v3315_v55, %v3316_v56  ;;  %v3389_v12 = vrot.slane %v3356_v7, 2 }
 0x291   : > { %v3430_v45 = vmul.f32 %v6524_v27, %v2959_v21  ;;  %v3342_v51 = vadd.f32 %v6703_v33, %v3265_v59  ;;  %v3461_v25 = vrot.slane %v3429_v10, 2  ;;  %v2993_v42 = vmul.f32 %v6508_v50, %v6852_v48 }
 0x292   : > { %v3343_v53 = vadd.f32 %v3317_v6, %v3266_v18  ;;  %v3341_v15 = vadd.f32 %v6580_v54, %v3264_v8  ;;  %v3390_v29 = vsel %vm3308_vm1, %v3388_v24, %v3389_v12  ;;  %v3012_v20 = vmul.f32 %v6546_v14, %v6852_v48  ;;  %v7469_v12 = vld [vmem:[#allocation57_spill] sm:$0xff] }
 0x293   : > { %v3462_v22 = vrot.slane %v3430_v45, 2  ;;  %v3418_v23 = vadd.f32 %v3390_v29, %v3342_v51  ;;  %v3001_v21 = vadd.f32 %v6544_v41, %v2993_v42  ;;  %v3019_v33 = vadd.f32 %v6680_v35, %v6750_v63 }
 0x294   : > { %v3419_v44 = vadd.f32 %v6632_v58, %v3343_v53  ;;  %v3417_v3 = vadd.f32 %v6706_v52, %v3341_v15  ;;  %v3020_v54 = vadd.f32 %v3012_v20, %v6709_v9  ;;  %v3031_v26 = vmul.f32 %v6548_v61, %v6852_v48 }
 0x295   : > { %v3463_v50 = vsel %vm3308_vm1, %v3461_v25, %v3462_v22  ;;  %v3494_v14 = vadd.f32 %v6635_v39, %v3418_v23  ;;  %v3021_v41 = vadd.f32 %v6621_v36, %v3001_v21  ;;  %v3059_v35 = vmul.f32 %v6510_v1, %v6852_v48  ;;  %v7467_v36 = vld [vmem:[#allocation63_spill] sm:$0xff] }
 0x296   : > { %v3495_v58 = vadd.f32 %v6796_v60, %v3419_v44  ;;  %v3493_v63 = vadd.f32 %v3463_v50, %v3417_v3  ;;  %v3039_v52 = vadd.f32 %v3031_v26, %v3019_v33  ;;  %v3040_v40 = vadd.f32 %v7465_v34, %v3020_v54  ;;  %v7470_v21 = vld [vmem:[#allocation59_spill] sm:$0xff]  ;;  %v7481_v34 = vld [vmem:[#allocation62_spill] sm:$0xff] }
 0x297   : > { %v3060_v9 = vmul.f32 %v6510_v1, %v2967_v17  ;;  %v3502_v62 = vmax.f32 %v3494_v14, 0.0  ;;  %v3041_v39 = vadd.f32 %v6799_v38, %v3021_v41  ;;  %v3098_v0 = vrot.slane %v3059_v35, 1  ;;  %v7475_v41 = vld [vmem:[#allocation49_spill] sm:$0xff] }
 0x298   : > { %v3503_v61 = vmax.f32 %v3495_v58, 0.0  ;;  %v3501_v30 = vmax.f32 %v3493_v63, 0.0  ;;  %v3116_v2 = vadd.f32 %v7466_v5, %v3039_v52  ;;  %v3117_v13 = vadd.f32 %v7467_v36, %v3040_v40  ;;  %v7479_v63 = vld [vmem:[#allocation73_spill] sm:$0xff]  ;;  %v7483_v5 = vld [vmem:[#allocation51_spill] sm:$0xff]  ;;  %v7485_v36 = vld [vmem:[#allocation50_spill] sm:$0xff] }
 0x299   : > { %v3099_v60 = vrot.slane %v3060_v9, 1  ;;  %3510 = vst [vmem:[%s6793_s21 + $0x8] sm:$0xff] %v3502_v62  ;;  %v3134_v19 = vmul.f32 %v6537_v28, %v6852_v48  ;;  %v3135_v4 = vmul.f32 %v6537_v28, %v2967_v17  ;;  %v3208_v1 = vmul.f32 %v6512_v46, %v6852_v48 }
 0x29a   : > { %3511 = vst [vmem:[%s6793_s21 + $0x10] sm:$0xff] %v3503_v61  ;;  %v3209_v47 = vmul.f32 %v6512_v46, %v2967_v17  ;;  %3509 = vst [vmem:[%s6793_s21] sm:$0xff] %v3501_v30  ;;  %v3192_v55 = vadd.f32 %v7468_v16, %v3116_v2  ;;  %v3288_v56 = vmul.f32 %v6515_v32, %v6852_v48  ;;  %v3480_v44 = vrot.slane %v6815_v43, 2 }
 0x29b   : > { %v3100_v38 = vsel %vm3079_vm0, %v3098_v0, %v3099_v60  ;;  %v3289_v7 = vmul.f32 %v6515_v32, %v2967_v17  ;;  %v3171_v11 = vrot.slane %v3134_v19, 1  ;;  %v3172_v59 = vrot.slane %v3135_v4, 1 }
 0x29c   : > { %v3118_v24 = vadd.f32 %v3100_v38, %v3041_v39  ;;  %v3244_v18 = vrot.slane %v3208_v1, 1  ;;  %v3245_v28 = vrot.slane %v3209_v47, 1  ;;  %v3327_v10 = vrot.slane %v3288_v56, 2 }
 0x29d   : > { %v3328_v8 = vrot.slane %v3289_v7, 2  ;;  %v3363_v46 = vmul.f32 %v6550_v31, %v6852_v48  ;;  %v3173_v6 = vsel %vm3079_vm0, %v3171_v11, %v3172_v59  ;;  %v3364_v51 = vmul.f32 %v6550_v31, %v2967_v17 }
 0x29e   : > { %v3194_v45 = vadd.f32 %v7469_v12, %v3118_v24  ;;  %v3437_v53 = vmul.f32 %v6524_v27, %v6852_v48  ;;  %v3479_v32 = vrot.slane %v6806_v37, 2  ;;  %v3193_v25 = vadd.f32 %v3173_v6, %v3117_v13  ;;  %v7471_v48 = vld [vmem:[#allocation41_spill] sm:$0xff]  ;;  %v7473_v37 = vld [vmem:[#allocation40_spill] sm:$0xff] }
 0x29f   : > { %v3246_v42 = vsel %vm3079_vm0, %v3244_v18, %v3245_v28  ;;  %v3400_v15 = vrot.slane %v3363_v46, 2  ;;  %v3401_v20 = vrot.slane %v3364_v51, 2  ;;  %v3438_v23 = vmul.f32 %v6524_v27, %v2967_v17  ;;  %v7477_v27 = vld [vmem:[#allocation48_spill] sm:$0xff] }
 0x2a0   : > { %v3268_v29 = vadd.f32 %v3246_v42, %v3192_v55  ;;  %v3270_v22 = vadd.f32 %v6803_v57, %v3194_v45  ;;  %v3269_v33 = vadd.f32 %v7470_v21, %v3193_v25  ;;  %v3329_v31 = vsel %vm3308_vm1, %v3327_v10, %v3328_v8 }
 0x2a1   : > { %v3473_v3 = vrot.slane %v3437_v53, 2  ;;  %v7472_v50 = vrot.slane %v7471_v48, 2  ;;  %v7474_v54 = vrot.slane %v7473_v37, 2  ;;  %v3474_v57 = vrot.slane %v3438_v23, 2 }
 0x2a2   : > { %v3345_v14 = vadd.f32 %v6776_v49, %v3268_v29  ;;  %v3347_v58 = vadd.f32 %v3329_v31, %v3270_v22  ;;  %v7476_v35 = vrot.slane %v7475_v41, 2  ;;  %v7478_v17 = vrot.slane %v7477_v27, 2 }
 0x2a3   : > { %v3326_v26 = vsel %vm3308_vm1, %v7474_v54, %v7472_v50  ;;  %v7480_v52 = vrot.slane %v7479_v63, 2  ;;  %v7482_v40 = vrot.slane %v7481_v34, 2  ;;  %v3402_v49 = vsel %vm3308_vm1, %v3400_v15, %v3401_v20 }
 0x2a4   : > { %v3405_v43 = vsel %vm3308_vm1, %v7478_v17, %v7476_v35  ;;  %v3346_v62 = vadd.f32 %v3326_v26, %v3269_v33  ;;  %v3481_v0 = vsel %vm3308_vm1, %v3479_v32, %v3480_v44  ;;  %v3475_v60 = vsel %vm3308_vm1, %v3473_v3, %v3474_v57 }
 0x2a5   : > { %v3399_v9 = vsel %vm3308_vm1, %v7482_v40, %v7480_v52  ;;  %v3423_v39 = vadd.f32 %v3405_v43, %v3347_v58  ;;  %v7484_v2 = vrot.slane %v7483_v5, 2  ;;  %v7486_v13 = vrot.slane %v7485_v36, 2 }
 0x2a6   : > { %v3421_v61 = vadd.f32 %v3399_v9, %v3345_v14  ;;  %v3422_v30 = vadd.f32 %v3402_v49, %v3346_v62 }
 0x2a7   : > { %v3478_v19 = vsel %vm3308_vm1, %v7486_v13, %v7484_v2  ;;  %v3499_v1 = vadd.f32 %v3481_v0, %v3423_v39 }
 0x2a8   : > { %v3497_v4 = vadd.f32 %v3475_v60, %v3421_v61  ;;  %v3498_v47 = vadd.f32 %v3478_v19, %v3422_v30 }
 0x2a9   : > { %v3507_v16 = vmax.f32 %v3499_v1, 0.0 }
 0x2aa   : > { %v3505_v38 = vmax.f32 %v3497_v4, 0.0  ;;  %v3506_v55 = vmax.f32 %v3498_v47, 0.0 }
 0x2ab   : > { %3515 = vst [vmem:[%s6793_s21 + $0x30] sm:$0xff] %v3507_v16 }
 0x2ac   : > { %3513 = vst [vmem:[%s6793_s21 + $0x20] sm:$0xff] %v3505_v38  ;;  %3514 = vst [vmem:[%s6793_s21 + $0x28] sm:$0xff] %v3506_v55 }
 0x2ad PF: > { %s14_s15 = sadd.s32 1, %s4401_s15  }
 0x2ae   : > { %p11_p4 = scmp.ge.s32.totalorder %s14_s15, 4  }
 0x2b0   :  { %13 = sbr.rel (!%p11_p4) target bundleno = 1 (0x1), region = 68 }

</bundles_post_ra>
